<compile_context>
chip_gen: v7x
topology: tpu7x:2x2x1
jax: 0.10.0
libtpu: 0.0.40
codegen_flags: <defaults>
</compile_context>

<pallas_src>
import jax
import jax.numpy as jnp
from jax.experimental import pallas as pl
from jax.experimental.pallas import tpu as pltpu


def ibasic_block_kernel(h1_ref, x_ref, w1_ref, w2_ref, vec_ref, out_ref,
                        h1r1_ref, h1r2_ref, acc1_ref,
                        z_ref, zr1_ref, zr2_ref, acc2_ref):
    """One (batch, row-tile) step: conv3x3 -> bn2/PReLU -> conv3x3 -> bn3 -> +x."""
    rows_in, w_in, cp = h1_ref.shape          # (TILE_H+4, W_in, Cp) bf16 staged bn1(x)
    tile_h, w_img, _ = x_ref.shape            # (TILE_H, W, Cp) f32 residual
    pp = out_ref.shape[-1]
    rows_a = tile_h + 2                       # conv1 output rows (conv2 needs 1-halo)
    m_full = rows_in * w_in
    m_a = rows_a * w_in
    m_b = tile_h * w_in
    f32 = jnp.float32
    shift = w_in.bit_length() - 1             # log2(w_in); w_in is a power of two

    bn2b = vec_ref[0:1, :]                    # (1, Pp) bn2 shift (conv1 bias)
    alpha = vec_ref[1:2, :]                   # (1, Pp) PReLU slope
    bn3b = vec_ref[2:3, :]                    # (1, Pp) bn3 shift (conv2 bias)

    # ---- kw-shifted copies of the conv1 input: 2 rolls total (XLU), bf16 operands ----
    # roll wrap only pollutes columns >= W+2 of the last row, which are masked/dropped.
    h1f = h1_ref[...].reshape(m_full, cp).astype(f32)
    h1r1_ref[...] = pltpu.roll(h1f, m_full - 1, 0).astype(h1r1_ref.dtype)  # [m]=h1[m+1]
    h1r2_ref[...] = pltpu.roll(h1f, m_full - 2, 0).astype(h1r2_ref.dtype)  # [m]=h1[m+2]

    # ---- conv1: 9 MXU taps grouped by kw -> 1 accumulator store + 2 RMW passes ----
    for kw in range(3):
        if kw == 0:
            taps = [h1_ref[kh:kh + rows_a, :, :].reshape(m_a, cp) for kh in range(3)]
        else:
            src = h1r1_ref if kw == 1 else h1r2_ref
            taps = [src[kh * w_in:kh * w_in + m_a, :] for kh in range(3)]
        y = jnp.dot(taps[0], w1_ref[0, kw], preferred_element_type=f32)
        y = y + jnp.dot(taps[1], w1_ref[1, kw], preferred_element_type=f32)
        y = y + jnp.dot(taps[2], w1_ref[2, kw], preferred_element_type=f32)
        if kw == 0:
            acc1_ref[...] = y
        else:
            acc1_ref[...] += y

    # ---- bn2 bias + PReLU; zero conv2's padding ring + widened-M garbage columns ----
    # validity mask computed in-kernel (sublane iota + shift/and), no streamed mask.
    m_idx = jax.lax.broadcasted_iota(jnp.int32, (m_a, pp), 0)
    r_loc = m_idx >> shift                    # m // w_in
    c_loc = m_idx & (w_in - 1)                # m %  w_in
    r_glob = pl.program_id(1) * tile_h - 1 + r_loc
    h_img = tile_h * pl.num_programs(1)
    valid = (r_glob >= 0) & (r_glob < h_img) & (c_loc >= 1) & (c_loc <= w_img)

    pre = acc1_ref[...] + bn2b
    act = jnp.where(pre >= 0.0, pre, alpha * pre)
    zf = jnp.where(valid, act, 0.0)
    z_ref[...] = zf.astype(z_ref.dtype)
    zr1_ref[...] = pltpu.roll(zf, m_a - 1, 0).astype(zr1_ref.dtype)
    zr2_ref[...] = pltpu.roll(zf, m_a - 2, 0).astype(zr2_ref.dtype)

    # ---- conv2: 9 MXU taps (bn3 scale folded into w2), same kw grouping ----
    for kw in range(3):
        src = (z_ref, zr1_ref, zr2_ref)[kw]
        y = jnp.dot(src[0:m_b, :], w2_ref[0, kw], preferred_element_type=f32)
        y = y + jnp.dot(src[w_in:w_in + m_b, :], w2_ref[1, kw],
                        preferred_element_type=f32)
        y = y + jnp.dot(src[2 * w_in:2 * w_in + m_b, :], w2_ref[2, kw],
                        preferred_element_type=f32)
        if kw == 0:
            acc2_ref[...] = y
        else:
            acc2_ref[...] += y

    # ---- bn3 bias + residual (raw x) + writeback (drop padded cols) ----
    res = (acc2_ref[...] + bn3b).reshape(tile_h, w_in, pp)[:, :w_img, :]
    out_ref[...] = res + x_ref[...]


def _bn_fold(gamma, beta, mean, var, eps=1e-5):
    scale = gamma / jnp.sqrt(var + eps)
    bias = beta - mean * scale
    return scale, bias


def _round_up(v, m):
    return (v + m - 1) // m * m


def _pad_width(W):
    # width incl. 2-pad on each side, rounded up to a power of two (>= 8) so the
    # in-kernel flattened row/col recovery is a shift/and (no vector integer division).
    return max(8, 1 << (W + 3).bit_length())


def _vmem_estimate(tile_h, W, Cp, Pp):
    """Rough per-step VMEM bytes (double-buffered streams + resident weights + scratch)."""
    w_in = _pad_width(W)
    rows_in, rows_a = tile_h + 4, tile_h + 2
    m_full, m_a, m_b = rows_in * w_in, rows_a * w_in, tile_h * w_in
    stream = (m_full * Cp * 2            # staged bn1(x) tile, bf16
              + tile_h * W * Cp * 4      # residual tile, f32
              + tile_h * W * Pp * 4)     # output tile, f32
    weights = 9 * Cp * Pp * 2 + 9 * Pp * Pp * 2 + 8 * Pp * 4
    scratch = (2 * m_full * Cp * 2       # kw-shifted h1 copies, bf16
               + m_a * Pp * 4            # conv1 accumulator, f32
               + 3 * m_a * Pp * 2        # z + 2 kw-shifted copies, bf16
               + m_b * Pp * 4)           # conv2 accumulator, f32
    return 2 * stream + 2 * weights + scratch


def _pick_tile_h(H, W, Cp, Pp, budget):
    for cand in range(H, 0, -1):
        if H % cand == 0 and _vmem_estimate(cand, W, Cp, Pp) <= budget:
            return cand
    return 1


def ibasic_block(x_nchw, params, *, tile_h=None, vmem_budget_bytes=28 << 20):
    """Wrapper: NCHW in -> NCHW out (PyTorch convention)."""
    x = jnp.transpose(x_nchw, (0, 2, 3, 1)).astype(jnp.float32)   # NCHW -> NHWC
    N, H, W, C = x.shape
    w1 = params["w1"].astype(jnp.float32)     # (3, 3, C, P)  (HWIO)
    w2 = params["w2"].astype(jnp.float32)     # (3, 3, P, P)
    P = w1.shape[-1]
    assert C == P, "stride=1 / downsample=None IBasicBlock requires inplanes == planes"

    bn1s, bn1b = _bn_fold(*params["bn1"])
    bn2s, bn2b = _bn_fold(*params["bn2"])
    bn3s, bn3b = _bn_fold(*params["bn3"])
    alpha = params["alpha"].astype(jnp.float32)

    # ---- tiling parameters ----
    LANE = 128
    Cp = _round_up(C, LANE)                   # lane/MXU-dense channel dims
    Pp = _round_up(P, LANE)
    w_in = _pad_width(W)
    assert w_in >= W + 4 and (w_in & (w_in - 1)) == 0
    if tile_h is None:
        tile_h = _pick_tile_h(H, W, Cp, Pp, vmem_budget_bytes)
    assert H % tile_h == 0
    n_t = H // tile_h
    rows_in = tile_h + 4                      # 2-deep row halo (two stacked 3x3 convs)
    rows_a = tile_h + 2
    m_full = rows_in * w_in
    m_a = rows_a * w_in
    m_b = tile_h * w_in
    est = _vmem_estimate(tile_h, W, Cp, Pp)
    vmem_limit = int(min(max(est * 3 // 2, 32 << 20), 56 << 20))

    # ---- fold bn2/bn3 scales into conv weights; zero-pad channels to 128 ----
    w1f = (jnp.zeros((3, 3, Cp, Pp), jnp.float32)
           .at[:, :, :C, :P].set(w1 * bn2s).astype(jnp.bfloat16))
    w2f = (jnp.zeros((3, 3, Pp, Pp), jnp.float32)
           .at[:, :, :P, :P].set(w2 * bn3s).astype(jnp.bfloat16))

    # ---- bn1 + zero pad (spatial 2, channels to Cp), bf16 staging, halo row tiles ----
    h1 = x * bn1s + bn1b
    h1p = jnp.pad(h1, ((0, 0), (2, 2), (2, w_in - W - 2), (0, Cp - C)))
    h1p = h1p.astype(jnp.bfloat16)
    if n_t == 1:
        h1_tiles = h1p[:, None]               # no halo duplication when tile_h == H
    else:
        h1_tiles = jnp.stack(
            [h1p[:, t * tile_h:t * tile_h + rows_in] for t in range(n_t)], axis=1)
    # (N, n_t, rows_in, w_in, Cp)

    # identity path (pre-bn1 x), channel padded, f32
    xres = jnp.pad(x, ((0, 0), (0, 0), (0, 0), (0, Cp - C)))

    # per-channel vectors packed into a single small resident block
    vecs = (jnp.zeros((8, Pp), jnp.float32)
            .at[0, :P].set(bn2b)
            .at[1, :P].set(alpha)
            .at[2, :P].set(bn3b))

    out_nhwc = pl.pallas_call(
        ibasic_block_kernel,
        out_shape=jax.ShapeDtypeStruct((N, H, W, Pp), jnp.float32),
        grid=(N, n_t),
        in_specs=[
            # staged bn1 output with row halo (bf16)
            pl.BlockSpec((None, None, rows_in, w_in, Cp),
                         lambda n, t: (n, t, 0, 0, 0)),
            # residual (raw x), row-tiled, f32
            pl.BlockSpec((None, tile_h, W, Cp), lambda n, t: (n, t, 0, 0)),
            # conv weights: constant block index -> stays resident across steps
            pl.BlockSpec((3, 3, Cp, Pp), lambda n, t: (0, 0, 0, 0)),
            pl.BlockSpec((3, 3, Pp, Pp), lambda n, t: (0, 0, 0, 0)),
            # packed per-channel vectors (bn2 bias, alpha, bn3 bias)
            pl.BlockSpec((8, Pp), lambda n, t: (0, 0)),
        ],
        out_specs=pl.BlockSpec((None, tile_h, W, Pp), lambda n, t: (n, t, 0, 0)),
        scratch_shapes=[
            pltpu.VMEM((m_full, Cp), jnp.bfloat16),   # h1 shifted by 1 column
            pltpu.VMEM((m_full, Cp), jnp.bfloat16),   # h1 shifted by 2 columns
            pltpu.VMEM((m_a, Pp), jnp.float32),       # conv1 accumulator
            pltpu.VMEM((m_a, Pp), jnp.bfloat16),      # PReLU output z
            pltpu.VMEM((m_a, Pp), jnp.bfloat16),      # z shifted by 1 column
            pltpu.VMEM((m_a, Pp), jnp.bfloat16),      # z shifted by 2 columns
            pltpu.VMEM((m_b, Pp), jnp.float32),       # conv2 accumulator
        ],
        compiler_params=pltpu.CompilerParams(
            dimension_semantics=("parallel", "parallel"),
            vmem_limit_bytes=vmem_limit),
    )(h1_tiles, xres, w1f, w2f, vecs)

    out = out_nhwc[..., :P]                       # drop channel padding
    return jnp.transpose(out, (0, 3, 1, 2))       # NHWC -> NCHW


def ibasic_block_ref(x_nchw, params, eps=1e-5):
    """Pure-JAX reference (same eval-mode semantics) for verification."""
    x = jnp.transpose(x_nchw, (0, 2, 3, 1)).astype(jnp.float32)

    def bn(v, p):
        g, b, m, var = p
        return (v - m) / jnp.sqrt(var + eps) * g + b

    h = bn(x, params["bn1"])
    h = jax.lax.conv_general_dilated(
        h, params["w1"], (1, 1), ((1, 1), (1, 1)),
        dimension_numbers=("NHWC", "HWIO", "NHWC"))
    h = bn(h, params["bn2"])
    a = params["alpha"]
    h = jnp.where(h >= 0, h, a * h)
    h = jax.lax.conv_general_dilated(
        h, params["w2"], (1, 1), ((1, 1), (1, 1)),
        dimension_numbers=("NHWC", "HWIO", "NHWC"))
    h = bn(h, params["bn3"])
    h = h + x
    return jnp.transpose(h, (0, 3, 1, 2))


def make_params(key, inplanes, planes):
    ks = jax.random.split(key, 12)

    def bn_params(k, c):
        k0, k1, k2, k3 = jax.random.split(k, 4)
        gamma = 1.0 + 0.1 * jax.random.normal(k0, (c,), jnp.float32)
        beta = 0.1 * jax.random.normal(k1, (c,), jnp.float32)
        mean = 0.1 * jax.random.normal(k2, (c,), jnp.float32)
        var = jax.random.uniform(k3, (c,), jnp.float32, 0.5, 1.5)
        return (gamma, beta, mean, var)

    return {
        "bn1": bn_params(ks[0], inplanes),
        "w1": 0.1 * jax.random.normal(ks[1], (3, 3, inplanes, planes), jnp.float32),
        "bn2": bn_params(ks[2], planes),
        "alpha": jnp.full((planes,), 0.25, jnp.float32),   # nn.PReLU default init
        "w2": 0.1 * jax.random.normal(ks[3], (3, 3, planes, planes), jnp.float32),
        "bn3": bn_params(ks[4], planes),
    }


if __name__ == "__main__":
    key = jax.random.PRNGKey(0)
    kx, kp = jax.random.split(key)

    N, C, H, W = 2, 4, 16, 16          # inplanes = planes = 4, stride = 1
    x = jax.random.normal(kx, (N, C, H, W), jnp.float32)
    params = make_params(kp, C, C)

    fwd = jax.jit(ibasic_block)
    out = jax.block_until_ready(fwd(x, params))
    ref = jax.block_until_ready(ibasic_block_ref(x, params))

    max_diff = float(jnp.max(jnp.abs(out - ref)))
    assert out.shape == (N, C, H, W)
    assert max_diff < 5e-2, f"mismatch vs reference: {max_diff}"

    print("KERNEL_OK")
</pallas_src>

<mosaic_0001>
module attributes {stable_mosaic.version = 11 : i64} {
  func.func @ibasic_block_kernel(%arg0: i32, %arg1: i32, %arg2: memref<1x1x20x32x128xbf16, #tpu.memory_space<vmem>>, %arg3: memref<1x16x16x128xf32, #tpu.memory_space<vmem>>, %arg4: memref<3x3x128x128xbf16, #tpu.memory_space<vmem>>, %arg5: memref<3x3x128x128xbf16, #tpu.memory_space<vmem>>, %arg6: memref<8x128xf32, #tpu.memory_space<vmem>>, %arg7: memref<1x16x16x128xf32, #tpu.memory_space<vmem>>, %arg8: memref<640x128xbf16, #tpu.memory_space<vmem>>, %arg9: memref<640x128xbf16, #tpu.memory_space<vmem>>, %arg10: memref<576x128xf32, #tpu.memory_space<vmem>>, %arg11: memref<576x128xbf16, #tpu.memory_space<vmem>>, %arg12: memref<576x128xbf16, #tpu.memory_space<vmem>>, %arg13: memref<576x128xbf16, #tpu.memory_space<vmem>>, %arg14: memref<512x128xf32, #tpu.memory_space<vmem>>) attributes {dimension_semantics = [#tpu.dimension_semantics<parallel>, #tpu.dimension_semantics<parallel>], iteration_bounds = array<i64: 2, 1>, scalar_prefetch = 0 : i64, scratch_operands = 7 : i64, tpu.core_type = #tpu.core_type<tc>, window_params = [{transform_indices = @transform_0, window_bounds = array<i64: 1, 1, 20, 32, 128>}, {transform_indices = @transform_1, window_bounds = array<i64: 1, 16, 16, 128>}, {pipeline_mode = #tpu.pipeline_mode<synchronous>, transform_indices = @transform_2, window_bounds = array<i64: 3, 3, 128, 128>}, {pipeline_mode = #tpu.pipeline_mode<synchronous>, transform_indices = @transform_3, window_bounds = array<i64: 3, 3, 128, 128>}, {pipeline_mode = #tpu.pipeline_mode<synchronous>, transform_indices = @transform_4, window_bounds = array<i64: 8, 128>}, {transform_indices = @transform_5, window_bounds = array<i64: 1, 16, 16, 128>}]} {
    %c0 = arith.constant 0 : index
    %c0_0 = arith.constant 0 : index
    %0 = vector.load %arg6[%c0, %c0_0] : memref<8x128xf32, #tpu.memory_space<vmem>>, vector<1x128xf32>
    %c1 = arith.constant 1 : index
    %c0_1 = arith.constant 0 : index
    %1 = vector.load %arg6[%c1, %c0_1] : memref<8x128xf32, #tpu.memory_space<vmem>>, vector<1x128xf32>
    %c2 = arith.constant 2 : index
    %c0_2 = arith.constant 0 : index
    %2 = vector.load %arg6[%c2, %c0_2] : memref<8x128xf32, #tpu.memory_space<vmem>>, vector<1x128xf32>
    %c0_3 = arith.constant 0 : index
    %c0_4 = arith.constant 0 : index
    %c0_5 = arith.constant 0 : index
    %c0_6 = arith.constant 0 : index
    %c0_7 = arith.constant 0 : index
    %3 = vector.load %arg2[%c0_3, %c0_4, %c0_5, %c0_6, %c0_7] : memref<1x1x20x32x128xbf16, #tpu.memory_space<vmem>>, vector<1x1x20x32x128xbf16>
    %4 = vector.shape_cast %3 : vector<1x1x20x32x128xbf16> to vector<20x32x128xbf16>
    %5 = vector.shape_cast %4 : vector<20x32x128xbf16> to vector<640x128xbf16>
    %6 = arith.extf %5 : vector<640x128xbf16> to vector<640x128xf32>
    %c639_i32 = arith.constant 639 : i32
    %7 = tpu.dynamic_rotate %6 by %c639_i32 dim 0 : vector<640x128xf32>, i32 -> vector<640x128xf32>
    %8 = arith.truncf %7 : vector<640x128xf32> to vector<640x128xbf16>
    %c0_8 = arith.constant 0 : index
    %c0_9 = arith.constant 0 : index
    %9 = vector.load %arg8[%c0_8, %c0_9] : memref<640x128xbf16, #tpu.memory_space<vmem>>, vector<640x128xbf16>
    tpu.vector_store %arg8[%c0_8, %c0_9], %8 {strides = array<i32>} : memref<640x128xbf16, #tpu.memory_space<vmem>>, vector<640x128xbf16>,
    %c638_i32 = arith.constant 638 : i32
    %10 = tpu.dynamic_rotate %6 by %c638_i32 dim 0 : vector<640x128xf32>, i32 -> vector<640x128xf32>
    %11 = arith.truncf %10 : vector<640x128xf32> to vector<640x128xbf16>
    %c0_10 = arith.constant 0 : index
    %c0_11 = arith.constant 0 : index
    %12 = vector.load %arg9[%c0_10, %c0_11] : memref<640x128xbf16, #tpu.memory_space<vmem>>, vector<640x128xbf16>
    tpu.vector_store %arg9[%c0_10, %c0_11], %11 {strides = array<i32>} : memref<640x128xbf16, #tpu.memory_space<vmem>>, vector<640x128xbf16>,
    %c0_12 = arith.constant 0 : index
    %c0_13 = arith.constant 0 : index
    %c0_14 = arith.constant 0 : index
    %c0_15 = arith.constant 0 : index
    %c0_16 = arith.constant 0 : index
    %13 = vector.load %arg2[%c0_12, %c0_13, %c0_14, %c0_15, %c0_16] : memref<1x1x20x32x128xbf16, #tpu.memory_space<vmem>>, vector<1x1x18x32x128xbf16>
    %14 = vector.shape_cast %13 : vector<1x1x18x32x128xbf16> to vector<18x32x128xbf16>
    %15 = vector.shape_cast %14 : vector<18x32x128xbf16> to vector<576x128xbf16>
    %c0_17 = arith.constant 0 : index
    %c0_18 = arith.constant 0 : index
    %c1_19 = arith.constant 1 : index
    %c0_20 = arith.constant 0 : index
    %c0_21 = arith.constant 0 : index
    %16 = vector.load %arg2[%c0_17, %c0_18, %c1_19, %c0_20, %c0_21] : memref<1x1x20x32x128xbf16, #tpu.memory_space<vmem>>, vector<1x1x18x32x128xbf16>
    %17 = vector.shape_cast %16 : vector<1x1x18x32x128xbf16> to vector<18x32x128xbf16>
    %18 = vector.shape_cast %17 : vector<18x32x128xbf16> to vector<576x128xbf16>
    %c0_22 = arith.constant 0 : index
    %c0_23 = arith.constant 0 : index
    %c2_24 = arith.constant 2 : index
    %c0_25 = arith.constant 0 : index
    %c0_26 = arith.constant 0 : index
    %19 = vector.load %arg2[%c0_22, %c0_23, %c2_24, %c0_25, %c0_26] : memref<1x1x20x32x128xbf16, #tpu.memory_space<vmem>>, vector<1x1x18x32x128xbf16>
    %20 = vector.shape_cast %19 : vector<1x1x18x32x128xbf16> to vector<18x32x128xbf16>
    %21 = vector.shape_cast %20 : vector<18x32x128xbf16> to vector<576x128xbf16>
    %c0_27 = arith.constant 0 : index
    %c0_28 = arith.constant 0 : index
    %c0_29 = arith.constant 0 : index
    %c0_30 = arith.constant 0 : index
    %22 = vector.load %arg4[%c0_27, %c0_28, %c0_29, %c0_30] : memref<3x3x128x128xbf16, #tpu.memory_space<vmem>>, vector<1x1x128x128xbf16>
    %23 = vector.shape_cast %22 : vector<1x1x128x128xbf16> to vector<128x128xbf16>
    %cst = arith.constant dense<0.000000e+00> : vector<576x128xf32>
    %24 = tpu.matmul %15, %23, %cst {dimension_numbers = #tpu.dot_dimension_numbers<[1], [0], [0], [1], [0, 0, 1, 1], [], []>} : vector<576x128xbf16>, vector<128x128xbf16>, vector<576x128xf32> -> vector<576x128xf32>
    %c1_31 = arith.constant 1 : index
    %c0_32 = arith.constant 0 : index
    %c0_33 = arith.constant 0 : index
    %c0_34 = arith.constant 0 : index
    %25 = vector.load %arg4[%c1_31, %c0_32, %c0_33, %c0_34] : memref<3x3x128x128xbf16, #tpu.memory_space<vmem>>, vector<1x1x128x128xbf16>
    %26 = vector.shape_cast %25 : vector<1x1x128x128xbf16> to vector<128x128xbf16>
    %cst_35 = arith.constant dense<0.000000e+00> : vector<576x128xf32>
    %27 = tpu.matmul %18, %26, %cst_35 {dimension_numbers = #tpu.dot_dimension_numbers<[1], [0], [0], [1], [0, 0, 1, 1], [], []>} : vector<576x128xbf16>, vector<128x128xbf16>, vector<576x128xf32> -> vector<576x128xf32>
    %28 = arith.addf %24, %27 : vector<576x128xf32>
    %c2_36 = arith.constant 2 : index
    %c0_37 = arith.constant 0 : index
    %c0_38 = arith.constant 0 : index
    %c0_39 = arith.constant 0 : index
    %29 = vector.load %arg4[%c2_36, %c0_37, %c0_38, %c0_39] : memref<3x3x128x128xbf16, #tpu.memory_space<vmem>>, vector<1x1x128x128xbf16>
    %30 = vector.shape_cast %29 : vector<1x1x128x128xbf16> to vector<128x128xbf16>
    %cst_40 = arith.constant dense<0.000000e+00> : vector<576x128xf32>
    %31 = tpu.matmul %21, %30, %cst_40 {dimension_numbers = #tpu.dot_dimension_numbers<[1], [0], [0], [1], [0, 0, 1, 1], [], []>} : vector<576x128xbf16>, vector<128x128xbf16>, vector<576x128xf32> -> vector<576x128xf32>
    %32 = arith.addf %28, %31 : vector<576x128xf32>
    %c0_41 = arith.constant 0 : index
    %c0_42 = arith.constant 0 : index
    %33 = vector.load %arg10[%c0_41, %c0_42] : memref<576x128xf32, #tpu.memory_space<vmem>>, vector<576x128xf32>
    tpu.vector_store %arg10[%c0_41, %c0_42], %32 {strides = array<i32>} : memref<576x128xf32, #tpu.memory_space<vmem>>, vector<576x128xf32>,
    %c0_43 = arith.constant 0 : index
    %c0_44 = arith.constant 0 : index
    %34 = vector.load %arg8[%c0_43, %c0_44] : memref<640x128xbf16, #tpu.memory_space<vmem>>, vector<576x128xbf16>
    %c32 = arith.constant 32 : index
    %c0_45 = arith.constant 0 : index
    %35 = vector.load %arg8[%c32, %c0_45] : memref<640x128xbf16, #tpu.memory_space<vmem>>, vector<576x128xbf16>
    %c64 = arith.constant 64 : index
    %c0_46 = arith.constant 0 : index
    %36 = vector.load %arg8[%c64, %c0_46] : memref<640x128xbf16, #tpu.memory_space<vmem>>, vector<576x128xbf16>
    %c0_47 = arith.constant 0 : index
    %c1_48 = arith.constant 1 : index
    %c0_49 = arith.constant 0 : index
    %c0_50 = arith.constant 0 : index
    %37 = vector.load %arg4[%c0_47, %c1_48, %c0_49, %c0_50] : memref<3x3x128x128xbf16, #tpu.memory_space<vmem>>, vector<1x1x128x128xbf16>
    %38 = vector.shape_cast %37 : vector<1x1x128x128xbf16> to vector<128x128xbf16>
    %cst_51 = arith.constant dense<0.000000e+00> : vector<576x128xf32>
    %39 = tpu.matmul %34, %38, %cst_51 {dimension_numbers = #tpu.dot_dimension_numbers<[1], [0], [0], [1], [0, 0, 1, 1], [], []>} : vector<576x128xbf16>, vector<128x128xbf16>, vector<576x128xf32> -> vector<576x128xf32>
    %c1_52 = arith.constant 1 : index
    %c1_53 = arith.constant 1 : index
    %c0_54 = arith.constant 0 : index
    %c0_55 = arith.constant 0 : index
    %40 = vector.load %arg4[%c1_52, %c1_53, %c0_54, %c0_55] : memref<3x3x128x128xbf16, #tpu.memory_space<vmem>>, vector<1x1x128x128xbf16>
    %41 = vector.shape_cast %40 : vector<1x1x128x128xbf16> to vector<128x128xbf16>
    %cst_56 = arith.constant dense<0.000000e+00> : vector<576x128xf32>
    %42 = tpu.matmul %35, %41, %cst_56 {dimension_numbers = #tpu.dot_dimension_numbers<[1], [0], [0], [1], [0, 0, 1, 1], [], []>} : vector<576x128xbf16>, vector<128x128xbf16>, vector<576x128xf32> -> vector<576x128xf32>
    %43 = arith.addf %39, %42 : vector<576x128xf32>
    %c2_57 = arith.constant 2 : index
    %c1_58 = arith.constant 1 : index
    %c0_59 = arith.constant 0 : index
    %c0_60 = arith.constant 0 : index
    %44 = vector.load %arg4[%c2_57, %c1_58, %c0_59, %c0_60] : memref<3x3x128x128xbf16, #tpu.memory_space<vmem>>, vector<1x1x128x128xbf16>
    %45 = vector.shape_cast %44 : vector<1x1x128x128xbf16> to vector<128x128xbf16>
    %cst_61 = arith.constant dense<0.000000e+00> : vector<576x128xf32>
    %46 = tpu.matmul %36, %45, %cst_61 {dimension_numbers = #tpu.dot_dimension_numbers<[1], [0], [0], [1], [0, 0, 1, 1], [], []>} : vector<576x128xbf16>, vector<128x128xbf16>, vector<576x128xf32> -> vector<576x128xf32>
    %47 = arith.addf %43, %46 : vector<576x128xf32>
    %c0_62 = arith.constant 0 : index
    %c0_63 = arith.constant 0 : index
    %48 = vector.load %arg10[%c0_62, %c0_63] : memref<576x128xf32, #tpu.memory_space<vmem>>, vector<576x128xf32>
    %49 = arith.addf %48, %47 : vector<576x128xf32>
    %c0_64 = arith.constant 0 : index
    %c0_65 = arith.constant 0 : index
    %50 = vector.load %arg10[%c0_64, %c0_65] : memref<576x128xf32, #tpu.memory_space<vmem>>, vector<576x128xf32>
    tpu.vector_store %arg10[%c0_64, %c0_65], %49 {strides = array<i32>} : memref<576x128xf32, #tpu.memory_space<vmem>>, vector<576x128xf32>,
    %c0_66 = arith.constant 0 : index
    %c0_67 = arith.constant 0 : index
    %51 = vector.load %arg9[%c0_66, %c0_67] : memref<640x128xbf16, #tpu.memory_space<vmem>>, vector<576x128xbf16>
    %c32_68 = arith.constant 32 : index
    %c0_69 = arith.constant 0 : index
    %52 = vector.load %arg9[%c32_68, %c0_69] : memref<640x128xbf16, #tpu.memory_space<vmem>>, vector<576x128xbf16>
    %c64_70 = arith.constant 64 : index
    %c0_71 = arith.constant 0 : index
    %53 = vector.load %arg9[%c64_70, %c0_71] : memref<640x128xbf16, #tpu.memory_space<vmem>>, vector<576x128xbf16>
    %c0_72 = arith.constant 0 : index
    %c2_73 = arith.constant 2 : index
    %c0_74 = arith.constant 0 : index
    %c0_75 = arith.constant 0 : index
    %54 = vector.load %arg4[%c0_72, %c2_73, %c0_74, %c0_75] : memref<3x3x128x128xbf16, #tpu.memory_space<vmem>>, vector<1x1x128x128xbf16>
    %55 = vector.shape_cast %54 : vector<1x1x128x128xbf16> to vector<128x128xbf16>
    %cst_76 = arith.constant dense<0.000000e+00> : vector<576x128xf32>
    %56 = tpu.matmul %51, %55, %cst_76 {dimension_numbers = #tpu.dot_dimension_numbers<[1], [0], [0], [1], [0, 0, 1, 1], [], []>} : vector<576x128xbf16>, vector<128x128xbf16>, vector<576x128xf32> -> vector<576x128xf32>
    %c1_77 = arith.constant 1 : index
    %c2_78 = arith.constant 2 : index
    %c0_79 = arith.constant 0 : index
    %c0_80 = arith.constant 0 : index
    %57 = vector.load %arg4[%c1_77, %c2_78, %c0_79, %c0_80] : memref<3x3x128x128xbf16, #tpu.memory_space<vmem>>, vector<1x1x128x128xbf16>
    %58 = vector.shape_cast %57 : vector<1x1x128x128xbf16> to vector<128x128xbf16>
    %cst_81 = arith.constant dense<0.000000e+00> : vector<576x128xf32>
    %59 = tpu.matmul %52, %58, %cst_81 {dimension_numbers = #tpu.dot_dimension_numbers<[1], [0], [0], [1], [0, 0, 1, 1], [], []>} : vector<576x128xbf16>, vector<128x128xbf16>, vector<576x128xf32> -> vector<576x128xf32>
    %60 = arith.addf %56, %59 : vector<576x128xf32>
    %c2_82 = arith.constant 2 : index
    %c2_83 = arith.constant 2 : index
    %c0_84 = arith.constant 0 : index
    %c0_85 = arith.constant 0 : index
    %61 = vector.load %arg4[%c2_82, %c2_83, %c0_84, %c0_85] : memref<3x3x128x128xbf16, #tpu.memory_space<vmem>>, vector<1x1x128x128xbf16>
    %62 = vector.shape_cast %61 : vector<1x1x128x128xbf16> to vector<128x128xbf16>
    %cst_86 = arith.constant dense<0.000000e+00> : vector<576x128xf32>
    %63 = tpu.matmul %53, %62, %cst_86 {dimension_numbers = #tpu.dot_dimension_numbers<[1], [0], [0], [1], [0, 0, 1, 1], [], []>} : vector<576x128xbf16>, vector<128x128xbf16>, vector<576x128xf32> -> vector<576x128xf32>
    %64 = arith.addf %60, %63 : vector<576x128xf32>
    %c0_87 = arith.constant 0 : index
    %c0_88 = arith.constant 0 : index
    %65 = vector.load %arg10[%c0_87, %c0_88] : memref<576x128xf32, #tpu.memory_space<vmem>>, vector<576x128xf32>
    %66 = arith.addf %65, %64 : vector<576x128xf32>
    %c0_89 = arith.constant 0 : index
    %c0_90 = arith.constant 0 : index
    %67 = vector.load %arg10[%c0_89, %c0_90] : memref<576x128xf32, #tpu.memory_space<vmem>>, vector<576x128xf32>
    tpu.vector_store %arg10[%c0_89, %c0_90], %66 {strides = array<i32>} : memref<576x128xf32, #tpu.memory_space<vmem>>, vector<576x128xf32>,
    %68 = tpu.iota {dimensions = array<i32: 0>} : vector<576x128xi32>
    %c5_i32 = arith.constant 5 : i32
    %69 = vector.broadcast %c5_i32 : i32 to vector<576x128xi32>
    %70 = arith.shrsi %68, %69 : vector<576x128xi32>
    %c31_i32 = arith.constant 31 : i32
    %71 = vector.broadcast %c31_i32 : i32 to vector<576x128xi32>
    %72 = arith.andi %68, %71 : vector<576x128xi32>
    %c16_i32 = arith.constant 16 : i32
    %73 = arith.muli %arg1, %c16_i32 : i32
    %c1_i32 = arith.constant 1 : i32
    %74 = arith.subi %73, %c1_i32 : i32
    %75 = vector.broadcast %74 : i32 to vector<576x128xi32>
    %76 = arith.addi %75, %70 : vector<576x128xi32>
    %c0_i32 = arith.constant 0 : i32
    %77 = vector.broadcast %c0_i32 : i32 to vector<576x128xi32>
    %78 = arith.cmpi sge, %76, %77 : vector<576x128xi32>
    %c16_i32_91 = arith.constant 16 : i32
    %79 = vector.broadcast %c16_i32_91 : i32 to vector<576x128xi32>
    %80 = arith.cmpi slt, %76, %79 : vector<576x128xi32>
    %81 = arith.andi %78, %80 : vector<576x128xi1>
    %c1_i32_92 = arith.constant 1 : i32
    %82 = vector.broadcast %c1_i32_92 : i32 to vector<576x128xi32>
    %83 = arith.cmpi sge, %72, %82 : vector<576x128xi32>
    %84 = arith.andi %81, %83 : vector<576x128xi1>
    %c16_i32_93 = arith.constant 16 : i32
    %85 = vector.broadcast %c16_i32_93 : i32 to vector<576x128xi32>
    %86 = arith.cmpi sle, %72, %85 : vector<576x128xi32>
    %87 = arith.andi %84, %86 : vector<576x128xi1>
    %c0_94 = arith.constant 0 : index
    %c0_95 = arith.constant 0 : index
    %88 = vector.load %arg10[%c0_94, %c0_95] : memref<576x128xf32, #tpu.memory_space<vmem>>, vector<576x128xf32>
    %89 = vector.broadcast %0 : vector<1x128xf32> to vector<576x128xf32>
    %90 = arith.addf %88, %89 : vector<576x128xf32>
    %cst_96 = arith.constant 0.000000e+00 : f32
    %91 = vector.broadcast %cst_96 : f32 to vector<576x128xf32>
    %92 = arith.cmpf oge, %90, %91 : vector<576x128xf32>
    %93 = vector.broadcast %1 : vector<1x128xf32> to vector<576x128xf32>
    %94 = arith.mulf %93, %90 : vector<576x128xf32>
    %95 = arith.select %92, %90, %94 : vector<576x128xi1>, vector<576x128xf32>
    %cst_97 = arith.constant 0.000000e+00 : f32
    %96 = vector.broadcast %cst_97 : f32 to vector<576x128xf32>
    %97 = arith.select %87, %95, %96 : vector<576x128xi1>, vector<576x128xf32>
    %98 = arith.truncf %97 : vector<576x128xf32> to vector<576x128xbf16>
    %c0_98 = arith.constant 0 : index
    %c0_99 = arith.constant 0 : index
    %99 = vector.load %arg11[%c0_98, %c0_99] : memref<576x128xbf16, #tpu.memory_space<vmem>>, vector<576x128xbf16>
    tpu.vector_store %arg11[%c0_98, %c0_99], %98 {strides = array<i32>} : memref<576x128xbf16, #tpu.memory_space<vmem>>, vector<576x128xbf16>,
    %c575_i32 = arith.constant 575 : i32
    %100 = tpu.dynamic_rotate %97 by %c575_i32 dim 0 : vector<576x128xf32>, i32 -> vector<576x128xf32>
    %101 = arith.truncf %100 : vector<576x128xf32> to vector<576x128xbf16>
    %c0_100 = arith.constant 0 : index
    %c0_101 = arith.constant 0 : index
    %102 = vector.load %arg12[%c0_100, %c0_101] : memref<576x128xbf16, #tpu.memory_space<vmem>>, vector<576x128xbf16>
    tpu.vector_store %arg12[%c0_100, %c0_101], %101 {strides = array<i32>} : memref<576x128xbf16, #tpu.memory_space<vmem>>, vector<576x128xbf16>,
    %c574_i32 = arith.constant 574 : i32
    %103 = tpu.dynamic_rotate %97 by %c574_i32 dim 0 : vector<576x128xf32>, i32 -> vector<576x128xf32>
    %104 = arith.truncf %103 : vector<576x128xf32> to vector<576x128xbf16>
    %c0_102 = arith.constant 0 : index
    %c0_103 = arith.constant 0 : index
    %105 = vector.load %arg13[%c0_102, %c0_103] : memref<576x128xbf16, #tpu.memory_space<vmem>>, vector<576x128xbf16>
    tpu.vector_store %arg13[%c0_102, %c0_103], %104 {strides = array<i32>} : memref<576x128xbf16, #tpu.memory_space<vmem>>, vector<576x128xbf16>,
    %c0_104 = arith.constant 0 : index
    %c0_105 = arith.constant 0 : index
    %106 = vector.load %arg11[%c0_104, %c0_105] : memref<576x128xbf16, #tpu.memory_space<vmem>>, vector<512x128xbf16>
    %c0_106 = arith.constant 0 : index
    %c0_107 = arith.constant 0 : index
    %c0_108 = arith.constant 0 : index
    %c0_109 = arith.constant 0 : index
    %107 = vector.load %arg5[%c0_106, %c0_107, %c0_108, %c0_109] : memref<3x3x128x128xbf16, #tpu.memory_space<vmem>>, vector<1x1x128x128xbf16>
    %108 = vector.shape_cast %107 : vector<1x1x128x128xbf16> to vector<128x128xbf16>
    %cst_110 = arith.constant dense<0.000000e+00> : vector<512x128xf32>
    %109 = tpu.matmul %106, %108, %cst_110 {dimension_numbers = #tpu.dot_dimension_numbers<[1], [0], [0], [1], [0, 0, 1, 1], [], []>} : vector<512x128xbf16>, vector<128x128xbf16>, vector<512x128xf32> -> vector<512x128xf32>
    %c32_111 = arith.constant 32 : index
    %c0_112 = arith.constant 0 : index
    %110 = vector.load %arg11[%c32_111, %c0_112] : memref<576x128xbf16, #tpu.memory_space<vmem>>, vector<512x128xbf16>
    %c1_113 = arith.constant 1 : index
    %c0_114 = arith.constant 0 : index
    %c0_115 = arith.constant 0 : index
    %c0_116 = arith.constant 0 : index
    %111 = vector.load %arg5[%c1_113, %c0_114, %c0_115, %c0_116] : memref<3x3x128x128xbf16, #tpu.memory_space<vmem>>, vector<1x1x128x128xbf16>
    %112 = vector.shape_cast %111 : vector<1x1x128x128xbf16> to vector<128x128xbf16>
    %cst_117 = arith.constant dense<0.000000e+00> : vector<512x128xf32>
    %113 = tpu.matmul %110, %112, %cst_117 {dimension_numbers = #tpu.dot_dimension_numbers<[1], [0], [0], [1], [0, 0, 1, 1], [], []>} : vector<512x128xbf16>, vector<128x128xbf16>, vector<512x128xf32> -> vector<512x128xf32>
    %114 = arith.addf %109, %113 : vector<512x128xf32>
    %c64_118 = arith.constant 64 : index
    %c0_119 = arith.constant 0 : index
    %115 = vector.load %arg11[%c64_118, %c0_119] : memref<576x128xbf16, #tpu.memory_space<vmem>>, vector<512x128xbf16>
    %c2_120 = arith.constant 2 : index
    %c0_121 = arith.constant 0 : index
    %c0_122 = arith.constant 0 : index
    %c0_123 = arith.constant 0 : index
    %116 = vector.load %arg5[%c2_120, %c0_121, %c0_122, %c0_123] : memref<3x3x128x128xbf16, #tpu.memory_space<vmem>>, vector<1x1x128x128xbf16>
    %117 = vector.shape_cast %116 : vector<1x1x128x128xbf16> to vector<128x128xbf16>
    %cst_124 = arith.constant dense<0.000000e+00> : vector<512x128xf32>
    %118 = tpu.matmul %115, %117, %cst_124 {dimension_numbers = #tpu.dot_dimension_numbers<[1], [0], [0], [1], [0, 0, 1, 1], [], []>} : vector<512x128xbf16>, vector<128x128xbf16>, vector<512x128xf32> -> vector<512x128xf32>
    %119 = arith.addf %114, %118 : vector<512x128xf32>
    %c0_125 = arith.constant 0 : index
    %c0_126 = arith.constant 0 : index
    %120 = vector.load %arg14[%c0_125, %c0_126] : memref<512x128xf32, #tpu.memory_space<vmem>>, vector<512x128xf32>
    tpu.vector_store %arg14[%c0_125, %c0_126], %119 {strides = array<i32>} : memref<512x128xf32, #tpu.memory_space<vmem>>, vector<512x128xf32>,
    %c0_127 = arith.constant 0 : index
    %c0_128 = arith.constant 0 : index
    %121 = vector.load %arg12[%c0_127, %c0_128] : memref<576x128xbf16, #tpu.memory_space<vmem>>, vector<512x128xbf16>
    %c0_129 = arith.constant 0 : index
    %c1_130 = arith.constant 1 : index
    %c0_131 = arith.constant 0 : index
    %c0_132 = arith.constant 0 : index
    %122 = vector.load %arg5[%c0_129, %c1_130, %c0_131, %c0_132] : memref<3x3x128x128xbf16, #tpu.memory_space<vmem>>, vector<1x1x128x128xbf16>
    %123 = vector.shape_cast %122 : vector<1x1x128x128xbf16> to vector<128x128xbf16>
    %cst_133 = arith.constant dense<0.000000e+00> : vector<512x128xf32>
    %124 = tpu.matmul %121, %123, %cst_133 {dimension_numbers = #tpu.dot_dimension_numbers<[1], [0], [0], [1], [0, 0, 1, 1], [], []>} : vector<512x128xbf16>, vector<128x128xbf16>, vector<512x128xf32> -> vector<512x128xf32>
    %c32_134 = arith.constant 32 : index
    %c0_135 = arith.constant 0 : index
    %125 = vector.load %arg12[%c32_134, %c0_135] : memref<576x128xbf16, #tpu.memory_space<vmem>>, vector<512x128xbf16>
    %c1_136 = arith.constant 1 : index
    %c1_137 = arith.constant 1 : index
    %c0_138 = arith.constant 0 : index
    %c0_139 = arith.constant 0 : index
    %126 = vector.load %arg5[%c1_136, %c1_137, %c0_138, %c0_139] : memref<3x3x128x128xbf16, #tpu.memory_space<vmem>>, vector<1x1x128x128xbf16>
    %127 = vector.shape_cast %126 : vector<1x1x128x128xbf16> to vector<128x128xbf16>
    %cst_140 = arith.constant dense<0.000000e+00> : vector<512x128xf32>
    %128 = tpu.matmul %125, %127, %cst_140 {dimension_numbers = #tpu.dot_dimension_numbers<[1], [0], [0], [1], [0, 0, 1, 1], [], []>} : vector<512x128xbf16>, vector<128x128xbf16>, vector<512x128xf32> -> vector<512x128xf32>
    %129 = arith.addf %124, %128 : vector<512x128xf32>
    %c64_141 = arith.constant 64 : index
    %c0_142 = arith.constant 0 : index
    %130 = vector.load %arg12[%c64_141, %c0_142] : memref<576x128xbf16, #tpu.memory_space<vmem>>, vector<512x128xbf16>
    %c2_143 = arith.constant 2 : index
    %c1_144 = arith.constant 1 : index
    %c0_145 = arith.constant 0 : index
    %c0_146 = arith.constant 0 : index
    %131 = vector.load %arg5[%c2_143, %c1_144, %c0_145, %c0_146] : memref<3x3x128x128xbf16, #tpu.memory_space<vmem>>, vector<1x1x128x128xbf16>
    %132 = vector.shape_cast %131 : vector<1x1x128x128xbf16> to vector<128x128xbf16>
    %cst_147 = arith.constant dense<0.000000e+00> : vector<512x128xf32>
    %133 = tpu.matmul %130, %132, %cst_147 {dimension_numbers = #tpu.dot_dimension_numbers<[1], [0], [0], [1], [0, 0, 1, 1], [], []>} : vector<512x128xbf16>, vector<128x128xbf16>, vector<512x128xf32> -> vector<512x128xf32>
    %134 = arith.addf %129, %133 : vector<512x128xf32>
    %c0_148 = arith.constant 0 : index
    %c0_149 = arith.constant 0 : index
    %135 = vector.load %arg14[%c0_148, %c0_149] : memref<512x128xf32, #tpu.memory_space<vmem>>, vector<512x128xf32>
    %136 = arith.addf %135, %134 : vector<512x128xf32>
    %c0_150 = arith.constant 0 : index
    %c0_151 = arith.constant 0 : index
    %137 = vector.load %arg14[%c0_150, %c0_151] : memref<512x128xf32, #tpu.memory_space<vmem>>, vector<512x128xf32>
    tpu.vector_store %arg14[%c0_150, %c0_151], %136 {strides = array<i32>} : memref<512x128xf32, #tpu.memory_space<vmem>>, vector<512x128xf32>,
    %c0_152 = arith.constant 0 : index
    %c0_153 = arith.constant 0 : index
    %138 = vector.load %arg13[%c0_152, %c0_153] : memref<576x128xbf16, #tpu.memory_space<vmem>>, vector<512x128xbf16>
    %c0_154 = arith.constant 0 : index
    %c2_155 = arith.constant 2 : index
    %c0_156 = arith.constant 0 : index
    %c0_157 = arith.constant 0 : index
    %139 = vector.load %arg5[%c0_154, %c2_155, %c0_156, %c0_157] : memref<3x3x128x128xbf16, #tpu.memory_space<vmem>>, vector<1x1x128x128xbf16>
    %140 = vector.shape_cast %139 : vector<1x1x128x128xbf16> to vector<128x128xbf16>
    %cst_158 = arith.constant dense<0.000000e+00> : vector<512x128xf32>
    %141 = tpu.matmul %138, %140, %cst_158 {dimension_numbers = #tpu.dot_dimension_numbers<[1], [0], [0], [1], [0, 0, 1, 1], [], []>} : vector<512x128xbf16>, vector<128x128xbf16>, vector<512x128xf32> -> vector<512x128xf32>
    %c32_159 = arith.constant 32 : index
    %c0_160 = arith.constant 0 : index
    %142 = vector.load %arg13[%c32_159, %c0_160] : memref<576x128xbf16, #tpu.memory_space<vmem>>, vector<512x128xbf16>
    %c1_161 = arith.constant 1 : index
    %c2_162 = arith.constant 2 : index
    %c0_163 = arith.constant 0 : index
    %c0_164 = arith.constant 0 : index
    %143 = vector.load %arg5[%c1_161, %c2_162, %c0_163, %c0_164] : memref<3x3x128x128xbf16, #tpu.memory_space<vmem>>, vector<1x1x128x128xbf16>
    %144 = vector.shape_cast %143 : vector<1x1x128x128xbf16> to vector<128x128xbf16>
    %cst_165 = arith.constant dense<0.000000e+00> : vector<512x128xf32>
    %145 = tpu.matmul %142, %144, %cst_165 {dimension_numbers = #tpu.dot_dimension_numbers<[1], [0], [0], [1], [0, 0, 1, 1], [], []>} : vector<512x128xbf16>, vector<128x128xbf16>, vector<512x128xf32> -> vector<512x128xf32>
    %146 = arith.addf %141, %145 : vector<512x128xf32>
    %c64_166 = arith.constant 64 : index
    %c0_167 = arith.constant 0 : index
    %147 = vector.load %arg13[%c64_166, %c0_167] : memref<576x128xbf16, #tpu.memory_space<vmem>>, vector<512x128xbf16>
    %c2_168 = arith.constant 2 : index
    %c2_169 = arith.constant 2 : index
    %c0_170 = arith.constant 0 : index
    %c0_171 = arith.constant 0 : index
    %148 = vector.load %arg5[%c2_168, %c2_169, %c0_170, %c0_171] : memref<3x3x128x128xbf16, #tpu.memory_space<vmem>>, vector<1x1x128x128xbf16>
    %149 = vector.shape_cast %148 : vector<1x1x128x128xbf16> to vector<128x128xbf16>
    %cst_172 = arith.constant dense<0.000000e+00> : vector<512x128xf32>
    %150 = tpu.matmul %147, %149, %cst_172 {dimension_numbers = #tpu.dot_dimension_numbers<[1], [0], [0], [1], [0, 0, 1, 1], [], []>} : vector<512x128xbf16>, vector<128x128xbf16>, vector<512x128xf32> -> vector<512x128xf32>
    %151 = arith.addf %146, %150 : vector<512x128xf32>
    %c0_173 = arith.constant 0 : index
    %c0_174 = arith.constant 0 : index
    %152 = vector.load %arg14[%c0_173, %c0_174] : memref<512x128xf32, #tpu.memory_space<vmem>>, vector<512x128xf32>
    %153 = arith.addf %152, %151 : vector<512x128xf32>
    %c0_175 = arith.constant 0 : index
    %c0_176 = arith.constant 0 : index
    %154 = vector.load %arg14[%c0_175, %c0_176] : memref<512x128xf32, #tpu.memory_space<vmem>>, vector<512x128xf32>
    tpu.vector_store %arg14[%c0_175, %c0_176], %153 {strides = array<i32>} : memref<512x128xf32, #tpu.memory_space<vmem>>, vector<512x128xf32>,
    %c0_177 = arith.constant 0 : index
    %c0_178 = arith.constant 0 : index
    %155 = vector.load %arg14[%c0_177, %c0_178] : memref<512x128xf32, #tpu.memory_space<vmem>>, vector<512x128xf32>
    %156 = vector.broadcast %2 : vector<1x128xf32> to vector<512x128xf32>
    %157 = arith.addf %155, %156 : vector<512x128xf32>
    %158 = vector.shape_cast %157 : vector<512x128xf32> to vector<16x32x128xf32>
    %159 = vector.extract_strided_slice %158 {offsets = [0, 0, 0], sizes = [16, 16, 128], strides = [1, 1, 1]} : vector<16x32x128xf32> to vector<16x16x128xf32>
    %c0_179 = arith.constant 0 : index
    %c0_180 = arith.constant 0 : index
    %c0_181 = arith.constant 0 : index
    %c0_182 = arith.constant 0 : index
    %160 = vector.load %arg3[%c0_179, %c0_180, %c0_181, %c0_182] : memref<1x16x16x128xf32, #tpu.memory_space<vmem>>, vector<1x16x16x128xf32>
    %161 = vector.shape_cast %160 : vector<1x16x16x128xf32> to vector<16x16x128xf32>
    %162 = arith.addf %159, %161 : vector<16x16x128xf32>
    %c0_183 = arith.constant 0 : index
    %c0_184 = arith.constant 0 : index
    %c0_185 = arith.constant 0 : index
    %c0_186 = arith.constant 0 : index
    %163 = vector.load %arg7[%c0_183, %c0_184, %c0_185, %c0_186] : memref<1x16x16x128xf32, #tpu.memory_space<vmem>>, vector<1x16x16x128xf32>
    %164 = vector.shape_cast %163 : vector<1x16x16x128xf32> to vector<16x16x128xf32>
    %165 = vector.shape_cast %162 : vector<16x16x128xf32> to vector<1x16x16x128xf32>
    tpu.vector_store %arg7[%c0_183, %c0_184, %c0_185, %c0_186], %165 {strides = array<i32>} : memref<1x16x16x128xf32, #tpu.memory_space<vmem>>, vector<1x16x16x128xf32>,
    return
  }
  func.func @transform_0(%arg0: i32, %arg1: i32) -> (i32, i32, i32, i32, i32) {
    %c0_i32 = arith.constant 0 : i32
    %c0_i32_0 = arith.constant 0 : i32
    %c0_i32_1 = arith.constant 0 : i32
    %c0_i32_2 = arith.constant 0 : i32
    return %arg0, %arg1, %c0_i32, %c0_i32_0, %c0_i32_1 : i32, i32, i32, i32, i32
  }
  func.func @transform_1(%arg0: i32, %arg1: i32) -> (i32, i32, i32, i32) {
    %c0_i32 = arith.constant 0 : i32
    %c0_i32_0 = arith.constant 0 : i32
    %c0_i32_1 = arith.constant 0 : i32
    return %arg0, %arg1, %c0_i32, %c0_i32_0 : i32, i32, i32, i32
  }
  func.func @transform_2(%arg0: i32, %arg1: i32) -> (i32, i32, i32, i32) {
    %c0_i32 = arith.constant 0 : i32
    %c0_i32_0 = arith.constant 0 : i32
    %c0_i32_1 = arith.constant 0 : i32
    %c0_i32_2 = arith.constant 0 : i32
    %c0_i32_3 = arith.constant 0 : i32
    return %c0_i32, %c0_i32_0, %c0_i32_1, %c0_i32_2 : i32, i32, i32, i32
  }
  func.func @transform_3(%arg0: i32, %arg1: i32) -> (i32, i32, i32, i32) {
    %c0_i32 = arith.constant 0 : i32
    %c0_i32_0 = arith.constant 0 : i32
    %c0_i32_1 = arith.constant 0 : i32
    %c0_i32_2 = arith.constant 0 : i32
    %c0_i32_3 = arith.constant 0 : i32
    return %c0_i32, %c0_i32_0, %c0_i32_1, %c0_i32_2 : i32, i32, i32, i32
  }
  func.func @transform_4(%arg0: i32, %arg1: i32) -> (i32, i32) {
    %c0_i32 = arith.constant 0 : i32
    %c0_i32_0 = arith.constant 0 : i32
    %c0_i32_1 = arith.constant 0 : i32
    return %c0_i32, %c0_i32_0 : i32, i32
  }
  func.func @transform_5(%arg0: i32, %arg1: i32) -> (i32, i32, i32, i32) {
    %c0_i32 = arith.constant 0 : i32
    %c0_i32_0 = arith.constant 0 : i32
    %c0_i32_1 = arith.constant 0 : i32
    return %arg0, %arg1, %c0_i32, %c0_i32_0 : i32, i32, i32, i32
  }
}

</mosaic_0001>

<bundles_post_ra>
// kernel: ibasic_block.1
= control target key start
LH: loop header
LB: loop body
LE: loop exit
PB: predicated region body
PF: predicated region fallthrough
CT: control target
= control target key end

     0   :  { %s15984_s18 = smov 0   ;;  %s15986_s19 = smov 0   ;;  %s23669_s0 = inlined_call_operand.vmem [shape: bf16[2,1,20,32,128], index: 0, kind: input, shape index: {}]   ;;  %s23670_s1 = inlined_call_operand.vmem [shape: f32[2,16,16,128], index: 1, kind: input, shape index: {}]   ;;  %s23671_s2 = inlined_call_operand.vmem [shape: bf16[3,3,128,128], index: 2, kind: input, shape index: {}]   ;;  %s23672_s3 = inlined_call_operand.vmem [shape: bf16[3,3,128,128], index: 3, kind: input, shape index: {}]   ;;  %s23673_s4 = inlined_call_operand.vmem [shape: f32[8,128], index: 4, kind: input, shape index: {}]   ;;  %s23674_s5 = inlined_call_operand.vmem [shape: f32[2,16,16,128], index: 5, kind: output, shape index: {}]  }
   0x1   :  { %s15988_s20 = smov 0  }
   0x2 LB: > { %s27_s21 = sadd.s32 1, %s15946_s19  ;;  %p12204_p0 = scmp.ge.s32.totalorder %s15950_s20, 1  ;;  %s15950_s20 = sphi %s15988_s20, %s15_s20   ;;  %s15946_s19 = sphi %s15986_s19, %s26673_s19   ;;  %s15942_s18 = sphi %s15984_s18, %s26672_s18  }
   0x3   : > { %p29_p1 = scmp.ge.s32.totalorder %s27_s21, 2  ;;  %p225_p2 = scmp.lt.s32.totalorder %s15950_s20, 3 }
   0x5   : > { %s26675_s21 = smov (%p29_p1, %s27_s21), 0  ;;  %p226_p3 = pnand %p12204_p0, %p225_p2 }
   0x7   : > { %229 = sbr.rel (%p226_p3) target bundleno = 1867 (0x74b), region = 40 }
   0xe   : > { %v15667_v0 = vld [vmem:[%s23671_s2 + $0xc0] sm:$0xff]   ;;  %p272_p4 = scmp.lt.s32.totalorder %s15942_s18, 1  ;;  %v15669_v2 = vld [vmem:[%s23671_s2 + $0xc8] sm:$0xff]   ;;  %v15671_v4 = vld [vmem:[%s23671_s2 + $0xd0] sm:$0xff]  }
   0xf   : > { %v15668_v1 = vld [vmem:[%s23671_s2] sm:$0xff]   ;;  %14112 = vmatprep.subr.bf16.mxu0 %v15667_v0  ;;  %v15670_v3 = vld [vmem:[%s23671_s2 + $0x8] sm:$0xff]   ;;  %v15672_v5 = vld [vmem:[%s23671_s2 + $0x10] sm:$0xff]  }
  0x10   : > { %14200 = vmatprep.subr.bf16.mxu1 %v15668_v1  ;;  %14113 = vmatpush3.bf16.msra.mxu0 %v15667_v0  ;;  %s26677_s18 = smov (!%p272_p4, %s15942_s18), 1  ;;  %v15673_v6 = vld [vmem:[%s23671_s2 + $0xd8] sm:$0xff]   ;;  %v15675_v8 = vld [vmem:[%s23671_s2 + $0xe0] sm:$0xff]   ;;  %v15677_v10 = vld [vmem:[%s23671_s2 + $0xe8] sm:$0xff]  }
  0x11   : > { %14201 = vmatpush3.bf16.msra.mxu1 %v15668_v1  ;;  %14114 = vmatprep.subr.bf16.mxu0 %v15669_v2  ;;  %v15674_v7 = vld [vmem:[%s23671_s2 + $0x18] sm:$0xff]   ;;  %s15640_s13 = smul.u32 320, %s26677_s18  ;;  %v15676_v9 = vld [vmem:[%s23671_s2 + $0x20] sm:$0xff]   ;;  %v15678_v11 = vld [vmem:[%s23671_s2 + $0x28] sm:$0xff]   ;;  %s12867_s25 = sshll.u32 %s26677_s18, 8 }
  0x12   : > { %14202 = vmatprep.subr.bf16.mxu1 %v15670_v3  ;;  %v15679_v14 = vld [vmem:[%s23671_s2 + $0xf0] sm:$0xff]   ;;  %v15681_v16 = vld [vmem:[%s23671_s2 + $0xf8] sm:$0xff]   ;;  %v15687_v18 = vld [vmem:[%s23671_s2 + $0x180] sm:$0xff]   ;;  %s23459_s28 = scalar_lea.vmem %s23670_s1, %s12867_s25  ;;  %s23476_s7 = scalar_lea.vmem %s23674_s5, %s12867_s25 }
  0x13   : > { %s16038_s24 = scalar_lea.vmem %s23669_s0, %s15640_s13  ;;  %v15680_v15 = vld [vmem:[%s23671_s2 + $0x30] sm:$0xff]   ;;  %v15682_v17 = vld [vmem:[%s23671_s2 + $0x38] sm:$0xff]   ;;  %v15696_v23 = vld [vmem:[%s23671_s2 + $0x188] sm:$0xff]  }
  0x14   : > { %14115 = vmatpush3.bf16.msra.mxu0 %v15669_v2  ;;  %v15683_v12 = vld [vmem:[%s16038_s24 + $0x10] sm:$0xff]   ;;  %v15684_v13 = vld [vmem:[%s16038_s24] sm:$0xff]   ;;  %v15685_v19 = vld [vmem:[%s16038_s24 + $0x18] sm:$0xff]  }
  0x15   : > { %14203 = vmatpush3.bf16.msra.mxu1 %v15670_v3  ;;  %14116 = vmatprep.subr.bf16.mxu0 %v15671_v4  ;;  %v15686_v20 = vld [vmem:[%s16038_s24 + $0x8] sm:$0xff]   ;;  %v15688_v21 = vld [vmem:[%s16038_s24 + $0x20] sm:$0xff]   ;;  %v15689_v22 = vld [vmem:[%s16038_s24 + $0x10] sm:$0xff]  }
  0x16   : > { %14204 = vmatprep.subr.bf16.mxu1 %v15672_v5  ;;  %14128 = vmatprep.mubr.bf16.mxu0 %v15683_v12  ;;  %v15690_v24 = vld [vmem:[%s16038_s24 + $0x28] sm:$0xff]   ;;  %v15691_v25 = vld [vmem:[%s16038_s24 + $0x18] sm:$0xff]   ;;  %v15705_v26 = vld [vmem:[%s23671_s2 + $0x190] sm:$0xff]  }
  0x17   : > { %14216 = vmatprep.mubr.bf16.mxu1 %v15684_v13  ;;  %v15692_v27 = vld [vmem:[%s16038_s24 + $0x30] sm:$0xff]   ;;  %v15693_v28 = vld [vmem:[%s16038_s24 + $0x20] sm:$0xff]   ;;  %v15694_v29 = vld [vmem:[%s16038_s24 + $0x38] sm:$0xff]  }
  0x18   : > { %14117 = vmatpush3.bf16.msra.mxu0 %v15671_v4  ;;  %v15695_v30 = vld [vmem:[%s16038_s24 + $0x28] sm:$0xff]   ;;  %v15697_v31 = vld [vmem:[%s16038_s24 + $0x40] sm:$0xff]   ;;  %v15714_v32 = vld [vmem:[%s23671_s2 + $0x198] sm:$0xff]  }
  0x19   : > { %14205 = vmatpush3.bf16.msra.mxu1 %v15672_v5  ;;  %14118 = vmatprep.subr.bf16.mxu0 %v15673_v6  ;;  %v15698_v33 = vld [vmem:[%s16038_s24 + $0x30] sm:$0xff]   ;;  %v15699_v34 = vld [vmem:[%s16038_s24 + $0x48] sm:$0xff]   ;;  %v15700_v35 = vld [vmem:[%s16038_s24 + $0x38] sm:$0xff]  }
  0x1a   : > { %14206 = vmatprep.subr.bf16.mxu1 %v15674_v7  ;;  %v15701_v36 = vld [vmem:[%s16038_s24 + $0x50] sm:$0xff]   ;;  %v15702_v37 = vld [vmem:[%s16038_s24 + $0x40] sm:$0xff]   ;;  %v15703_v39 = vld [vmem:[%s16038_s24 + $0x58] sm:$0xff]  }
  0x1b   : > { %v15727_v38 = vld [vmem:[%s23671_s2 + $0x1a0] sm:$0xff]   ;;  %v15704_v40 = vld [vmem:[%s16038_s24 + $0x48] sm:$0xff]   ;;  %v15707_v42 = vld [vmem:[%s16038_s24 + $0x50] sm:$0xff]  }
  0x1c   : > { %14119 = vmatpush3.bf16.msra.mxu0 %v15673_v6  ;;  %v15706_v41 = vld [vmem:[%s16038_s24 + $0x60] sm:$0xff]   ;;  %v15708_v43 = vld [vmem:[%s16038_s24 + $0x68] sm:$0xff]   ;;  %v15709_v45 = vld [vmem:[%s16038_s24 + $0x58] sm:$0xff]  }
  0x1d   : > { %14207 = vmatpush3.bf16.msra.mxu1 %v15674_v7  ;;  %14120 = vmatprep.subr.bf16.mxu0 %v15675_v8  ;;  %v15736_v44 = vld [vmem:[%s23671_s2 + $0x1a8] sm:$0xff]   ;;  %v15710_v46 = vld [vmem:[%s16038_s24 + $0x70] sm:$0xff]   ;;  %v15711_v47 = vld [vmem:[%s16038_s24 + $0x60] sm:$0xff]  }
  0x1e   : > { %14208 = vmatprep.subr.bf16.mxu1 %v15676_v9  ;;  %v15712_v48 = vld [vmem:[%s16038_s24 + $0x78] sm:$0xff]   ;;  %v15713_v49 = vld [vmem:[%s16038_s24 + $0x68] sm:$0xff]   ;;  %v15745_v50 = vld [vmem:[%s23671_s2 + $0x1b0] sm:$0xff]  }
  0x1f   : > { %v15715_v51 = vld [vmem:[%s16038_s24 + $0x80] sm:$0xff]   ;;  %v15716_v52 = vld [vmem:[%s16038_s24 + $0x70] sm:$0xff]   ;;  %v15751_v54 = vld [vmem:[%s23671_s2 + $0x108] sm:$0xff]  }
  0x20   : > { %14121 = vmatpush3.bf16.msra.mxu0 %v15675_v8  ;;  %v15750_v53 = vld [vmem:[%s23671_s2 + $0x100] sm:$0xff]   ;;  %v15717_v55 = vld [vmem:[%s16038_s24 + $0x88] sm:$0xff]   ;;  %v15718_v56 = vld [vmem:[%s16038_s24 + $0x78] sm:$0xff]  }
  0x21   : > { %14209 = vmatpush3.bf16.msra.mxu1 %v15676_v9  ;;  %14122 = vmatprep.subr.bf16.mxu0 %v15677_v10  ;;  %v15719_v57 = vld [vmem:[%s16038_s24 + $0x90] sm:$0xff]   ;;  %v15720_v58 = vld [vmem:[%s16038_s24 + $0x80] sm:$0xff]   ;;  %v15757_v60 = vld [vmem:[%s23671_s2 + $0x118] sm:$0xff]  }
  0x22   : > { %14210 = vmatprep.subr.bf16.mxu1 %v15678_v11  ;;  %v15756_v59 = vld [vmem:[%s23671_s2 + $0x110] sm:$0xff]   ;;  %v15758_v61 = vld [vmem:[%s23671_s2 + $0x1b8] sm:$0xff]   ;;  %v15722_v63 = vld [vmem:[%s16038_s24 + $0x88] sm:$0xff]  }
  0x23   : > { %v15721_v62 = vld [vmem:[%s16038_s24 + $0x98] sm:$0xff]   ;;  %v15723_v0 = vld [vmem:[%s16038_s24 + $0xa0] sm:$0xff]   ;;  %v15724_v1 = vld [vmem:[%s16038_s24 + $0x90] sm:$0xff]  }
  0x24   : > { %14123 = vmatpush3.bf16.msra.mxu0 %v15677_v10  ;;  %v15763_v2 = vld [vmem:[%s23671_s2 + $0x120] sm:$0xff]   ;;  %v15764_v3 = vld [vmem:[%s23671_s2 + $0x128] sm:$0xff]   ;;  %v15726_v5 = vld [vmem:[%s16038_s24 + $0x98] sm:$0xff]  }
  0x25   : > { %14211 = vmatpush3.bf16.msra.mxu1 %v15678_v11  ;;  %14124 = vmatprep.subr.bf16.mxu0 %v15679_v14  ;;  %v15725_v4 = vld [vmem:[%s16038_s24 + $0xa8] sm:$0xff]   ;;  %v15728_v6 = vld [vmem:[%s16038_s24 + $0xb0] sm:$0xff]   ;;  %v15729_v7 = vld [vmem:[%s16038_s24 + $0xa0] sm:$0xff]  }
  0x26   : > { %14212 = vmatprep.subr.bf16.mxu1 %v15680_v15  ;;  %v15769_v8 = vld [vmem:[%s23671_s2 + $0x130] sm:$0xff]   ;;  %v15770_v9 = vld [vmem:[%s23671_s2 + $0x138] sm:$0xff]   ;;  %v16151_v10 = vld [vmem:[%s23671_s2 + $0x40] sm:$0xff]  }
  0x27   : > { %v15730_v11 = vld [vmem:[%s16038_s24 + $0xb8] sm:$0xff]   ;;  %v15731_v12 = vld [vmem:[%s16038_s24 + $0xa8] sm:$0xff]   ;;  %v15732_v13 = vld [vmem:[%s16038_s24 + $0xc0] sm:$0xff]  }
  0x28   : > { %14125 = vmatpush3.bf16.msra.mxu0 %v15679_v14  ;;  %v15733_v14 = vld [vmem:[%s16038_s24 + $0xb0] sm:$0xff]  }
  0x29   : > { %14213 = vmatpush3.bf16.msra.mxu1 %v15680_v15  ;;  %14126 = vmatprep.subr.bf16.mxu0 %v15681_v16  ;;  %v15734_v15 = vld [vmem:[%s16038_s24 + $0xc8] sm:$0xff]  }
  0x2a   : > { %14214 = vmatprep.subr.bf16.mxu1 %v15682_v17 }
  0x2c   : > { %14127 = vmatpush3.bf16.msra.mxu0 %v15681_v16  ;;  %v15735_v16 = vld [vmem:[%s16038_s24 + $0xb8] sm:$0xff]  }
  0x2d   : > { %14215 = vmatpush3.bf16.msra.mxu1 %v15682_v17  ;;  %14288 = vmatprep.subr.bf16.mxu0 %v15687_v18  ;;  %v15737_v17 = vld [vmem:[%s16038_s24 + $0xd0] sm:$0xff]  }
  0x2e   : > { %14376 = vmatprep.subr.bf16.mxu1 %v15750_v53 }
  0x2f   : > { %14129 = vmatmul.mubr.bf16.vlgmr.msra.gmra.mrb[0].mxu0 %v15685_v19  ;;  %v15739_v19 = vld [vmem:[%s16038_s24 + $0xd8] sm:$0xff]  }
  0x30   : > { %14217 = vmatmul.mubr.bf16.vlgmr.msra.gmra.mrb[0].mxu1 %v15686_v20  ;;  %14289 = vmatpush3.bf16.msra.mxu0 %v15687_v18  ;;  %v15738_v18 = vld [vmem:[%s16038_s24 + $0xc0] sm:$0xff]   ;;  %v15740_v20 = vld [vmem:[%s16038_s24 + $0xc8] sm:$0xff]  }
  0x31   : > { %14132 = vmatprep.mubr.bf16.mxu0 %v15688_v21  ;;  %14220 = vmatprep.mubr.bf16.mxu1 %v15689_v22  ;;  %v15741_v21 = vld [vmem:[%s16038_s24 + $0xe0] sm:$0xff]   ;;  %v15742_v22 = vld [vmem:[%s16038_s24 + $0xd0] sm:$0xff]  }
  0x32   : > { %14290 = vmatprep.subr.bf16.mxu0 %v15696_v23  ;;  %14377 = vmatpush3.bf16.msra.mxu1 %v15750_v53 }
  0x33   : > { %14378 = vmatprep.subr.bf16.mxu1 %v15751_v54 }
  0x34   : > { %14291 = vmatpush3.bf16.msra.mxu0 %v15696_v23  ;;  %v15743_v23 = vld [vmem:[%s16038_s24 + $0xe8] sm:$0xff]  }
  0x35   : > { %14292 = vmatprep.subr.bf16.mxu0 %v15705_v26 }
  0x36   : > { %14379 = vmatpush3.bf16.msra.mxu1 %v15751_v54 }
  0x37   : > { %14133 = vmatmul.mubr.bf16.gmra.mrb[4].mxu0 %v15690_v24  ;;  %14380 = vmatprep.subr.bf16.mxu1 %v15756_v59  ;;  %v15744_v24 = vld [vmem:[%s16038_s24 + $0xd8] sm:$0xff]  }
  0x38   : > { %14221 = vmatmul.mubr.bf16.gmra.mrb[4].mxu1 %v15691_v25  ;;  %14136 = vmatprep.mubr.bf16.mxu0 %v15692_v27  ;;  %v15746_v25 = vld [vmem:[%s16038_s24 + $0xf0] sm:$0xff]   ;;  %v15748_v27 = vld [vmem:[%s16038_s24 + $0xf8] sm:$0xff]  }
  0x39   : > { %14224 = vmatprep.mubr.bf16.mxu1 %v15693_v28  ;;  %14293 = vmatpush3.bf16.msra.mxu0 %v15705_v26  ;;  %v15747_v26 = vld [vmem:[%s16038_s24 + $0xe0] sm:$0xff]   ;;  %v15749_v28 = vld [vmem:[%s16038_s24 + $0xe8] sm:$0xff]  }
  0x3a   : > { %14294 = vmatprep.subr.bf16.mxu0 %v15714_v32  ;;  %14381 = vmatpush3.bf16.msra.mxu1 %v15756_v59  ;;  %v16224_v59 = vld [vmem:[%s16038_s24 + $0x38] sm:$0xff]  }
  0x3b   : > { %14382 = vmatprep.subr.bf16.mxu1 %v15757_v60  ;;  %24275 = vst [vmem:[#allocation15_spill] sm:$0xff] %v16224_v59 }
  0x3d   : > { %14295 = vmatpush3.bf16.msra.mxu0 %v15714_v32  ;;  %v15755_v32 = vld [vmem:[%s16038_s24 + $0xf8] sm:$0xff]  }
  0x3e   : > { %14296 = vmatprep.subr.bf16.mxu0 %v15727_v38  ;;  %14383 = vmatpush3.bf16.msra.mxu1 %v15757_v60  ;;  %v16227_v60 = vld [vmem:[%s16038_s24 + $0x40] sm:$0xff]  }
  0x3f   : > { %14137 = vmatmul.mubr.bf16.gmra.mrb[8].mxu0 %v15694_v29  ;;  %14384 = vmatprep.subr.bf16.mxu1 %v15763_v2  ;;  %v15752_v29 = vld [vmem:[%s16038_s24 + $0x100] sm:$0xff]   ;;  %24276 = vst [vmem:[#allocation16_spill] sm:$0xff] %v16227_v60 }
  0x40   : > { %14225 = vmatmul.mubr.bf16.gmra.mrb[8].mxu1 %v15695_v30  ;;  %14140 = vmatprep.mubr.bf16.mxu0 %v15697_v31  ;;  %v15753_v30 = vld [vmem:[%s16038_s24 + $0xf0] sm:$0xff]   ;;  %v15754_v31 = vld [vmem:[%s16038_s24 + $0x108] sm:$0xff]  }
  0x41   : > { %14228 = vmatprep.mubr.bf16.mxu1 %v15698_v33  ;;  %14297 = vmatpush3.bf16.msra.mxu0 %v15727_v38  ;;  %v15759_v33 = vld [vmem:[%s16038_s24 + $0x110] sm:$0xff]   ;;  %v15761_v38 = vld [vmem:[%s16038_s24 + $0x118] sm:$0xff]  }
  0x42   : > { %14298 = vmatprep.subr.bf16.mxu0 %v15736_v44  ;;  %14385 = vmatpush3.bf16.msra.mxu1 %v15763_v2 }
  0x43   : > { %14386 = vmatprep.subr.bf16.mxu1 %v15764_v3 }
  0x45   : > { %14299 = vmatpush3.bf16.msra.mxu0 %v15736_v44  ;;  %v15765_v44 = vld [vmem:[%s16038_s24 + $0x120] sm:$0xff]  }
  0x46   : > { %14300 = vmatprep.subr.bf16.mxu0 %v15745_v50  ;;  %14387 = vmatpush3.bf16.msra.mxu1 %v15764_v3 }
  0x47   : > { %14141 = vmatmul.mubr.bf16.gmra.mrb[12].mxu0 %v15699_v34  ;;  %14388 = vmatprep.subr.bf16.mxu1 %v15769_v8  ;;  %v15760_v34 = vld [vmem:[%s16038_s24 + $0x100] sm:$0xff]  }
  0x48   : > { %14229 = vmatmul.mubr.bf16.gmra.mrb[12].mxu1 %v15700_v35  ;;  %14144 = vmatprep.mubr.bf16.mxu0 %v15701_v36  ;;  %v16179_v35 = vld [vmem:[%s16038_s24 + $0x10] sm:$0xff]   ;;  %v16182_v36 = vld [vmem:[%s16038_s24 + $0x18] sm:$0xff]  }
  0x49   : > { %14232 = vmatprep.mubr.bf16.mxu1 %v15702_v37  ;;  %14301 = vmatpush3.bf16.msra.mxu0 %v15745_v50  ;;  %24269 = vst [vmem:[#allocation9_spill] sm:$0xff] %v16179_v35  ;;  %24270 = vst [vmem:[#allocation10_spill] sm:$0xff] %v16182_v36  ;;  %v547_v37 = vlaneseq }
  0x4a   : > { %14302 = vmatprep.subr.bf16.mxu0 %v15758_v61  ;;  %14389 = vmatpush3.bf16.msra.mxu1 %v15769_v8  ;;  %v23688_v8 = vunpack.c.l.bf16 %v16224_v59 }
  0x4b   : > { %14390 = vmatprep.subr.bf16.mxu1 %v15770_v9 }
  0x4d   : > { %14303 = vmatpush3.bf16.msra.mxu0 %v15758_v61 }
  0x4e   : > { %14464 = vmatprep.subr.bf16.mxu0 %v16151_v10  ;;  %14391 = vmatpush3.bf16.msra.mxu1 %v15770_v9  ;;  %v23687_v9 = vunpack.c.h.bf16 %v16224_v59 }
  0x4f   : > { %14145 = vmatmul.mubr.bf16.gmra.mrb[16].mxu0 %v15703_v39  ;;  %v23707_v39 = vunpack.c.l.bf16 %v16179_v35 }
  0x50   : > { %14233 = vmatmul.mubr.bf16.gmra.mrb[16].mxu1 %v15704_v40  ;;  %14148 = vmatprep.mubr.bf16.mxu0 %v15706_v41  ;;  %v23704_v40 = vunpack.c.h.bf16 %v16179_v35  ;;  %v23700_v41 = vunpack.c.l.bf16 %v16182_v36  ;;  %v15803_v35 = vld [vmem:[%s16038_s24 + $0xf0] sm:$0xff]  }
  0x51   : > { %14236 = vmatprep.mubr.bf16.mxu1 %v15707_v42  ;;  %v16189_v42 = vld [vmem:[%s16038_s24 + $0x20] sm:$0xff]   ;;  %v16203_v50 = vrot.slane %v23707_v39, 1 }
  0x52   : > { %24271 = vst [vmem:[#allocation11_spill] sm:$0xff] %v16189_v42  ;;  %v23694_v53 = vunpack.c.h.bf16 %v16189_v42 }
  0x57   : > { %14149 = vmatmul.mubr.bf16.gmra.mrb[20].mxu0 %v15708_v43  ;;  %v15762_v43 = vld [vmem:[%s16038_s24 + $0x108] sm:$0xff]  }
  0x58   : > { %14237 = vmatmul.mubr.bf16.gmra.mrb[20].mxu1 %v15709_v45  ;;  %14152 = vmatprep.mubr.bf16.mxu0 %v15710_v46  ;;  %v16193_v45 = vshrl.u32 %v547_v37, 7  ;;  %v23698_v46 = vunpack.c.h.bf16 %v16182_v36  ;;  %v15802_v36 = vld [vmem:[%s16038_s24 + $0xe8] sm:$0xff]  }
  0x59   : > { %14240 = vmatprep.mubr.bf16.mxu1 %v15711_v47  ;;  %v16197_v47 = vld [vmem:[%s16038_s24 + $0x28] sm:$0xff]  }
  0x5a   : > { %24272 = vst [vmem:[#allocation12_spill] sm:$0xff] %v16193_v45  ;;  %24273 = vst [vmem:[#allocation13_spill] sm:$0xff] %v16197_v47  ;;  %vm23879_vm0 = vcmp.lt.s32.totalorder %v16193_v45, 7  ;;  %v23693_v54 = vunpack.c.l.bf16 %v16197_v47  ;;  %vm23878_vm1 = vcmp.lt.s32.totalorder %v16193_v45, 6 }
  0x5f   : > { %14153 = vmatmul.mubr.bf16.gmra.mrb[24].mxu0 %v15712_v48  ;;  %v23697_v48 = vunpack.c.l.bf16 %v16189_v42 }
  0x60   : > { %14241 = vmatmul.mubr.bf16.gmra.mrb[24].mxu1 %v15713_v49  ;;  %14156 = vmatprep.mubr.bf16.mxu0 %v15715_v51  ;;  %v15766_v49 = vld [vmem:[%s16038_s24 + $0x110] sm:$0xff]   ;;  %v472_v51 = vrot.slane %v23704_v40, 1  ;;  %v15813_v40 = vld [vmem:[%s23671_s2 + $0x1d8] sm:$0xff]  }
  0x61   : > { %14244 = vmatprep.mubr.bf16.mxu1 %v15716_v52  ;;  %v473_v52 = vrot.slane %v23700_v41, 1  ;;  %v475_v61 = vrot.slane %v23697_v48, 1  ;;  %v15788_v41 = vld [vmem:[%s23671_s2 + $0x58] sm:$0xff]  }
  0x67   : > { %14157 = vmatmul.mubr.bf16.gmra.mrb[28].mxu0 %v15717_v55  ;;  %v16213_v55 = vld [vmem:[%s16038_s24 + $0x30] sm:$0xff]  }
  0x68   : > { %14245 = vmatmul.mubr.bf16.gmra.mrb[28].mxu1 %v15718_v56  ;;  %14160 = vmatprep.mubr.bf16.mxu0 %v15719_v57  ;;  %24274 = vst [vmem:[#allocation14_spill] sm:$0xff] %v16213_v55  ;;  %v16218_v56 = vld [vmem:[%s23671_s2 + $0x1c0] sm:$0xff]   ;;  %v474_v57 = vrot.slane %v23698_v46, 1  ;;  %v23691_v2 = vunpack.c.l.bf16 %v16213_v55  ;;  %v23690_v3 = vunpack.c.h.bf16 %v16213_v55 }
  0x69   : > { %14248 = vmatprep.mubr.bf16.mxu1 %v15720_v58  ;;  %v23692_v58 = vunpack.c.h.bf16 %v16197_v47  ;;  %14552 = vmatprep.subr.bf16.mxu1 %v16218_v56 }
  0x6f   : > { %14161 = vmatmul.mubr.bf16.gmra.mrb[32].mxu0 %v15721_v62  ;;  %v16232_v62 = vld [vmem:[%s16038_s24 + $0x48] sm:$0xff]  }
  0x70   : > { %14249 = vmatmul.mubr.bf16.gmra.mrb[32].mxu1 %v15722_v63  ;;  %14164 = vmatprep.mubr.bf16.mxu0 %v15723_v0  ;;  %24277 = vst [vmem:[#allocation17_spill] sm:$0xff] %v16232_v62  ;;  %v15767_v63 = vld [vmem:[%s16038_s24 + $0x128] sm:$0xff]   ;;  %v623_v0 = vsel %vm23879_vm0, %v472_v51, %v473_v52 }
  0x71   : > { %14252 = vmatprep.mubr.bf16.mxu1 %v15724_v1  ;;  %v624_v1 = vsel %vm23879_vm0, %v16203_v50, %v472_v51 }
  0x77   : > { %14165 = vmatmul.mubr.bf16.gmra.mrb[36].mxu0 %v15725_v4  ;;  %v15768_v4 = vld [vmem:[%s16038_s24 + $0x118] sm:$0xff]  }
  0x78   : > { %14253 = vmatmul.mubr.bf16.gmra.mrb[36].mxu1 %v15726_v5  ;;  %14168 = vmatprep.mubr.bf16.mxu0 %v15728_v6  ;;  %v15771_v5 = vld [vmem:[%s16038_s24 + $0x20] sm:$0xff]   ;;  %v476_v6 = vrot.slane %v23694_v53, 1 }
  0x79   : > { %14256 = vmatprep.mubr.bf16.mxu1 %v15729_v7  ;;  %v16249_v7 = vrot.slane %v23693_v54, 1  ;;  %v16427_v54 = vld [vmem:[%s16038_s24 + $0xa0] sm:$0xff]  }
  0x7a   : > { %24288 = vst [vmem:[#allocation28_spill] sm:$0xff] %v16427_v54 }
  0x7f   : > { %14169 = vmatmul.mubr.bf16.gmra.mrb[40].mxu0 %v15730_v11  ;;  %v16255_v11 = vrot.slane %v23692_v58, 1  ;;  %v16424_v58 = vld [vmem:[%s16038_s24 + $0x98] sm:$0xff]  }
  0x80   : > { %14257 = vmatmul.mubr.bf16.gmra.mrb[40].mxu1 %v15731_v12  ;;  %14172 = vmatprep.mubr.bf16.mxu0 %v15732_v13  ;;  %v23686_v12 = vunpack.c.l.bf16 %v16227_v60  ;;  %v23683_v13 = vunpack.c.h.bf16 %v16227_v60  ;;  %24287 = vst [vmem:[#allocation27_spill] sm:$0xff] %v16424_v58 }
  0x81   : > { %14260 = vmatprep.mubr.bf16.mxu1 %v15733_v14  ;;  %v16260_v14 = vld [vmem:[%s16038_s24 + $0x50] sm:$0xff]  }
  0x82   : > { %24278 = vst [vmem:[#allocation18_spill] sm:$0xff] %v16260_v14 }
  0x87   : > { %14173 = vmatmul.mubr.bf16.gmra.mrb[44].mxu0 %v15734_v15  ;;  %v23682_v15 = vunpack.c.l.bf16 %v16232_v62 }
  0x88   : > { %14261 = vmatmul.mubr.bf16.gmra.mrb[44].mxu1 %v15735_v16  ;;  %14176 = vmatprep.mubr.bf16.mxu0 %v15737_v17  ;;  %v16263_v16 = vpack.c.bf16 %v623_v0, %v624_v1  ;;  %v479_v17 = vrot.slane %v23691_v2, 1  ;;  %v16337_v1 = vld [vmem:[%s16038_s24 + $0x78] sm:$0xff]  }
  0x89   : > { %14264 = vmatprep.mubr.bf16.mxu1 %v15738_v18  ;;  %v16269_v18 = vrot.slane %v23690_v3, 1  ;;  %24283 = vst [vmem:[#allocation23_spill] sm:$0xff] %v16337_v1  ;;  %v15776_v3 = vld [vmem:[%s16038_s24 + $0x40] sm:$0xff]  }
  0x8f   : > { %14177 = vmatmul.mubr.bf16.gmra.mrb[48].mxu0 %v15739_v19  ;;  %v16273_v19 = vrot.slane %v23688_v8, 1 }
  0x90   : > { %14265 = vmatmul.mubr.bf16.gmra.mrb[48].mxu1 %v15740_v20  ;;  %14180 = vmatprep.mubr.bf16.mxu0 %v15741_v21  ;;  %v16277_v20 = vrot.slane %v23687_v9, 1  ;;  %v23677_v21 = vunpack.c.h.bf16 %v16232_v62  ;;  %v15775_v9 = vld [vmem:[%s16038_s24 + $0x38] sm:$0xff]   ;;  %v15801_v62 = vld [vmem:[%s16038_s24 + $0xe0] sm:$0xff]  }
  0x91   : > { %14268 = vmatprep.mubr.bf16.mxu1 %v15742_v22  ;;  %v23675_v22 = vunpack.c.l.bf16 %v16260_v14 }
  0x97   : > { %14181 = vmatmul.mubr.bf16.gmra.mrb[52].mxu0 %v15743_v23  ;;  %v16282_v23 = vld [vmem:[%s16038_s24 + $0x58] sm:$0xff]  }
  0x98   : > { %14269 = vmatmul.mubr.bf16.gmra.mrb[52].mxu1 %v15744_v24  ;;  %14184 = vmatprep.mubr.bf16.mxu0 %v15746_v25  ;;  %24279 = vst [vmem:[#allocation19_spill] sm:$0xff] %v16282_v23  ;;  %v16286_v24 = vrot.slane %v23686_v12, 1  ;;  %v16290_v25 = vrot.slane %v23683_v13, 1  ;;  %v23679_v37 = vunpack.c.l.bf16 %v16282_v23  ;;  %v16381_v13 = vld [vmem:[%s16038_s24 + $0x88] sm:$0xff]   ;;  %v16397_v12 = vld [vmem:[%s16038_s24 + $0x90] sm:$0xff]  }
  0x99   : > { %14272 = vmatprep.mubr.bf16.mxu1 %v15747_v26  ;;  %v23676_v26 = vunpack.c.h.bf16 %v16260_v14  ;;  %24285 = vst [vmem:[#allocation25_spill] sm:$0xff] %v16381_v13  ;;  %24286 = vst [vmem:[#allocation26_spill] sm:$0xff] %v16397_v12  ;;  %v23706_v53 = vunpack.c.h.bf16 %v16381_v13  ;;  %v15799_v14 = vld [vmem:[%s16038_s24 + $0xd8] sm:$0xff]  }
  0x9f   : > { %14185 = vmatmul.mubr.bf16.gmra.mrb[56].mxu0 %v15748_v27  ;;  %v16294_v27 = vld [vmem:[%s16038_s24 + $0x60] sm:$0xff]  }
  0xa0   : > { %14273 = vmatmul.mubr.bf16.gmra.mrb[56].mxu1 %v15749_v28  ;;  %14188 = vmatprep.mubr.bf16.mxu0 %v15752_v29  ;;  %24280 = vst [vmem:[#allocation20_spill] sm:$0xff] %v16294_v27  ;;  %v16297_v28 = vld [vmem:[%s16038_s24 + $0x68] sm:$0xff]   ;;  %v621_v29 = vsel %vm23879_vm0, %v474_v57, %v475_v61  ;;  %v23680_v51 = vunpack.c.l.bf16 %v16294_v27 }
  0xa1   : > { %14276 = vmatprep.mubr.bf16.mxu1 %v15753_v30  ;;  %24281 = vst [vmem:[#allocation21_spill] sm:$0xff] %v16297_v28  ;;  %v622_v30 = vsel %vm23879_vm0, %v473_v52, %v474_v57  ;;  %v23681_v52 = vunpack.c.h.bf16 %v16294_v27  ;;  %v15774_v57 = vld [vmem:[%s16038_s24 + $0x30] sm:$0xff]   ;;  %v23685_v0 = vunpack.c.h.bf16 %v16297_v28 }
  0xa7   : > { %14189 = vmatmul.mubr.bf16.gmra.mrb[60].mxu0 %v15754_v31  ;;  %v16305_v31 = vrot.slane %v23682_v15, 1  ;;  %v23699_v15 = vunpack.c.h.bf16 %v16337_v1 }
  0xa8   : > { %14277 = vmatmul.mubr.bf16.gmra.mrb[60].mxu1 %v15755_v32  ;;  %14192 = vmatprep.mubr.bf16.mxu0 %v15759_v33  ;;  %v16308_v32 = vld [vmem:[%s16038_s24 + $0x70] sm:$0xff]   ;;  %v619_v33 = vsel %vm23879_vm0, %v476_v6, %v16249_v7 }
  0xa9   : > { %14280 = vmatprep.mubr.bf16.mxu1 %v15760_v34  ;;  %24282 = vst [vmem:[#allocation22_spill] sm:$0xff] %v16308_v32  ;;  %v620_v34 = vsel %vm23879_vm0, %v475_v61, %v476_v6  ;;  %v16332_v61 = vrot.slane %v23676_v26, 1  ;;  %v611_v39 = vsel %vm23879_vm0, %v16290_v25, %v16305_v31 }
  0xaa   : > { %v16342_v6 = vpack.c.bf16 %v619_v33, %v620_v34  ;;  %v23695_v33 = vunpack.c.h.bf16 %v16308_v32  ;;  %v23696_v34 = vunpack.c.l.bf16 %v16337_v1 }
  0xac   : > { %v16416_v2 = vrot.slane %v23695_v33, 1  ;;  %v23705_v33 = vunpack.c.l.bf16 %v16397_v12 }
  0xaf   : > { %14193 = vmatmul.mubr.bf16.gmra.mrb[64].mxu0 %v15761_v38  ;;  %v23678_v38 = vunpack.c.h.bf16 %v16282_v23 }
  0xb0   : > { %14281 = vmatmul.mubr.bf16.gmra.mrb[64].mxu1 %v15762_v43  ;;  %14196 = vmatprep.mubr.bf16.mxu0 %v15765_v44  ;;  %v15772_v43 = vld [vmem:[%s16038_s24 + $0x28] sm:$0xff]   ;;  %v16321_v44 = vrot.slane %v23677_v21, 1 }
  0xb1   : > { %14284 = vmatprep.mubr.bf16.mxu1 %v15766_v49  ;;  %v16325_v49 = vrot.slane %v23675_v22, 1  ;;  %v16346_v22 = vrot.slane %v23679_v37, 1  ;;  %v16350_v26 = vrot.slane %v23678_v38, 1  ;;  %v15778_v21 = vld [vmem:[%s23671_s2 + $0x48] sm:$0xff]   ;;  %v16366_v38 = vld [vmem:[%s16038_s24 + $0x80] sm:$0xff]   ;;  %v15783_v37 = vld [vmem:[%s23671_s2 + $0x50] sm:$0xff]  }
  0xb2   : > { %24284 = vst [vmem:[#allocation24_spill] sm:$0xff] %v16366_v38  ;;  %v23703_v8 = vunpack.c.l.bf16 %v16366_v38 }
  0xb7   : > { %14197 = vmatmul.mubr.bf16.gmra.mrb[68].mxu0 %v15767_v63  ;;  %v23684_v63 = vunpack.c.l.bf16 %v16297_v28 }
  0xb8   : > { %14285 = vmatmul.mubr.bf16.gmra.mrb[68].mxu1 %v15768_v4  ;;  %14304 = vmatprep.mubr.bf16.mxu0 %v15771_v5  ;;  %v16339_v4 = vpack.c.bf16 %v621_v29, %v622_v30  ;;  %v23689_v5 = vunpack.c.l.bf16 %v16308_v32  ;;  %v16357_v29 = vrot.slane %v23680_v51, 1  ;;  %v16361_v30 = vrot.slane %v23681_v52, 1 }
  0xb9   : > { %14392 = vmatprep.mubr.bf16.mxu1 %v16263_v16  ;;  %v16373_v51 = vrot.slane %v23684_v63, 1  ;;  %v16377_v52 = vrot.slane %v23685_v0, 1  ;;  %v618_v63 = vsel %vm23879_vm0, %v16249_v7, %v16255_v11  ;;  %v616_v7 = vsel %vm23879_vm0, %v479_v17, %v16269_v18 }
  0xba   : > { %v16394_v0 = vrot.slane %v23689_v5, 1  ;;  %v23701_v5 = vunpack.c.h.bf16 %v16366_v38  ;;  %v15798_v38 = vld [vmem:[%s16038_s24 + $0xd0] sm:$0xff]  }
  0xbf   : > { %14305 = vmatmul.mubr.bf16.vlgmr.msra.gmra.mrb[72].mxu0 %v15772_v43  ;;  %v15809_v43 = vld [vmem:[%s23671_s2 + $0x1c8] sm:$0xff]  }
  0xc0   : > { %14393 = vmatmul.mubr.bf16.vlgmr.msra.gmra.mrb[72].mxu1 %v16339_v4  ;;  %14465 = vmatpush3.bf16.msra.mxu0 %v16151_v10  ;;  %v617_v10 = vsel %vm23879_vm0, %v16255_v11, %v479_v17  ;;  %v16420_v11 = vrot.slane %v23696_v34, 1  ;;  %v23702_v17 = vunpack.c.l.bf16 %v16381_v13  ;;  %v15812_v34 = vld [vmem:[%s23671_s2 + $0x1d0] sm:$0xff]   ;;  %v15797_v13 = vld [vmem:[%s16038_s24 + $0xc8] sm:$0xff]  }
  0xc1   : > { %14308 = vmatprep.mubr.bf16.mxu0 %v15774_v57  ;;  %14396 = vmatprep.mubr.bf16.mxu1 %v16342_v6  ;;  %v615_v57 = vsel %vm23879_vm0, %v16269_v18, %v16273_v19  ;;  %v16432_v18 = vrot.slane %v23699_v15, 1  ;;  %v16439_v48 = vpack.c.bf16 %v617_v10, %v618_v63  ;;  %v16449_v15 = vrot.slane %v23701_v5, 1 }
  0xc2   : > { %14466 = vmatprep.subr.bf16.mxu0 %v15778_v21  ;;  %14553 = vmatpush3.bf16.msra.mxu1 %v16218_v56  ;;  %v16441_v46 = vpack.c.bf16 %v615_v57, %v616_v7  ;;  %v16445_v56 = vrot.slane %v23703_v8, 1  ;;  %v16456_v63 = vrot.slane %v23702_v17, 1  ;;  %v23709_v10 = vunpack.c.l.bf16 %v16424_v58  ;;  %v16471_v8 = vld [vmem:[%s16038_s24 + $0xa8] sm:$0xff]  }
  0xc3   : > { %14554 = vmatprep.subr.bf16.mxu1 %v15809_v43  ;;  %v23712_v7 = vunpack.c.h.bf16 %v16424_v58  ;;  %v16463_v57 = vrot.slane %v23706_v53, 1  ;;  %v16467_v5 = vrot.slane %v23705_v33, 1  ;;  %24289 = vst [vmem:[#allocation29_spill] sm:$0xff] %v16471_v8  ;;  %v614_v33 = vsel %vm23879_vm0, %v16273_v19, %v16277_v20 }
  0xc4   : > { %14467 = vmatpush3.bf16.msra.mxu0 %v15778_v21  ;;  %v23708_v21 = vunpack.c.h.bf16 %v16397_v12  ;;  %v612_v53 = vsel %vm23879_vm0, %v16286_v24, %v16290_v25  ;;  %v16502_v19 = vrot.slane %v23709_v10, 1  ;;  %v24290_v25 = vunpack.c.l.bf16 %v16427_v54  ;;  %v15817_v10 = vld [vmem:[%s23671_s2 + $0x1e0] sm:$0xff]  }
  0xc5   : > { %14468 = vmatprep.subr.bf16.mxu0 %v15783_v37  ;;  %v16525_v58 = vpack.c.bf16 %v611_v39, %v612_v53  ;;  %v609_v53 = vsel %vm23879_vm0, %v16321_v44, %v16325_v49 }
  0xc6   : > { %14555 = vmatpush3.bf16.msra.mxu1 %v15809_v43  ;;  %v613_v43 = vsel %vm23879_vm0, %v16277_v20, %v16286_v24  ;;  %v16498_v17 = vrot.slane %v23708_v21, 1  ;;  %v16506_v20 = vrot.slane %v23712_v7, 1  ;;  %v15795_v24 = vld [vmem:[%s23671_s2 + $0x60] sm:$0xff]   ;;  %v23716_v21 = vunpack.c.h.bf16 %v16427_v54  ;;  %v15822_v54 = vld [vmem:[%s23671_s2 + $0x1f8] sm:$0xff]  }
  0xc7   : > { %14309 = vmatmul.mubr.bf16.gmra.mrb[76].mxu0 %v15775_v9  ;;  %14556 = vmatprep.subr.bf16.mxu1 %v15812_v34  ;;  %v15777_v9 = vld [vmem:[%s16038_s24 + $0x48] sm:$0xff]   ;;  %v16519_v12 = vpack.c.bf16 %v613_v43, %v614_v33  ;;  %v23715_v7 = vunpack.c.l.bf16 %v16471_v8  ;;  %v15821_v43 = vld [vmem:[%s23671_s2 + $0x1f0] sm:$0xff]  }
  0xc8   : > { %14397 = vmatmul.mubr.bf16.gmra.mrb[76].mxu1 %v16439_v48  ;;  %14312 = vmatprep.mubr.bf16.mxu0 %v15776_v3  ;;  %v15779_v3 = vld [vmem:[%s16038_s24 + $0x50] sm:$0xff]   ;;  %v15818_v33 = vld [vmem:[%s23671_s2 + $0x1e8] sm:$0xff]  }
  0xc9   : > { %14400 = vmatprep.mubr.bf16.mxu1 %v16441_v46  ;;  %14469 = vmatpush3.bf16.msra.mxu0 %v15783_v37  ;;  %v16513_v37 = vrot.slane %v24290_v25, 1  ;;  %v16529_v25 = vrot.slane %v23716_v21, 1  ;;  %v16537_v39 = vrot.slane %v23715_v7, 1  ;;  %v607_v7 = vsel %vm23879_vm0, %v16332_v61, %v16346_v22 }
  0xca   : > { %14470 = vmatprep.subr.bf16.mxu0 %v15788_v41  ;;  %14557 = vmatpush3.bf16.msra.mxu1 %v15812_v34  ;;  %v15800_v34 = vld [vmem:[%s23671_s2 + $0x68] sm:$0xff]   ;;  %v608_v21 = vsel %vm23879_vm0, %v16325_v49, %v16332_v61  ;;  %v16575_v49 = vld [vmem:[%s16038_s24 + $0xb0] sm:$0xff]   ;;  %v16581_v61 = vld [vmem:[%s23671_s2 + $0x140] sm:$0xff]  }
  0xcb   : > { %14558 = vmatprep.subr.bf16.mxu1 %v15813_v40  ;;  %24291 = vst [vmem:[#allocation30_spill] sm:$0xff] %v16575_v49 }
  0xcd   : > { %14471 = vmatpush3.bf16.msra.mxu0 %v15788_v41  ;;  %v15780_v41 = vld [vmem:[%s16038_s24 + $0x58] sm:$0xff]  }
  0xce   : > { %14472 = vmatprep.subr.bf16.mxu0 %v15795_v24  ;;  %14559 = vmatpush3.bf16.msra.mxu1 %v15813_v40  ;;  %v15805_v40 = vld [vmem:[%s23671_s2 + $0x70] sm:$0xff]  }
  0xcf   : > { %14313 = vmatmul.mubr.bf16.gmra.mrb[80].mxu0 %v15777_v9  ;;  %14560 = vmatprep.subr.bf16.mxu1 %v15817_v10  ;;  %v610_v9 = vsel %vm23879_vm0, %v16305_v31, %v16321_v44  ;;  %v15814_v44 = vld [vmem:[%s23671_s2 + $0x78] sm:$0xff]  }
  0xd0   : > { %14401 = vmatmul.mubr.bf16.gmra.mrb[80].mxu1 %v16519_v12  ;;  %14316 = vmatprep.mubr.bf16.mxu0 %v15779_v3  ;;  %v15781_v3 = vld [vmem:[%s16038_s24 + $0x60] sm:$0xff]   ;;  %v16564_v31 = vpack.c.bf16 %v609_v53, %v610_v9  ;;  %v15785_v9 = vld [vmem:[%s16038_s24 + $0x78] sm:$0xff]  }
  0xd1   : > { %14404 = vmatprep.mubr.bf16.mxu1 %v16525_v58  ;;  %14473 = vmatpush3.bf16.msra.mxu0 %v15795_v24  ;;  %v16569_v24 = vpack.c.bf16 %v607_v7, %v608_v21  ;;  %v15782_v21 = vld [vmem:[%s16038_s24 + $0x68] sm:$0xff]   ;;  %v606_v7 = vsel %vm23879_vm0, %v16346_v22, %v16350_v26  ;;  %v23721_v22 = vunpack.c.h.bf16 %v16471_v8 }
  0xd2   : > { %14474 = vmatprep.subr.bf16.mxu0 %v15800_v34  ;;  %14561 = vmatpush3.bf16.msra.mxu1 %v15817_v10  ;;  %v605_v10 = vsel %vm23879_vm0, %v16350_v26, %v16357_v29  ;;  %v23720_v26 = vunpack.c.l.bf16 %v16575_v49 }
  0xd3   : > { %14562 = vmatprep.subr.bf16.mxu1 %v15818_v33  ;;  %v16602_v53 = vpack.c.bf16 %v605_v10, %v606_v7 }
  0xd5   : > { %14475 = vmatpush3.bf16.msra.mxu0 %v15800_v34  ;;  %v15784_v34 = vld [vmem:[%s16038_s24 + $0x70] sm:$0xff]  }
  0xd6   : > { %14476 = vmatprep.subr.bf16.mxu0 %v15805_v40  ;;  %14563 = vmatpush3.bf16.msra.mxu1 %v15818_v33  ;;  %v603_v33 = vsel %vm23879_vm0, %v16361_v30, %v16373_v51 }
  0xd7   : > { %14317 = vmatmul.mubr.bf16.gmra.mrb[84].mxu0 %v15780_v41  ;;  %14564 = vmatprep.subr.bf16.mxu1 %v15821_v43  ;;  %v604_v41 = vsel %vm23879_vm0, %v16357_v29, %v16361_v30  ;;  %v510_v29 = vrot.slane %v23721_v22, 1  ;;  %v16614_v30 = vrot.slane %v23720_v26, 1  ;;  %v15796_v22 = vld [vmem:[%s16038_s24 + $0xc0] sm:$0xff]  }
  0xd8   : > { %14405 = vmatmul.mubr.bf16.gmra.mrb[84].mxu1 %v16564_v31  ;;  %14320 = vmatprep.mubr.bf16.mxu0 %v15781_v3  ;;  %v15786_v3 = vld [vmem:[%s16038_s24 + $0x80] sm:$0xff]  }
  0xd9   : > { %14408 = vmatprep.mubr.bf16.mxu1 %v16569_v24  ;;  %14477 = vmatpush3.bf16.msra.mxu0 %v15805_v40  ;;  %v16606_v40 = vpack.c.bf16 %v603_v33, %v604_v41  ;;  %v596_v33 = vsel %vm23879_vm0, %v16445_v56, %v16449_v15 }
  0xda   : > { %14478 = vmatprep.subr.bf16.mxu0 %v15814_v44  ;;  %14565 = vmatpush3.bf16.msra.mxu1 %v15821_v43  ;;  %v602_v43 = vsel %vm23879_vm0, %v16373_v51, %v16377_v52  ;;  %v15787_v51 = vld [vmem:[%s16038_s24 + $0x88] sm:$0xff]  }
  0xdb   : > { %14566 = vmatprep.subr.bf16.mxu1 %v15822_v54 }
  0xdd   : > { %14479 = vmatpush3.bf16.msra.mxu0 %v15814_v44  ;;  %v599_v44 = vsel %vm23879_vm0, %v16416_v2, %v16420_v11 }
  0xde   : > { %14567 = vmatpush3.bf16.msra.mxu1 %v15822_v54  ;;  %14640 = vmatprep.subr.bf16.mxu0 %v16581_v61  ;;  %v601_v54 = vsel %vm23879_vm0, %v16377_v52, %v16394_v0  ;;  %v597_v52 = vsel %vm23879_vm0, %v16432_v18, %v16445_v56  ;;  %v23719_v56 = vunpack.c.h.bf16 %v16575_v49 }
  0xdf   : > { %14321 = vmatmul.mubr.bf16.gmra.mrb[88].mxu0 %v15782_v21  ;;  %v600_v21 = vsel %vm23879_vm0, %v16394_v0, %v16416_v2  ;;  %v16635_v10 = vpack.c.bf16 %v601_v54, %v602_v43  ;;  %v598_v2 = vsel %vm23879_vm0, %v16420_v11, %v16432_v18  ;;  %v15789_v0 = vld [vmem:[%s16038_s24 + $0x90] sm:$0xff]   ;;  %v15790_v11 = vld [vmem:[%s16038_s24 + $0x98] sm:$0xff]   ;;  %v593_v18 = vsel %vm23879_vm0, %v16463_v57, %v16467_v5 }
  0xe0   : > { %14409 = vmatmul.mubr.bf16.gmra.mrb[88].mxu1 %v16602_v53  ;;  %14324 = vmatprep.mubr.bf16.mxu0 %v15784_v34  ;;  %v16637_v7 = vpack.c.bf16 %v599_v44, %v600_v21  ;;  %v595_v34 = vsel %vm23879_vm0, %v16449_v15, %v16456_v63  ;;  %v16659_v41 = vpack.c.bf16 %v597_v52, %v598_v2  ;;  %v15792_v2 = vld [vmem:[%s16038_s24 + $0xa8] sm:$0xff]  }
  0xe1   : > { %14412 = vmatprep.mubr.bf16.mxu1 %v16606_v40  ;;  %v16664_v54 = vpack.c.bf16 %v595_v34, %v596_v33  ;;  %v594_v15 = vsel %vm23879_vm0, %v16456_v63, %v16463_v57  ;;  %v591_v44 = vsel %vm23879_vm0, %v16498_v17, %v16502_v19  ;;  %v592_v21 = vsel %vm23879_vm0, %v16467_v5, %v16498_v17 }
  0xe2   : > { %v16690_v63 = vpack.c.bf16 %v591_v44, %v592_v21  ;;  %v512_v57 = vrot.slane %v23719_v56, 1  ;;  %v589_v5 = vsel %vm23879_vm0, %v16506_v20, %v16513_v37  ;;  %v590_v17 = vsel %vm23879_vm0, %v16502_v19, %v16506_v20 }
  0xe3   : > { %v587_v34 = vsel %vm23879_vm0, %v16529_v25, %v16537_v39  ;;  %v588_v33 = vsel %vm23879_vm0, %v16513_v37, %v16529_v25  ;;  %v585_v19 = vsel %vm23879_vm0, %v510_v29, %v16614_v30  ;;  %v586_v20 = vsel %vm23879_vm0, %v16537_v39, %v510_v29  ;;  %v15794_v39 = vld [vmem:[%s16038_s24 + $0xb8] sm:$0xff]  }
  0xe4   : > { %v16746_v26 = vpack.c.bf16 %v585_v19, %v586_v20  ;;  %v16762_v20 = vld [vmem:[%s16038_s24 + $0xd0] sm:$0xff]  }
  0xe5   : > { %24298 = vst [vmem:[#allocation34_spill] sm:$0xff] %v16762_v20  ;;  %v24301_v28 = vunpack.c.l.bf16 %v16762_v20 }
  0xe7   : > { %14325 = vmatmul.mubr.bf16.gmra.mrb[92].mxu0 %v15785_v9  ;;  %v16662_v9 = vld [vmem:[%s16038_s24 + $0xb8] sm:$0xff]   ;;  %v519_v27 = vrot.slane %v24301_v28, 1 }
  0xe8   : > { %14413 = vmatmul.mubr.bf16.gmra.mrb[92].mxu1 %v16635_v10  ;;  %14328 = vmatprep.mubr.bf16.mxu0 %v15786_v3  ;;  %24292 = vst [vmem:[#allocation31_spill] sm:$0xff] %v16662_v9  ;;  %v23722_v43 = vunpack.c.l.bf16 %v16662_v9  ;;  %v15791_v3 = vld [vmem:[%s16038_s24 + $0xa0] sm:$0xff]   ;;  %v23727_v37 = vunpack.c.h.bf16 %v16662_v9 }
  0xe9   : > { %14416 = vmatprep.mubr.bf16.mxu1 %v16637_v7 }
  0xea   : > { %v513_v52 = vrot.slane %v23722_v43, 1 }
  0xec   : > { %v583_v21 = vsel %vm23879_vm0, %v512_v57, %v513_v52 }
  0xef   : > { %14329 = vmatmul.mubr.bf16.gmra.mrb[96].mxu0 %v15787_v51  ;;  %v16688_v51 = vpack.c.bf16 %v593_v18, %v594_v15  ;;  %v16719_v18 = vld [vmem:[%s16038_s24 + $0xc0] sm:$0xff]   ;;  %v16721_v15 = vpack.c.bf16 %v587_v34, %v588_v33 }
  0xf0   : > { %14417 = vmatmul.mubr.bf16.gmra.mrb[96].mxu1 %v16659_v41  ;;  %14332 = vmatprep.mubr.bf16.mxu0 %v15789_v0  ;;  %v15793_v0 = vld [vmem:[%s16038_s24 + $0xb0] sm:$0xff]   ;;  %24293 = vst [vmem:[#allocation32_spill] sm:$0xff] %v16719_v18 }
  0xf1   : > { %14420 = vmatprep.mubr.bf16.mxu1 %v16664_v54 }
  0xf7   : > { %14333 = vmatmul.mubr.bf16.gmra.mrb[100].mxu0 %v15790_v11  ;;  %v16716_v11 = vpack.c.bf16 %v589_v5, %v590_v17  ;;  %v514_v17 = vrot.slane %v23727_v37, 1  ;;  %v24295_v5 = vunpack.c.l.bf16 %v16719_v18 }
  0xf8   : > { %14421 = vmatmul.mubr.bf16.gmra.mrb[100].mxu1 %v16688_v51  ;;  %14336 = vmatprep.mubr.bf16.mxu0 %v15791_v3  ;;  %v16724_v3 = vld [vmem:[%s16038_s24 + $0xc8] sm:$0xff]  }
  0xf9   : > { %14424 = vmatprep.mubr.bf16.mxu1 %v16690_v63  ;;  %24294 = vst [vmem:[#allocation33_spill] sm:$0xff] %v16724_v3  ;;  %v515_v49 = vrot.slane %v24295_v5, 1 }
  0xff   : > { %14337 = vmatmul.mubr.bf16.gmra.mrb[104].mxu0 %v15792_v2  ;;  %v584_v2 = vsel %vm23879_vm0, %v16614_v30, %v512_v57 }
 0x100   : > { %14425 = vmatmul.mubr.bf16.gmra.mrb[104].mxu1 %v16716_v11  ;;  %14340 = vmatprep.mubr.bf16.mxu0 %v15793_v0  ;;  %v16751_v57 = vpack.c.bf16 %v583_v21, %v584_v2  ;;  %v581_v21 = vsel %vm23879_vm0, %v514_v17, %v515_v49  ;;  %v582_v2 = vsel %vm23879_vm0, %v513_v52, %v514_v17 }
 0x101   : > { %14428 = vmatprep.mubr.bf16.mxu1 %v16721_v15  ;;  %v16786_v5 = vpack.c.bf16 %v581_v21, %v582_v2 }
 0x102   : > { %v14130_v44 = vpop.f32.mrb[0].mxu0 }
 0x103   : > { %v14218_v0 = vpop.f32.mrb[0].mxu1  ;;  %v1500_v34 = vpop.f32.mrb[1].mxu0 }
 0x104   : > { %v16744_v29 = vadd.f32 %v14218_v0, %v14130_v44  ;;  %v2085_v33 = vpop.f32.mrb[1].mxu1  ;;  %v14131_v56 = vpop.f32.mrb[2].mxu0  ;;  %v24296_v0 = vunpack.c.h.bf16 %v16719_v18 }
 0x105   : > { %v16749_v43 = vadd.f32 %v2085_v33, %v1500_v34  ;;  %v14219_v25 = vpop.f32.mrb[2].mxu1  ;;  %v1503_v30 = vpop.f32.mrb[3].mxu0  ;;  %v24297_v56 = vunpack.c.l.bf16 %v16724_v3 }
 0x106   : > { %v2088_v44 = vpop.f32.mrb[3].mxu1  ;;  %v516_v8 = vrot.slane %v24296_v0, 1  ;;  %v16767_v25 = vld [vmem:[%s16038_s24 + $0xd8] sm:$0xff]   ;;  %v24300_v0 = vunpack.c.h.bf16 %v16724_v3 }
 0x107   : > { %v517_v19 = vrot.slane %v24297_v56, 1  ;;  %v16764_v34 = vadd.f32 %v2088_v44, %v1503_v30  ;;  %14341 = vmatmul.mubr.bf16.gmra.mrb[108].mxu0 %v15794_v39  ;;  %24299 = vst [vmem:[#allocation35_spill] sm:$0xff] %v16767_v25  ;;  %v24303_v21 = vunpack.c.l.bf16 %v16767_v25 }
 0x108   : > { %14429 = vmatmul.mubr.bf16.gmra.mrb[108].mxu1 %v16746_v26  ;;  %14344 = vmatprep.mubr.bf16.mxu0 %v15796_v22  ;;  %v580_v22 = vsel %vm23879_vm0, %v515_v49, %v516_v8  ;;  %v518_v44 = vrot.slane %v24300_v0, 1 }
 0x109   : > { %14432 = vmatprep.mubr.bf16.mxu1 %v16751_v57  ;;  %v579_v30 = vsel %vm23879_vm0, %v516_v8, %v517_v19  ;;  %v521_v2 = vrot.slane %v24303_v21, 1 }
 0x10a   : > { %v14134_v39 = vpop.f32.mrb[4].mxu0  ;;  %v16791_v49 = vpack.c.bf16 %v579_v30, %v580_v22  ;;  %v577_v28 = vsel %vm23879_vm0, %v518_v44, %v519_v27  ;;  %v578_v30 = vsel %vm23879_vm0, %v517_v19, %v518_v44 }
 0x10b   : > { %v14222_v56 = vpop.f32.mrb[4].mxu1  ;;  %v1516_v37 = vpop.f32.mrb[5].mxu0  ;;  %v16826_v22 = vpack.c.bf16 %v577_v28, %v578_v30 }
 0x10c   : > { %v16784_v52 = vadd.f32 %v14222_v56, %v14134_v39  ;;  %v2101_v17 = vpop.f32.mrb[5].mxu1  ;;  %v14135_v33 = vpop.f32.mrb[6].mxu0  ;;  %v24302_v56 = vunpack.c.h.bf16 %v16762_v20 }
 0x10d   : > { %v16789_v1 = vadd.f32 %v2101_v17, %v1516_v37  ;;  %v14223_v32 = vpop.f32.mrb[6].mxu1  ;;  %v1519_v8 = vpop.f32.mrb[7].mxu0  ;;  %v16802_v33 = vld [vmem:[%s16038_s24 + $0xe0] sm:$0xff]  }
 0x10e   : > { %v2104_v39 = vpop.f32.mrb[7].mxu1  ;;  %v520_v23 = vrot.slane %v24302_v56, 1  ;;  %24304 = vst [vmem:[#allocation36_spill] sm:$0xff] %v16802_v33  ;;  %v16807_v32 = vld [vmem:[%s16038_s24 + $0xe8] sm:$0xff]   ;;  %v24307_v55 = vunpack.c.l.bf16 %v16802_v33 }
 0x10f   : > { %v16804_v37 = vadd.f32 %v2104_v39, %v1519_v8  ;;  %14345 = vmatmul.mubr.bf16.gmra.mrb[112].mxu0 %v15797_v13  ;;  %24305 = vst [vmem:[#allocation37_spill] sm:$0xff] %v16807_v32  ;;  %v24306_v39 = vunpack.c.h.bf16 %v16767_v25  ;;  %v24309_v28 = vunpack.c.l.bf16 %v16807_v32 }
 0x110   : > { %14433 = vmatmul.mubr.bf16.gmra.mrb[112].mxu1 %v16786_v5  ;;  %14348 = vmatprep.mubr.bf16.mxu0 %v15798_v38  ;;  %v575_v17 = vsel %vm23879_vm0, %v520_v23, %v521_v2  ;;  %v576_v38 = vsel %vm23879_vm0, %v519_v27, %v520_v23  ;;  %v523_v47 = vrot.slane %v24307_v55, 1 }
 0x111   : > { %14436 = vmatprep.mubr.bf16.mxu1 %v16791_v49  ;;  %v16831_v27 = vpack.c.bf16 %v575_v17, %v576_v38  ;;  %v522_v8 = vrot.slane %v24306_v39, 1  ;;  %v525_v30 = vrot.slane %v24309_v28, 1 }
 0x112   : > { %v14138_v13 = vpop.f32.mrb[8].mxu0 }
 0x113   : > { %v14226_v56 = vpop.f32.mrb[8].mxu1  ;;  %v1532_v21 = vpop.f32.mrb[9].mxu0  ;;  %v573_v55 = vsel %vm23879_vm0, %v522_v8, %v523_v47  ;;  %v574_v17 = vsel %vm23879_vm0, %v521_v2, %v522_v8 }
 0x114   : > { %v16824_v19 = vadd.f32 %v14226_v56, %v14138_v13  ;;  %v2117_v44 = vpop.f32.mrb[9].mxu1  ;;  %v14139_v0 = vpop.f32.mrb[10].mxu0  ;;  %v24308_v56 = vunpack.c.h.bf16 %v16802_v33  ;;  %v16866_v38 = vpack.c.bf16 %v573_v55, %v574_v17 }
 0x115   : > { %v16829_v60 = vadd.f32 %v2117_v44, %v1532_v21  ;;  %v14227_v59 = vpop.f32.mrb[10].mxu1  ;;  %v1535_v23 = vpop.f32.mrb[11].mxu0  ;;  %v16842_v0 = vld [vmem:[%s16038_s24 + $0xf0] sm:$0xff]  }
 0x116   : > { %v2120_v13 = vpop.f32.mrb[11].mxu1  ;;  %v524_v42 = vrot.slane %v24308_v56, 1  ;;  %24310 = vst [vmem:[#allocation38_spill] sm:$0xff] %v16842_v0  ;;  %v16847_v59 = vld [vmem:[%s16038_s24 + $0xf8] sm:$0xff]   ;;  %24313 = vst [vmem:[#allocation41_spill] sm:$0xff] %v16866_v38  ;;  %v24317_v20 = vunpack.c.l.bf16 %v16842_v0 }
 0x117   : > { %v16844_v21 = vadd.f32 %v2120_v13, %v1535_v23  ;;  %14349 = vmatmul.mubr.bf16.gmra.mrb[116].mxu0 %v15799_v14  ;;  %24311 = vst [vmem:[#allocation39_spill] sm:$0xff] %v16847_v59  ;;  %v24316_v13 = vunpack.c.h.bf16 %v16807_v32  ;;  %v24319_v55 = vunpack.c.l.bf16 %v16847_v59  ;;  %v15806_v32 = vld [vmem:[%s16038_s24 + $0x100] sm:$0xff]  }
 0x118   : > { %14437 = vmatmul.mubr.bf16.gmra.mrb[116].mxu1 %v16826_v22  ;;  %14352 = vmatprep.mubr.bf16.mxu0 %v15801_v62  ;;  %v571_v44 = vsel %vm23879_vm0, %v524_v42, %v525_v30  ;;  %v572_v62 = vsel %vm23879_vm0, %v523_v47, %v524_v42  ;;  %v527_v3 = vrot.slane %v24317_v20, 1 }
 0x119   : > { %14440 = vmatprep.mubr.bf16.mxu1 %v16831_v27  ;;  %v16871_v47 = vpack.c.bf16 %v571_v44, %v572_v62  ;;  %v526_v23 = vrot.slane %v24316_v13, 1  ;;  %v529_v17 = vrot.slane %v24319_v55, 1 }
 0x11a   : > { %v14142_v14 = vpop.f32.mrb[12].mxu0 }
 0x11b   : > { %v14230_v56 = vpop.f32.mrb[12].mxu1  ;;  %v1548_v28 = vpop.f32.mrb[13].mxu0  ;;  %24315 = vst [vmem:[#allocation43_spill] sm:$0xff] %v16871_v47  ;;  %v569_v20 = vsel %vm23879_vm0, %v526_v23, %v527_v3  ;;  %v570_v44 = vsel %vm23879_vm0, %v525_v30, %v526_v23 }
 0x11c   : > { %v16864_v2 = vadd.f32 %v14230_v56, %v14142_v14  ;;  %v2133_v8 = vpop.f32.mrb[13].mxu1  ;;  %v14143_v39 = vpop.f32.mrb[14].mxu0  ;;  %v24318_v56 = vunpack.c.h.bf16 %v16842_v0  ;;  %v15804_v0 = vld [vmem:[%s16038_s24 + $0xf8] sm:$0xff]   ;;  %v16906_v62 = vpack.c.bf16 %v569_v20, %v570_v44 }
 0x11d   : > { %v16869_v33 = vadd.f32 %v2133_v8, %v1548_v28  ;;  %v14231_v25 = vpop.f32.mrb[14].mxu1  ;;  %v1551_v42 = vpop.f32.mrb[15].mxu0  ;;  %v16882_v39 = vld [vmem:[%s16038_s24 + $0x100] sm:$0xff]  }
 0x11e   : > { %24312 = vst [vmem:[#allocation40_spill] sm:$0xff] %v16864_v2  ;;  %v2136_v14 = vpop.f32.mrb[15].mxu1  ;;  %v528_v2 = vrot.slane %v24318_v56, 1  ;;  %24320 = vst [vmem:[#allocation44_spill] sm:$0xff] %v16882_v39  ;;  %v16887_v25 = vld [vmem:[%s16038_s24 + $0x108] sm:$0xff]  }
 0x11f   : > { %24314 = vst [vmem:[#allocation42_spill] sm:$0xff] %v16869_v33  ;;  %v16884_v28 = vadd.f32 %v2136_v14, %v1551_v42  ;;  %14353 = vmatmul.mubr.bf16.gmra.mrb[120].mxu0 %v15802_v36  ;;  %24322 = vst [vmem:[#allocation46_spill] sm:$0xff] %v16887_v25  ;;  %v24327_v14 = vunpack.c.h.bf16 %v16847_v59  ;;  %v24330_v20 = vunpack.c.l.bf16 %v16887_v25  ;;  %v15810_v59 = vld [vmem:[%s16038_s24 + $0x110] sm:$0xff]  }
 0x120   : > { %14441 = vmatmul.mubr.bf16.gmra.mrb[120].mxu1 %v16866_v38  ;;  %14356 = vmatprep.mubr.bf16.mxu0 %v15803_v35  ;;  %v567_v8 = vsel %vm23879_vm0, %v528_v2, %v529_v17  ;;  %v568_v35 = vsel %vm23879_vm0, %v527_v3, %v528_v2  ;;  %24324 = vst [vmem:[#allocation48_spill] sm:$0xff] %v16906_v62 }
 0x121   : > { %24321 = vst [vmem:[#allocation45_spill] sm:$0xff] %v16884_v28  ;;  %14444 = vmatprep.mubr.bf16.mxu1 %v16871_v47  ;;  %v16911_v2 = vpack.c.bf16 %v567_v8, %v568_v35  ;;  %v530_v42 = vrot.slane %v24327_v14, 1  ;;  %v24328_v47 = vunpack.c.l.bf16 %v16882_v39  ;;  %v533_v44 = vrot.slane %v24330_v20, 1 }
 0x122   : > { %v14146_v36 = vpop.f32.mrb[16].mxu0 }
 0x123   : > { %v14234_v56 = vpop.f32.mrb[16].mxu1  ;;  %v1564_v55 = vpop.f32.mrb[17].mxu0  ;;  %24326 = vst [vmem:[#allocation50_spill] sm:$0xff] %v16911_v2  ;;  %v531_v18 = vrot.slane %v24328_v47, 1  ;;  %v566_v8 = vsel %vm23879_vm0, %v529_v17, %v530_v42  ;;  %v15807_v17 = vld [vmem:[%s16038_s24 + $0x108] sm:$0xff]  }
 0x124   : > { %v16904_v30 = vadd.f32 %v14234_v56, %v14146_v36  ;;  %v2149_v23 = vpop.f32.mrb[17].mxu1  ;;  %v14147_v13 = vpop.f32.mrb[18].mxu0  ;;  %v24329_v56 = vunpack.c.h.bf16 %v16882_v39 }
 0x125   : > { %v16909_v28 = vadd.f32 %v2149_v23, %v1564_v55  ;;  %v14235_v33 = vpop.f32.mrb[18].mxu1  ;;  %v1567_v3 = vpop.f32.mrb[19].mxu0  ;;  %v16922_v13 = vld [vmem:[%s16038_s24 + $0x110] sm:$0xff]   ;;  %v565_v47 = vsel %vm23879_vm0, %v530_v42, %v531_v18 }
 0x126   : > { %24323 = vst [vmem:[#allocation47_spill] sm:$0xff] %v16904_v30  ;;  %v2152_v36 = vpop.f32.mrb[19].mxu1  ;;  %v532_v30 = vrot.slane %v24329_v56, 1  ;;  %24331 = vst [vmem:[#allocation51_spill] sm:$0xff] %v16922_v13  ;;  %v16927_v33 = vld [vmem:[%s16038_s24 + $0x118] sm:$0xff]  }
 0x127   : > { %24325 = vst [vmem:[#allocation49_spill] sm:$0xff] %v16909_v28  ;;  %v16924_v55 = vadd.f32 %v2152_v36, %v1567_v3  ;;  %14357 = vmatmul.mubr.bf16.gmra.mrb[124].mxu0 %v15804_v0  ;;  %24333 = vst [vmem:[#allocation53_spill] sm:$0xff] %v16927_v33  ;;  %v16946_v0 = vpack.c.bf16 %v565_v47, %v566_v8  ;;  %v24339_v36 = vunpack.c.h.bf16 %v16887_v25  ;;  %v24342_v47 = vunpack.c.h.bf16 %v16922_v13 }
 0x128   : > { %14445 = vmatmul.mubr.bf16.gmra.mrb[124].mxu1 %v16906_v62  ;;  %14360 = vmatprep.mubr.bf16.mxu0 %v15806_v32  ;;  %v563_v23 = vsel %vm23879_vm0, %v532_v30, %v533_v44  ;;  %v564_v32 = vsel %vm23879_vm0, %v531_v18, %v532_v30  ;;  %v24340_v62 = vunpack.c.l.bf16 %v16922_v13 }
 0x129   : > { %24332 = vst [vmem:[#allocation52_spill] sm:$0xff] %v16924_v55  ;;  %14448 = vmatprep.mubr.bf16.mxu1 %v16911_v2  ;;  %24335 = vst [vmem:[#allocation55_spill] sm:$0xff] %v16946_v0  ;;  %v16950_v55 = vld [vmem:[%s16038_s24 + $0x120] sm:$0xff]   ;;  %v16954_v3 = vpack.c.bf16 %v563_v23, %v564_v32  ;;  %v534_v2 = vrot.slane %v24339_v36, 1  ;;  %v536_v8 = vrot.slane %v24342_v47, 1  ;;  %v23794_v23 = vunpack.c.h.bf16 %v16927_v33  ;;  %v15811_v36 = vld [vmem:[%s16038_s24 + $0x118] sm:$0xff]  }
 0x12a   : > { %v14150_v14 = vpop.f32.mrb[20].mxu0  ;;  %24336 = vst [vmem:[#allocation56_spill] sm:$0xff] %v16950_v55  ;;  %v23799_v32 = vunpack.c.l.bf16 %v16950_v55 }
 0x12b   : > { %v14238_v56 = vpop.f32.mrb[20].mxu1  ;;  %v1580_v20 = vpop.f32.mrb[21].mxu0  ;;  %24338 = vst [vmem:[#allocation58_spill] sm:$0xff] %v16954_v3 }
 0x12c   : > { %v16944_v42 = vadd.f32 %v14238_v56, %v14150_v14  ;;  %v2165_v35 = vpop.f32.mrb[21].mxu1  ;;  %v14151_v39 = vpop.f32.mrb[22].mxu0  ;;  %v535_v14 = vrot.slane %v24340_v62, 1  ;;  %v16961_v56 = vld [vmem:[%s16038_s24 + $0x128] sm:$0xff]   ;;  %v538_v62 = vrot.slane %v23794_v23, 1  ;;  %v539_v13 = vrot.slane %v23799_v32, 1 }
 0x12d   : > { %v16952_v28 = vadd.f32 %v2165_v35, %v1580_v20  ;;  %v14239_v18 = vpop.f32.mrb[22].mxu1  ;;  %v1583_v30 = vpop.f32.mrb[23].mxu0  ;;  %24341 = vst [vmem:[#allocation59_spill] sm:$0xff] %v16961_v56  ;;  %v17002_v32 = vld [vmem:[%s16038_s24 + $0x130] sm:$0xff]  }
 0x12e   : > { %24334 = vst [vmem:[#allocation54_spill] sm:$0xff] %v16944_v42  ;;  %v2168_v39 = vpop.f32.mrb[23].mxu1  ;;  %v24343_v42 = vunpack.c.l.bf16 %v16927_v33  ;;  %24350 = vst [vmem:[#allocation64_spill] sm:$0xff] %v17002_v32 }
 0x12f   : > { %24337 = vst [vmem:[#allocation57_spill] sm:$0xff] %v16952_v28  ;;  %v16967_v20 = vadd.f32 %v2168_v39, %v1583_v30  ;;  %14361 = vmatmul.mubr.bf16.gmra.mrb[128].mxu0 %v15807_v17  ;;  %v562_v17 = vsel %vm23879_vm0, %v533_v44, %v534_v2  ;;  %v15815_v28 = vld [vmem:[%s16038_s24 + $0x120] sm:$0xff]  }
 0x130   : > { %v537_v35 = vrot.slane %v24343_v42, 1  ;;  %14449 = vmatmul.mubr.bf16.gmra.mrb[128].mxu1 %v16946_v0  ;;  %14364 = vmatprep.mubr.bf16.mxu0 %v15810_v59  ;;  %v561_v42 = vsel %vm23879_vm0, %v534_v2, %v535_v14  ;;  %v560_v59 = vsel %vm23879_vm0, %v535_v14, %v536_v8  ;;  %v24346_v14 = vunpack.c.h.bf16 %v16950_v55 }
 0x131   : > { %24344 = vst [vmem:[#allocation60_spill] sm:$0xff] %v16967_v20  ;;  %14452 = vmatprep.mubr.bf16.mxu1 %v16954_v3  ;;  %v16990_v20 = vpack.c.bf16 %v561_v42, %v562_v17  ;;  %v24347_v3 = vunpack.c.l.bf16 %v16961_v56 }
 0x132   : > { %v14154_v18 = vpop.f32.mrb[24].mxu0  ;;  %v559_v30 = vsel %vm23879_vm0, %v536_v8, %v537_v35  ;;  %v540_v8 = vrot.slane %v24346_v14, 1  ;;  %v15816_v14 = vld [vmem:[%s16038_s24 + $0x128] sm:$0xff]  }
 0x133   : > { %v14242_v39 = vpop.f32.mrb[24].mxu1  ;;  %v1596_v47 = vpop.f32.mrb[25].mxu0  ;;  %v541_v0 = vrot.slane %v24347_v3, 1  ;;  %v16999_v38 = vpack.c.bf16 %v559_v30, %v560_v59  ;;  %v557_v3 = vsel %vm23879_vm0, %v538_v62, %v539_v13 }
 0x134   : > { %v16988_v2 = vadd.f32 %v14242_v39, %v14154_v18  ;;  %v2181_v44 = vpop.f32.mrb[25].mxu1  ;;  %v14155_v25 = vpop.f32.mrb[26].mxu0  ;;  %v17005_v39 = vld [vmem:[%s16038_s24] sm:$0xff]  }
 0x135   : > { %v16997_v33 = vadd.f32 %v2181_v44, %v1596_v47  ;;  %v14243_v23 = vpop.f32.mrb[26].mxu1  ;;  %v1599_v9 = vpop.f32.mrb[27].mxu0  ;;  %24349 = vst [vmem:[#allocation63_spill] sm:$0xff] %v16999_v38  ;;  %v17008_v25 = vld [vmem:[%s16038_s24 + $0x8] sm:$0xff]   ;;  %v555_v17 = vsel %vm23879_vm0, %v540_v8, %v541_v0 }
 0x136   : > { %24345 = vst [vmem:[#allocation61_spill] sm:$0xff] %v16988_v2  ;;  %v2184_v18 = vpop.f32.mrb[27].mxu1  ;;  %v558_v23 = vsel %vm23879_vm0, %v537_v35, %v538_v62 }
 0x137   : > { %24348 = vst [vmem:[#allocation62_spill] sm:$0xff] %v16997_v33  ;;  %v17010_v42 = vadd.f32 %v2184_v18, %v1599_v9  ;;  %14365 = vmatmul.mubr.bf16.gmra.mrb[132].mxu0 %v15811_v36  ;;  %v556_v36 = vsel %vm23879_vm0, %v539_v13, %v540_v8  ;;  %v17028_v18 = vpack.c.bf16 %v557_v3, %v558_v23  ;;  %v24354_v13 = vunpack.c.h.bf16 %v16961_v56 }
 0x138   : > { %14453 = vmatmul.mubr.bf16.gmra.mrb[132].mxu1 %v16990_v20  ;;  %14368 = vmatprep.mubr.bf16.mxu0 %v15815_v28  ;;  %v17033_v33 = vpack.c.bf16 %v555_v17, %v556_v36  ;;  %v24355_v28 = vunpack.c.l.bf16 %v17002_v32  ;;  %v24358_v3 = vunpack.c.l.bf16 %v17005_v39  ;;  %v24361_v17 = vunpack.c.l.bf16 %v17008_v25 }
 0x139   : > { %24351 = vst [vmem:[#allocation65_spill] sm:$0xff] %v17010_v42  ;;  %14456 = vmatprep.mubr.bf16.mxu1 %v16999_v38  ;;  %v15819_v42 = vld [vmem:[%s16038_s24 + $0x130] sm:$0xff]   ;;  %v542_v8 = vrot.slane %v24354_v13, 1 }
 0x13a   : > { %v14158_v35 = vpop.f32.mrb[28].mxu0  ;;  %24353 = vst [vmem:[#allocation67_spill] sm:$0xff] %v17033_v33  ;;  %v17039_v59 = vrot.slane %v24355_v28, 1  ;;  %v17045_v23 = vrot.slane %v24358_v3, 1  ;;  %v469_v36 = vrot.slane %v24361_v17, 1  ;;  %v15830_v28 = vld [vmem:[%s23671_s2 + $0x80] sm:$0xff]  }
 0x13b   : > { %v14246_v62 = vpop.f32.mrb[28].mxu1  ;;  %v1612_v44 = vpop.f32.mrb[29].mxu0  ;;  %v554_v13 = vsel %vm23879_vm0, %v541_v0, %v542_v8  ;;  %14728 = vmatprep.subr.bf16.mxu1 %v15830_v28  ;;  %v15820_v17 = vld [vmem:[%s16038_s24 + $0x138] sm:$0xff]   ;;  %v24363_v0 = vunpack.c.h.bf16 %v17008_v25 }
 0x13c   : > { %v17030_v30 = vadd.f32 %v14246_v62, %v14158_v35  ;;  %v2197_v9 = vpop.f32.mrb[29].mxu1  ;;  %v14159_v55 = vpop.f32.mrb[30].mxu0  ;;  %24356 = vst [vmem:[#allocation68_spill] sm:$0xff] %v17039_v59  ;;  %24359 = vst [vmem:[#allocation70_spill] sm:$0xff] %v17045_v23 }
 0x13d   : > { %v17041_v47 = vadd.f32 %v2197_v9, %v1612_v44  ;;  %v14247_v2 = vpop.f32.mrb[30].mxu1  ;;  %v1615_v38 = vpop.f32.mrb[31].mxu0  ;;  %v24360_v55 = vunpack.c.h.bf16 %v17005_v39 }
 0x13e   : > { %24352 = vst [vmem:[#allocation66_spill] sm:$0xff] %v17030_v30  ;;  %v2200_v62 = vpop.f32.mrb[31].mxu1  ;;  %v553_v2 = vsel %vm23879_vm0, %v542_v8, %v17039_v59  ;;  %v470_v8 = vrot.slane %v24363_v0, 1  ;;  %v15831_v0 = vld [vmem:[%s23671_s2 + $0x88] sm:$0xff]  }
 0x13f   : > { %24357 = vst [vmem:[#allocation69_spill] sm:$0xff] %v17041_v47  ;;  %v468_v35 = vrot.slane %v24360_v55, 1  ;;  %v17054_v9 = vadd.f32 %v2200_v62, %v1615_v38  ;;  %14369 = vmatmul.mubr.bf16.gmra.mrb[136].mxu0 %v15816_v14 }
 0x140   : > { %14457 = vmatmul.mubr.bf16.gmra.mrb[136].mxu1 %v17028_v18  ;;  %14372 = vmatprep.mubr.bf16.mxu0 %v15819_v42 }
 0x141   : > { %24362 = vst [vmem:[#allocation71_spill] sm:$0xff] %v17054_v9  ;;  %14460 = vmatprep.mubr.bf16.mxu1 %v17033_v33  ;;  %v627_v3 = vsel %vm23879_vm0, %v468_v35, %v469_v36  ;;  %v628_v38 = vsel %vm23879_vm0, %v17045_v23, %v468_v35  ;;  %v17072_v9 = vpack.c.bf16 %v553_v2, %v554_v13 }
 0x142   : > { %v14162_v42 = vpop.f32.mrb[32].mxu0  ;;  %v630_v47 = vpack.c.bf16 %v627_v3, %v628_v38  ;;  %v626_v2 = vsel %vm23879_vm0, %v469_v36, %v470_v8 }
 0x143   : > { %v14250_v14 = vpop.f32.mrb[32].mxu1  ;;  %v1628_v55 = vpop.f32.mrb[33].mxu0 }
 0x144   : > { %v17070_v62 = vadd.f32 %v14250_v14, %v14162_v42  ;;  %v2213_v44 = vpop.f32.mrb[33].mxu1  ;;  %v14163_v56 = vpop.f32.mrb[34].mxu0 }
 0x145   : > { %v17076_v30 = vadd.f32 %v2213_v44, %v1628_v55  ;;  %v14251_v33 = vpop.f32.mrb[34].mxu1  ;;  %v1631_v59 = vpop.f32.mrb[35].mxu0  ;;  %v625_v56 = vsel %vm23879_vm0, %v470_v8, %v16203_v50  ;;  %v15824_v50 = vld [vmem:[%s23671_s2 + $0x148] sm:$0xff]   ;;  %v15825_v8 = vld [vmem:[%s23671_s2 + $0x150] sm:$0xff]  }
 0x146   : > { %v2216_v35 = vpop.f32.mrb[35].mxu1  ;;  %v631_v3 = vpack.c.bf16 %v625_v56, %v626_v2 }
 0x147   : > { %v17078_v23 = vadd.f32 %v2216_v35, %v1631_v59  ;;  %14373 = vmatmul.mubr.bf16.gmra.mrb[140].mxu0 %v15820_v17 }
 0x148   : > { %14461 = vmatmul.mubr.bf16.gmra.mrb[140].mxu1 %v17072_v9  ;;  %14480 = vmatprep.mubr.bf16.mxu0 %v630_v47 }
 0x149   : > { %14568 = vmatprep.mubr.bf16.mxu1 %v16342_v6 }
 0x14a   : > { %v14166_v44 = vpop.f32.mrb[36].mxu0 }
 0x14b   : > { %v14254_v13 = vpop.f32.mrb[36].mxu1  ;;  %v1644_v33 = vpop.f32.mrb[37].mxu0 }
 0x14c   : > { %v17087_v38 = vadd.f32 %v14254_v13, %v14166_v44  ;;  %v2229_v59 = vpop.f32.mrb[37].mxu1  ;;  %v14167_v42 = vpop.f32.mrb[38].mxu0  ;;  %v15832_v44 = vld [vmem:[%s23671_s2 + $0x90] sm:$0xff]  }
 0x14d   : > { %v17089_v14 = vadd.f32 %v2229_v59, %v1644_v33  ;;  %v14255_v47 = vpop.f32.mrb[38].mxu1  ;;  %v1647_v55 = vpop.f32.mrb[39].mxu0  ;;  %v17114_v42 = vld [vmem:[%s16038_s24 + $0x138] sm:$0xff]  }
 0x14e   : > { %v2232_v17 = vpop.f32.mrb[39].mxu1  ;;  %24364 = vst [vmem:[#allocation72_spill] sm:$0xff] %v17114_v42  ;;  %v15826_v47 = vld [vmem:[%s23671_s2 + $0x158] sm:$0xff]  }
 0x14f   : > { %v17094_v36 = vadd.f32 %v2232_v17, %v1647_v55  ;;  %14481 = vmatmul.mubr.bf16.vlgmr.msra.gmra.mrb[144].mxu0 %v631_v3  ;;  %v15833_v17 = vld [vmem:[%s23671_s2 + $0x98] sm:$0xff]  }
 0x150   : > { %14569 = vmatmul.mubr.bf16.vlgmr.msra.gmra.mrb[144].mxu1 %v16439_v48  ;;  %14641 = vmatpush3.bf16.msra.mxu0 %v16581_v61 }
 0x151   : > { %14484 = vmatprep.mubr.bf16.mxu0 %v16263_v16  ;;  %14572 = vmatprep.mubr.bf16.mxu1 %v16441_v46 }
 0x152   : > { %v14170_v35 = vpop.f32.mrb[40].mxu0  ;;  %14642 = vmatprep.subr.bf16.mxu0 %v15824_v50  ;;  %14729 = vmatpush3.bf16.msra.mxu1 %v15830_v28 }
 0x153   : > { %v14258_v56 = vpop.f32.mrb[40].mxu1  ;;  %v1660_v2 = vpop.f32.mrb[41].mxu0  ;;  %14730 = vmatprep.subr.bf16.mxu1 %v15831_v0 }
 0x154   : > { %v17109_v61 = vadd.f32 %v14258_v56, %v14170_v35  ;;  %v2245_v16 = vpop.f32.mrb[41].mxu1  ;;  %v14171_v13 = vpop.f32.mrb[42].mxu0  ;;  %14643 = vmatpush3.bf16.msra.mxu0 %v15824_v50  ;;  %v23809_v50 = vunpack.c.h.bf16 %v17114_v42 }
 0x155   : > { %v17111_v33 = vadd.f32 %v2245_v16, %v1660_v2  ;;  %v14259_v3 = vpop.f32.mrb[42].mxu1  ;;  %v1663_v59 = vpop.f32.mrb[43].mxu0  ;;  %14644 = vmatprep.subr.bf16.mxu0 %v15825_v8 }
 0x156   : > { %v2248_v28 = vpop.f32.mrb[43].mxu1  ;;  %14731 = vmatpush3.bf16.msra.mxu1 %v15831_v0  ;;  %v17134_v0 = vrot.slane %v23809_v50, 2  ;;  %v24367_v3 = vunpack.c.l.bf16 %v17005_v39 }
 0x157   : > { %v17119_v55 = vadd.f32 %v2248_v28, %v1663_v59  ;;  %14485 = vmatmul.mubr.bf16.gmra.mrb[148].mxu0 %v16339_v4  ;;  %14732 = vmatprep.subr.bf16.mxu1 %v15832_v44  ;;  %v15827_v4 = vld [vmem:[%s23671_s2 + $0x160] sm:$0xff]  }
 0x158   : > { %14573 = vmatmul.mubr.bf16.gmra.mrb[148].mxu1 %v16519_v12  ;;  %14488 = vmatprep.mubr.bf16.mxu0 %v16342_v6  ;;  %24366 = vst [vmem:[#allocation74_spill] sm:$0xff] %v17134_v0  ;;  %v15835_v6 = vld [vmem:[%s23671_s2 + $0xa0] sm:$0xff]   ;;  %v17143_v59 = vrot.slane %v24367_v3, 2 }
 0x159   : > { %24365 = vst [vmem:[#allocation73_spill] sm:$0xff] %v17119_v55  ;;  %14576 = vmatprep.mubr.bf16.mxu1 %v16525_v58  ;;  %14645 = vmatpush3.bf16.msra.mxu0 %v15825_v8 }
 0x15a   : > { %v14174_v35 = vpop.f32.mrb[44].mxu0  ;;  %14646 = vmatprep.subr.bf16.mxu0 %v15826_v47  ;;  %14733 = vmatpush3.bf16.msra.mxu1 %v15832_v44 }
 0x15b   : > { %v14262_v56 = vpop.f32.mrb[44].mxu1  ;;  %v1676_v2 = vpop.f32.mrb[45].mxu0  ;;  %14734 = vmatprep.subr.bf16.mxu1 %v15833_v17 }
 0x15c   : > { %v17139_v16 = vadd.f32 %v14262_v56, %v14174_v35  ;;  %v2261_v8 = vpop.f32.mrb[45].mxu1  ;;  %v14175_v13 = vpop.f32.mrb[46].mxu0  ;;  %v15828_v35 = vld [vmem:[%s23671_s2 + $0x168] sm:$0xff]   ;;  %v17155_v56 = vsel %vm23878_vm1, %v17134_v0, %v17143_v59 }
 0x15d   : > { %v17145_v44 = vadd.f32 %v2261_v8, %v1676_v2  ;;  %v14263_v28 = vpop.f32.mrb[46].mxu1  ;;  %v1679_v50 = vpop.f32.mrb[47].mxu0  ;;  %14647 = vmatpush3.bf16.msra.mxu0 %v15826_v47  ;;  %24368 = vst [vmem:[#allocation75_spill] sm:$0xff] %v17155_v56  ;;  %v15836_v47 = vld [vmem:[%s23671_s2 + $0xa8] sm:$0xff]   ;;  %v15837_v8 = vld [vmem:[%s23671_s2 + $0xb0] sm:$0xff]  }
 0x15e   : > { %v2264_v55 = vpop.f32.mrb[47].mxu1  ;;  %14648 = vmatprep.subr.bf16.mxu0 %v15827_v4  ;;  %14735 = vmatpush3.bf16.msra.mxu1 %v15833_v17 }
 0x15f   : > { %v17157_v2 = vadd.f32 %v2264_v55, %v1679_v50  ;;  %14489 = vmatmul.mubr.bf16.gmra.mrb[152].mxu0 %v16439_v48  ;;  %14736 = vmatprep.subr.bf16.mxu1 %v15835_v6  ;;  %v15829_v55 = vld [vmem:[%s23671_s2 + $0x170] sm:$0xff]  }
 0x160   : > { %14577 = vmatmul.mubr.bf16.gmra.mrb[152].mxu1 %v16564_v31  ;;  %14492 = vmatprep.mubr.bf16.mxu0 %v16441_v46 }
 0x161   : > { %24369 = vst [vmem:[#allocation76_spill] sm:$0xff] %v17157_v2  ;;  %14580 = vmatprep.mubr.bf16.mxu1 %v16569_v24  ;;  %14649 = vmatpush3.bf16.msra.mxu0 %v15827_v4 }
 0x162   : > { %v14178_v17 = vpop.f32.mrb[48].mxu0  ;;  %14650 = vmatprep.subr.bf16.mxu0 %v15828_v35  ;;  %14737 = vmatpush3.bf16.msra.mxu1 %v15835_v6  ;;  %v15834_v6 = vld [vmem:[%s23671_s2 + $0x178] sm:$0xff]  }
 0x163   : > { %v14266_v48 = vpop.f32.mrb[48].mxu1  ;;  %v1692_v50 = vpop.f32.mrb[49].mxu0  ;;  %14738 = vmatprep.subr.bf16.mxu1 %v15836_v47 }
 0x164   : > { %v17172_v13 = vadd.f32 %v14266_v48, %v14178_v17  ;;  %v2277_v46 = vpop.f32.mrb[49].mxu1  ;;  %v14179_v3 = vpop.f32.mrb[50].mxu0  ;;  %v15838_v17 = vld [vmem:[%s23671_s2 + $0xb8] sm:$0xff]  }
 0x165   : > { %v17174_v28 = vadd.f32 %v2277_v46, %v1692_v50  ;;  %v14267_v4 = vpop.f32.mrb[50].mxu1  ;;  %v1695_v56 = vpop.f32.mrb[51].mxu0  ;;  %14651 = vmatpush3.bf16.msra.mxu0 %v15828_v35 }
 0x166   : > { %v2280_v0 = vpop.f32.mrb[51].mxu1  ;;  %14652 = vmatprep.subr.bf16.mxu0 %v15829_v55  ;;  %14739 = vmatpush3.bf16.msra.mxu1 %v15836_v47 }
 0x167   : > { %v17179_v2 = vadd.f32 %v2280_v0, %v1695_v56  ;;  %14493 = vmatmul.mubr.bf16.gmra.mrb[156].mxu0 %v16519_v12  ;;  %14740 = vmatprep.subr.bf16.mxu1 %v15837_v8  ;;  %v17191_v0 = vld [vmem:[%s23671_s2 + $0x200] sm:$0xff]  }
 0x168   : > { %14581 = vmatmul.mubr.bf16.gmra.mrb[156].mxu1 %v16602_v53  ;;  %14496 = vmatprep.mubr.bf16.mxu0 %v16525_v58 }
 0x169   : > { %14584 = vmatprep.mubr.bf16.mxu1 %v16606_v40  ;;  %14653 = vmatpush3.bf16.msra.mxu0 %v15829_v55 }
 0x16a   : > { %v14182_v35 = vpop.f32.mrb[52].mxu0  ;;  %14654 = vmatprep.subr.bf16.mxu0 %v15834_v6  ;;  %14741 = vmatpush3.bf16.msra.mxu1 %v15837_v8 }
 0x16b   : > { %v14270_v12 = vpop.f32.mrb[52].mxu1  ;;  %v1708_v56 = vpop.f32.mrb[53].mxu0  ;;  %14742 = vmatprep.subr.bf16.mxu1 %v15838_v17 }
 0x16c   : > { %v17193_v47 = vadd.f32 %v14270_v12, %v14182_v35  ;;  %v2293_v48 = vpop.f32.mrb[53].mxu1  ;;  %v14183_v50 = vpop.f32.mrb[54].mxu0 }
 0x16d   : > { %v17195_v46 = vadd.f32 %v2293_v48, %v1708_v56  ;;  %v14271_v58 = vpop.f32.mrb[54].mxu1  ;;  %v1711_v3 = vpop.f32.mrb[55].mxu0  ;;  %14655 = vmatpush3.bf16.msra.mxu0 %v15834_v6 }
 0x16e   : > { %v2296_v55 = vpop.f32.mrb[55].mxu1  ;;  %14743 = vmatpush3.bf16.msra.mxu1 %v15838_v17  ;;  %14816 = vmatprep.subr.bf16.mxu0 %v17191_v0 }
 0x16f   : > { %v17198_v8 = vadd.f32 %v2296_v55, %v1711_v3  ;;  %14497 = vmatmul.mubr.bf16.gmra.mrb[160].mxu0 %v16564_v31 }
 0x170   : > { %14585 = vmatmul.mubr.bf16.gmra.mrb[160].mxu1 %v16635_v10  ;;  %14500 = vmatprep.mubr.bf16.mxu0 %v16569_v24 }
 0x171   : > { %14588 = vmatprep.mubr.bf16.mxu1 %v16637_v7 }
 0x172   : > { %v14186_v4 = vpop.f32.mrb[56].mxu0 }
 0x173   : > { %v14274_v35 = vpop.f32.mrb[56].mxu1  ;;  %v1724_v12 = vpop.f32.mrb[57].mxu0 }
 0x174   : > { %v17204_v56 = vadd.f32 %v14274_v35, %v14186_v4  ;;  %v2309_v6 = vpop.f32.mrb[57].mxu1  ;;  %v14187_v48 = vpop.f32.mrb[58].mxu0 }
 0x175   : > { %v17206_v17 = vadd.f32 %v2309_v6, %v1724_v12  ;;  %v14275_v50 = vpop.f32.mrb[58].mxu1  ;;  %v1727_v58 = vpop.f32.mrb[59].mxu0 }
 0x176   : > { %v2312_v3 = vpop.f32.mrb[59].mxu1 }
 0x177   : > { %v17208_v55 = vadd.f32 %v2312_v3, %v1727_v58  ;;  %14501 = vmatmul.mubr.bf16.gmra.mrb[164].mxu0 %v16602_v53 }
 0x178   : > { %14589 = vmatmul.mubr.bf16.gmra.mrb[164].mxu1 %v16659_v41  ;;  %14504 = vmatprep.mubr.bf16.mxu0 %v16606_v40 }
 0x179   : > { %24370 = vst [vmem:[#allocation77_spill] sm:$0xff] %v17208_v55  ;;  %14592 = vmatprep.mubr.bf16.mxu1 %v16664_v54 }
 0x17a   : > { %v14190_v31 = vpop.f32.mrb[60].mxu0 }
 0x17b   : > { %v14278_v24 = vpop.f32.mrb[60].mxu1  ;;  %v1740_v4 = vpop.f32.mrb[61].mxu0 }
 0x17c   : > { %v17214_v35 = vadd.f32 %v14278_v24, %v14190_v31  ;;  %v2325_v12 = vpop.f32.mrb[61].mxu1  ;;  %v14191_v6 = vpop.f32.mrb[62].mxu0 }
 0x17d   : > { %v17216_v48 = vadd.f32 %v2325_v12, %v1740_v4  ;;  %v14279_v50 = vpop.f32.mrb[62].mxu1  ;;  %v1743_v58 = vpop.f32.mrb[63].mxu0 }
 0x17e   : > { %v2328_v3 = vpop.f32.mrb[63].mxu1 }
 0x17f   : > { %v17218_v55 = vadd.f32 %v2328_v3, %v1743_v58  ;;  %14505 = vmatmul.mubr.bf16.gmra.mrb[168].mxu0 %v16635_v10 }
 0x180   : > { %14593 = vmatmul.mubr.bf16.gmra.mrb[168].mxu1 %v16688_v51  ;;  %14508 = vmatprep.mubr.bf16.mxu0 %v16637_v7 }
 0x181   : > { %24371 = vst [vmem:[#allocation78_spill] sm:$0xff] %v17218_v55  ;;  %14596 = vmatprep.mubr.bf16.mxu1 %v16690_v63 }
 0x182   : > { %v14194_v53 = vpop.f32.mrb[64].mxu0 }
 0x183   : > { %v14282_v40 = vpop.f32.mrb[64].mxu1  ;;  %v1756_v31 = vpop.f32.mrb[65].mxu0 }
 0x184   : > { %v17224_v24 = vadd.f32 %v14282_v40, %v14194_v53  ;;  %v2341_v4 = vpop.f32.mrb[65].mxu1  ;;  %v14195_v12 = vpop.f32.mrb[66].mxu0 }
 0x185   : > { %v17226_v6 = vadd.f32 %v2341_v4, %v1756_v31  ;;  %v14283_v50 = vpop.f32.mrb[66].mxu1  ;;  %v1759_v58 = vpop.f32.mrb[67].mxu0 }
 0x186   : > { %v2344_v3 = vpop.f32.mrb[67].mxu1 }
 0x187   : > { %v17228_v55 = vadd.f32 %v2344_v3, %v1759_v58  ;;  %14509 = vmatmul.mubr.bf16.gmra.mrb[172].mxu0 %v16659_v41 }
 0x188   : > { %14597 = vmatmul.mubr.bf16.gmra.mrb[172].mxu1 %v16716_v11  ;;  %14512 = vmatprep.mubr.bf16.mxu0 %v16664_v54 }
 0x189   : > { %24372 = vst [vmem:[#allocation79_spill] sm:$0xff] %v17228_v55  ;;  %14600 = vmatprep.mubr.bf16.mxu1 %v16721_v15 }
 0x18a   : > { %v14198_v10 = vpop.f32.mrb[68].mxu0 }
 0x18b   : > { %v14286_v7 = vpop.f32.mrb[68].mxu1  ;;  %v1772_v53 = vpop.f32.mrb[69].mxu0 }
 0x18c   : > { %v17234_v40 = vadd.f32 %v14286_v7, %v14198_v10  ;;  %v2357_v31 = vpop.f32.mrb[69].mxu1  ;;  %v14199_v4 = vpop.f32.mrb[70].mxu0 }
 0x18d   : > { %v17236_v12 = vadd.f32 %v2357_v31, %v1772_v53  ;;  %v14287_v50 = vpop.f32.mrb[70].mxu1  ;;  %v1775_v58 = vpop.f32.mrb[71].mxu0 }
 0x18e   : > { %v2360_v3 = vpop.f32.mrb[71].mxu1 }
 0x18f   : > { %v17238_v55 = vadd.f32 %v2360_v3, %v1775_v58  ;;  %14513 = vmatmul.mubr.bf16.gmra.mrb[176].mxu0 %v16688_v51 }
 0x190   : > { %14601 = vmatmul.mubr.bf16.gmra.mrb[176].mxu1 %v16746_v26  ;;  %14516 = vmatprep.mubr.bf16.mxu0 %v16690_v63 }
 0x191   : > { %14604 = vmatprep.mubr.bf16.mxu1 %v16751_v57 }
 0x192   : > { %v14306_v41 = vpop.f32.mrb[72].mxu0 }
 0x193   : > { %v17245_v54 = vadd.f32 %v14306_v41, %v16744_v29  ;;  %v2687_v10 = vpop.f32.mrb[73].mxu0  ;;  %v17247_v7 = vpop.f32.mrb[72].mxu1 }
 0x194   : > { %v17250_v53 = vadd.f32 %v2687_v10, %v16749_v43  ;;  %v14307_v31 = vpop.f32.mrb[74].mxu0  ;;  %v17252_v4 = vpop.f32.mrb[73].mxu1 }
 0x195   : > { %24373 = vst [vmem:[#allocation80_spill] sm:$0xff] %v17245_v54  ;;  %v2690_v51 = vpop.f32.mrb[75].mxu0  ;;  %v14395_v50 = vpop.f32.mrb[74].mxu1 }
 0x196   : > { %24374 = vst [vmem:[#allocation81_spill] sm:$0xff] %v17250_v53  ;;  %v17255_v58 = vadd.f32 %v2690_v51, %v16764_v34  ;;  %v17257_v63 = vpop.f32.mrb[75].mxu1  ;;  %v24482_v53 = vld [vmem:[#allocation10_spill] sm:$0xff] }
 0x197   : > { %14517 = vmatmul.mubr.bf16.gmra.mrb[180].mxu0 %v16716_v11 }
 0x198   : > { %24375 = vst [vmem:[#allocation82_spill] sm:$0xff] %v17255_v58  ;;  %14605 = vmatmul.mubr.bf16.gmra.mrb[180].mxu1 %v16786_v5  ;;  %14520 = vmatprep.mubr.bf16.mxu0 %v16721_v15 }
 0x199   : > { %14608 = vmatprep.mubr.bf16.mxu1 %v16791_v49 }
 0x19a   : > { %v14310_v43 = vpop.f32.mrb[76].mxu0 }
 0x19b   : > { %v17264_v29 = vadd.f32 %v14310_v43, %v16784_v52  ;;  %v2703_v3 = vpop.f32.mrb[77].mxu0  ;;  %v17266_v41 = vpop.f32.mrb[76].mxu1 }
 0x19c   : > { %24377 = vst [vmem:[#allocation84_spill] sm:$0xff] %v17266_v41  ;;  %v17269_v34 = vadd.f32 %v2703_v3, %v16789_v1  ;;  %v14311_v10 = vpop.f32.mrb[78].mxu0  ;;  %v17271_v31 = vpop.f32.mrb[77].mxu1 }
 0x19d   : > { %24376 = vst [vmem:[#allocation83_spill] sm:$0xff] %v17264_v29  ;;  %24379 = vst [vmem:[#allocation86_spill] sm:$0xff] %v17271_v31  ;;  %v2706_v11 = vpop.f32.mrb[79].mxu0  ;;  %v14399_v51 = vpop.f32.mrb[78].mxu1 }
 0x19e   : > { %24378 = vst [vmem:[#allocation85_spill] sm:$0xff] %v17269_v34  ;;  %v17274_v50 = vadd.f32 %v2706_v11, %v16804_v37  ;;  %v17276_v15 = vpop.f32.mrb[79].mxu1 }
 0x19f   : > { %24381 = vst [vmem:[#allocation88_spill] sm:$0xff] %v17276_v15  ;;  %14521 = vmatmul.mubr.bf16.gmra.mrb[184].mxu0 %v16746_v26 }
 0x1a0   : > { %24380 = vst [vmem:[#allocation87_spill] sm:$0xff] %v17274_v50  ;;  %14609 = vmatmul.mubr.bf16.gmra.mrb[184].mxu1 %v16826_v22  ;;  %14524 = vmatprep.mubr.bf16.mxu0 %v16751_v57 }
 0x1a1   : > { %14612 = vmatprep.mubr.bf16.mxu1 %v16831_v27 }
 0x1a2   : > { %v14314_v1 = vpop.f32.mrb[80].mxu0 }
 0x1a3   : > { %v17283_v52 = vadd.f32 %v14314_v1, %v16824_v19  ;;  %v2719_v43 = vpop.f32.mrb[81].mxu0  ;;  %v17285_v3 = vpop.f32.mrb[80].mxu1  ;;  %v24388_v19 = vld [vmem:[#allocation41_spill] sm:$0xff]  ;;  %v24389_v1 = vld [vmem:[#allocation31_spill] sm:$0xff] }
 0x1a4   : > { %24383 = vst [vmem:[#allocation90_spill] sm:$0xff] %v17285_v3  ;;  %v17288_v37 = vadd.f32 %v2719_v43, %v16829_v60  ;;  %v14315_v10 = vpop.f32.mrb[82].mxu0  ;;  %v17290_v11 = vpop.f32.mrb[81].mxu1  ;;  %v24391_v43 = vld [vmem:[#allocation32_spill] sm:$0xff] }
 0x1a5   : > { %24382 = vst [vmem:[#allocation89_spill] sm:$0xff] %v17283_v52  ;;  %24385 = vst [vmem:[#allocation92_spill] sm:$0xff] %v17290_v11  ;;  %v2722_v26 = vpop.f32.mrb[83].mxu0  ;;  %v14403_v51 = vpop.f32.mrb[82].mxu1  ;;  %v24390_v52 = vunpack.c.h.bf16 %v24389_v1  ;;  %v24392_v10 = vunpack.c.l.bf16 %v24391_v43  ;;  %v24394_v11 = vld [vmem:[#allocation43_spill] sm:$0xff] }
 0x1a6   : > { %24384 = vst [vmem:[#allocation91_spill] sm:$0xff] %v17288_v37  ;;  %v17293_v50 = vadd.f32 %v2722_v26, %v16844_v21  ;;  %v17295_v57 = vpop.f32.mrb[83].mxu1  ;;  %v24395_v21 = vunpack.c.l.bf16 %v24389_v1 }
 0x1a7   : > { %24387 = vst [vmem:[#allocation94_spill] sm:$0xff] %v17295_v57  ;;  %14525 = vmatmul.mubr.bf16.gmra.mrb[188].mxu0 %v16786_v5  ;;  %v757_v60 = vrot.slane %v24390_v52, 2  ;;  %v17304_v37 = vrot.slane %v24392_v10, 2 }
 0x1a8   : > { %24386 = vst [vmem:[#allocation93_spill] sm:$0xff] %v17293_v50  ;;  %14613 = vmatmul.mubr.bf16.gmra.mrb[188].mxu1 %v24388_v19  ;;  %14528 = vmatprep.mubr.bf16.mxu0 %v16791_v49  ;;  %v17309_v26 = vrot.slane %v24395_v21, 2  ;;  %v24396_v50 = vld [vmem:[#allocation40_spill] sm:$0xff]  ;;  %v24399_v49 = vld [vmem:[#allocation42_spill] sm:$0xff] }
 0x1a9   : > { %24393 = vst [vmem:[#allocation41_spill] sm:$0xff] %v17304_v37  ;;  %14616 = vmatprep.mubr.bf16.mxu1 %v24394_v11  ;;  %v822_v1 = vsel %vm23878_vm1, %v757_v60, %v17304_v37 }
 0x1aa   : > { %v14318_v51 = vpop.f32.mrb[84].mxu0 }
 0x1ab   : > { %v17312_v5 = vadd.f32 %v14318_v51, %v24396_v50  ;;  %v2735_v57 = vpop.f32.mrb[85].mxu0  ;;  %v17314_v3 = vpop.f32.mrb[84].mxu1  ;;  %v823_v50 = vsel %vm23878_vm1, %v17309_v26, %v757_v60  ;;  %v24402_v51 = vld [vmem:[#allocation45_spill] sm:$0xff]  ;;  %v24412_v60 = vld [vmem:[#allocation50_spill] sm:$0xff] }
 0x1ac   : > { %24398 = vst [vmem:[#allocation32_spill] sm:$0xff] %v17314_v3  ;;  %v17317_v34 = vadd.f32 %v2735_v57, %v24399_v49  ;;  %v14319_v52 = vpop.f32.mrb[86].mxu0  ;;  %v17319_v29 = vpop.f32.mrb[85].mxu1  ;;  %v17332_v57 = vpack.c.bf16 %v822_v1, %v823_v50  ;;  %v24406_v49 = vld [vmem:[#allocation48_spill] sm:$0xff]  ;;  %v24415_v50 = vld [vmem:[#allocation47_spill] sm:$0xff] }
 0x1ad   : > { %24397 = vst [vmem:[#allocation31_spill] sm:$0xff] %v17312_v5  ;;  %24401 = vst [vmem:[#allocation40_spill] sm:$0xff] %v17319_v29  ;;  %v2738_v10 = vpop.f32.mrb[87].mxu0  ;;  %v14407_v15 = vpop.f32.mrb[86].mxu1  ;;  %v24409_v29 = vld [vmem:[#allocation34_spill] sm:$0xff] }
 0x1ae   : > { %24400 = vst [vmem:[#allocation43_spill] sm:$0xff] %v17317_v34  ;;  %v17328_v21 = vadd.f32 %v2738_v10, %v24402_v51  ;;  %v17330_v5 = vpop.f32.mrb[87].mxu1  ;;  %24405 = vst [vmem:[#allocation95_spill] sm:$0xff] %v17332_v57  ;;  %v24407_v15 = vld [vmem:[#allocation33_spill] sm:$0xff]  ;;  %v24410_v3 = vunpack.c.l.bf16 %v24409_v29 }
 0x1af   : > { %24404 = vst [vmem:[#allocation45_spill] sm:$0xff] %v17330_v5  ;;  %14529 = vmatmul.mubr.bf16.gmra.mrb[192].mxu0 %v16826_v22  ;;  %v24408_v52 = vunpack.c.h.bf16 %v24407_v15  ;;  %v24413_v51 = vunpack.c.l.bf16 %v24407_v15 }
 0x1b0   : > { %24403 = vst [vmem:[#allocation42_spill] sm:$0xff] %v17328_v21  ;;  %14617 = vmatmul.mubr.bf16.gmra.mrb[192].mxu1 %v24406_v49  ;;  %14532 = vmatprep.mubr.bf16.mxu0 %v16831_v27  ;;  %v17341_v31 = vrot.slane %v24410_v3, 2  ;;  %v24418_v27 = vld [vmem:[#allocation49_spill] sm:$0xff] }
 0x1b1   : > { %v761_v34 = vrot.slane %v24408_v52, 2  ;;  %14620 = vmatprep.mubr.bf16.mxu1 %v24412_v60  ;;  %v17346_v1 = vrot.slane %v24413_v51, 2  ;;  %v24421_v51 = vld [vmem:[#allocation52_spill] sm:$0xff] }
 0x1b2   : > { %24411 = vst [vmem:[#allocation48_spill] sm:$0xff] %v17341_v31  ;;  %v14322_v10 = vpop.f32.mrb[88].mxu0 }
 0x1b3   : > { %24414 = vst [vmem:[#allocation33_spill] sm:$0xff] %v17346_v1  ;;  %v17349_v22 = vadd.f32 %v14322_v10, %v24415_v50  ;;  %v2751_v21 = vpop.f32.mrb[89].mxu0  ;;  %v17351_v5 = vpop.f32.mrb[88].mxu1  ;;  %v818_v15 = vsel %vm23878_vm1, %v761_v34, %v17341_v31  ;;  %v819_v10 = vsel %vm23878_vm1, %v17346_v1, %v761_v34  ;;  %v24431_v34 = vld [vmem:[#allocation58_spill] sm:$0xff] }
 0x1b4   : > { %24417 = vst [vmem:[#allocation47_spill] sm:$0xff] %v17351_v5  ;;  %v17354_v57 = vadd.f32 %v2751_v21, %v24418_v27  ;;  %v14323_v52 = vpop.f32.mrb[90].mxu0  ;;  %v17356_v29 = vpop.f32.mrb[89].mxu1  ;;  %v17369_v21 = vpack.c.bf16 %v818_v15, %v819_v10  ;;  %v24425_v27 = vld [vmem:[#allocation55_spill] sm:$0xff]  ;;  %v24434_v10 = vld [vmem:[#allocation54_spill] sm:$0xff] }
 0x1b5   : > { %24416 = vst [vmem:[#allocation50_spill] sm:$0xff] %v17349_v22  ;;  %24420 = vst [vmem:[#allocation96_spill] sm:$0xff] %v17356_v29  ;;  %v2754_v3 = vpop.f32.mrb[91].mxu0  ;;  %v14411_v41 = vpop.f32.mrb[90].mxu1  ;;  %v24428_v29 = vld [vmem:[#allocation36_spill] sm:$0xff] }
 0x1b6   : > { %24419 = vst [vmem:[#allocation49_spill] sm:$0xff] %v17354_v57  ;;  %v17365_v50 = vadd.f32 %v2754_v3, %v24421_v51  ;;  %v17367_v22 = vpop.f32.mrb[91].mxu1  ;;  %24424 = vst [vmem:[#allocation98_spill] sm:$0xff] %v17369_v21  ;;  %v24426_v41 = vld [vmem:[#allocation35_spill] sm:$0xff]  ;;  %v24429_v5 = vunpack.c.l.bf16 %v24428_v29 }
 0x1b7   : > { %24423 = vst [vmem:[#allocation97_spill] sm:$0xff] %v17367_v22  ;;  %14533 = vmatmul.mubr.bf16.gmra.mrb[196].mxu0 %v24388_v19  ;;  %v24427_v52 = vunpack.c.h.bf16 %v24426_v41  ;;  %v24432_v51 = vunpack.c.l.bf16 %v24426_v41 }
 0x1b8   : > { %24422 = vst [vmem:[#allocation52_spill] sm:$0xff] %v17365_v50  ;;  %14621 = vmatmul.mubr.bf16.gmra.mrb[196].mxu1 %v24425_v27  ;;  %14536 = vmatprep.mubr.bf16.mxu0 %v24394_v11  ;;  %v17378_v31 = vrot.slane %v24429_v5, 2  ;;  %v24437_v11 = vld [vmem:[#allocation57_spill] sm:$0xff] }
 0x1b9   : > { %v765_v57 = vrot.slane %v24427_v52, 2  ;;  %14624 = vmatprep.mubr.bf16.mxu1 %v24431_v34  ;;  %v17383_v15 = vrot.slane %v24432_v51, 2  ;;  %v24440_v51 = vld [vmem:[#allocation60_spill] sm:$0xff] }
 0x1ba   : > { %24430 = vst [vmem:[#allocation55_spill] sm:$0xff] %v17378_v31  ;;  %v14326_v3 = vpop.f32.mrb[92].mxu0 }
 0x1bb   : > { %24433 = vst [vmem:[#allocation35_spill] sm:$0xff] %v17383_v15  ;;  %v17386_v19 = vadd.f32 %v14326_v3, %v24434_v10  ;;  %v2767_v50 = vpop.f32.mrb[93].mxu0  ;;  %v17388_v22 = vpop.f32.mrb[92].mxu1  ;;  %v814_v41 = vsel %vm23878_vm1, %v765_v57, %v17378_v31  ;;  %v815_v3 = vsel %vm23878_vm1, %v17383_v15, %v765_v57  ;;  %v24458_v31 = vunpack.c.l.bf16 %v17114_v42 }
 0x1bc   : > { %24436 = vst [vmem:[#allocation54_spill] sm:$0xff] %v17388_v22  ;;  %v17391_v21 = vadd.f32 %v2767_v50, %v24437_v11  ;;  %v14327_v52 = vpop.f32.mrb[94].mxu0  ;;  %v17393_v29 = vpop.f32.mrb[93].mxu1  ;;  %v17406_v50 = vpack.c.bf16 %v814_v41, %v815_v3  ;;  %v24455_v11 = vld [vmem:[#allocation62_spill] sm:$0xff] }
 0x1bd   : > { %24435 = vst [vmem:[#allocation58_spill] sm:$0xff] %v17386_v19  ;;  %24439 = vst [vmem:[#allocation99_spill] sm:$0xff] %v17393_v29  ;;  %v2770_v5 = vpop.f32.mrb[95].mxu0  ;;  %v14415_v58 = vpop.f32.mrb[94].mxu1  ;;  %v24444_v52 = vld [vmem:[#allocation37_spill] sm:$0xff]  ;;  %v24446_v29 = vld [vmem:[#allocation38_spill] sm:$0xff] }
 0x1be   : > { %24438 = vst [vmem:[#allocation57_spill] sm:$0xff] %v17391_v21  ;;  %v17402_v10 = vadd.f32 %v2770_v5, %v24440_v51  ;;  %v17404_v19 = vpop.f32.mrb[95].mxu1  ;;  %24443 = vst [vmem:[#allocation101_spill] sm:$0xff] %v17406_v50  ;;  %v24445_v21 = vunpack.c.h.bf16 %v24444_v52  ;;  %v24447_v5 = vunpack.c.l.bf16 %v24446_v29  ;;  %v545_v15 = vrot.slane %v24458_v31, 1 }
 0x1bf   : > { %24442 = vst [vmem:[#allocation100_spill] sm:$0xff] %v17404_v19  ;;  %14537 = vmatmul.mubr.bf16.gmra.mrb[200].mxu0 %v24406_v49  ;;  %v24450_v49 = vunpack.c.l.bf16 %v24444_v52  ;;  %v24452_v19 = vld [vmem:[#allocation61_spill] sm:$0xff] }
 0x1c0   : > { %24441 = vst [vmem:[#allocation60_spill] sm:$0xff] %v17402_v10  ;;  %14625 = vmatmul.mubr.bf16.gmra.mrb[200].mxu1 %v16990_v20  ;;  %14540 = vmatprep.mubr.bf16.mxu0 %v24412_v60  ;;  %v769_v57 = vrot.slane %v24445_v21, 2  ;;  %v17417_v51 = vrot.slane %v24447_v5, 2  ;;  %v24449_v10 = vld [vmem:[#allocation63_spill] sm:$0xff]  ;;  %v24457_v5 = vunpack.c.h.bf16 %v17002_v32 }
 0x1c1   : > { %14628 = vmatprep.mubr.bf16.mxu1 %v24449_v10  ;;  %v17422_v3 = vrot.slane %v24450_v49, 2  ;;  %v24465_v32 = vld [vmem:[#allocation39_spill] sm:$0xff] }
 0x1c2   : > { %24448 = vst [vmem:[#allocation37_spill] sm:$0xff] %v17417_v51  ;;  %v14330_v41 = vpop.f32.mrb[96].mxu0  ;;  %v544_v29 = vrot.slane %v24457_v5, 1 }
 0x1c3   : > { %24451 = vst [vmem:[#allocation63_spill] sm:$0xff] %v17422_v3  ;;  %v17425_v60 = vadd.f32 %v14330_v41, %v24452_v19  ;;  %v2783_v58 = vpop.f32.mrb[97].mxu0  ;;  %v17427_v22 = vpop.f32.mrb[96].mxu1  ;;  %v810_v19 = vsel %vm23878_vm1, %v769_v57, %v17417_v51 }
 0x1c4   : > { %24454 = vst [vmem:[#allocation102_spill] sm:$0xff] %v17427_v22  ;;  %v17430_v50 = vadd.f32 %v2783_v58, %v24455_v11  ;;  %v14331_v21 = vpop.f32.mrb[98].mxu0  ;;  %v17436_v37 = vpop.f32.mrb[97].mxu1  ;;  %v811_v58 = vsel %vm23878_vm1, %v17422_v3, %v769_v57  ;;  %v24460_v11 = vld [vmem:[#allocation65_spill] sm:$0xff]  ;;  %v551_v31 = vsel %vm23879_vm0, %v544_v29, %v545_v15 }
 0x1c5   : > { %24453 = vst [vmem:[#allocation61_spill] sm:$0xff] %v17425_v60  ;;  %24459 = vst [vmem:[#allocation103_spill] sm:$0xff] %v17436_v37  ;;  %v2786_v52 = vpop.f32.mrb[99].mxu0  ;;  %v14419_v49 = vpop.f32.mrb[98].mxu1  ;;  %v17449_v5 = vpack.c.bf16 %v810_v19, %v811_v58  ;;  %v24470_v58 = vld [vmem:[#allocation67_spill] sm:$0xff]  ;;  %v24471_v60 = vunpack.c.l.bf16 %v24465_v32 }
 0x1c6   : > { %24456 = vst [vmem:[#allocation62_spill] sm:$0xff] %v17430_v50  ;;  %v17445_v41 = vadd.f32 %v2786_v52, %v24460_v11  ;;  %v17447_v21 = vpop.f32.mrb[99].mxu1  ;;  %v24464_v49 = vld [vmem:[#allocation68_spill] sm:$0xff]  ;;  %v24466_v52 = vunpack.c.h.bf16 %v24465_v32 }
 0x1c7   : > { %24462 = vst [vmem:[#allocation104_spill] sm:$0xff] %v17447_v21  ;;  %24463 = vst [vmem:[#allocation105_spill] sm:$0xff] %v17449_v5  ;;  %14541 = vmatmul.mubr.bf16.gmra.mrb[204].mxu0 %v24425_v27  ;;  %v552_v57 = vsel %vm23879_vm0, %v24464_v49, %v544_v29  ;;  %v24473_v21 = vld [vmem:[#allocation66_spill] sm:$0xff]  ;;  %v24475_v29 = vunpack.c.h.bf16 %v17114_v42  ;;  %v24486_v42 = vunpack.c.l.bf16 %v17008_v25 }
 0x1c8   : > { %24461 = vst [vmem:[#allocation65_spill] sm:$0xff] %v17445_v41  ;;  %14629 = vmatmul.mubr.bf16.gmra.mrb[204].mxu1 %v17028_v18  ;;  %14544 = vmatprep.mubr.bf16.mxu0 %v24431_v34  ;;  %v773_v11 = vrot.slane %v24466_v52, 2  ;;  %v24467_v41 = vld [vmem:[#allocation44_spill] sm:$0xff]  ;;  %v17468_v34 = vrot.slane %v24471_v60, 2  ;;  %v668_v5 = vpack.c.bf16 %v551_v31, %v552_v57  ;;  %v24485_v57 = vunpack.c.h.bf16 %v17005_v39  ;;  %v24491_v39 = vld [vmem:[#allocation46_spill] sm:$0xff] }
 0x1c9   : > { %v24468_v50 = vunpack.c.l.bf16 %v24467_v41  ;;  %14632 = vmatprep.mubr.bf16.mxu1 %v24470_v58  ;;  %v546_v49 = vrot.slane %v24475_v29, 1  ;;  %v24477_v41 = vld [vmem:[#allocation69_spill] sm:$0xff] }
 0x1ca   : > { %v14334_v27 = vpop.f32.mrb[100].mxu0  ;;  %24472 = vst [vmem:[#allocation39_spill] sm:$0xff] %v17468_v34  ;;  %v24479_v58 = vld [vmem:[#allocation9_spill] sm:$0xff]  ;;  %v711_v29 = vrot.slane %v24485_v57, 2 }
 0x1cb   : > { %v17463_v19 = vrot.slane %v24468_v50, 2  ;;  %v17471_v37 = vadd.f32 %v14334_v27, %v24473_v21  ;;  %v2799_v22 = vpop.f32.mrb[101].mxu0  ;;  %v17475_v52 = vpop.f32.mrb[100].mxu1  ;;  %v24480_v3 = vunpack.c.l.bf16 %v24479_v58  ;;  %v24481_v32 = vunpack.c.h.bf16 %v24479_v58  ;;  %v24487_v58 = vld [vmem:[#allocation71_spill] sm:$0xff] }
 0x1cc   : > { %24476 = vst [vmem:[#allocation66_spill] sm:$0xff] %v17475_v52  ;;  %v17478_v50 = vadd.f32 %v2799_v22, %v24477_v41  ;;  %v14335_v51 = vpop.f32.mrb[102].mxu0  ;;  %v24483_v21 = vunpack.c.l.bf16 %v24482_v53  ;;  %v712_v22 = vrot.slane %v24486_v42, 2  ;;  %v24492_v42 = vunpack.c.h.bf16 %v24491_v39 }
 0x1cd   : > { %24469 = vst [vmem:[#allocation68_spill] sm:$0xff] %v17463_v19  ;;  %24474 = vst [vmem:[#allocation67_spill] sm:$0xff] %v17471_v37  ;;  %v714_v1 = vrot.slane %v24480_v3, 2  ;;  %v715_v60 = vrot.slane %v24481_v32, 2  ;;  %v17486_v37 = vpop.f32.mrb[101].mxu1  ;;  %v2802_v31 = vpop.f32.mrb[103].mxu0  ;;  %v806_v51 = vsel %vm23878_vm1, %v773_v11, %v17463_v19  ;;  %v807_v3 = vsel %vm23878_vm1, %v17468_v34, %v773_v11 }
 0x1ce   : > { %24478 = vst [vmem:[#allocation69_spill] sm:$0xff] %v17478_v50  ;;  %v716_v27 = vrot.slane %v24483_v21, 2  ;;  %24484 = vst [vmem:[#allocation9_spill] sm:$0xff] %v17486_v37  ;;  %v14423_v41 = vpop.f32.mrb[102].mxu1  ;;  %v17499_v32 = vadd.f32 %v2802_v31, %v24487_v58  ;;  %v17503_v50 = vpack.c.bf16 %v806_v51, %v807_v3  ;;  %v777_v57 = vrot.slane %v24492_v42, 2  ;;  %v24495_v31 = vld [vmem:[#allocation70_spill] sm:$0xff] }
 0x1cf   : > { %v17501_v21 = vpop.f32.mrb[103].mxu1  ;;  %14545 = vmatmul.mubr.bf16.gmra.mrb[208].mxu0 %v16990_v20  ;;  %v24493_v41 = vld [vmem:[#allocation51_spill] sm:$0xff]  ;;  %v550_v11 = vsel %vm23879_vm0, %v545_v15, %v546_v49  ;;  %v629_v51 = vsel %vm23879_vm0, %v546_v49, %v24495_v31  ;;  %v865_v3 = vsel %vm23878_vm1, %v714_v1, %v715_v60  ;;  %v24496_v15 = vunpack.c.l.bf16 %v24491_v39 }
 0x1d0   : > { %24488 = vst [vmem:[#allocation10_spill] sm:$0xff] %v17499_v32  ;;  %24489 = vst [vmem:[#allocation71_spill] sm:$0xff] %v17501_v21  ;;  %v24494_v37 = vunpack.c.l.bf16 %v24493_v41  ;;  %14633 = vmatmul.mubr.bf16.gmra.mrb[208].mxu1 %v17072_v9  ;;  %14548 = vmatprep.mubr.bf16.mxu0 %v24449_v10  ;;  %v864_v20 = vsel %vm23878_vm1, %v715_v60, %v716_v27  ;;  %v869_v9 = vsel %vm23878_vm1, %v17143_v59, %v711_v29  ;;  %v24500_v21 = vld [vmem:[#allocation11_spill] sm:$0xff] }
 0x1d1   : > { %24490 = vst [vmem:[#allocation106_spill] sm:$0xff] %v17503_v50  ;;  %14636 = vmatprep.mubr.bf16.mxu1 %v668_v5  ;;  %v17530_v58 = vrot.slane %v24496_v15, 2  ;;  %v24497_v5 = vunpack.c.h.bf16 %v24482_v53  ;;  %v24498_v42 = vunpack.c.h.bf16 %v17008_v25  ;;  %v24501_v50 = vunpack.c.l.bf16 %v24500_v21 }
 0x1d2   : > { %v17510_v52 = vrot.slane %v24494_v37, 2  ;;  %v868_v37 = vsel %vm23878_vm1, %v711_v29, %v712_v22  ;;  %v14338_v10 = vpop.f32.mrb[104].mxu0  ;;  %v669_v39 = vpack.c.bf16 %v629_v51, %v550_v11  ;;  %v873_v15 = vpack.c.bf16 %v864_v20, %v865_v3  ;;  %v24506_v20 = vld [vmem:[#allocation53_spill] sm:$0xff] }
 0x1d3   : > { %v717_v49 = vrot.slane %v24497_v5, 2  ;;  %v713_v31 = vrot.slane %v24498_v42, 2  ;;  %v17537_v60 = vadd.f32 %v14338_v10, %v17070_v62  ;;  %v2815_v32 = vpop.f32.mrb[105].mxu0  ;;  %v718_v41 = vrot.slane %v24501_v50, 2  ;;  %v17541_v19 = vpop.f32.mrb[104].mxu1  ;;  %v24503_v10 = vld [vmem:[#allocation13_spill] sm:$0xff] }
 0x1d4   : > { %v17544_v59 = vadd.f32 %v2815_v32, %v17076_v30  ;;  %v14339_v29 = vpop.f32.mrb[106].mxu0  ;;  %v871_v53 = vpack.c.bf16 %v868_v37, %v869_v9  ;;  %v17546_v5 = vpop.f32.mrb[105].mxu1  ;;  %v24502_v42 = vunpack.c.h.bf16 %v24500_v21  ;;  %v802_v50 = vsel %vm23878_vm1, %v777_v57, %v17510_v52  ;;  %v24508_v9 = vld [vmem:[#allocation56_spill] sm:$0xff] }
 0x1d5   : > { %24499 = vst [vmem:[#allocation46_spill] sm:$0xff] %v17537_v60  ;;  %v2818_v25 = vpop.f32.mrb[107].mxu0  ;;  %v24504_v60 = vunpack.c.l.bf16 %v24503_v10  ;;  %v14427_v54 = vpop.f32.mrb[106].mxu1  ;;  %v803_v30 = vsel %vm23878_vm1, %v17530_v58, %v777_v57  ;;  %v863_v21 = vsel %vm23878_vm1, %v716_v27, %v717_v49  ;;  %v866_v57 = vsel %vm23878_vm1, %v713_v31, %v714_v1 }
 0x1d6   : > { %v719_v62 = vrot.slane %v24502_v42, 2  ;;  %v17559_v32 = vadd.f32 %v2818_v25, %v17078_v23  ;;  %v17561_v11 = vpop.f32.mrb[107].mxu1  ;;  %v17563_v51 = vpack.c.bf16 %v802_v50, %v803_v30  ;;  %v862_v54 = vsel %vm23878_vm1, %v717_v49, %v718_v41 }
 0x1d7   : > { %v720_v34 = vrot.slane %v24504_v60, 2  ;;  %14549 = vmatmul.mubr.bf16.gmra.mrb[212].mxu0 %v17028_v18  ;;  %v867_v23 = vsel %vm23878_vm1, %v712_v22, %v713_v31  ;;  %v24507_v3 = vunpack.c.h.bf16 %v24506_v20  ;;  %v24509_v60 = vunpack.c.l.bf16 %v24508_v9 }
 0x1d8   : > { %24505 = vst [vmem:[#allocation70_spill] sm:$0xff] %v17559_v32  ;;  %14637 = vmatmul.mubr.bf16.gmra.mrb[212].mxu1 %v669_v39  ;;  %14656 = vmatprep.mubr.bf16.mxu0 %v873_v15  ;;  %v861_v27 = vsel %vm23878_vm1, %v718_v41, %v719_v62  ;;  %v24510_v1 = vunpack.c.l.bf16 %v24506_v20  ;;  %v874_v25 = vpack.c.bf16 %v862_v54, %v863_v21  ;;  %v24511_v41 = vunpack.c.h.bf16 %v24503_v10  ;;  %v24512_v20 = vld [vmem:[#allocation14_spill] sm:$0xff] }
 0x1d9   : > { %v781_v37 = vrot.slane %v24507_v3, 2  ;;  %v17578_v18 = vrot.slane %v24509_v60, 2  ;;  %14744 = vmatprep.mubr.bf16.mxu1 %v871_v53  ;;  %v860_v29 = vsel %vm23878_vm1, %v719_v62, %v720_v34  ;;  %v872_v42 = vpack.c.bf16 %v866_v57, %v867_v23  ;;  %v24515_v57 = vld [vmem:[#allocation15_spill] sm:$0xff] }
 0x1da   : > { %v14342_v49 = vpop.f32.mrb[108].mxu0  ;;  %v17586_v39 = vrot.slane %v24510_v1, 2  ;;  %v17596_v3 = vpack.c.bf16 %v860_v29, %v861_v27  ;;  %v721_v62 = vrot.slane %v24511_v41, 2  ;;  %v24513_v60 = vunpack.c.l.bf16 %v24512_v20 }
 0x1db   : > { %v17589_v22 = vadd.f32 %v14342_v49, %v17087_v38  ;;  %v2831_v31 = vpop.f32.mrb[109].mxu0  ;;  %v17591_v50 = vpop.f32.mrb[108].mxu1  ;;  %v24514_v54 = vunpack.c.h.bf16 %v24512_v20  ;;  %v24516_v23 = vunpack.c.l.bf16 %v24515_v57  ;;  %v798_v29 = vsel %vm23878_vm1, %v781_v37, %v17578_v18 }
 0x1dc   : > { %v17594_v53 = vadd.f32 %v2831_v31, %v17089_v14  ;;  %v14343_v30 = vpop.f32.mrb[110].mxu0  ;;  %v722_v1 = vrot.slane %v24513_v60, 2  ;;  %v17602_v32 = vpop.f32.mrb[109].mxu1  ;;  %v799_v10 = vsel %vm23878_vm1, %v17586_v39, %v781_v37  ;;  %v15840_v31 = vld [vmem:[%s23671_s2 + $0x208] sm:$0xff]   ;;  %v859_v37 = vsel %vm23878_vm1, %v720_v34, %v721_v62 }
 0x1dd   : > { %v2834_v38 = vpop.f32.mrb[111].mxu0  ;;  %v723_v21 = vrot.slane %v24514_v54, 2  ;;  %v724_v49 = vrot.slane %v24516_v23, 2  ;;  %v14431_v14 = vpop.f32.mrb[110].mxu1  ;;  %v17622_v41 = vpack.c.bf16 %v798_v29, %v799_v10  ;;  %v24522_v29 = vld [vmem:[#allocation16_spill] sm:$0xff] }
 0x1de   : > { %v17615_v27 = vadd.f32 %v2834_v38, %v17094_v36  ;;  %v17620_v30 = vpop.f32.mrb[111].mxu1  ;;  %v858_v20 = vsel %vm23878_vm1, %v721_v62, %v722_v1  ;;  %v24523_v10 = vunpack.c.l.bf16 %v24522_v29 }
 0x1df   : > { %14657 = vmatmul.mubr.bf16.vlgmr.msra.gmra.mrb[216].mxu0 %v874_v25  ;;  %v856_v36 = vsel %vm23878_vm1, %v723_v21, %v724_v49  ;;  %v857_v60 = vsel %vm23878_vm1, %v722_v1, %v723_v21  ;;  %v17640_v34 = vpack.c.bf16 %v858_v20, %v859_v37  ;;  %v24521_v1 = vunpack.c.h.bf16 %v24515_v57 }
 0x1e0   : > { %24517 = vst [vmem:[#allocation11_spill] sm:$0xff] %v17615_v27  ;;  %14745 = vmatmul.mubr.bf16.vlgmr.msra.gmra.mrb[216].mxu1 %v872_v42  ;;  %14817 = vmatpush3.bf16.msra.mxu0 %v17191_v0  ;;  %v15841_v42 = vld [vmem:[%s23671_s2 + $0x210] sm:$0xff]   ;;  %v17647_v14 = vpack.c.bf16 %v856_v36, %v857_v60  ;;  %v726_v27 = vrot.slane %v24523_v10, 2  ;;  %v24525_v20 = vunpack.c.h.bf16 %v24522_v29  ;;  %v24528_v36 = vld [vmem:[#allocation73_spill] sm:$0xff] }
 0x1e1   : > { %14660 = vmatprep.mubr.bf16.mxu0 %v17596_v3  ;;  %14748 = vmatprep.mubr.bf16.mxu1 %v873_v15  ;;  %v725_v21 = vrot.slane %v24521_v1, 2 }
 0x1e2   : > { %v14346_v0 = vpop.f32.mrb[112].mxu0  ;;  %14818 = vmatprep.subr.bf16.mxu0 %v15840_v31  ;;  %v727_v37 = vrot.slane %v24525_v20, 2 }
 0x1e3   : > { %v17638_v38 = vadd.f32 %v14346_v0, %v17109_v61  ;;  %v2847_v54 = vpop.f32.mrb[113].mxu0  ;;  %v17642_v62 = vpop.f32.mrb[112].mxu1 }
 0x1e4   : > { %24519 = vst [vmem:[#allocation53_spill] sm:$0xff] %v17642_v62  ;;  %v17645_v15 = vadd.f32 %v2847_v54, %v17111_v33  ;;  %v14347_v23 = vpop.f32.mrb[114].mxu0  ;;  %14819 = vmatpush3.bf16.msra.mxu0 %v15840_v31  ;;  %v17653_v61 = vpop.f32.mrb[113].mxu1  ;;  %v15842_v31 = vld [vmem:[%s23671_s2 + $0x218] sm:$0xff]   ;;  %v853_v29 = vsel %vm23878_vm1, %v726_v27, %v727_v37 }
 0x1e5   : > { %24518 = vst [vmem:[#allocation13_spill] sm:$0xff] %v17638_v38  ;;  %24524 = vst [vmem:[#allocation14_spill] sm:$0xff] %v17653_v61  ;;  %v2850_v0 = vpop.f32.mrb[115].mxu0  ;;  %v24526_v38 = vld [vmem:[#allocation17_spill] sm:$0xff]  ;;  %14820 = vmatprep.subr.bf16.mxu0 %v15841_v42  ;;  %v14435_v54 = vpop.f32.mrb[114].mxu1  ;;  %v854_v23 = vsel %vm23878_vm1, %v725_v21, %v726_v27 }
 0x1e6   : > { %24520 = vst [vmem:[#allocation56_spill] sm:$0xff] %v17645_v15  ;;  %v24527_v62 = vunpack.c.l.bf16 %v24526_v38  ;;  %v17660_v60 = vadd.f32 %v2850_v0, %v24528_v36  ;;  %v17662_v57 = vpop.f32.mrb[115].mxu1 }
 0x1e7   : > { %24530 = vst [vmem:[#allocation16_spill] sm:$0xff] %v17662_v57  ;;  %14661 = vmatmul.mubr.bf16.gmra.mrb[220].mxu0 %v17640_v34 }
 0x1e8   : > { %v728_v33 = vrot.slane %v24527_v62, 2  ;;  %24529 = vst [vmem:[#allocation15_spill] sm:$0xff] %v17660_v60  ;;  %14749 = vmatmul.mubr.bf16.gmra.mrb[220].mxu1 %v874_v25  ;;  %14664 = vmatprep.mubr.bf16.mxu0 %v17647_v14  ;;  %v855_v62 = vsel %vm23878_vm1, %v724_v49, %v725_v21  ;;  %v15843_v25 = vld [vmem:[%s23671_s2 + $0x220] sm:$0xff]   ;;  %v24535_v60 = vld [vmem:[#allocation18_spill] sm:$0xff] }
 0x1e9   : > { %14752 = vmatprep.mubr.bf16.mxu1 %v17596_v3  ;;  %14821 = vmatpush3.bf16.msra.mxu0 %v15841_v42  ;;  %v17684_v49 = vpack.c.bf16 %v854_v23, %v855_v62  ;;  %v24534_v42 = vunpack.c.h.bf16 %v24526_v38  ;;  %v24536_v15 = vunpack.c.l.bf16 %v24535_v60  ;;  %v24538_v23 = vunpack.c.h.bf16 %v24535_v60  ;;  %v15844_v38 = vld [vmem:[%s23671_s2 + $0x228] sm:$0xff]  }
 0x1ea   : > { %v852_v1 = vsel %vm23878_vm1, %v727_v37, %v728_v33  ;;  %v14350_v10 = vpop.f32.mrb[116].mxu0  ;;  %14822 = vmatprep.subr.bf16.mxu0 %v15842_v31 }
 0x1eb   : > { %v17682_v0 = vadd.f32 %v14350_v10, %v17139_v16  ;;  %v2863_v20 = vpop.f32.mrb[117].mxu0  ;;  %v17686_v21 = vpop.f32.mrb[116].mxu1  ;;  %v17691_v27 = vpack.c.bf16 %v852_v1, %v853_v29  ;;  %v729_v37 = vrot.slane %v24534_v42, 2  ;;  %v730_v57 = vrot.slane %v24536_v15, 2  ;;  %v24539_v10 = vld [vmem:[#allocation19_spill] sm:$0xff] }
 0x1ec   : > { %24532 = vst [vmem:[#allocation73_spill] sm:$0xff] %v17686_v21  ;;  %v17689_v54 = vadd.f32 %v2863_v20, %v17145_v44  ;;  %v14351_v36 = vpop.f32.mrb[118].mxu0  ;;  %v17697_v61 = vpop.f32.mrb[117].mxu1  ;;  %v731_v62 = vrot.slane %v24538_v23, 2  ;;  %v24541_v20 = vld [vmem:[#allocation76_spill] sm:$0xff]  ;;  %v15845_v42 = vld [vmem:[%s23671_s2 + $0x230] sm:$0xff]  }
 0x1ed   : > { %24531 = vst [vmem:[#allocation17_spill] sm:$0xff] %v17682_v0  ;;  %24537 = vst [vmem:[#allocation18_spill] sm:$0xff] %v17697_v61  ;;  %v2866_v16 = vpop.f32.mrb[119].mxu0  ;;  %v24540_v0 = vunpack.c.l.bf16 %v24539_v10  ;;  %v14439_v44 = vpop.f32.mrb[118].mxu1  ;;  %14823 = vmatpush3.bf16.msra.mxu0 %v15842_v31  ;;  %v850_v15 = vsel %vm23878_vm1, %v729_v37, %v730_v57  ;;  %v851_v60 = vsel %vm23878_vm1, %v728_v33, %v729_v37 }
 0x1ee   : > { %24533 = vst [vmem:[#allocation107_spill] sm:$0xff] %v17689_v54  ;;  %v17704_v1 = vadd.f32 %v2866_v16, %v24541_v20  ;;  %v17706_v29 = vpop.f32.mrb[119].mxu1  ;;  %14824 = vmatprep.subr.bf16.mxu0 %v15843_v25  ;;  %v17729_v33 = vpack.c.bf16 %v850_v15, %v851_v60 }
 0x1ef   : > { %v732_v21 = vrot.slane %v24540_v0, 2  ;;  %24543 = vst [vmem:[#allocation76_spill] sm:$0xff] %v17706_v29  ;;  %14665 = vmatmul.mubr.bf16.gmra.mrb[224].mxu0 %v17684_v49  ;;  %v849_v0 = vsel %vm23878_vm1, %v730_v57, %v731_v62 }
 0x1f0   : > { %24542 = vst [vmem:[#allocation19_spill] sm:$0xff] %v17704_v1  ;;  %14753 = vmatmul.mubr.bf16.gmra.mrb[224].mxu1 %v17640_v34  ;;  %14668 = vmatprep.mubr.bf16.mxu0 %v17691_v27  ;;  %v24548_v1 = vld [vmem:[#allocation20_spill] sm:$0xff] }
 0x1f1   : > { %14756 = vmatprep.mubr.bf16.mxu1 %v17647_v14  ;;  %v848_v31 = vsel %vm23878_vm1, %v731_v62, %v732_v21  ;;  %14825 = vmatpush3.bf16.msra.mxu0 %v15843_v25  ;;  %v24547_v25 = vunpack.c.h.bf16 %v24539_v10  ;;  %v24549_v54 = vunpack.c.l.bf16 %v24548_v1  ;;  %v24550_v15 = vunpack.c.h.bf16 %v24548_v1 }
 0x1f2   : > { %v14354_v36 = vpop.f32.mrb[120].mxu0  ;;  %14826 = vmatprep.subr.bf16.mxu0 %v15844_v38  ;;  %v17736_v57 = vpack.c.bf16 %v848_v31, %v849_v0 }
 0x1f3   : > { %v17727_v16 = vadd.f32 %v14354_v36, %v17172_v13  ;;  %v2879_v23 = vpop.f32.mrb[121].mxu0  ;;  %v17731_v37 = vpop.f32.mrb[120].mxu1  ;;  %v733_v62 = vrot.slane %v24547_v25, 2  ;;  %v734_v29 = vrot.slane %v24549_v54, 2  ;;  %v735_v60 = vrot.slane %v24550_v15, 2  ;;  %v24551_v36 = vld [vmem:[#allocation21_spill] sm:$0xff] }
 0x1f4   : > { %24545 = vst [vmem:[#allocation109_spill] sm:$0xff] %v17731_v37  ;;  %v17734_v44 = vadd.f32 %v2879_v23, %v17174_v28  ;;  %v14355_v20 = vpop.f32.mrb[122].mxu0  ;;  %v17742_v61 = vpop.f32.mrb[121].mxu1  ;;  %v15846_v54 = vld [vmem:[%s23671_s2 + $0x238] sm:$0xff]  }
 0x1f5   : > { %24544 = vst [vmem:[#allocation108_spill] sm:$0xff] %v17727_v16  ;;  %v2882_v13 = vpop.f32.mrb[123].mxu0  ;;  %v24552_v16 = vunpack.c.l.bf16 %v24551_v36  ;;  %v14443_v28 = vpop.f32.mrb[122].mxu1  ;;  %14827 = vmatpush3.bf16.msra.mxu0 %v15844_v38  ;;  %v846_v10 = vsel %vm23878_vm1, %v733_v62, %v734_v29  ;;  %v845_v38 = vsel %vm23878_vm1, %v734_v29, %v735_v60 }
 0x1f6   : > { %24546 = vst [vmem:[#allocation110_spill] sm:$0xff] %v17734_v44  ;;  %v17749_v31 = vadd.f32 %v2882_v13, %v17179_v2  ;;  %v17751_v0 = vpop.f32.mrb[123].mxu1  ;;  %14828 = vmatprep.subr.bf16.mxu0 %v15845_v42  ;;  %v847_v2 = vsel %vm23878_vm1, %v732_v21, %v733_v62  ;;  %v24557_v28 = vunpack.c.h.bf16 %v24551_v36 }
 0x1f7   : > { %v736_v37 = vrot.slane %v24552_v16, 2  ;;  %14669 = vmatmul.mubr.bf16.gmra.mrb[228].mxu0 %v17729_v33  ;;  %v17771_v25 = vpack.c.bf16 %v846_v10, %v847_v2 }
 0x1f8   : > { %24553 = vst [vmem:[#allocation20_spill] sm:$0xff] %v17749_v31  ;;  %14757 = vmatmul.mubr.bf16.gmra.mrb[228].mxu1 %v17684_v49  ;;  %14672 = vmatprep.mubr.bf16.mxu0 %v17736_v57  ;;  %v737_v29 = vrot.slane %v24557_v28, 2 }
 0x1f9   : > { %14760 = vmatprep.mubr.bf16.mxu1 %v17691_v27  ;;  %v844_v1 = vsel %vm23878_vm1, %v735_v60, %v736_v37  ;;  %14829 = vmatpush3.bf16.msra.mxu0 %v15845_v42  ;;  %v24558_v42 = vld [vmem:[#allocation22_spill] sm:$0xff] }
 0x1fa   : > { %v14358_v16 = vpop.f32.mrb[124].mxu0  ;;  %14830 = vmatprep.subr.bf16.mxu0 %v15846_v54  ;;  %v17778_v15 = vpack.c.bf16 %v844_v1, %v845_v38  ;;  %v24559_v60 = vunpack.c.l.bf16 %v24558_v42  ;;  %v24560_v10 = vunpack.c.h.bf16 %v24558_v42 }
 0x1fb   : > { %v17769_v23 = vadd.f32 %v14358_v16, %v17193_v47  ;;  %v2895_v20 = vpop.f32.mrb[125].mxu0  ;;  %v17773_v13 = vpop.f32.mrb[124].mxu1  ;;  %v24561_v16 = vld [vmem:[#allocation23_spill] sm:$0xff] }
 0x1fc   : > { %24555 = vst [vmem:[#allocation111_spill] sm:$0xff] %v17773_v13  ;;  %v17776_v21 = vadd.f32 %v2895_v20, %v17195_v46  ;;  %v14359_v62 = vpop.f32.mrb[126].mxu0  ;;  %v738_v31 = vrot.slane %v24559_v60, 2  ;;  %v17784_v44 = vpop.f32.mrb[125].mxu1  ;;  %v739_v2 = vrot.slane %v24560_v10, 2  ;;  %v843_v20 = vsel %vm23878_vm1, %v736_v37, %v737_v29 }
 0x1fd   : > { %24554 = vst [vmem:[#allocation21_spill] sm:$0xff] %v17769_v23  ;;  %v2898_v47 = vpop.f32.mrb[127].mxu0  ;;  %v24562_v23 = vunpack.c.l.bf16 %v24561_v16  ;;  %v14447_v46 = vpop.f32.mrb[126].mxu1  ;;  %14831 = vmatpush3.bf16.msra.mxu0 %v15846_v54  ;;  %v24567_v10 = vunpack.c.h.bf16 %v24561_v16 }
 0x1fe   : > { %24556 = vst [vmem:[#allocation112_spill] sm:$0xff] %v17776_v21  ;;  %v17791_v1 = vadd.f32 %v2898_v47, %v17198_v8  ;;  %v17793_v38 = vpop.f32.mrb[127].mxu1  ;;  %v842_v36 = vsel %vm23878_vm1, %v737_v29, %v738_v31  ;;  %v841_v54 = vsel %vm23878_vm1, %v738_v31, %v739_v2 }
 0x1ff   : > { %v740_v13 = vrot.slane %v24562_v23, 2  ;;  %14673 = vmatmul.mubr.bf16.gmra.mrb[232].mxu0 %v17771_v25  ;;  %v17810_v42 = vpack.c.bf16 %v842_v36, %v843_v20  ;;  %v741_v46 = vrot.slane %v24567_v10, 2 }
 0x200   : > { %24563 = vst [vmem:[#allocation22_spill] sm:$0xff] %v17791_v1  ;;  %14761 = vmatmul.mubr.bf16.gmra.mrb[232].mxu1 %v17729_v33  ;;  %14676 = vmatprep.mubr.bf16.mxu0 %v17778_v15  ;;  %v24568_v1 = vld [vmem:[#allocation24_spill] sm:$0xff] }
 0x201   : > { %14764 = vmatprep.mubr.bf16.mxu1 %v17736_v57  ;;  %v840_v8 = vsel %vm23878_vm1, %v739_v2, %v740_v13  ;;  %v24569_v31 = vunpack.c.l.bf16 %v24568_v1  ;;  %v24571_v36 = vunpack.c.h.bf16 %v24568_v1  ;;  %v839_v1 = vsel %vm23878_vm1, %v740_v13, %v741_v46 }
 0x202   : > { %v14362_v23 = vpop.f32.mrb[128].mxu0  ;;  %v17817_v29 = vpack.c.bf16 %v840_v8, %v841_v54 }
 0x203   : > { %v17808_v62 = vadd.f32 %v14362_v23, %v17204_v56  ;;  %v2911_v28 = vpop.f32.mrb[129].mxu0  ;;  %v17812_v60 = vpop.f32.mrb[128].mxu1  ;;  %v742_v2 = vrot.slane %v24569_v31, 2  ;;  %v743_v20 = vrot.slane %v24571_v36, 2 }
 0x204   : > { %24565 = vst [vmem:[#allocation113_spill] sm:$0xff] %v17812_v60  ;;  %v17815_v47 = vadd.f32 %v2911_v28, %v17206_v17  ;;  %v14363_v37 = vpop.f32.mrb[130].mxu0  ;;  %v17823_v21 = vpop.f32.mrb[129].mxu1  ;;  %v24574_v28 = vld [vmem:[#allocation77_spill] sm:$0xff] }
 0x205   : > { %24564 = vst [vmem:[#allocation23_spill] sm:$0xff] %v17808_v62  ;;  %24570 = vst [vmem:[#allocation24_spill] sm:$0xff] %v17823_v21  ;;  %v2914_v56 = vpop.f32.mrb[131].mxu0  ;;  %v14451_v23 = vpop.f32.mrb[130].mxu1  ;;  %v24572_v62 = vld [vmem:[#allocation25_spill] sm:$0xff]  ;;  %v838_v16 = vsel %vm23878_vm1, %v741_v46, %v742_v2 }
 0x206   : > { %24566 = vst [vmem:[#allocation114_spill] sm:$0xff] %v17815_v47  ;;  %v24573_v60 = vunpack.c.l.bf16 %v24572_v62  ;;  %v17830_v37 = vadd.f32 %v2914_v56, %v24574_v28  ;;  %v17832_v8 = vpop.f32.mrb[131].mxu1  ;;  %v17849_v23 = vpack.c.bf16 %v838_v16, %v839_v1 }
 0x207   : > { %24576 = vst [vmem:[#allocation77_spill] sm:$0xff] %v17832_v8  ;;  %14677 = vmatmul.mubr.bf16.gmra.mrb[236].mxu0 %v17810_v42  ;;  %v24581_v8 = vld [vmem:[#allocation26_spill] sm:$0xff] }
 0x208   : > { %v744_v17 = vrot.slane %v24573_v60, 2  ;;  %24575 = vst [vmem:[#allocation25_spill] sm:$0xff] %v17830_v37  ;;  %14765 = vmatmul.mubr.bf16.gmra.mrb[236].mxu1 %v17771_v25  ;;  %14680 = vmatprep.mubr.bf16.mxu0 %v17817_v29  ;;  %v837_v60 = vsel %vm23878_vm1, %v742_v2, %v743_v20  ;;  %v24580_v37 = vunpack.c.h.bf16 %v24572_v62  ;;  %v24582_v2 = vunpack.c.l.bf16 %v24581_v8 }
 0x209   : > { %14768 = vmatprep.mubr.bf16.mxu1 %v17778_v15  ;;  %v24584_v16 = vunpack.c.h.bf16 %v24581_v8 }
 0x20a   : > { %v836_v54 = vsel %vm23878_vm1, %v743_v20, %v744_v17  ;;  %v14366_v10 = vpop.f32.mrb[132].mxu0  ;;  %v745_v47 = vrot.slane %v24580_v37, 2  ;;  %v746_v20 = vrot.slane %v24582_v2, 2 }
 0x20b   : > { %v17847_v31 = vadd.f32 %v14366_v10, %v17214_v35  ;;  %v2927_v56 = vpop.f32.mrb[133].mxu0  ;;  %v17851_v36 = vpop.f32.mrb[132].mxu1  ;;  %v17856_v46 = vpack.c.bf16 %v836_v54, %v837_v60  ;;  %v747_v1 = vrot.slane %v24584_v16, 2 }
 0x20c   : > { %24578 = vst [vmem:[#allocation116_spill] sm:$0xff] %v17851_v36  ;;  %v17854_v28 = vadd.f32 %v2927_v56, %v17216_v48  ;;  %v14367_v13 = vpop.f32.mrb[134].mxu0  ;;  %v17862_v21 = vpop.f32.mrb[133].mxu1  ;;  %v24587_v56 = vld [vmem:[#allocation78_spill] sm:$0xff]  ;;  %v834_v62 = vsel %vm23878_vm1, %v745_v47, %v746_v20  ;;  %v835_v37 = vsel %vm23878_vm1, %v744_v17, %v745_v47 }
 0x20d   : > { %24577 = vst [vmem:[#allocation115_spill] sm:$0xff] %v17847_v31  ;;  %24583 = vst [vmem:[#allocation26_spill] sm:$0xff] %v17862_v21  ;;  %v2930_v35 = vpop.f32.mrb[135].mxu0  ;;  %v14455_v10 = vpop.f32.mrb[134].mxu1  ;;  %v24585_v31 = vld [vmem:[#allocation27_spill] sm:$0xff]  ;;  %v833_v60 = vsel %vm23878_vm1, %v746_v20, %v747_v1 }
 0x20e   : > { %24579 = vst [vmem:[#allocation117_spill] sm:$0xff] %v17854_v28  ;;  %v24586_v36 = vunpack.c.l.bf16 %v24585_v31  ;;  %v17869_v13 = vadd.f32 %v2930_v35, %v24587_v56  ;;  %v17871_v54 = vpop.f32.mrb[135].mxu1  ;;  %v17888_v10 = vpack.c.bf16 %v834_v62, %v835_v37  ;;  %v24593_v28 = vunpack.c.h.bf16 %v24585_v31 }
 0x20f   : > { %24589 = vst [vmem:[#allocation78_spill] sm:$0xff] %v17871_v54  ;;  %14681 = vmatmul.mubr.bf16.gmra.mrb[240].mxu0 %v17849_v23 }
 0x210   : > { %v748_v48 = vrot.slane %v24586_v36, 2  ;;  %24588 = vst [vmem:[#allocation27_spill] sm:$0xff] %v17869_v13  ;;  %14769 = vmatmul.mubr.bf16.gmra.mrb[240].mxu1 %v17810_v42  ;;  %14684 = vmatprep.mubr.bf16.mxu0 %v17856_v46  ;;  %v749_v20 = vrot.slane %v24593_v28, 2 }
 0x211   : > { %14772 = vmatprep.mubr.bf16.mxu1 %v17817_v29 }
 0x212   : > { %v832_v8 = vsel %vm23878_vm1, %v747_v1, %v748_v48  ;;  %v14370_v36 = vpop.f32.mrb[136].mxu0  ;;  %v24594_v1 = vld [vmem:[#allocation28_spill] sm:$0xff]  ;;  %v831_v28 = vsel %vm23878_vm1, %v748_v48, %v749_v20 }
 0x213   : > { %v17886_v2 = vadd.f32 %v14370_v36, %v17224_v24  ;;  %v2943_v35 = vpop.f32.mrb[137].mxu0  ;;  %v17890_v16 = vpop.f32.mrb[136].mxu1  ;;  %v17897_v13 = vpack.c.bf16 %v832_v8, %v833_v60  ;;  %v24595_v54 = vunpack.c.l.bf16 %v24594_v1  ;;  %v24596_v62 = vunpack.c.h.bf16 %v24594_v1 }
 0x214   : > { %24591 = vst [vmem:[#allocation119_spill] sm:$0xff] %v17890_v16  ;;  %v17893_v56 = vadd.f32 %v2943_v35, %v17226_v6  ;;  %v14371_v47 = vpop.f32.mrb[138].mxu0  ;;  %v17895_v17 = vpop.f32.mrb[137].mxu1  ;;  %v24597_v16 = vld [vmem:[#allocation29_spill] sm:$0xff]  ;;  %v24599_v35 = vld [vmem:[#allocation79_spill] sm:$0xff] }
 0x215   : > { %24590 = vst [vmem:[#allocation118_spill] sm:$0xff] %v17886_v2  ;;  %v750_v24 = vrot.slane %v24595_v54, 2  ;;  %v2946_v36 = vpop.f32.mrb[139].mxu0  ;;  %v14459_v2 = vpop.f32.mrb[138].mxu1  ;;  %v751_v37 = vrot.slane %v24596_v62, 2  ;;  %v24598_v21 = vunpack.c.l.bf16 %v24597_v16 }
 0x216   : > { %24592 = vst [vmem:[#allocation120_spill] sm:$0xff] %v17893_v56  ;;  %v17908_v47 = vadd.f32 %v2946_v36, %v24599_v35  ;;  %v17910_v56 = vpop.f32.mrb[139].mxu1 }
 0x217   : > { %v752_v6 = vrot.slane %v24598_v21, 2  ;;  %24601 = vst [vmem:[#allocation29_spill] sm:$0xff] %v17910_v56  ;;  %14685 = vmatmul.mubr.bf16.gmra.mrb[244].mxu0 %v17888_v10  ;;  %v830_v31 = vsel %vm23878_vm1, %v749_v20, %v750_v24  ;;  %v829_v54 = vsel %vm23878_vm1, %v750_v24, %v751_v37 }
 0x218   : > { %24600 = vst [vmem:[#allocation28_spill] sm:$0xff] %v17908_v47  ;;  %14773 = vmatmul.mubr.bf16.gmra.mrb[244].mxu1 %v17849_v23  ;;  %14688 = vmatprep.mubr.bf16.mxu0 %v17897_v13  ;;  %v17927_v1 = vpack.c.bf16 %v830_v31, %v831_v28  ;;  %v24606_v47 = vunpack.c.h.bf16 %v24597_v16 }
 0x219   : > { %14776 = vmatprep.mubr.bf16.mxu1 %v17856_v46  ;;  %v828_v21 = vsel %vm23878_vm1, %v751_v37, %v752_v6  ;;  %v24607_v37 = vld [vmem:[#allocation30_spill] sm:$0xff] }
 0x21a   : > { %v14374_v8 = vpop.f32.mrb[140].mxu0  ;;  %v17936_v35 = vpack.c.bf16 %v828_v21, %v829_v54  ;;  %v753_v24 = vrot.slane %v24606_v47, 2  ;;  %v24608_v56 = vunpack.c.l.bf16 %v24607_v37  ;;  %v24609_v31 = vunpack.c.h.bf16 %v24607_v37 }
 0x21b   : > { %v17925_v60 = vadd.f32 %v14374_v8, %v17234_v40  ;;  %v2959_v2 = vpop.f32.mrb[141].mxu0  ;;  %v17929_v36 = vpop.f32.mrb[140].mxu1 }
 0x21c   : > { %24603 = vst [vmem:[#allocation121_spill] sm:$0xff] %v17929_v36  ;;  %v17932_v62 = vadd.f32 %v2959_v2, %v17236_v12  ;;  %v14375_v48 = vpop.f32.mrb[142].mxu0  ;;  %v17934_v20 = vpop.f32.mrb[141].mxu1  ;;  %v754_v40 = vrot.slane %v24608_v56, 2  ;;  %v755_v28 = vrot.slane %v24609_v31, 2  ;;  %v827_v56 = vsel %vm23878_vm1, %v752_v6, %v753_v24 }
 0x21d   : > { %24602 = vst [vmem:[#allocation79_spill] sm:$0xff] %v17925_v60  ;;  %24605 = vst [vmem:[#allocation123_spill] sm:$0xff] %v17934_v20  ;;  %v2962_v8 = vpop.f32.mrb[143].mxu0  ;;  %v14463_v60 = vpop.f32.mrb[142].mxu1 }
 0x21e   : > { %24604 = vst [vmem:[#allocation122_spill] sm:$0xff] %v17932_v62  ;;  %v17945_v36 = vadd.f32 %v2962_v8, %v17238_v55  ;;  %v17947_v12 = vpop.f32.mrb[143].mxu1  ;;  %v826_v16 = vsel %vm23878_vm1, %v753_v24, %v754_v40  ;;  %v824_v55 = vsel %vm23878_vm1, %v755_v28, %v17309_v26  ;;  %v825_v47 = vsel %vm23878_vm1, %v754_v40, %v755_v28 }
 0x21f   : > { %24611 = vst [vmem:[#allocation124_spill] sm:$0xff] %v17947_v12  ;;  %14689 = vmatmul.mubr.bf16.gmra.mrb[248].mxu0 %v17927_v1  ;;  %v17963_v48 = vpack.c.bf16 %v826_v16, %v827_v56  ;;  %v17966_v24 = vpack.c.bf16 %v824_v55, %v825_v47  ;;  %v24614_v26 = vunpack.c.h.bf16 %v24391_v43  ;;  %v24619_v43 = vld [vmem:[#allocation33_spill] sm:$0xff]  ;;  %v24621_v55 = vld [vmem:[#allocation82_spill] sm:$0xff] }
 0x220   : > { %24610 = vst [vmem:[#allocation30_spill] sm:$0xff] %v17945_v36  ;;  %14777 = vmatmul.mubr.bf16.gmra.mrb[248].mxu1 %v17888_v10  ;;  %14692 = vmatprep.mubr.bf16.mxu0 %v17936_v35 }
 0x221   : > { %14780 = vmatprep.mubr.bf16.mxu1 %v17897_v13  ;;  %24612 = vst [vmem:[#allocation125_spill] sm:$0xff] %v17963_v48  ;;  %24613 = vst [vmem:[#allocation126_spill] sm:$0xff] %v17966_v24  ;;  %v759_v12 = vrot.slane %v24614_v26, 2 }
 0x222   : > { %v14482_v21 = vpop.f32.mrb[144].mxu0 }
 0x223   : > { %v3686_v54 = vadd.f32 %v14482_v21, %v17247_v7  ;;  %v3677_v60 = vpop.f32.mrb[145].mxu0  ;;  %v14570_v2 = vpop.f32.mrb[144].mxu1  ;;  %v24615_v21 = vld [vmem:[#allocation80_spill] sm:$0xff] }
 0x224   : > { %v3678_v37 = vadd.f32 %v3677_v60, %v17252_v4  ;;  %v14483_v8 = vpop.f32.mrb[146].mxu0  ;;  %v4063_v6 = vpop.f32.mrb[145].mxu1  ;;  %v24617_v4 = vld [vmem:[#allocation81_spill] sm:$0xff]  ;;  %v24623_v60 = vld [vmem:[#allocation84_spill] sm:$0xff] }
 0x225   : > { %v4352_v31 = vadd.f32 %v14570_v2, %v3686_v54  ;;  %v3680_v36 = vpop.f32.mrb[147].mxu0  ;;  %v14571_v62 = vpop.f32.mrb[146].mxu1 }
 0x226   : > { %v3681_v40 = vadd.f32 %v3680_v36, %v17257_v63  ;;  %v4350_v28 = vadd.f32 %v4063_v6, %v3678_v37  ;;  %v4066_v7 = vpop.f32.mrb[147].mxu1  ;;  %v820_v63 = vsel %vm23878_vm1, %v759_v12, %v24619_v43  ;;  %v24620_v36 = vld [vmem:[#allocation41_spill] sm:$0xff]  ;;  %v24624_v6 = vld [vmem:[#allocation86_spill] sm:$0xff] }
 0x227   : > { %v17972_v20 = vadd.f32 %v4352_v31, %v24615_v21  ;;  %14693 = vmatmul.mubr.bf16.gmra.mrb[252].mxu0 %v17963_v48  ;;  %v821_v62 = vsel %vm23878_vm1, %v24620_v36, %v759_v12  ;;  %v24626_v43 = vld [vmem:[#allocation34_spill] sm:$0xff]  ;;  %v24628_v36 = vld [vmem:[#allocation88_spill] sm:$0xff] }
 0x228   : > { %v17976_v16 = vadd.f32 %v4350_v28, %v24617_v4  ;;  %v4351_v56 = vadd.f32 %v4066_v7, %v3681_v40  ;;  %14781 = vmatmul.mubr.bf16.gmra.mrb[252].mxu1 %v17927_v1  ;;  %14696 = vmatprep.mubr.bf16.mxu0 %v17966_v24  ;;  %v17992_v28 = vpack.c.bf16 %v820_v63, %v821_v62 }
 0x229   : > { %24616 = vst [vmem:[#allocation80_spill] sm:$0xff] %v17972_v20  ;;  %14784 = vmatprep.mubr.bf16.mxu1 %v17936_v35  ;;  %v24629_v20 = vld [vmem:[#allocation83_spill] sm:$0xff] }
 0x22a   : > { %24618 = vst [vmem:[#allocation81_spill] sm:$0xff] %v17976_v16  ;;  %v17988_v47 = vadd.f32 %v4351_v56, %v24621_v55  ;;  %v14486_v54 = vpop.f32.mrb[148].mxu0  ;;  %24625 = vst [vmem:[#allocation41_spill] sm:$0xff] %v17992_v28  ;;  %v24627_v16 = vunpack.c.h.bf16 %v24626_v43 }
 0x22b   : > { %v3702_v2 = vadd.f32 %v14486_v54, %v24623_v60  ;;  %v3693_v37 = vpop.f32.mrb[149].mxu0  ;;  %v14574_v8 = vpop.f32.mrb[148].mxu1  ;;  %v24631_v60 = vld [vmem:[#allocation95_spill] sm:$0xff] }
 0x22c   : > { %24622 = vst [vmem:[#allocation33_spill] sm:$0xff] %v17988_v47  ;;  %v3694_v31 = vadd.f32 %v3693_v37, %v24624_v6  ;;  %v14487_v26 = vpop.f32.mrb[150].mxu0  ;;  %v4079_v40 = vpop.f32.mrb[149].mxu1  ;;  %v763_v12 = vrot.slane %v24627_v16, 2  ;;  %v24632_v37 = vld [vmem:[#allocation85_spill] sm:$0xff]  ;;  %v24634_v16 = vld [vmem:[#allocation35_spill] sm:$0xff] }
 0x22d   : > { %v4356_v7 = vadd.f32 %v14574_v8, %v3702_v2  ;;  %v3696_v21 = vpop.f32.mrb[151].mxu0  ;;  %v14575_v4 = vpop.f32.mrb[150].mxu1  ;;  %v24635_v2 = vld [vmem:[#allocation48_spill] sm:$0xff]  ;;  %v24636_v8 = vld [vmem:[#allocation87_spill] sm:$0xff] }
 0x22e   : > { %v3697_v56 = vadd.f32 %v3696_v21, %v24628_v36  ;;  %v4354_v55 = vadd.f32 %v4079_v40, %v3694_v31  ;;  %v4082_v47 = vpop.f32.mrb[151].mxu1  ;;  %v816_v62 = vsel %vm23878_vm1, %v763_v12, %v24634_v16  ;;  %v24638_v40 = vld [vmem:[#allocation90_spill] sm:$0xff]  ;;  %v24639_v4 = vld [vmem:[#allocation92_spill] sm:$0xff] }
 0x22f   : > { %v17998_v54 = vadd.f32 %v4356_v7, %v24629_v20  ;;  %14697 = vmatmul.mubr.bf16.gmra.mrb[0].mxu0 %v24631_v60  ;;  %v817_v20 = vsel %vm23878_vm1, %v24635_v2, %v763_v12  ;;  %v24643_v2 = vld [vmem:[#allocation94_spill] sm:$0xff] }
 0x230   : > { %v18002_v6 = vadd.f32 %v4354_v55, %v24632_v37  ;;  %v4355_v63 = vadd.f32 %v4082_v47, %v3697_v56  ;;  %14785 = vmatmul.mubr.bf16.gmra.mrb[0].mxu1 %v17963_v48  ;;  %14700 = vmatprep.mubr.bf16.mxu0 %v17992_v28  ;;  %v18018_v55 = vpack.c.bf16 %v816_v62, %v817_v20  ;;  %v24644_v48 = vld [vmem:[#allocation89_spill] sm:$0xff] }
 0x231   : > { %24630 = vst [vmem:[#allocation82_spill] sm:$0xff] %v17998_v54  ;;  %14788 = vmatprep.mubr.bf16.mxu1 %v17966_v24  ;;  %v24641_v54 = vld [vmem:[#allocation36_spill] sm:$0xff]  ;;  %v24651_v20 = vld [vmem:[#allocation93_spill] sm:$0xff] }
 0x232   : > { %24633 = vst [vmem:[#allocation84_spill] sm:$0xff] %v18002_v6  ;;  %v18014_v31 = vadd.f32 %v4355_v63, %v24636_v8  ;;  %v14490_v26 = vpop.f32.mrb[152].mxu0  ;;  %24640 = vst [vmem:[#allocation34_spill] sm:$0xff] %v18018_v55  ;;  %v24642_v24 = vunpack.c.h.bf16 %v24641_v54 }
 0x233   : > { %v3718_v47 = vadd.f32 %v14490_v26, %v24638_v40  ;;  %v3709_v7 = vpop.f32.mrb[153].mxu0  ;;  %v14578_v21 = vpop.f32.mrb[152].mxu1  ;;  %v24646_v40 = vld [vmem:[#allocation98_spill] sm:$0xff] }
 0x234   : > { %24637 = vst [vmem:[#allocation86_spill] sm:$0xff] %v18014_v31  ;;  %v3710_v43 = vadd.f32 %v3709_v7, %v24639_v4  ;;  %v14491_v36 = vpop.f32.mrb[154].mxu0  ;;  %v4095_v56 = vpop.f32.mrb[153].mxu1  ;;  %v767_v12 = vrot.slane %v24642_v24, 2  ;;  %v24647_v7 = vld [vmem:[#allocation91_spill] sm:$0xff] }
 0x235   : > { %v4360_v37 = vadd.f32 %v14578_v21, %v3718_v47  ;;  %v3712_v16 = vpop.f32.mrb[155].mxu0  ;;  %v14579_v6 = vpop.f32.mrb[154].mxu1  ;;  %v24649_v24 = vld [vmem:[#allocation63_spill] sm:$0xff] }
 0x236   : > { %v3713_v63 = vadd.f32 %v3712_v16, %v24643_v2  ;;  %v4358_v8 = vadd.f32 %v4095_v56, %v3710_v43  ;;  %v4098_v31 = vpop.f32.mrb[155].mxu1  ;;  %v812_v54 = vsel %vm23878_vm1, %v767_v12, %v24649_v24  ;;  %v24650_v6 = vld [vmem:[#allocation55_spill] sm:$0xff]  ;;  %v24653_v43 = vld [vmem:[#allocation32_spill] sm:$0xff] }
 0x237   : > { %v18024_v26 = vadd.f32 %v4360_v37, %v24644_v48  ;;  %14701 = vmatmul.mubr.bf16.gmra.mrb[4].mxu0 %v24646_v40  ;;  %v813_v48 = vsel %vm23878_vm1, %v24650_v6, %v767_v12  ;;  %v24654_v37 = vld [vmem:[#allocation40_spill] sm:$0xff]  ;;  %v24657_v6 = vld [vmem:[#allocation45_spill] sm:$0xff] }
 0x238   : > { %v18028_v4 = vadd.f32 %v4358_v8, %v24647_v7  ;;  %v4359_v62 = vadd.f32 %v4098_v31, %v3713_v63  ;;  %14789 = vmatmul.mubr.bf16.gmra.mrb[4].mxu1 %v24631_v60  ;;  %14704 = vmatprep.mubr.bf16.mxu0 %v18018_v55  ;;  %v18044_v8 = vpack.c.bf16 %v812_v54, %v813_v48  ;;  %v24658_v60 = vld [vmem:[#allocation31_spill] sm:$0xff]  ;;  %v24665_v48 = vld [vmem:[#allocation42_spill] sm:$0xff] }
 0x239   : > { %24645 = vst [vmem:[#allocation88_spill] sm:$0xff] %v18024_v26  ;;  %14792 = vmatprep.mubr.bf16.mxu1 %v17992_v28  ;;  %v24655_v26 = vld [vmem:[#allocation38_spill] sm:$0xff] }
 0x23a   : > { %24648 = vst [vmem:[#allocation83_spill] sm:$0xff] %v18028_v4  ;;  %v18040_v47 = vadd.f32 %v4359_v62, %v24651_v20  ;;  %v14494_v21 = vpop.f32.mrb[156].mxu0  ;;  %v24656_v28 = vunpack.c.h.bf16 %v24655_v26 }
 0x23b   : > { %v3734_v31 = vadd.f32 %v14494_v21, %v24653_v43  ;;  %v3725_v36 = vpop.f32.mrb[157].mxu0  ;;  %v14582_v56 = vpop.f32.mrb[156].mxu1  ;;  %v24660_v43 = vld [vmem:[#allocation101_spill] sm:$0xff] }
 0x23c   : > { %24652 = vst [vmem:[#allocation85_spill] sm:$0xff] %v18040_v47  ;;  %v3726_v16 = vadd.f32 %v3725_v36, %v24654_v37  ;;  %v14495_v2 = vpop.f32.mrb[158].mxu0  ;;  %v4111_v63 = vpop.f32.mrb[157].mxu1  ;;  %v771_v12 = vrot.slane %v24656_v28, 2  ;;  %v24661_v36 = vld [vmem:[#allocation43_spill] sm:$0xff] }
 0x23d   : > { %v4364_v7 = vadd.f32 %v14582_v56, %v3734_v31  ;;  %v3728_v24 = vpop.f32.mrb[159].mxu0  ;;  %v14583_v4 = vpop.f32.mrb[158].mxu1  ;;  %v24663_v28 = vld [vmem:[#allocation39_spill] sm:$0xff] }
 0x23e   : > { %v3729_v62 = vadd.f32 %v3728_v24, %v24657_v6  ;;  %v4362_v20 = vadd.f32 %v4111_v63, %v3726_v16  ;;  %v4114_v47 = vpop.f32.mrb[159].mxu1  ;;  %v808_v26 = vsel %vm23878_vm1, %v771_v12, %v24663_v28  ;;  %v24664_v4 = vld [vmem:[#allocation37_spill] sm:$0xff]  ;;  %v24667_v16 = vld [vmem:[#allocation47_spill] sm:$0xff] }
 0x23f   : > { %v18050_v21 = vadd.f32 %v4364_v7, %v24658_v60  ;;  %14705 = vmatmul.mubr.bf16.gmra.mrb[8].mxu0 %v24660_v43  ;;  %v809_v60 = vsel %vm23878_vm1, %v24664_v4, %v771_v12  ;;  %v24668_v7 = vld [vmem:[#allocation96_spill] sm:$0xff]  ;;  %v24672_v4 = vld [vmem:[#allocation97_spill] sm:$0xff] }
 0x240   : > { %v18054_v37 = vadd.f32 %v4362_v20, %v24661_v36  ;;  %v4363_v54 = vadd.f32 %v4114_v47, %v3729_v62  ;;  %14793 = vmatmul.mubr.bf16.gmra.mrb[8].mxu1 %v24646_v40  ;;  %14708 = vmatprep.mubr.bf16.mxu0 %v18044_v8  ;;  %v18070_v20 = vpack.c.bf16 %v808_v26, %v809_v60  ;;  %v24673_v40 = vld [vmem:[#allocation50_spill] sm:$0xff] }
 0x241   : > { %24659 = vst [vmem:[#allocation35_spill] sm:$0xff] %v18050_v21  ;;  %14796 = vmatprep.mubr.bf16.mxu1 %v18018_v55  ;;  %v24670_v21 = vld [vmem:[#allocation44_spill] sm:$0xff] }
 0x242   : > { %24662 = vst [vmem:[#allocation48_spill] sm:$0xff] %v18054_v37  ;;  %v18066_v31 = vadd.f32 %v4363_v54, %v24665_v48  ;;  %v14498_v56 = vpop.f32.mrb[160].mxu0  ;;  %24669 = vst [vmem:[#allocation90_spill] sm:$0xff] %v18070_v20  ;;  %v24671_v55 = vunpack.c.h.bf16 %v24670_v21  ;;  %v24678_v21 = vld [vmem:[#allocation68_spill] sm:$0xff] }
 0x243   : > { %v3750_v47 = vadd.f32 %v14498_v56, %v24667_v16  ;;  %v3741_v2 = vpop.f32.mrb[161].mxu0  ;;  %v14586_v63 = vpop.f32.mrb[160].mxu1  ;;  %v24675_v16 = vld [vmem:[#allocation105_spill] sm:$0xff] }
 0x244   : > { %24666 = vst [vmem:[#allocation87_spill] sm:$0xff] %v18066_v31  ;;  %v3742_v24 = vadd.f32 %v3741_v2, %v24668_v7  ;;  %v14499_v6 = vpop.f32.mrb[162].mxu0  ;;  %v4127_v62 = vpop.f32.mrb[161].mxu1  ;;  %v775_v12 = vrot.slane %v24671_v55, 2  ;;  %v24676_v2 = vld [vmem:[#allocation49_spill] sm:$0xff] }
 0x245   : > { %v4368_v36 = vadd.f32 %v14586_v63, %v3750_v47  ;;  %v3744_v28 = vpop.f32.mrb[163].mxu0  ;;  %v14587_v37 = vpop.f32.mrb[162].mxu1  ;;  %v24681_v63 = vld [vmem:[#allocation54_spill] sm:$0xff] }
 0x246   : > { %v3745_v54 = vadd.f32 %v3744_v28, %v24672_v4  ;;  %v4366_v48 = vadd.f32 %v4127_v62, %v3742_v24  ;;  %v4130_v31 = vpop.f32.mrb[163].mxu1  ;;  %v804_v55 = vsel %vm23878_vm1, %v775_v12, %v17530_v58  ;;  %v24679_v37 = vld [vmem:[#allocation52_spill] sm:$0xff]  ;;  %v24682_v62 = vld [vmem:[#allocation99_spill] sm:$0xff]  ;;  %v15847_v58 = vld [vmem:[%s23672_s3 + $0xc0] sm:$0xff]  }
 0x247   : > { %v18076_v56 = vadd.f32 %v4368_v36, %v24673_v40  ;;  %14709 = vmatmul.mubr.bf16.gmra.mrb[12].mxu0 %v24675_v16  ;;  %v805_v40 = vsel %vm23878_vm1, %v24678_v21, %v775_v12  ;;  %14904 = vmatprep.subr.bf16.mxu1 %v15847_v58 }
 0x248   : > { %v18080_v7 = vadd.f32 %v4366_v48, %v24676_v2  ;;  %v4367_v26 = vadd.f32 %v4130_v31, %v3745_v54  ;;  %14797 = vmatmul.mubr.bf16.gmra.mrb[12].mxu1 %v24660_v43  ;;  %14712 = vmatprep.mubr.bf16.mxu0 %v18070_v20  ;;  %v18096_v54 = vpack.c.bf16 %v804_v55, %v805_v40  ;;  %v24688_v55 = vld [vmem:[#allocation106_spill] sm:$0xff]  ;;  %v24689_v40 = vld [vmem:[#allocation57_spill] sm:$0xff] }
 0x249   : > { %24674 = vst [vmem:[#allocation92_spill] sm:$0xff] %v18076_v56  ;;  %14800 = vmatprep.mubr.bf16.mxu1 %v18044_v8  ;;  %14905 = vmatpush3.bf16.msra.mxu1 %v15847_v58 }
 0x24a   : > { %24677 = vst [vmem:[#allocation36_spill] sm:$0xff] %v18080_v7  ;;  %v18092_v60 = vadd.f32 %v4367_v26, %v24679_v37  ;;  %v14502_v47 = vpop.f32.mrb[164].mxu0  ;;  %v24683_v26 = vld [vmem:[#allocation51_spill] sm:$0xff] }
 0x24b   : > { %v3766_v31 = vadd.f32 %v14502_v47, %v24681_v63  ;;  %v3757_v24 = vpop.f32.mrb[165].mxu0  ;;  %v14590_v6 = vpop.f32.mrb[164].mxu1  ;;  %v24684_v21 = vunpack.c.h.bf16 %v24683_v26  ;;  %v24694_v26 = vld [vmem:[#allocation103_spill] sm:$0xff] }
 0x24c   : > { %24680 = vst [vmem:[#allocation94_spill] sm:$0xff] %v18092_v60  ;;  %v3758_v36 = vadd.f32 %v3757_v24, %v24682_v62  ;;  %v14503_v28 = vpop.f32.mrb[166].mxu0  ;;  %v4143_v4 = vpop.f32.mrb[165].mxu1  ;;  %v24685_v60 = vld [vmem:[#allocation100_spill] sm:$0xff]  ;;  %v24686_v24 = vld [vmem:[#allocation58_spill] sm:$0xff] }
 0x24d   : > { %v4372_v48 = vadd.f32 %v14590_v6, %v3766_v31  ;;  %v3760_v12 = vpop.f32.mrb[167].mxu0  ;;  %v14591_v2 = vpop.f32.mrb[166].mxu1  ;;  %v779_v37 = vrot.slane %v24684_v21, 2 }
 0x24e   : > { %v3761_v47 = vadd.f32 %v3760_v12, %v24685_v60  ;;  %v4370_v63 = vadd.f32 %v4143_v4, %v3758_v36  ;;  %v4146_v7 = vpop.f32.mrb[167].mxu1  ;;  %v24691_v36 = vld [vmem:[#allocation60_spill] sm:$0xff] }
 0x24f   : > { %v18105_v62 = vadd.f32 %v4372_v48, %v24686_v24  ;;  %14713 = vmatmul.mubr.bf16.gmra.mrb[16].mxu0 %v24688_v55  ;;  %v800_v60 = vsel %vm23878_vm1, %v779_v37, %v17586_v39  ;;  %v801_v6 = vsel %vm23878_vm1, %v17510_v52, %v779_v37  ;;  %v24693_v48 = vld [vmem:[#allocation102_spill] sm:$0xff]  ;;  %v24696_v37 = vld [vmem:[#allocation59_spill] sm:$0xff] }
 0x250   : > { %v18109_v28 = vadd.f32 %v4370_v63, %v24689_v40  ;;  %v4371_v31 = vadd.f32 %v4146_v7, %v3761_v47  ;;  %14801 = vmatmul.mubr.bf16.gmra.mrb[16].mxu1 %v24675_v16  ;;  %14716 = vmatprep.mubr.bf16.mxu0 %v18096_v54  ;;  %v18125_v24 = vpack.c.bf16 %v800_v60, %v801_v6  ;;  %v24701_v60 = vld [vmem:[#allocation62_spill] sm:$0xff] }
 0x251   : > { %24687 = vst [vmem:[#allocation89_spill] sm:$0xff] %v18105_v62  ;;  %14804 = vmatprep.mubr.bf16.mxu1 %v18070_v20  ;;  %v24695_v62 = vunpack.c.h.bf16 %v24508_v9  ;;  %v24699_v20 = vld [vmem:[#allocation61_spill] sm:$0xff] }
 0x252   : > { %24690 = vst [vmem:[#allocation91_spill] sm:$0xff] %v18109_v28  ;;  %v18121_v4 = vadd.f32 %v4371_v31, %v24691_v36  ;;  %v14506_v58 = vpop.f32.mrb[168].mxu0  ;;  %v24697_v31 = vunpack.c.l.bf16 %v24696_v37 }
 0x253   : > { %v3782_v7 = vadd.f32 %v14506_v58, %v24693_v48  ;;  %v3773_v12 = vpop.f32.mrb[169].mxu0  ;;  %v14594_v2 = vpop.f32.mrb[168].mxu1  ;;  %v783_v52 = vrot.slane %v24695_v62, 2  ;;  %v24703_v62 = vld [vmem:[#allocation65_spill] sm:$0xff] }
 0x254   : > { %24692 = vst [vmem:[#allocation63_spill] sm:$0xff] %v18121_v4  ;;  %v3774_v21 = vadd.f32 %v3773_v12, %v24694_v26  ;;  %v14507_v47 = vpop.f32.mrb[170].mxu0  ;;  %v4159_v63 = vpop.f32.mrb[169].mxu1  ;;  %v784_v36 = vrot.slane %v24697_v31, 2  ;;  %v24698_v4 = vld [vmem:[#allocation104_spill] sm:$0xff]  ;;  %v24705_v12 = vunpack.c.h.bf16 %v24696_v37  ;;  %v24709_v31 = vld [vmem:[#allocation9_spill] sm:$0xff] }
 0x255   : > { %v4376_v40 = vadd.f32 %v14594_v2, %v3782_v7  ;;  %v3776_v39 = vpop.f32.mrb[171].mxu0  ;;  %v14595_v28 = vpop.f32.mrb[170].mxu1  ;;  %v24706_v2 = vld [vmem:[#allocation64_spill] sm:$0xff]  ;;  %v24708_v47 = vld [vmem:[#allocation66_spill] sm:$0xff] }
 0x256   : > { %v3777_v56 = vadd.f32 %v3776_v39, %v24698_v4  ;;  %v4374_v58 = vadd.f32 %v4159_v63, %v3774_v21  ;;  %v4162_v48 = vpop.f32.mrb[171].mxu1  ;;  %v796_v9 = vsel %vm23878_vm1, %v783_v52, %v784_v36  ;;  %v24707_v26 = vunpack.c.l.bf16 %v24706_v2  ;;  %v15848_v37 = vld [vmem:[%s23672_s3 + $0xc8] sm:$0xff]  }
 0x257   : > { %v18133_v16 = vadd.f32 %v4376_v40, %v24699_v20  ;;  %14717 = vmatmul.mubr.bf16.gmra.mrb[20].mxu0 %v17563_v51  ;;  %v797_v20 = vsel %vm23878_vm1, %v17578_v18, %v783_v52  ;;  %14906 = vmatprep.subr.bf16.mxu1 %v15848_v37 }
 0x258   : > { %v18137_v6 = vadd.f32 %v4374_v58, %v24701_v60  ;;  %v4375_v7 = vadd.f32 %v4162_v48, %v3777_v56  ;;  %14805 = vmatmul.mubr.bf16.gmra.mrb[20].mxu1 %v24688_v55  ;;  %14720 = vmatprep.mubr.bf16.mxu0 %v18125_v24  ;;  %v785_v56 = vrot.slane %v24705_v12, 2  ;;  %v18154_v21 = vrot.slane %v24707_v26, 2  ;;  %v24710_v12 = vld [vmem:[#allocation71_spill] sm:$0xff] }
 0x259   : > { %24700 = vst [vmem:[#allocation55_spill] sm:$0xff] %v18133_v16  ;;  %14808 = vmatprep.mubr.bf16.mxu1 %v18096_v54  ;;  %v18158_v18 = vpack.c.bf16 %v796_v9, %v797_v20  ;;  %v24713_v20 = vld [vmem:[#allocation69_spill] sm:$0xff]  ;;  %14907 = vmatpush3.bf16.msra.mxu1 %v15848_v37 }
 0x25a   : > { %24702 = vst [vmem:[#allocation93_spill] sm:$0xff] %v18137_v6  ;;  %v18148_v28 = vadd.f32 %v4375_v7, %v24703_v62  ;;  %v14510_v4 = vpop.f32.mrb[172].mxu0  ;;  %v794_v9 = vsel %vm23878_vm1, %v785_v56, %v18154_v21 }
 0x25b   : > { %v3798_v63 = vadd.f32 %v14510_v4, %v24708_v47  ;;  %v3789_v40 = vpop.f32.mrb[173].mxu0  ;;  %v14598_v39 = vpop.f32.mrb[172].mxu1  ;;  %v24711_v4 = vld [vmem:[#allocation67_spill] sm:$0xff] }
 0x25c   : > { %24704 = vst [vmem:[#allocation32_spill] sm:$0xff] %v18148_v28  ;;  %v3790_v58 = vadd.f32 %v3789_v40, %v24709_v31  ;;  %v14511_v48 = vpop.f32.mrb[174].mxu0  ;;  %v4175_v60 = vpop.f32.mrb[173].mxu1  ;;  %v24715_v31 = vld [vmem:[#allocation10_spill] sm:$0xff] }
 0x25d   : > { %v4380_v52 = vadd.f32 %v14598_v39, %v3798_v63  ;;  %v3792_v7 = vpop.f32.mrb[175].mxu0  ;;  %v14599_v62 = vpop.f32.mrb[174].mxu1  ;;  %v795_v39 = vsel %vm23878_vm1, %v784_v36, %v785_v56 }
 0x25e   : > { %v3793_v26 = vadd.f32 %v3792_v7, %v24710_v12  ;;  %v4378_v28 = vadd.f32 %v4175_v60, %v3790_v58  ;;  %v4178_v6 = vpop.f32.mrb[175].mxu1  ;;  %v18183_v7 = vpack.c.bf16 %v794_v9, %v795_v39 }
 0x25f   : > { %v18165_v47 = vadd.f32 %v4380_v52, %v24711_v4  ;;  %14721 = vmatmul.mubr.bf16.gmra.mrb[24].mxu0 %v17622_v41 }
 0x260   : > { %v18172_v63 = vadd.f32 %v4378_v28, %v24713_v20  ;;  %v4379_v40 = vadd.f32 %v4178_v6, %v3793_v26  ;;  %14809 = vmatmul.mubr.bf16.gmra.mrb[24].mxu1 %v17563_v51  ;;  %14724 = vmatprep.mubr.bf16.mxu0 %v18158_v18 }
 0x261   : > { %24712 = vst [vmem:[#allocation40_spill] sm:$0xff] %v18165_v47  ;;  %14812 = vmatprep.mubr.bf16.mxu1 %v18125_v24 }
 0x262   : > { %24714 = vst [vmem:[#allocation38_spill] sm:$0xff] %v18172_v63  ;;  %v18180_v58 = vadd.f32 %v4379_v40, %v24715_v31  ;;  %v14514_v48 = vpop.f32.mrb[176].mxu0  ;;  %v24717_v40 = vld [vmem:[#allocation46_spill] sm:$0xff] }
 0x263   : > { %v3814_v60 = vadd.f32 %v14514_v48, %v17541_v19  ;;  %v3805_v52 = vpop.f32.mrb[177].mxu0  ;;  %v14602_v28 = vpop.f32.mrb[176].mxu1 }
 0x264   : > { %24716 = vst [vmem:[#allocation45_spill] sm:$0xff] %v18180_v58  ;;  %v3806_v6 = vadd.f32 %v3805_v52, %v17546_v5  ;;  %v14515_v62 = vpop.f32.mrb[178].mxu0  ;;  %v4191_v12 = vpop.f32.mrb[177].mxu1  ;;  %v24720_v5 = vld [vmem:[#allocation70_spill] sm:$0xff] }
 0x265   : > { %v4384_v36 = vadd.f32 %v14602_v28, %v3814_v60  ;;  %v3808_v56 = vpop.f32.mrb[179].mxu0  ;;  %v14603_v26 = vpop.f32.mrb[178].mxu1 }
 0x266   : > { %v3809_v4 = vadd.f32 %v3808_v56, %v17561_v11  ;;  %v4382_v37 = vadd.f32 %v4191_v12, %v3806_v6  ;;  %v4194_v20 = vpop.f32.mrb[179].mxu1 }
 0x267   : > { %v18188_v31 = vadd.f32 %v4384_v36, %v24717_v40  ;;  %14725 = vmatmul.mubr.bf16.gmra.mrb[28].mxu0 %v18183_v7 }
 0x268   : > { %v18192_v19 = vadd.f32 %v4382_v37, %v17544_v59  ;;  %v4383_v9 = vadd.f32 %v4194_v20, %v3809_v4  ;;  %14813 = vmatmul.mubr.bf16.gmra.mrb[28].mxu1 %v17622_v41  ;;  %14832 = vmatprep.mubr.bf16.mxu0 %v17596_v3  ;;  %v24724_v20 = vld [vmem:[#allocation11_spill] sm:$0xff] }
 0x269   : > { %24718 = vst [vmem:[#allocation31_spill] sm:$0xff] %v18188_v31 }
 0x26a   : > { %24719 = vst [vmem:[#allocation101_spill] sm:$0xff] %v18192_v19  ;;  %v18197_v39 = vadd.f32 %v4383_v9, %v24720_v5  ;;  %v14518_v48 = vpop.f32.mrb[180].mxu0 }
 0x26b   : > { %v3830_v11 = vadd.f32 %v14518_v48, %v17591_v50  ;;  %v3821_v60 = vpop.f32.mrb[181].mxu0  ;;  %v14606_v52 = vpop.f32.mrb[180].mxu1  ;;  %v15849_v50 = vld [vmem:[%s23672_s3 + $0xd0] sm:$0xff]  }
 0x26c   : > { %24721 = vst [vmem:[#allocation43_spill] sm:$0xff] %v18197_v39  ;;  %v3822_v28 = vadd.f32 %v3821_v60, %v17602_v32  ;;  %v14519_v6 = vpop.f32.mrb[182].mxu0  ;;  %v4207_v62 = vpop.f32.mrb[181].mxu1  ;;  %14908 = vmatprep.subr.bf16.mxu1 %v15849_v50 }
 0x26d   : > { %v4388_v12 = vadd.f32 %v14606_v52, %v3830_v11  ;;  %v3824_v59 = vpop.f32.mrb[183].mxu0  ;;  %v14607_v36 = vpop.f32.mrb[182].mxu1  ;;  %14909 = vmatpush3.bf16.msra.mxu1 %v15849_v50  ;;  %v24729_v52 = vld [vmem:[#allocation14_spill] sm:$0xff] }
 0x26e   : > { %v3825_v56 = vadd.f32 %v3824_v59, %v17620_v30  ;;  %v4386_v26 = vadd.f32 %v4207_v62, %v3822_v28  ;;  %v4210_v4 = vpop.f32.mrb[183].mxu1  ;;  %v24730_v59 = vld [vmem:[#allocation74_spill] sm:$0xff] }
 0x26f   : > { %v18203_v3 = vadd.f32 %v4388_v12, %v17589_v22  ;;  %14833 = vmatmul.mubr.bf16.vlgmr.msra.gmra.mrb[32].mxu0 %v17640_v34  ;;  %v24726_v22 = vld [vmem:[#allocation72_spill] sm:$0xff]  ;;  %v24728_v34 = vld [vmem:[#allocation53_spill] sm:$0xff] }
 0x270   : > { %v18210_v32 = vadd.f32 %v4386_v26, %v17594_v53  ;;  %v4387_v37 = vadd.f32 %v4210_v4, %v3825_v56  ;;  %14836 = vmatprep.mubr.bf16.mxu0 %v17647_v14  ;;  %v24727_v9 = vunpack.c.l.bf16 %v24726_v22  ;;  %v24731_v56 = vld [vmem:[#allocation16_spill] sm:$0xff] }
 0x271   : > { %24722 = vst [vmem:[#allocation39_spill] sm:$0xff] %v18203_v3 }
 0x272   : > { %24723 = vst [vmem:[#allocation37_spill] sm:$0xff] %v18210_v32  ;;  %v18214_v30 = vadd.f32 %v4387_v37, %v24724_v20  ;;  %v14522_v40 = vpop.f32.mrb[184].mxu0  ;;  %v18218_v5 = vrot.slane %v24727_v9, 2  ;;  %v24732_v37 = vld [vmem:[#allocation75_spill] sm:$0xff]  ;;  %v24735_v9 = vld [vmem:[#allocation56_spill] sm:$0xff]  ;;  %v18562_v32 = vadd.s32 16, %v16193_v45 }
 0x273   : > { %v3846_v48 = vadd.f32 %v14522_v40, %v24728_v34  ;;  %v3837_v11 = vpop.f32.mrb[185].mxu0  ;;  %v14610_v60 = vpop.f32.mrb[184].mxu1  ;;  %v24733_v40 = vld [vmem:[#allocation13_spill] sm:$0xff] }
 0x274   : > { %24725 = vst [vmem:[#allocation42_spill] sm:$0xff] %v18214_v30  ;;  %v3838_v53 = vadd.f32 %v3837_v11, %v24729_v52  ;;  %v14523_v28 = vpop.f32.mrb[186].mxu0  ;;  %v4223_v6 = vpop.f32.mrb[185].mxu1  ;;  %v18226_v36 = vsel %vm23878_vm1, %v18218_v5, %v24730_v59  ;;  %v24737_v11 = vld [vmem:[#allocation15_spill] sm:$0xff] }
 0x275   : > { %v4392_v62 = vadd.f32 %v14610_v60, %v3846_v48  ;;  %v3840_v14 = vpop.f32.mrb[187].mxu0  ;;  %v14611_v12 = vpop.f32.mrb[186].mxu1 }
 0x276   : > { %v3841_v26 = vadd.f32 %v3840_v14, %v24731_v56  ;;  %v4390_v4 = vadd.f32 %v4223_v6, %v3838_v53  ;;  %v4226_v50 = vpop.f32.mrb[187].mxu1  ;;  %v24739_v53 = vld [vmem:[#allocation73_spill] sm:$0xff]  ;;  %v24740_v12 = vld [vmem:[#allocation18_spill] sm:$0xff] }
 0x277   : > { %v18232_v22 = vadd.f32 %v4392_v62, %v24733_v40  ;;  %14837 = vmatmul.mubr.bf16.gmra.mrb[36].mxu0 %v17684_v49 }
 0x278   : > { %v18236_v34 = vadd.f32 %v4390_v4, %v24735_v9  ;;  %v4391_v48 = vadd.f32 %v4226_v50, %v3841_v26  ;;  %14840 = vmatprep.mubr.bf16.mxu0 %v17691_v27  ;;  %v24741_v4 = vld [vmem:[#allocation76_spill] sm:$0xff]  ;;  %v24742_v27 = vld [vmem:[#allocation17_spill] sm:$0xff] }
 0x279   : > { %24734 = vst [vmem:[#allocation47_spill] sm:$0xff] %v18232_v22 }
 0x27a   : > { %24736 = vst [vmem:[#allocation96_spill] sm:$0xff] %v18236_v34  ;;  %v18240_v60 = vadd.f32 %v4391_v48, %v24737_v11  ;;  %v14526_v52 = vpop.f32.mrb[188].mxu0  ;;  %v15850_v48 = vld [vmem:[%s23672_s3 + $0xd8] sm:$0xff]   ;;  %v24744_v11 = vld [vmem:[#allocation107_spill] sm:$0xff] }
 0x27b   : > { %v3862_v28 = vadd.f32 %v14526_v52, %v24739_v53  ;;  %v3853_v6 = vpop.f32.mrb[189].mxu0  ;;  %v14614_v14 = vpop.f32.mrb[188].mxu1  ;;  %14910 = vmatprep.subr.bf16.mxu1 %v15850_v48 }
 0x27c   : > { %24738 = vst [vmem:[#allocation44_spill] sm:$0xff] %v18240_v60  ;;  %v3854_v59 = vadd.f32 %v3853_v6, %v24740_v12  ;;  %v14527_v62 = vpop.f32.mrb[190].mxu0  ;;  %v4239_v56 = vpop.f32.mrb[189].mxu1  ;;  %14911 = vmatpush3.bf16.msra.mxu1 %v15850_v48  ;;  %v24751_v48 = vld [vmem:[#allocation110_spill] sm:$0xff] }
 0x27d   : > { %v4396_v40 = vadd.f32 %v14614_v14, %v3862_v28  ;;  %v3856_v49 = vpop.f32.mrb[191].mxu0  ;;  %v14615_v20 = vpop.f32.mrb[190].mxu1  ;;  %v24748_v14 = vld [vmem:[#allocation109_spill] sm:$0xff] }
 0x27e   : > { %v3857_v9 = vadd.f32 %v3856_v49, %v24741_v4  ;;  %v4394_v26 = vadd.f32 %v4239_v56, %v3854_v59  ;;  %v4242_v50 = vpop.f32.mrb[191].mxu1  ;;  %v24746_v20 = vld [vmem:[#allocation19_spill] sm:$0xff] }
 0x27f   : > { %v18246_v34 = vadd.f32 %v4396_v40, %v24742_v27  ;;  %14841 = vmatmul.mubr.bf16.gmra.mrb[40].mxu0 %v17729_v33  ;;  %v24749_v27 = vld [vmem:[#allocation108_spill] sm:$0xff] }
 0x280   : > { %v18253_v52 = vadd.f32 %v4394_v26, %v24744_v11  ;;  %v4395_v53 = vadd.f32 %v4242_v50, %v3857_v9  ;;  %14844 = vmatprep.mubr.bf16.mxu0 %v17736_v57 }
 0x281   : > { %24743 = vst [vmem:[#allocation97_spill] sm:$0xff] %v18246_v34 }
 0x282   : > { %24745 = vst [vmem:[#allocation50_spill] sm:$0xff] %v18253_v52  ;;  %v18257_v28 = vadd.f32 %v4395_v53, %v24746_v20  ;;  %v14530_v6 = vpop.f32.mrb[192].mxu0 }
 0x283   : > { %v3878_v12 = vadd.f32 %v14530_v6, %v24748_v14  ;;  %v3869_v59 = vpop.f32.mrb[193].mxu0  ;;  %v14618_v33 = vpop.f32.mrb[192].mxu1 }
 0x284   : > { %24747 = vst [vmem:[#allocation49_spill] sm:$0xff] %v18257_v28  ;;  %v3870_v62 = vadd.f32 %v3869_v59, %v17742_v61  ;;  %v14531_v56 = vpop.f32.mrb[194].mxu0  ;;  %v4255_v40 = vpop.f32.mrb[193].mxu1  ;;  %v24753_v61 = vld [vmem:[#allocation20_spill] sm:$0xff] }
 0x285   : > { %v4400_v49 = vadd.f32 %v14618_v33, %v3878_v12  ;;  %v3872_v4 = vpop.f32.mrb[195].mxu0  ;;  %v14619_v26 = vpop.f32.mrb[194].mxu1  ;;  %v24755_v12 = vld [vmem:[#allocation111_spill] sm:$0xff] }
 0x286   : > { %v3873_v9 = vadd.f32 %v3872_v4, %v17751_v0  ;;  %v4398_v57 = vadd.f32 %v4255_v40, %v3870_v62  ;;  %v4258_v50 = vpop.f32.mrb[195].mxu1 }
 0x287   : > { %v18263_v11 = vadd.f32 %v4400_v49, %v24749_v27  ;;  %14845 = vmatmul.mubr.bf16.gmra.mrb[44].mxu0 %v17771_v25  ;;  %v24758_v27 = vld [vmem:[#allocation112_spill] sm:$0xff] }
 0x288   : > { %v18267_v53 = vadd.f32 %v4398_v57, %v24751_v48  ;;  %v4399_v20 = vadd.f32 %v4258_v50, %v3873_v9  ;;  %14848 = vmatprep.mubr.bf16.mxu0 %v17778_v15  ;;  %v24756_v15 = vld [vmem:[#allocation21_spill] sm:$0xff] }
 0x289   : > { %24750 = vst [vmem:[#allocation68_spill] sm:$0xff] %v18263_v11 }
 0x28a   : > { %24752 = vst [vmem:[#allocation52_spill] sm:$0xff] %v18267_v53  ;;  %v18271_v6 = vadd.f32 %v4399_v20, %v24753_v61  ;;  %v14534_v14 = vpop.f32.mrb[196].mxu0 }
 0x28b   : > { %v3894_v59 = vadd.f32 %v14534_v14, %v24755_v12  ;;  %v3885_v0 = vpop.f32.mrb[197].mxu0  ;;  %v14622_v33 = vpop.f32.mrb[196].mxu1  ;;  %v24762_v12 = vld [vmem:[#allocation113_spill] sm:$0xff] }
 0x28c   : > { %24754 = vst [vmem:[#allocation54_spill] sm:$0xff] %v18271_v6  ;;  %v3886_v62 = vadd.f32 %v3885_v0, %v17784_v44  ;;  %v14535_v56 = vpop.f32.mrb[198].mxu0  ;;  %v4271_v40 = vpop.f32.mrb[197].mxu1  ;;  %v24760_v44 = vld [vmem:[#allocation22_spill] sm:$0xff] }
 0x28d   : > { %v4404_v49 = vadd.f32 %v14622_v33, %v3894_v59  ;;  %v3888_v25 = vpop.f32.mrb[199].mxu0  ;;  %v14623_v4 = vpop.f32.mrb[198].mxu1  ;;  %v24763_v33 = vld [vmem:[#allocation24_spill] sm:$0xff] }
 0x28e   : > { %v3889_v26 = vadd.f32 %v3888_v25, %v17793_v38  ;;  %v4402_v9 = vadd.f32 %v4271_v40, %v3886_v62  ;;  %v4274_v57 = vpop.f32.mrb[199].mxu1 }
 0x28f   : > { %v18277_v50 = vadd.f32 %v4404_v49, %v24756_v15  ;;  %14849 = vmatmul.mubr.bf16.gmra.mrb[48].mxu0 %v17810_v42  ;;  %v15851_v42 = vld [vmem:[%s23672_s3 + $0xe0] sm:$0xff]   ;;  %v24765_v15 = vld [vmem:[#allocation23_spill] sm:$0xff] }
 0x290   : > { %v18281_v48 = vadd.f32 %v4402_v9, %v24758_v27  ;;  %v4403_v20 = vadd.f32 %v4274_v57, %v3889_v26  ;;  %14852 = vmatprep.mubr.bf16.mxu0 %v17817_v29  ;;  %v24764_v29 = vld [vmem:[#allocation77_spill] sm:$0xff]  ;;  %14912 = vmatprep.subr.bf16.mxu1 %v15851_v42 }
 0x291   : > { %24757 = vst [vmem:[#allocation99_spill] sm:$0xff] %v18277_v50  ;;  %14913 = vmatpush3.bf16.msra.mxu1 %v15851_v42 }
 0x292   : > { %24759 = vst [vmem:[#allocation51_spill] sm:$0xff] %v18281_v48  ;;  %v18285_v61 = vadd.f32 %v4403_v20, %v24760_v44  ;;  %v14538_v14 = vpop.f32.mrb[200].mxu0  ;;  %v24767_v20 = vld [vmem:[#allocation114_spill] sm:$0xff] }
 0x293   : > { %v3910_v59 = vadd.f32 %v14538_v14, %v24762_v12  ;;  %v3901_v38 = vpop.f32.mrb[201].mxu0  ;;  %v14626_v0 = vpop.f32.mrb[200].mxu1  ;;  %v24769_v12 = vld [vmem:[#allocation25_spill] sm:$0xff] }
 0x294   : > { %24761 = vst [vmem:[#allocation100_spill] sm:$0xff] %v18285_v61  ;;  %v3902_v62 = vadd.f32 %v3901_v38, %v24763_v33  ;;  %v14539_v56 = vpop.f32.mrb[202].mxu0  ;;  %v4287_v40 = vpop.f32.mrb[201].mxu1 }
 0x295   : > { %v4408_v49 = vadd.f32 %v14626_v0, %v3910_v59  ;;  %v3904_v25 = vpop.f32.mrb[203].mxu0  ;;  %v14627_v4 = vpop.f32.mrb[202].mxu1  ;;  %v24771_v0 = vld [vmem:[#allocation116_spill] sm:$0xff] }
 0x296   : > { %v3905_v26 = vadd.f32 %v3904_v25, %v24764_v29  ;;  %v4406_v9 = vadd.f32 %v4287_v40, %v3902_v62  ;;  %v4290_v57 = vpop.f32.mrb[203].mxu1  ;;  %v24772_v40 = vld [vmem:[#allocation26_spill] sm:$0xff] }
 0x297   : > { %v18294_v27 = vadd.f32 %v4408_v49, %v24765_v15  ;;  %14853 = vmatmul.mubr.bf16.gmra.mrb[52].mxu0 %v17849_v23  ;;  %24846 = vst [vmem:[#allocation26_spill] sm:$0xff] %v18562_v32 }
 0x298   : > { %v18298_v44 = vadd.f32 %v4406_v9, %v24767_v20  ;;  %v4407_v14 = vadd.f32 %v4290_v57, %v3905_v26  ;;  %14856 = vmatprep.mubr.bf16.mxu0 %v17856_v46  ;;  %v24773_v9 = vld [vmem:[#allocation78_spill] sm:$0xff]  ;;  %v24774_v46 = vld [vmem:[#allocation115_spill] sm:$0xff] }
 0x299   : > { %24766 = vst [vmem:[#allocation58_spill] sm:$0xff] %v18294_v27 }
 0x29a   : > { %24768 = vst [vmem:[#allocation106_spill] sm:$0xff] %v18298_v44  ;;  %v18302_v59 = vadd.f32 %v4407_v14, %v24769_v12  ;;  %v14542_v38 = vpop.f32.mrb[204].mxu0  ;;  %v24776_v14 = vld [vmem:[#allocation117_spill] sm:$0xff] }
 0x29b   : > { %v3926_v33 = vadd.f32 %v14542_v38, %v24771_v0  ;;  %v3917_v62 = vpop.f32.mrb[205].mxu0  ;;  %v14630_v56 = vpop.f32.mrb[204].mxu1  ;;  %v24778_v0 = vld [vmem:[#allocation27_spill] sm:$0xff] }
 0x29c   : > { %24770 = vst [vmem:[#allocation57_spill] sm:$0xff] %v18302_v59  ;;  %v3918_v49 = vadd.f32 %v3917_v62, %v24772_v40  ;;  %v14543_v25 = vpop.f32.mrb[206].mxu0  ;;  %v4303_v4 = vpop.f32.mrb[205].mxu1 }
 0x29d   : > { %v4412_v23 = vadd.f32 %v14630_v56, %v3926_v33  ;;  %v3920_v42 = vpop.f32.mrb[207].mxu0  ;;  %v14631_v29 = vpop.f32.mrb[206].mxu1  ;;  %v24780_v56 = vld [vmem:[#allocation119_spill] sm:$0xff] }
 0x29e   : > { %v3921_v15 = vadd.f32 %v3920_v42, %v24773_v9  ;;  %v4410_v26 = vadd.f32 %v4303_v4, %v3918_v49  ;;  %v4306_v57 = vpop.f32.mrb[207].mxu1 }
 0x29f   : > { %v18308_v20 = vadd.f32 %v4412_v23, %v24774_v46  ;;  %14857 = vmatmul.mubr.bf16.gmra.mrb[56].mxu0 %v17888_v10 }
 0x2a0   : > { %v18312_v12 = vadd.f32 %v4410_v26, %v24776_v14  ;;  %v4411_v38 = vadd.f32 %v4306_v57, %v3921_v15  ;;  %14860 = vmatprep.mubr.bf16.mxu0 %v17897_v13  ;;  %v15852_v15 = vld [vmem:[%s23672_s3 + $0xe8] sm:$0xff]   ;;  %v24781_v13 = vld [vmem:[#allocation29_spill] sm:$0xff] }
 0x2a1   : > { %24775 = vst [vmem:[#allocation60_spill] sm:$0xff] %v18308_v20  ;;  %v24782_v14 = vld [vmem:[#allocation118_spill] sm:$0xff]  ;;  %14914 = vmatprep.subr.bf16.mxu1 %v15852_v15 }
 0x2a2   : > { %24777 = vst [vmem:[#allocation102_spill] sm:$0xff] %v18312_v12  ;;  %v18316_v62 = vadd.f32 %v4411_v38, %v24778_v0  ;;  %v14546_v33 = vpop.f32.mrb[208].mxu0  ;;  %14915 = vmatpush3.bf16.msra.mxu1 %v15852_v15  ;;  %v24791_v15 = vld [vmem:[#allocation125_spill] sm:$0xff] }
 0x2a3   : > { %v3942_v40 = vadd.f32 %v14546_v33, %v24780_v56  ;;  %v3933_v25 = vpop.f32.mrb[209].mxu0  ;;  %v14634_v49 = vpop.f32.mrb[208].mxu1  ;;  %v24786_v56 = vld [vmem:[#allocation28_spill] sm:$0xff] }
 0x2a4   : > { %24779 = vst [vmem:[#allocation103_spill] sm:$0xff] %v18316_v62  ;;  %v3934_v4 = vadd.f32 %v3933_v25, %v17895_v17  ;;  %v14547_v23 = vpop.f32.mrb[210].mxu0  ;;  %v4319_v42 = vpop.f32.mrb[209].mxu1  ;;  %v24784_v17 = vld [vmem:[#allocation120_spill] sm:$0xff] }
 0x2a5   : > { %v4416_v29 = vadd.f32 %v14634_v49, %v3942_v40  ;;  %v3936_v10 = vpop.f32.mrb[211].mxu0  ;;  %v14635_v9 = vpop.f32.mrb[210].mxu1  ;;  %v24788_v49 = vld [vmem:[#allocation121_spill] sm:$0xff] }
 0x2a6   : > { %v3937_v26 = vadd.f32 %v3936_v10, %v24781_v13  ;;  %v4414_v57 = vadd.f32 %v4319_v42, %v3934_v4  ;;  %v4322_v46 = vpop.f32.mrb[211].mxu1 }
 0x2a7   : > { %v18325_v38 = vadd.f32 %v4416_v29, %v24782_v14  ;;  %14861 = vmatmul.mubr.bf16.gmra.mrb[60].mxu0 %v17927_v1  ;;  %v24789_v29 = vld [vmem:[#allocation123_spill] sm:$0xff] }
 0x2a8   : > { %v18329_v0 = vadd.f32 %v4414_v57, %v24784_v17  ;;  %v4415_v33 = vadd.f32 %v4322_v46, %v3937_v26  ;;  %14864 = vmatprep.mubr.bf16.mxu0 %v17936_v35  ;;  %v24790_v17 = vld [vmem:[#allocation124_spill] sm:$0xff] }
 0x2a9   : > { %24783 = vst [vmem:[#allocation59_spill] sm:$0xff] %v18325_v38 }
 0x2aa   : > { %24785 = vst [vmem:[#allocation104_spill] sm:$0xff] %v18329_v0  ;;  %v18333_v40 = vadd.f32 %v4415_v33, %v24786_v56  ;;  %v14550_v25 = vpop.f32.mrb[212].mxu0  ;;  %v24792_v33 = vld [vmem:[#allocation79_spill] sm:$0xff] }
 0x2ab   : > { %v3958_v4 = vadd.f32 %v14550_v25, %v24788_v49  ;;  %v3949_v23 = vpop.f32.mrb[213].mxu0  ;;  %v14638_v42 = vpop.f32.mrb[212].mxu1  ;;  %v24794_v25 = vld [vmem:[#allocation126_spill] sm:$0xff] }
 0x2ac   : > { %24787 = vst [vmem:[#allocation61_spill] sm:$0xff] %v18333_v40  ;;  %v3950_v10 = vadd.f32 %v3949_v23, %v24789_v29  ;;  %v14551_v9 = vpop.f32.mrb[214].mxu0  ;;  %v4335_v1 = vpop.f32.mrb[213].mxu1  ;;  %v24795_v49 = vld [vmem:[#allocation122_spill] sm:$0xff] }
 0x2ad   : > { %v4420_v13 = vadd.f32 %v14638_v42, %v3958_v4  ;;  %v3952_v14 = vpop.f32.mrb[215].mxu0  ;;  %v14639_v57 = vpop.f32.mrb[214].mxu1  ;;  %v24797_v29 = vld [vmem:[#allocation30_spill] sm:$0xff] }
 0x2ae   : > { %v3953_v26 = vadd.f32 %v3952_v14, %v24790_v17  ;;  %v4418_v46 = vadd.f32 %v4335_v1, %v3950_v10  ;;  %v4338_v35 = vpop.f32.mrb[215].mxu1 }
 0x2af   : > { %14865 = vmatmul.mubr.bf16.gmra.mrb[64].mxu0 %v24791_v15  ;;  %v18340_v56 = vadd.f32 %v4420_v13, %v24792_v33  ;;  %v24799_v15 = vld [vmem:[#allocation95_spill] sm:$0xff] }
 0x2b0   : > { %v4419_v40 = vadd.f32 %v4338_v35, %v3953_v26  ;;  %14868 = vmatprep.mubr.bf16.mxu0 %v24794_v25  ;;  %v18344_v0 = vadd.f32 %v4418_v46, %v24795_v49  ;;  %v24800_v46 = vld [vmem:[#allocation41_spill] sm:$0xff] }
 0x2b1   : > { %24793 = vst [vmem:[#allocation62_spill] sm:$0xff] %v18340_v56 }
 0x2b2   : > { %24796 = vst [vmem:[#allocation65_spill] sm:$0xff] %v18344_v0  ;;  %v14658_v23 = vpop.f32.mrb[216].mxu0  ;;  %v18347_v4 = vadd.f32 %v4419_v40, %v24797_v29  ;;  %v15853_v40 = vld [vmem:[%s23672_s3 + $0xf0] sm:$0xff]  }
 0x2b3   : > { %v14746_v42 = vpop.f32.mrb[216].mxu1  ;;  %v4828_v9 = vpop.f32.mrb[217].mxu0  ;;  %14916 = vmatprep.subr.bf16.mxu1 %v15853_v40 }
 0x2b4   : > { %24798 = vst [vmem:[#allocation64_spill] sm:$0xff] %v18347_v4  ;;  %v18349_v14 = vadd.f32 %v14746_v42, %v14658_v23  ;;  %v5197_v10 = vpop.f32.mrb[217].mxu1  ;;  %v14659_v1 = vpop.f32.mrb[218].mxu0  ;;  %14917 = vmatpush3.bf16.msra.mxu1 %v15853_v40  ;;  %v15854_v40 = vld [vmem:[%s23672_s3 + $0x180] sm:$0xff]  }
 0x2b5   : > { %v18351_v57 = vadd.f32 %v5197_v10, %v4828_v9  ;;  %v14747_v13 = vpop.f32.mrb[218].mxu1  ;;  %v4831_v17 = vpop.f32.mrb[219].mxu0  ;;  %15064 = vmatprep.subr.bf16.mxu0 %v15854_v40 }
 0x2b6   : > { %v5200_v26 = vpop.f32.mrb[219].mxu1  ;;  %15065 = vmatpush3.bf16.msra.mxu0 %v15854_v40  ;;  %v15857_v40 = vld [vmem:[%s23672_s3 + $0x190] sm:$0xff]  }
 0x2b7   : > { %v18353_v35 = vadd.f32 %v5200_v26, %v4831_v17  ;;  %14869 = vmatmul.mubr.bf16.gmra.mrb[68].mxu0 %v24799_v15  ;;  %v24801_v26 = vld [vmem:[#allocation98_spill] sm:$0xff] }
 0x2b8   : > { %14872 = vmatprep.mubr.bf16.mxu0 %v24800_v46  ;;  %v24802_v15 = vld [vmem:[#allocation34_spill] sm:$0xff] }
 0x2ba   : > { %v14662_v33 = vpop.f32.mrb[220].mxu0 }
 0x2bb   : > { %v14750_v25 = vpop.f32.mrb[220].mxu1  ;;  %v4844_v49 = vpop.f32.mrb[221].mxu0 }
 0x2bc   : > { %v18360_v23 = vadd.f32 %v14750_v25, %v14662_v33  ;;  %v5213_v29 = vpop.f32.mrb[221].mxu1  ;;  %v14663_v42 = vpop.f32.mrb[222].mxu0 }
 0x2bd   : > { %v18362_v9 = vadd.f32 %v5213_v29, %v4844_v49  ;;  %v14751_v10 = vpop.f32.mrb[222].mxu1  ;;  %v4847_v1 = vpop.f32.mrb[223].mxu0 }
 0x2be   : > { %v5216_v13 = vpop.f32.mrb[223].mxu1 }
 0x2bf   : > { %v18364_v17 = vadd.f32 %v5216_v13, %v4847_v1  ;;  %14873 = vmatmul.mubr.bf16.gmra.mrb[72].mxu0 %v24801_v26  ;;  %v15855_v26 = vld [vmem:[%s23672_s3 + $0x188] sm:$0xff]  }
 0x2c0   : > { %14876 = vmatprep.mubr.bf16.mxu0 %v24802_v15  ;;  %15066 = vmatprep.subr.bf16.mxu0 %v15855_v26 }
 0x2c1   : > { %15067 = vmatpush3.bf16.msra.mxu0 %v15855_v26 }
 0x2c2   : > { %v14666_v46 = vpop.f32.mrb[224].mxu0  ;;  %15068 = vmatprep.subr.bf16.mxu0 %v15857_v40 }
 0x2c3   : > { %v14754_v33 = vpop.f32.mrb[224].mxu1  ;;  %v4860_v25 = vpop.f32.mrb[225].mxu0 }
 0x2c4   : > { %v18371_v42 = vadd.f32 %v14754_v33, %v14666_v46  ;;  %v5229_v49 = vpop.f32.mrb[225].mxu1  ;;  %v14667_v29 = vpop.f32.mrb[226].mxu0 }
 0x2c5   : > { %v18373_v10 = vadd.f32 %v5229_v49, %v4860_v25  ;;  %v14755_v1 = vpop.f32.mrb[226].mxu1  ;;  %v4863_v13 = vpop.f32.mrb[227].mxu0  ;;  %15069 = vmatpush3.bf16.msra.mxu0 %v15857_v40  ;;  %v15859_v40 = vld [vmem:[%s23672_s3 + $0x1a0] sm:$0xff]  }
 0x2c6   : > { %v5232_v15 = vpop.f32.mrb[227].mxu1 }
 0x2c7   : > { %v18378_v4 = vadd.f32 %v5232_v15, %v4863_v13  ;;  %14877 = vmatmul.mubr.bf16.gmra.mrb[76].mxu0 %v24660_v43  ;;  %v15856_v43 = vld [vmem:[%s23672_s3 + $0xf8] sm:$0xff]  }
 0x2c8   : > { %14880 = vmatprep.mubr.bf16.mxu0 %v18044_v8  ;;  %v15858_v15 = vld [vmem:[%s23672_s3 + $0x198] sm:$0xff]   ;;  %14918 = vmatprep.subr.bf16.mxu1 %v15856_v43 }
 0x2c9   : > { %14919 = vmatpush3.bf16.msra.mxu1 %v15856_v43  ;;  %15070 = vmatprep.subr.bf16.mxu0 %v15858_v15 }
 0x2ca   : > { %v14670_v46 = vpop.f32.mrb[228].mxu0  ;;  %15071 = vmatpush3.bf16.msra.mxu0 %v15858_v15  ;;  %v15860_v15 = vld [vmem:[%s23672_s3 + $0x1a8] sm:$0xff]  }
 0x2cb   : > { %v14758_v33 = vpop.f32.mrb[228].mxu1  ;;  %v4876_v25 = vpop.f32.mrb[229].mxu0  ;;  %15072 = vmatprep.subr.bf16.mxu0 %v15859_v40 }
 0x2cc   : > { %v18385_v49 = vadd.f32 %v14758_v33, %v14670_v46  ;;  %v5245_v29 = vpop.f32.mrb[229].mxu1  ;;  %v14671_v1 = vpop.f32.mrb[230].mxu0  ;;  %v24803_v46 = vld [vmem:[#allocation105_spill] sm:$0xff]  ;;  %v24804_v33 = vld [vmem:[#allocation90_spill] sm:$0xff] }
 0x2cd   : > { %v18390_v13 = vadd.f32 %v5245_v29, %v4876_v25  ;;  %v14759_v8 = vpop.f32.mrb[230].mxu1  ;;  %v4879_v26 = vpop.f32.mrb[231].mxu0 }
 0x2ce   : > { %v5248_v0 = vpop.f32.mrb[231].mxu1  ;;  %15073 = vmatpush3.bf16.msra.mxu0 %v15859_v40  ;;  %v15862_v40 = vld [vmem:[%s23672_s3 + $0x1b0] sm:$0xff]  }
 0x2cf   : > { %v18395_v56 = vadd.f32 %v5248_v0, %v4879_v26  ;;  %14881 = vmatmul.mubr.bf16.gmra.mrb[80].mxu0 %v24803_v46  ;;  %15074 = vmatprep.subr.bf16.mxu0 %v15860_v15 }
 0x2d0   : > { %14884 = vmatprep.mubr.bf16.mxu0 %v24804_v33 }
 0x2d2   : > { %v14674_v25 = vpop.f32.mrb[232].mxu0  ;;  %15075 = vmatpush3.bf16.msra.mxu0 %v15860_v15  ;;  %v15863_v15 = vld [vmem:[%s23672_s3 + $0x1b8] sm:$0xff]  }
 0x2d3   : > { %v14762_v29 = vpop.f32.mrb[232].mxu1  ;;  %v4892_v1 = vpop.f32.mrb[233].mxu0  ;;  %15076 = vmatprep.subr.bf16.mxu0 %v15862_v40 }
 0x2d4   : > { %v18402_v8 = vadd.f32 %v14762_v29, %v14674_v25  ;;  %v5261_v38 = vpop.f32.mrb[233].mxu1  ;;  %v14675_v0 = vpop.f32.mrb[234].mxu0 }
 0x2d5   : > { %v18404_v26 = vadd.f32 %v5261_v38, %v4892_v1  ;;  %v14763_v46 = vpop.f32.mrb[234].mxu1  ;;  %v4895_v43 = vpop.f32.mrb[235].mxu0 }
 0x2d6   : > { %v5264_v33 = vpop.f32.mrb[235].mxu1  ;;  %15077 = vmatpush3.bf16.msra.mxu0 %v15862_v40  ;;  %v18432_v40 = vld [vmem:[%s23672_s3] sm:$0xff]  }
 0x2d7   : > { %24805 = vst [vmem:[#allocation66_spill] sm:$0xff] %v18404_v26  ;;  %v18409_v62 = vadd.f32 %v5264_v33, %v4895_v43  ;;  %14885 = vmatmul.mubr.bf16.gmra.mrb[84].mxu0 %v24688_v55  ;;  %15078 = vmatprep.subr.bf16.mxu0 %v15863_v15 }
 0x2d8   : > { %14888 = vmatprep.mubr.bf16.mxu0 %v18096_v54  ;;  %14984 = vmatprep.subr.bf16.mxu1 %v18432_v40 }
 0x2d9   : > { %24806 = vst [vmem:[#allocation9_spill] sm:$0xff] %v18409_v62 }
 0x2da   : > { %v14678_v25 = vpop.f32.mrb[236].mxu0  ;;  %15079 = vmatpush3.bf16.msra.mxu0 %v15863_v15 }
 0x2db   : > { %v14766_v29 = vpop.f32.mrb[236].mxu1  ;;  %v4908_v38 = vpop.f32.mrb[237].mxu0 }
 0x2dc   : > { %v18416_v1 = vadd.f32 %v14766_v29, %v14678_v25  ;;  %v5277_v0 = vpop.f32.mrb[237].mxu1  ;;  %v14679_v46 = vpop.f32.mrb[238].mxu0 }
 0x2dd   : > { %v18418_v12 = vadd.f32 %v5277_v0, %v4908_v38  ;;  %v14767_v43 = vpop.f32.mrb[238].mxu1  ;;  %v4911_v33 = vpop.f32.mrb[239].mxu0 }
 0x2de   : > { %24807 = vst [vmem:[#allocation71_spill] sm:$0xff] %v18416_v1  ;;  %v5280_v55 = vpop.f32.mrb[239].mxu1 }
 0x2df   : > { %24808 = vst [vmem:[#allocation67_spill] sm:$0xff] %v18418_v12  ;;  %v18420_v54 = vadd.f32 %v5280_v55, %v4911_v33  ;;  %14889 = vmatmul.mubr.bf16.gmra.mrb[88].mxu0 %v17563_v51 }
 0x2e0   : > { %14892 = vmatprep.mubr.bf16.mxu0 %v18125_v24  ;;  %v24812_v24 = vunpack.c.h.bf16 %v24706_v2 }
 0x2e1   : > { %24809 = vst [vmem:[#allocation69_spill] sm:$0xff] %v18420_v54 }
 0x2e2   : > { %v14682_v25 = vpop.f32.mrb[240].mxu0  ;;  %v787_v20 = vrot.slane %v24812_v24, 2 }
 0x2e3   : > { %v14770_v29 = vpop.f32.mrb[240].mxu1  ;;  %v4924_v38 = vpop.f32.mrb[241].mxu0 }
 0x2e4   : > { %v18427_v0 = vadd.f32 %v14770_v29, %v14682_v25  ;;  %v5293_v46 = vpop.f32.mrb[241].mxu1  ;;  %v14683_v43 = vpop.f32.mrb[242].mxu0  ;;  %v792_v25 = vsel %vm23878_vm1, %v787_v20, %v18218_v5  ;;  %v793_v29 = vsel %vm23878_vm1, %v18154_v21, %v787_v20 }
 0x2e5   : > { %v18434_v51 = vadd.f32 %v5293_v46, %v4924_v38  ;;  %v14771_v33 = vpop.f32.mrb[242].mxu1  ;;  %v4927_v55 = vpop.f32.mrb[243].mxu0 }
 0x2e6   : > { %24810 = vst [vmem:[#allocation10_spill] sm:$0xff] %v18427_v0  ;;  %v5296_v59 = vpop.f32.mrb[243].mxu1  ;;  %v18611_v0 = vadd.s32 240, %v16193_v45 }
 0x2e7   : > { %24811 = vst [vmem:[#allocation46_spill] sm:$0xff] %v18434_v51  ;;  %v18439_v15 = vadd.f32 %v5296_v59, %v4927_v55  ;;  %14893 = vmatmul.mubr.bf16.gmra.mrb[92].mxu0 %v17622_v41  ;;  %v909_v55 = vpack.c.bf16 %v792_v25, %v793_v29 }
 0x2e8   : > { %14896 = vmatprep.mubr.bf16.mxu0 %v18158_v18  ;;  %24854 = vst [vmem:[#allocation120_spill] sm:$0xff] %v18611_v0 }
 0x2e9   : > { %24813 = vst [vmem:[#allocation70_spill] sm:$0xff] %v18439_v15 }
 0x2ea   : > { %v14686_v38 = vpop.f32.mrb[244].mxu0 }
 0x2eb   : > { %v14774_v2 = vpop.f32.mrb[244].mxu1  ;;  %v4940_v46 = vpop.f32.mrb[245].mxu0 }
 0x2ec   : > { %v18449_v43 = vadd.f32 %v14774_v2, %v14686_v38  ;;  %v5309_v33 = vpop.f32.mrb[245].mxu1  ;;  %v14687_v59 = vpop.f32.mrb[246].mxu0 }
 0x2ed   : > { %v18451_v24 = vadd.f32 %v5309_v33, %v4940_v46  ;;  %v14775_v41 = vpop.f32.mrb[246].mxu1  ;;  %v4943_v18 = vpop.f32.mrb[247].mxu0 }
 0x2ee   : > { %24814 = vst [vmem:[#allocation11_spill] sm:$0xff] %v18449_v43  ;;  %v5312_v44 = vpop.f32.mrb[247].mxu1 }
 0x2ef   : > { %24815 = vst [vmem:[#allocation72_spill] sm:$0xff] %v18451_v24  ;;  %v18453_v27 = vadd.f32 %v5312_v44, %v4943_v18  ;;  %14897 = vmatmul.mubr.bf16.gmra.mrb[96].mxu0 %v18183_v7  ;;  %v24820_v44 = vpack.c.bf16 %v24732_v37, %v18226_v36 }
 0x2f0   : > { %14900 = vmatprep.mubr.bf16.mxu0 %v909_v55 }
 0x2f1   : > { %24816 = vst [vmem:[#allocation53_spill] sm:$0xff] %v18453_v27 }
 0x2f2   : > { %v14690_v5 = vpop.f32.mrb[248].mxu0 }
 0x2f3   : > { %v14778_v21 = vpop.f32.mrb[248].mxu1  ;;  %v4956_v20 = vpop.f32.mrb[249].mxu0 }
 0x2f4   : > { %v18456_v61 = vadd.f32 %v14778_v21, %v14690_v5  ;;  %v5325_v38 = vpop.f32.mrb[249].mxu1  ;;  %v14691_v2 = vpop.f32.mrb[250].mxu0 }
 0x2f5   : > { %v18458_v48 = vadd.f32 %v5325_v38, %v4956_v20  ;;  %v14779_v25 = vpop.f32.mrb[250].mxu1  ;;  %v4959_v29 = vpop.f32.mrb[251].mxu0 }
 0x2f6   : > { %24817 = vst [vmem:[#allocation14_spill] sm:$0xff] %v18456_v61  ;;  %v5328_v46 = vpop.f32.mrb[251].mxu1 }
 0x2f7   : > { %24818 = vst [vmem:[#allocation74_spill] sm:$0xff] %v18458_v48  ;;  %v18460_v33 = vadd.f32 %v5328_v46, %v4959_v29  ;;  %14901 = vmatmul.mubr.bf16.gmra.mrb[100].mxu0 %v24820_v44 }
 0x2f9   : > { %24819 = vst [vmem:[#allocation16_spill] sm:$0xff] %v18460_v33 }
 0x2fa   : > { %v14694_v7 = vpop.f32.mrb[252].mxu0 }
 0x2fb   : > { %v14782_v59 = vpop.f32.mrb[252].mxu1  ;;  %v4972_v55 = vpop.f32.mrb[253].mxu0 }
 0x2fc   : > { %v18465_v41 = vadd.f32 %v14782_v59, %v14694_v7  ;;  %v5341_v18 = vpop.f32.mrb[253].mxu1  ;;  %v14695_v5 = vpop.f32.mrb[254].mxu0 }
 0x2fd   : > { %v18467_v21 = vadd.f32 %v5341_v18, %v4972_v55  ;;  %v14783_v20 = vpop.f32.mrb[254].mxu1  ;;  %v4975_v38 = vpop.f32.mrb[255].mxu0 }
 0x2fe   : > { %24821 = vst [vmem:[#allocation75_spill] sm:$0xff] %v18465_v41  ;;  %v5344_v2 = vpop.f32.mrb[255].mxu1 }
 0x2ff   : > { %24822 = vst [vmem:[#allocation13_spill] sm:$0xff] %v18467_v21  ;;  %v18469_v25 = vadd.f32 %v5344_v2, %v4975_v38 }
 0x301   : > { %24823 = vst [vmem:[#allocation56_spill] sm:$0xff] %v18469_v25 }
 0x302   : > { %v14698_v29 = vpop.f32.mrb[0].mxu0 }
 0x303   : > { %v14786_v46 = vpop.f32.mrb[0].mxu1  ;;  %v4988_v50 = vpop.f32.mrb[1].mxu0 }
 0x304   : > { %v18471_v6 = vadd.f32 %v14786_v46, %v14698_v29  ;;  %v5357_v36 = vpop.f32.mrb[1].mxu1  ;;  %v14699_v37 = vpop.f32.mrb[2].mxu0 }
 0x305   : > { %v18473_v44 = vadd.f32 %v5357_v36, %v4988_v50  ;;  %v14787_v7 = vpop.f32.mrb[2].mxu1  ;;  %v4991_v59 = vpop.f32.mrb[3].mxu0 }
 0x306   : > { %24824 = vst [vmem:[#allocation15_spill] sm:$0xff] %v18471_v6  ;;  %v5360_v53 = vpop.f32.mrb[3].mxu1  ;;  %v18542_v6 = vadd.s32 144, %v16193_v45 }
 0x307   : > { %24825 = vst [vmem:[#allocation73_spill] sm:$0xff] %v18473_v44  ;;  %v18475_v5 = vadd.f32 %v5360_v53, %v4991_v59  ;;  %v6170_v44 = vadd.s32 104, %v16193_v45 }
 0x308   : > { %24842 = vst [vmem:[#allocation23_spill] sm:$0xff] %v18542_v6 }
 0x309   : > { %24826 = vst [vmem:[#allocation18_spill] sm:$0xff] %v18475_v5  ;;  %v18513_v5 = vadd.s32 64, %v16193_v45 }
 0x30a   : > { %v14702_v55 = vpop.f32.mrb[4].mxu0 }
 0x30b   : > { %v14790_v18 = vpop.f32.mrb[4].mxu1  ;;  %v5004_v20 = vpop.f32.mrb[5].mxu0 }
 0x30c   : > { %v18477_v11 = vadd.f32 %v14790_v18, %v14702_v55  ;;  %v5373_v38 = vpop.f32.mrb[5].mxu1  ;;  %v14703_v2 = vpop.f32.mrb[6].mxu0 }
 0x30d   : > { %v18479_v28 = vadd.f32 %v5373_v38, %v5004_v20  ;;  %v14791_v29 = vpop.f32.mrb[6].mxu1  ;;  %v5007_v46 = vpop.f32.mrb[7].mxu0 }
 0x30e   : > { %24827 = vst [vmem:[#allocation76_spill] sm:$0xff] %v18477_v11  ;;  %v5376_v52 = vpop.f32.mrb[7].mxu1 }
 0x30f   : > { %24828 = vst [vmem:[#allocation17_spill] sm:$0xff] %v18479_v28  ;;  %v18481_v37 = vadd.f32 %v5376_v52, %v5007_v46 }
 0x311   : > { %24829 = vst [vmem:[#allocation107_spill] sm:$0xff] %v18481_v37 }
 0x312   : > { %v14706_v50 = vpop.f32.mrb[8].mxu0 }
 0x313   : > { %v14794_v36 = vpop.f32.mrb[8].mxu1  ;;  %v5020_v7 = vpop.f32.mrb[9].mxu0 }
 0x314   : > { %v18483_v34 = vadd.f32 %v14794_v36, %v14706_v50  ;;  %v5389_v53 = vpop.f32.mrb[9].mxu1  ;;  %v14707_v59 = vpop.f32.mrb[10].mxu0 }
 0x315   : > { %v18485_v60 = vadd.f32 %v5389_v53, %v5020_v7  ;;  %v14795_v55 = vpop.f32.mrb[10].mxu1  ;;  %v5023_v18 = vpop.f32.mrb[11].mxu0  ;;  %v6158_v7 = vadd.s32 8, %v16193_v45 }
 0x316   : > { %24830 = vst [vmem:[#allocation19_spill] sm:$0xff] %v18483_v34  ;;  %v5392_v11 = vpop.f32.mrb[11].mxu1 }
 0x317   : > { %24831 = vst [vmem:[#allocation109_spill] sm:$0xff] %v18485_v60  ;;  %v18487_v2 = vadd.f32 %v5392_v11, %v5023_v18  ;;  %v18497_v11 = vadd.s32 32, %v16193_v45 }
 0x319   : > { %24832 = vst [vmem:[#allocation108_spill] sm:$0xff] %v18487_v2  ;;  %v6233_v60 = vshra.s32 %v18497_v11, 5 }
 0x31a   : > { %v14710_v20 = vpop.f32.mrb[12].mxu0 }
 0x31b   : > { %v14798_v38 = vpop.f32.mrb[12].mxu1  ;;  %v5036_v29 = vpop.f32.mrb[13].mxu0 }
 0x31c   : > { %v18489_v28 = vadd.f32 %v14798_v38, %v14710_v20  ;;  %v5405_v52 = vpop.f32.mrb[13].mxu1  ;;  %v14711_v46 = vpop.f32.mrb[14].mxu0  ;;  %v18500_v20 = vadd.s32 48, %v16193_v45  ;;  %v6229_v38 = vshra.s32 %v16193_v45, 5 }
 0x31d   : > { %v18491_v37 = vadd.f32 %v5405_v52, %v5036_v29  ;;  %v14799_v50 = vpop.f32.mrb[14].mxu1  ;;  %v5039_v36 = vpop.f32.mrb[15].mxu0 }
 0x31e   : > { %24833 = vst [vmem:[#allocation110_spill] sm:$0xff] %v18489_v28  ;;  %v5408_v34 = vpop.f32.mrb[15].mxu1  ;;  %v6230_v28 = vshra.s32 %v6158_v7, 5  ;;  %v6166_v7 = vadd.s32 72, %v16193_v45 }
 0x31f   : > { %24834 = vst [vmem:[#allocation20_spill] sm:$0xff] %v18491_v37  ;;  %v18493_v59 = vadd.f32 %v5408_v34, %v5039_v36  ;;  %v6162_v34 = vadd.s32 40, %v16193_v45  ;;  %v18509_v37 = vadd.s32 80, %v16193_v45 }
 0x321   : > { %24835 = vst [vmem:[#allocation111_spill] sm:$0xff] %v18493_v59 }
 0x322   : > { %v14714_v53 = vpop.f32.mrb[16].mxu0 }
 0x323   : > { %v14802_v55 = vpop.f32.mrb[16].mxu1  ;;  %v5052_v18 = vpop.f32.mrb[17].mxu0 }
 0x324   : > { %v18503_v29 = vadd.f32 %v14802_v55, %v14714_v53  ;;  %v5421_v52 = vpop.f32.mrb[17].mxu1  ;;  %v14715_v46 = vpop.f32.mrb[18].mxu0  ;;  %v6235_v55 = vshra.s32 %v18500_v20, 5 }
 0x325   : > { %v18506_v50 = vadd.f32 %v5421_v52, %v5052_v18  ;;  %v14803_v36 = vpop.f32.mrb[18].mxu1  ;;  %v5055_v59 = vpop.f32.mrb[19].mxu0  ;;  %v18519_v18 = vadd.s32 4294967295, %v6229_v38  ;;  %v6234_v52 = vshra.s32 %v6162_v34, 5  ;;  %v18535_v38 = vadd.s32 4294967295, %v6230_v28 }
 0x326   : > { %24836 = vst [vmem:[#allocation21_spill] sm:$0xff] %v18503_v29  ;;  %v5424_v2 = vpop.f32.mrb[19].mxu1  ;;  %v23837_v36 = vmov 0.0   ;;  %v18526_v29 = vadd.s32 112, %v16193_v45  ;;  %v18537_v46 = vadd.s32 4294967295, %v6233_v60  ;;  %v18546_v3 = vadd.s32 4294967295, %v6235_v55 }
 0x327   : > { %24837 = vst [vmem:[#allocation112_spill] sm:$0xff] %v18506_v50  ;;  %v18515_v53 = vadd.f32 %v5424_v2, %v5055_v59  ;;  %v18522_v50 = vrot.slane %v23837_v36, 1  ;;  %v18529_v22 = vrot.slane %v23837_v36, 2  ;;  %v6239_v2 = vshra.s32 %v18509_v37, 5  ;;  %24841 = vst [vmem:[#allocation77_spill] sm:$0xff] %v18535_v38 }
 0x328   : > { %v18533_v59 = vadd.s32 96, %v16193_v45  ;;  %v18549_v28 = vadd.s32 128, %v16193_v45  ;;  %v18553_v39 = vadd.s32 4294967295, %v6234_v52  ;;  %v6243_v33 = vshra.s32 %v18526_v29, 5 }
 0x329   : > { %24838 = vst [vmem:[#allocation22_spill] sm:$0xff] %v18515_v53  ;;  %24839 = vst [vmem:[#allocation113_spill] sm:$0xff] %v18522_v50  ;;  %v6237_v53 = vshra.s32 %v18513_v5, 5  ;;  %v18558_v48 = vadd.s32 4294967295, %v6239_v2  ;;  %v6174_v52 = vadd.s32 136, %v16193_v45  ;;  %v6182_v50 = vadd.s32 200, %v16193_v45 }
 0x32a   : > { %24840 = vst [vmem:[#allocation24_spill] sm:$0xff] %v18529_v22  ;;  %v14718_v34 = vpop.f32.mrb[20].mxu0  ;;  %24843 = vst [vmem:[#allocation114_spill] sm:$0xff] %v18549_v28  ;;  %v6238_v22 = vshra.s32 %v6166_v7, 5  ;;  %v6241_v55 = vshra.s32 %v18533_v59, 5  ;;  %v6247_v7 = vshra.s32 %v18542_v6, 5 }
 0x32b   : > { %v14806_v30 = vpop.f32.mrb[20].mxu1  ;;  %v5068_v36 = vpop.f32.mrb[21].mxu0  ;;  %v6246_v27 = vshra.s32 %v6174_v52, 5  ;;  %vm6452_vm2 = vcmp.ge.s32.totalorder %v18537_v46, 0  ;;  %vm6524_vm3 = vcmp.lt.s32.totalorder %v18537_v46, 16  ;;  %vm6454_vm4 = vcmp.ge.s32.totalorder %v18546_v3, 0 }
 0x32c   : > { %v18551_v60 = vadd.f32 %v14806_v30, %v14718_v34  ;;  %v5437_v21 = vpop.f32.mrb[21].mxu1  ;;  %v14719_v41 = vpop.f32.mrb[22].mxu0  ;;  %v18564_v34 = vadd.s32 4294967295, %v6237_v53  ;;  %v18578_v53 = vadd.s32 4294967295, %v6243_v33  ;;  %v18590_v2 = vadd.s32 4294967295, %v6247_v7  ;;  %vm18846_vm1 = vmand %vm6452_vm2, %vm6524_vm3 }
 0x32d   : > { %v18556_v19 = vadd.f32 %v5437_v21, %v5068_v36  ;;  %v14807_v31 = vpop.f32.mrb[22].mxu1  ;;  %v5071_v25 = vpop.f32.mrb[23].mxu0  ;;  %v6242_v41 = vshra.s32 %v6170_v44, 5  ;;  %v6245_v21 = vshra.s32 %v18549_v28, 5  ;;  %v18573_v36 = vadd.s32 176, %v16193_v45 }
 0x32e   : > { %24844 = vst [vmem:[#allocation25_spill] sm:$0xff] %v18551_v60  ;;  %v5440_v30 = vpop.f32.mrb[23].mxu1  ;;  %v18581_v44 = vadd.s32 160, %v16193_v45  ;;  %v6231_v31 = vshra.s32 %v18562_v32, 5  ;;  %v18618_v7 = vadd.s32 224, %v16193_v45  ;;  %v18644_v32 = vadd.s32 304, %v16193_v45 }
 0x32f   : > { %24845 = vst [vmem:[#allocation116_spill] sm:$0xff] %v18556_v19  ;;  %v18568_v60 = vadd.f32 %v5440_v30, %v5071_v25  ;;  %24848 = vst [vmem:[#allocation115_spill] sm:$0xff] %v18573_v36  ;;  %v18576_v19 = vadd.s32 4294967295, %v6238_v22  ;;  %v18584_v25 = vadd.s32 4294967295, %v6241_v55  ;;  %v18588_v58 = vadd.s32 4294967295, %v6242_v41 }
 0x330   : > { %24849 = vst [vmem:[#allocation117_spill] sm:$0xff] %v18581_v44  ;;  %v6178_v22 = vadd.s32 168, %v16193_v45  ;;  %v18593_v47 = vadd.s32 4294967295, %v6245_v21  ;;  %v6251_v61 = vshra.s32 %v18573_v36, 5  ;;  %v18597_v55 = vadd.s32 192, %v16193_v45  ;;  %24856 = vst [vmem:[#allocation121_spill] sm:$0xff] %v18618_v7 }
 0x331   : > { %24847 = vst [vmem:[#allocation78_spill] sm:$0xff] %v18568_v60  ;;  %v18600_v30 = vadd.s32 208, %v16193_v45  ;;  %v6249_v43 = vshra.s32 %v18581_v44, 5  ;;  %v18613_v54 = vadd.s32 4294967295, %v6231_v31  ;;  %v6254_v31 = vshra.s32 %v6182_v50, 5  ;;  %24863 = vst [vmem:[#allocation30_spill] sm:$0xff] %v18644_v32 }
 0x332   : > { %v14722_v60 = vpop.f32.mrb[24].mxu0  ;;  %24850 = vst [vmem:[#allocation27_spill] sm:$0xff] %v18597_v55  ;;  %v6257_v50 = vshra.s32 %v18618_v7, 5  ;;  %vm6526_vm5 = vcmp.lt.s32.totalorder %v18546_v3, 16  ;;  %vm6453_vm6 = vcmp.ge.s32.totalorder %v18553_v39, 0  ;;  %vm6525_vm7 = vcmp.lt.s32.totalorder %v18553_v39, 16 }
 0x333   : > { %v14810_v33 = vpop.f32.mrb[24].mxu1  ;;  %v5084_v63 = vpop.f32.mrb[25].mxu0  ;;  %24851 = vst [vmem:[#allocation119_spill] sm:$0xff] %v18600_v30  ;;  %24855 = vst [vmem:[#allocation28_spill] sm:$0xff] %v18613_v54  ;;  %v6255_v51 = vshra.s32 %v18600_v30, 5  ;;  %vm6456_vm10 = vcmp.ge.s32.totalorder %v18564_v34, 0 }
 0x334   : > { %v18602_v24 = vadd.f32 %v14810_v33, %v14722_v60  ;;  %v5453_v41 = vpop.f32.mrb[25].mxu1  ;;  %v14723_v52 = vpop.f32.mrb[26].mxu0  ;;  %v18615_v33 = vadd.s32 4294967295, %v6246_v27  ;;  %v6186_v27 = vadd.s32 232, %v16193_v45  ;;  %v18663_v30 = vadd.s32 4294967295, %v6257_v50  ;;  %vm18863_vm2 = vmand %vm6454_vm4, %vm6526_vm5 }
 0x335   : > { %v18607_v21 = vadd.f32 %v5453_v41, %v5084_v63  ;;  %v14811_v15 = vpop.f32.mrb[26].mxu1  ;;  %v5087_v16 = vpop.f32.mrb[27].mxu0  ;;  %v6250_v52 = vshra.s32 %v6178_v22, 5  ;;  %v6253_v41 = vshra.s32 %v18597_v55, 5  ;;  %v18631_v22 = vadd.s32 272, %v16193_v45  ;;  %vm18880_vm4 = vmand %vm6453_vm6, %vm6525_vm7 }
 0x336   : > { %24852 = vst [vmem:[#allocation29_spill] sm:$0xff] %v18602_v24  ;;  %v5456_v60 = vpop.f32.mrb[27].mxu1  ;;  %v18623_v15 = vadd.s32 4294967295, %v6251_v61  ;;  %v6259_v24 = vshra.s32 %v18611_v0, 5  ;;  %v6190_v61 = vadd.s32 264, %v16193_v45  ;;  %vm6528_vm11 = vcmp.lt.s32.totalorder %v18564_v34, 16 }
 0x337   : > { %24853 = vst [vmem:[#allocation118_spill] sm:$0xff] %v18607_v21  ;;  %v18621_v63 = vadd.f32 %v5456_v60, %v5087_v16  ;;  %v18627_v21 = vadd.s32 4294967295, %v6249_v43  ;;  %24860 = vst [vmem:[#allocation79_spill] sm:$0xff] %v18631_v22  ;;  %v18636_v16 = vadd.s32 256, %v16193_v45  ;;  %v18640_v43 = vadd.s32 4294967295, %v6250_v52 }
 0x338   : > { %24858 = vst [vmem:[#allocation124_spill] sm:$0xff] %v18623_v15  ;;  %v18647_v36 = vadd.s32 4294967295, %v6253_v41  ;;  %v6258_v52 = vshra.s32 %v6186_v27, 5  ;;  %v6263_v44 = vshra.s32 %v18631_v22, 5  ;;  %v18658_v26 = vadd.s32 4294967295, %v6259_v24 }
 0x339   : > { %24857 = vst [vmem:[#allocation123_spill] sm:$0xff] %v18621_v63  ;;  %24859 = vst [vmem:[#allocation125_spill] sm:$0xff] %v18627_v21  ;;  %v18650_v21 = vadd.s32 4294967295, %v6255_v51  ;;  %v18652_v63 = vadd.s32 4294967295, %v6254_v31  ;;  %v6261_v41 = vshra.s32 %v18636_v16, 5  ;;  %v6262_v54 = vshra.s32 %v6190_v61, 5 }
 0x33a   : > { %24861 = vst [vmem:[#allocation126_spill] sm:$0xff] %v18636_v16  ;;  %v14726_v60 = vpop.f32.mrb[28].mxu0  ;;  %24862 = vst [vmem:[#allocation122_spill] sm:$0xff] %v18640_v43  ;;  %v18656_v43 = vadd.s32 288, %v16193_v45  ;;  %v6267_v31 = vshra.s32 %v18644_v32, 5  ;;  %v18674_v24 = vadd.s32 336, %v16193_v45 }
 0x33b   : > { %v14814_v12 = vpop.f32.mrb[28].mxu1  ;;  %v5100_v1 = vpop.f32.mrb[29].mxu0  ;;  %24865 = vst [vmem:[#allocation41_spill] sm:$0xff] %v18658_v26  ;;  %v18681_v50 = vadd.s32 4294967295, %v6263_v44  ;;  %v18687_v55 = vadd.s32 4294967295, %v6262_v54  ;;  %v18700_v54 = vadd.s32 352, %v16193_v45 }
 0x33c   : > { %v5469_v38 = vpop.f32.mrb[29].mxu1  ;;  %v14727_v62 = vpop.f32.mrb[30].mxu0  ;;  %24864 = vst [vmem:[#allocation95_spill] sm:$0xff] %v18656_v43  ;;  %v18661_v15 = vadd.f32 %v14814_v12, %v14726_v60  ;;  %24869 = vst [vmem:[#allocation90_spill] sm:$0xff] %v18674_v24  ;;  %v18679_v60 = vadd.s32 4294967295, %v6258_v52  ;;  %v18694_v52 = vadd.s32 368, %v16193_v45 }
 0x33d   : > { %v14815_v6 = vpop.f32.mrb[30].mxu1  ;;  %v5103_v28 = vpop.f32.mrb[31].mxu0  ;;  %v6194_v62 = vadd.s32 296, %v16193_v45  ;;  %v18667_v27 = vadd.f32 %v5469_v38, %v5100_v1  ;;  %24871 = vst [vmem:[#allocation128_spill] sm:$0xff] %v18681_v50  ;;  %v18685_v38 = vadd.s32 4294967295, %v6261_v41  ;;  %24873 = vst [vmem:[#allocation130_spill] sm:$0xff] %v18687_v55 }
 0x33e   : > { %24866 = vst [vmem:[#allocation98_spill] sm:$0xff] %v18661_v15  ;;  %v5472_v51 = vpop.f32.mrb[31].mxu1  ;;  %v18671_v6 = vadd.s32 320, %v16193_v45  ;;  %v6265_v15 = vshra.s32 %v18656_v43, 5  ;;  %24875 = vst [vmem:[#allocation132_spill] sm:$0xff] %v18694_v52  ;;  %v6271_v41 = vshra.s32 %v18674_v24, 5 }
 0x33f   : > { %24867 = vst [vmem:[#allocation34_spill] sm:$0xff] %v18667_v27  ;;  %v18676_v61 = vadd.f32 %v5472_v51, %v5103_v28  ;;  %24872 = vst [vmem:[#allocation129_spill] sm:$0xff] %v18685_v38  ;;  %v6266_v26 = vshra.s32 %v6194_v62, 5  ;;  %v18690_v28 = vadd.s32 4294967295, %v6267_v31  ;;  %v6198_v51 = vadd.s32 328, %v16193_v45  ;;  %v18705_v62 = vld [vmem:[%s23672_s3 + $0x40] sm:$0xff]  }
 0x340   : > { %24868 = vst [vmem:[#allocation105_spill] sm:$0xff] %v18671_v6  ;;  %v6269_v1 = vshra.s32 %v18671_v6, 5  ;;  %24876 = vst [vmem:[#allocation133_spill] sm:$0xff] %v18700_v54  ;;  %v18717_v50 = vadd.s32 384, %v16193_v45  ;;  %v18720_v38 = vadd.s32 400, %v16193_v45  ;;  %15224 = vmatprep.subr.bf16.mxu0 %v18705_v62  ;;  %v18732_v55 = vadd.s32 4294967295, %v6271_v41 }
 0x341   : > { %24870 = vst [vmem:[#allocation127_spill] sm:$0xff] %v18676_v61  ;;  %24874 = vst [vmem:[#allocation131_spill] sm:$0xff] %v18690_v28  ;;  %v18708_v61 = vadd.s32 4294967295, %v6265_v15  ;;  %v24878_v28 = vld [vmem:[#allocation80_spill] sm:$0xff]  ;;  %v6273_v32 = vshra.s32 %v18700_v54, 5  ;;  %v24885_v43 = vld [vmem:[#allocation33_spill] sm:$0xff] }
 0x342   : > { %v14834_v0 = vpop.f32.mrb[32].mxu0  ;;  %24879 = vst [vmem:[#allocation80_spill] sm:$0xff] %v18717_v50  ;;  %24880 = vst [vmem:[#allocation135_spill] sm:$0xff] %v18720_v38  ;;  %v24896_v54 = vand.u32 31, %v18500_v20  ;;  %v18793_v20 = vld [vmem:[%s23673_s4] ss:$0 sm:$0xff] }
 0x343   : > { %v5872_v44 = vadd.f32 %v14834_v0, %v18349_v14  ;;  %v5583_v12 = vpop.f32.mrb[33].mxu0  ;;  %24877 = vst [vmem:[#allocation134_spill] sm:$0xff] %v18708_v61  ;;  %v6202_v0 = vadd.s32 360, %v16193_v45  ;;  %v18730_v14 = vadd.s32 4294967295, %v6269_v1  ;;  %24884 = vst [vmem:[#allocation137_spill] sm:$0xff] %v18732_v55  ;;  %v18748_v1 = vadd.s32 416, %v16193_v45 }
 0x344   : > { %v5870_v31 = vadd.f32 %v5583_v12, %v18351_v57  ;;  %v14835_v27 = vpop.f32.mrb[34].mxu0  ;;  %v24881_v57 = vld [vmem:[#allocation81_spill] sm:$0xff]  ;;  %v6270_v12 = vshra.s32 %v6198_v51, 5  ;;  %vm18778_vm9 = vcmp.le.s32.totalorder %v24896_v54, 16  ;;  %v24918_v46 = vmov 0 }
 0x345   : > { %v18713_v22 = vadd.f32 %v5872_v44, %v24878_v28  ;;  %v5586_v16 = vpop.f32.mrb[35].mxu0  ;;  %v6275_v28 = vshra.s32 %v18694_v52, 5  ;;  %v18728_v44 = vadd.s32 4294967295, %v6266_v26  ;;  %24883 = vst [vmem:[#allocation136_spill] sm:$0xff] %v18730_v14  ;;  %v6274_v7 = vshra.s32 %v6202_v0, 5  ;;  %24887 = vst [vmem:[#allocation138_spill] sm:$0xff] %v18748_v1 }
 0x346   : > { %v18724_v15 = vadd.f32 %v5870_v31, %v24881_v57  ;;  %v5871_v27 = vadd.f32 %v5586_v16, %v18353_v35  ;;  %v6206_v31 = vadd.s32 392, %v16193_v45  ;;  %v18740_v57 = vadd.s32 432, %v16193_v45  ;;  %vm23887_vm6 = vmand %vm18863_vm2, %vm18778_vm9 }
 0x347   : > { %24882 = vst [vmem:[#allocation81_spill] sm:$0xff] %v18728_v44  ;;  %v6277_v26 = vshra.s32 %v18717_v50, 5  ;;  %v6279_v16 = vshra.s32 %v18720_v38, 5  ;;  %v18753_v41 = vadd.s32 4294967295, %v6270_v12  ;;  %v18755_v0 = vadd.s32 4294967295, %v6275_v28 }
 0x348   : > { %v18736_v61 = vadd.f32 %v5871_v27, %v24885_v43  ;;  %24886 = vst [vmem:[#allocation33_spill] sm:$0xff] %v18740_v57  ;;  %v6210_v27 = vadd.s32 424, %v16193_v45  ;;  %v18762_v14 = vadd.s32 4294967295, %v6273_v32  ;;  %v24891_v28 = vand.u32 31, %v18497_v11 }
 0x349   : > { %24888 = vst [vmem:[#allocation139_spill] sm:$0xff] %v18753_v41  ;;  %24889 = vst [vmem:[#allocation140_spill] sm:$0xff] %v18755_v0  ;;  %v6283_v6 = vshra.s32 %v18740_v57, 5  ;;  %v24895_v41 = vld [vmem:[#allocation82_spill] sm:$0xff]  ;;  %v24897_v44 = vmov 0  ;;  %v18784_v11 = vadd.s32 4294967295, %v6279_v16 }
 0x34a   : > { %v14838_v43 = vpop.f32.mrb[36].mxu0  ;;  %24890 = vst [vmem:[#allocation141_spill] sm:$0xff] %v18762_v14  ;;  %vm18768_vm8 = vcmp.ge.s32.totalorder %v24891_v28, 1  ;;  %v24898_v44 = vsel %vm18778_vm9, 4294967295, %v24897_v44  ;;  %v18800_v16 = vadd.s32 456, %v16193_v45  ;;  %v18818_v50 = vadd.s32 496, %v16193_v45 }
 0x34b   : > { %v5876_v35 = vadd.f32 %v14838_v43, %v18360_v23  ;;  %v5599_v24 = vpop.f32.mrb[37].mxu0  ;;  %v18772_v23 = vadd.s32 4294967295, %v6274_v7  ;;  %v6278_v43 = vshra.s32 %v6206_v31, 5  ;;  %24899 = vst [vmem:[#allocation82_spill] sm:$0xff] %v24898_v44  ;;  %24901 = vst [vmem:[#allocation144_spill] sm:$0xff] %v18784_v11  ;;  %v24902_v7 = vld [vmem:[#allocation84_spill] sm:$0xff] }
 0x34c   : > { %v5874_v12 = vadd.f32 %v5599_v24, %v18362_v9  ;;  %v14839_v51 = vpop.f32.mrb[38].mxu0  ;;  %v18782_v9 = vadd.s32 4294967295, %v6277_v26  ;;  %v6281_v24 = vshra.s32 %v18748_v1, 5  ;;  %v18797_v26 = vadd.s32 448, %v16193_v45  ;;  %24909 = vst [vmem:[#allocation148_spill] sm:$0xff] %v18818_v50  ;;  %vm23886_vm12 = vmand %vm18846_vm1, %vm18768_vm8 }
 0x34d   : > { %24894 = vst [vmem:[#allocation142_spill] sm:$0xff] %v18772_v23  ;;  %v6020_v55 = vadd.f32 %v5876_v35, %v24895_v41  ;;  %v5602_v32 = vpop.f32.mrb[39].mxu0  ;;  %v6282_v35 = vshra.s32 %v6210_v27, 5  ;;  %v18803_v41 = vadd.s32 464, %v16193_v45  ;;  %v24919_v46 = vsel %vm18863_vm2, 4294967295, %v24918_v46  ;;  %v25045_v23 = vld [vmem:[#allocation117_spill] sm:$0xff] }
 0x34e   : > { %24900 = vst [vmem:[#allocation143_spill] sm:$0xff] %v18782_v9  ;;  %v6018_v51 = vadd.f32 %v5874_v12, %v24902_v7  ;;  %v5875_v31 = vadd.f32 %v5602_v32, %v18364_v17  ;;  %24903 = vst [vmem:[#allocation84_spill] sm:$0xff] %v18797_v26  ;;  %v24905_v12 = vld [vmem:[#allocation86_spill] sm:$0xff]  ;;  %v18807_v32 = vadd.s32 4294967295, %v6278_v43  ;;  %v18809_v7 = vadd.s32 4294967295, %v6283_v6  ;;  %v24931_v9 = vld [vmem:[#allocation85_spill] sm:$0xff] }
 0x34f   : > { %24904 = vst [vmem:[#allocation145_spill] sm:$0xff] %v18803_v41  ;;  %v7034_v17 = vadd.f32 %v18793_v20, %v6020_v55  ;;  %v18814_v54 = vadd.s32 4294967295, %v6281_v24  ;;  %v18824_v43 = vadd.s32 4294967295, %v6282_v35  ;;  %v18832_v24 = vld [vmem:[%s23673_s4 + $0x1] ss:$0 sm:$0xff]  ;;  %v6285_v38 = vshra.s32 %v18797_v26, 5 }
 0x350   : > { %v6019_v27 = vadd.f32 %v5875_v31, %v24905_v12  ;;  %24906 = vst [vmem:[#allocation86_spill] sm:$0xff] %v18807_v32  ;;  %24907 = vst [vmem:[#allocation146_spill] sm:$0xff] %v18809_v7  ;;  %v7032_v28 = vadd.f32 %v18793_v20, %v6018_v51  ;;  %v18827_v51 = vadd.s32 480, %v16193_v45  ;;  %v6286_v35 = vshra.s32 %v18800_v16, 5 }
 0x351   : > { %24908 = vst [vmem:[#allocation147_spill] sm:$0xff] %v18814_v54  ;;  %24910 = vst [vmem:[#allocation149_spill] sm:$0xff] %v18824_v43  ;;  %v6287_v6 = vshra.s32 %v18803_v41, 5  ;;  %v7182_v57 = vmul.f32 %v18832_v24, %v7034_v17  ;;  %v24914_v16 = vand.u32 31, %v18513_v5  ;;  %v24915_v7 = vmov 0  ;;  %v15864_v41 = vld [vmem:[%s23672_s3 + $0x8] sm:$0xff]  }
 0x352   : > { %v7033_v55 = vadd.f32 %v18793_v20, %v6019_v27  ;;  %v14842_v31 = vpop.f32.mrb[40].mxu0  ;;  %24911 = vst [vmem:[#allocation150_spill] sm:$0xff] %v18827_v51  ;;  %vm7106_vm15 = vcmp.ge.f32.partialorder %v7034_v17, 0.0  ;;  %v7180_v54 = vmul.f32 %v18832_v24, %v7032_v28  ;;  %v24921_v5 = vand.u32 31, %v18509_v37 }
 0x353   : > { %v5880_v12 = vadd.f32 %v14842_v31, %v18371_v42  ;;  %v5615_v27 = vpop.f32.mrb[41].mxu0  ;;  %vm18853_vm14 = vcmp.ge.s32.totalorder %v24914_v16, 1  ;;  %v24922_v16 = vmov 0  ;;  %v6291_v32 = vshra.s32 %v18818_v50, 5 }
 0x354   : > { %v5878_v1 = vadd.f32 %v5615_v27, %v18373_v10  ;;  %v14843_v43 = vpop.f32.mrb[42].mxu0  ;;  %vm7105_vm0 = vcmp.ge.f32.partialorder %v7033_v55, 0.0  ;;  %v7181_v31 = vmul.f32 %v18832_v24, %v7033_v55  ;;  %v24916_v7 = vsel %vm18853_vm14, 4294967295, %v24915_v7  ;;  %v24917_v10 = vld [vmem:[#allocation88_spill] sm:$0xff] }
 0x355   : > { %v6024_v43 = vadd.f32 %v5880_v12, %v24917_v10  ;;  %v5618_v27 = vpop.f32.mrb[43].mxu0  ;;  %24920 = vst [vmem:[#allocation88_spill] sm:$0xff] %v24919_v46  ;;  %vm18869_vm3 = vcmp.le.s32.totalorder %v24921_v5, 16  ;;  %v24925_v12 = vld [vmem:[#allocation83_spill] sm:$0xff]  ;;  %v24926_v3 = vmov 0  ;;  %vm7104_vm5 = vcmp.ge.f32.partialorder %v7032_v28, 0.0 }
 0x356   : > { %v24923_v16 = vsel %vm18869_vm3, 4294967295, %v24922_v16  ;;  %v6022_v10 = vadd.f32 %v5878_v1, %v24925_v12  ;;  %v5879_v11 = vadd.f32 %v5618_v27, %v18378_v4  ;;  %v24927_v3 = vsel %vm18880_vm4, 4294967295, %v24926_v3  ;;  %v25039_v46 = vld [vmem:[#allocation122_spill] sm:$0xff] }
 0x357   : > { %24924 = vst [vmem:[#allocation151_spill] sm:$0xff] %v24923_v16  ;;  %v6289_v37 = vshra.s32 %v18827_v51, 5  ;;  %v18890_v1 = vsel %vm7105_vm0, %v7033_v55, %v7181_v31  ;;  %v18892_v4 = vadd.s32 4294967295, %v6285_v38  ;;  %v18894_v27 = vadd.s32 4294967295, %v6287_v6  ;;  %v24994_v16 = vld [vmem:[#allocation114_spill] sm:$0xff] }
 0x358   : > { %v6218_v39 = vadd.s32 488, %v16193_v45  ;;  %v18898_v5 = vsel %vm7106_vm15, %v7034_v17, %v7182_v57  ;;  %v7038_v12 = vadd.f32 %v18793_v20, %v6024_v43  ;;  %v6023_v52 = vadd.f32 %v5879_v11, %v24931_v9  ;;  %vm18919_vm15 = vmpackc.low %vm18880_vm4, %vm23886_vm12 }
 0x359   : > { %24928 = vst [vmem:[#allocation83_spill] sm:$0xff] %v18892_v4  ;;  %24929 = vst [vmem:[#allocation152_spill] sm:$0xff] %v18894_v27  ;;  %v7036_v38 = vadd.f32 %v18793_v20, %v6022_v10  ;;  %v18910_v6 = vsel %vm7104_vm5, %v7032_v28, %v7180_v54  ;;  %v24932_v57 = vmov 0  ;;  %v18926_v11 = vadd.s32 4294967295, %v6286_v35 }
 0x35a   : > { %24930 = vst [vmem:[#allocation153_spill] sm:$0xff] %v18898_v5  ;;  %v24933_v57 = vsel %vm18919_vm15, 4294967295, %v24932_v57  ;;  %v7037_v28 = vadd.f32 %v18793_v20, %v6023_v52  ;;  %v18931_v54 = vpack.c.bf16 %v18890_v1, %v18910_v6  ;;  %v14846_v17 = vpop.f32.mrb[44].mxu0  ;;  %vm23893_vm5 = vmmov 1  }
 0x35b   : > { %24934 = vst [vmem:[#allocation85_spill] sm:$0xff] %v24933_v57  ;;  %24935 = vst [vmem:[#allocation154_spill] sm:$0xff] %v18926_v11  ;;  %v24937_v31 = vmov 0  ;;  %v18945_v52 = vadd.s32 4294967295, %v6289_v37  ;;  %v18947_v35 = vadd.s32 4294967295, %v6291_v32  ;;  %v24942_v43 = vmov 0.0  }
 0x35c   : > { %24936 = vst [vmem:[#allocation155_spill] sm:$0xff] %v18931_v54  ;;  %vm18939_vm12 = vmpackc.low %vm23893_vm5, %vm23887_vm6  ;;  %v18951_v10 = vpack.c.bf16 %v24942_v43, %v18898_v5  ;;  %v5884_v55 = vadd.f32 %v14846_v17, %v18385_v49  ;;  %v5631_v9 = vpop.f32.mrb[45].mxu0  ;;  %v6290_v26 = vshra.s32 %v6218_v39, 5  ;;  %v7186_v32 = vmul.f32 %v18832_v24, %v7038_v12  ;;  %14920 = vmatprep.mubr.msk.bf16.mxu1 %vm18919_vm15, %v18931_v54 }
 0x35d   : > { %v24938_v31 = vsel %vm18939_vm12, 4294967295, %v24937_v31  ;;  %24940 = vst [vmem:[#allocation157_spill] sm:$0xff] %v18945_v52  ;;  %24941 = vst [vmem:[#allocation158_spill] sm:$0xff] %v18947_v35  ;;  %v5882_v49 = vadd.f32 %v5631_v9, %v18390_v13  ;;  %v14847_v17 = vpop.f32.mrb[46].mxu0  ;;  %v24944_v35 = vmov 0  ;;  %v7185_v39 = vmul.f32 %v18832_v24, %v7037_v28  ;;  %v24949_v9 = vld [vmem:[#allocation35_spill] sm:$0xff] }
 0x35e   : > { %24939 = vst [vmem:[#allocation156_spill] sm:$0xff] %v24938_v31  ;;  %24943 = vst [vmem:[#allocation159_spill] sm:$0xff] %v18951_v10  ;;  %v24946_v37 = vand.u32 31, %v18533_v59  ;;  %v24947_v50 = vmov 0  ;;  %v18982_v13 = vadd.f32 %v18793_v20, %v18713_v22  ;;  %v6028_v34 = vadd.f32 %v5884_v55, %v24949_v9  ;;  %14921 = vmatmul.mubr.msk.bf16.vlgmr.msra.gmra.mrb[32].mxu1 %vm18939_vm12, %v18951_v10  ;;  %v5634_v17 = vpop.f32.mrb[47].mxu0  ;;  %v24959_v55 = vld [vmem:[#allocation48_spill] sm:$0xff] }
 0x35f   : > { %vm18969_vm6 = vmand %vm6456_vm10, %vm6528_vm11  ;;  %v7184_v57 = vmul.f32 %v18832_v24, %v7036_v38  ;;  %vm24950_vm10 = vcmp.lt.s32.totalorder %v18558_v48, 16  ;;  %vm24951_vm11 = vcmp.ge.s32.totalorder %v18558_v48, 0  ;;  %v24952_v59 = vmov 0  ;;  %14985 = vmatpush3.bf16.msra.mxu1 %v18432_v40  ;;  %v24989_v52 = vld [vmem:[#allocation66_spill] sm:$0xff] }
 0x360   : > { %v24945_v35 = vsel %vm18969_vm6, 4294967295, %v24944_v35  ;;  %vm18976_vm13 = vcmp.ge.s32.totalorder %v24946_v37, 1  ;;  %vm18993_vm5 = vmand %vm24951_vm11, %vm24950_vm10  ;;  %v24955_v22 = vand.u32 31, %v18526_v29  ;;  %v24956_v37 = vmov 0  ;;  %14986 = vmatprep.subr.bf16.mxu1 %v15864_v41 }
 0x361   : > { %v24948_v50 = vsel %vm18976_vm13, 4294967295, %v24947_v50  ;;  %v24953_v59 = vsel %vm18993_vm5, 4294967295, %v24952_v59  ;;  %v6026_v9 = vadd.f32 %v5882_v49, %v24959_v55  ;;  %v5883_v31 = vadd.f32 %v5634_v17, %v18395_v56  ;;  %vm23900_vm15 = vmand %vm18969_vm6, %vm18853_vm14 }
 0x362   : > { %24954 = vst [vmem:[#allocation35_spill] sm:$0xff] %v24953_v59  ;;  %vm18999_vm0 = vcmp.le.s32.totalorder %v24955_v22, 16  ;;  %vm24960_vm7 = vcmp.lt.s32.totalorder %v18576_v19, 16  ;;  %vm24961_vm12 = vcmp.ge.s32.totalorder %v18576_v19, 0  ;;  %v24962_v48 = vmov 0  ;;  %v15865_v19 = vld [vmem:[%s23672_s3 + $0x10] sm:$0xff]  }
 0x363   : > { %v24957_v37 = vsel %vm18999_vm0, 4294967295, %v24956_v37  ;;  %vm19010_vm10 = vmand %vm24961_vm12, %vm24960_vm7  ;;  %vm7108_vm11 = vcmp.ge.f32.partialorder %v7036_v38, 0.0  ;;  %v19015_v29 = vadd.s32 512, %v16193_v45  ;;  %vm24965_vm9 = vcmp.ge.f32.partialorder %v7037_v28, 0.0  ;;  %14987 = vmatpush3.bf16.msra.mxu1 %v15864_v41 }
 0x364   : > { %24958 = vst [vmem:[#allocation160_spill] sm:$0xff] %v24957_v37  ;;  %v24963_v48 = vsel %vm19010_vm10, 4294967295, %v24962_v48  ;;  %v19022_v40 = vsel %vm24965_vm9, %v7037_v28, %v7185_v39  ;;  %v19028_v49 = vadd.s32 4294967295, %v6290_v26  ;;  %v19031_v17 = vadd.s32 528, %v16193_v45  ;;  %v24969_v39 = vld [vmem:[#allocation87_spill] sm:$0xff]  ;;  %14988 = vmatprep.subr.bf16.mxu1 %v15865_v19 }
 0x365   : > { %24964 = vst [vmem:[#allocation48_spill] sm:$0xff] %v19015_v29  ;;  %v19035_v22 = vadd.f32 %v18793_v20, %v18724_v15  ;;  %vm24967_vm12 = vcmp.ge.f32.partialorder %v7038_v12, 0.0  ;;  %v19041_v28 = vadd.f32 %v18793_v20, %v6028_v34  ;;  %v6027_v10 = vadd.f32 %v5883_v31, %v24969_v39  ;;  %v25038_v37 = vld [vmem:[#allocation71_spill] sm:$0xff] }
 0x366   : > { %24966 = vst [vmem:[#allocation161_spill] sm:$0xff] %v19028_v49  ;;  %v19038_v55 = vsel %vm24967_vm12, %v7038_v12, %v7186_v32  ;;  %v7178_v26 = vmul.f32 %v18832_v24, %v18982_v13  ;;  %v19052_v15 = vadd.f32 %v18793_v20, %v6026_v9  ;;  %v19055_v12 = vsel %vm7108_vm11, %v7036_v38, %v7184_v57  ;;  %vm19064_vm12 = vmpackc.low %vm19010_vm10, %vm23900_vm15  ;;  %v14850_v57 = vpop.f32.mrb[48].mxu0 }
 0x367   : > { %24968 = vst [vmem:[#allocation162_spill] sm:$0xff] %v19038_v55  ;;  %v24970_v31 = vmov 0  ;;  %v7041_v32 = vadd.f32 %v18793_v20, %v6027_v10  ;;  %v19073_v38 = vpack.c.bf16 %v19022_v40, %v19055_v12  ;;  %vm24974_vm11 = vmand %vm18993_vm5, %vm18869_vm3  ;;  %vm24975_vm15 = vmmov 1   ;;  %v5647_v49 = vpop.f32.mrb[49].mxu0  ;;  %14989 = vmatpush3.bf16.msra.mxu1 %v15865_v19 }
 0x368   : > { %v24971_v31 = vsel %vm19064_vm12, 4294967295, %v24970_v31  ;;  %vm19081_vm2 = vmpackc.low %vm24975_vm15, %vm24974_vm11  ;;  %v24976_v34 = vmov 0  ;;  %v19088_v10 = vadd.s32 520, %v16193_v45  ;;  %v6293_v9 = vshra.s32 %v19015_v29, 5  ;;  %v14851_v27 = vpop.f32.mrb[50].mxu0 }
 0x369   : > { %24972 = vst [vmem:[#allocation87_spill] sm:$0xff] %v24971_v31  ;;  %24973 = vst [vmem:[#allocation163_spill] sm:$0xff] %v19073_v38  ;;  %v24977_v34 = vsel %vm19081_vm2, 4294967295, %v24976_v34  ;;  %v24979_v39 = vand.u32 31, %v16193_v45  ;;  %v24980_v56 = vmov 0  ;;  %v19099_v54 = vadd.f32 %v18793_v20, %v18736_v61  ;;  %v15871_v61 = vld [vmem:[%s23672_s3 + $0x48] sm:$0xff]   ;;  %14924 = vmatprep.mubr.msk.bf16.mxu1 %vm19064_vm12, %v19073_v38  ;;  %15080 = vmatprep.mubr.msk.bf16.mxu0 %vm19064_vm12, %v19073_v38 }
 0x36a   : > { %24978 = vst [vmem:[#allocation164_spill] sm:$0xff] %v24977_v34  ;;  %v19103_v41 = vpack.c.bf16 %v24942_v43, %v19038_v55  ;;  %v5888_v51 = vadd.f32 %v14850_v57, %v18402_v8  ;;  %vm24984_vm9 = vcmp.lt.s32.totalorder %v18519_v18, 16  ;;  %vm24985_vm3 = vcmp.ge.s32.totalorder %v18519_v18, 0 }
 0x36b   : > { %vm19093_vm10 = vcmp.ge.s32.totalorder %v24979_v39, 1  ;;  %v15866_v39 = vld [vmem:[%s23672_s3 + $0x18] sm:$0xff]   ;;  %vm19119_vm5 = vmand %vm24985_vm3, %vm24984_vm9  ;;  %v24986_v8 = vmov 0  ;;  %v7190_v57 = vmul.f32 %v18832_v24, %v19041_v28  ;;  %v5886_v11 = vadd.f32 %v5647_v49, %v24989_v52 }
 0x36c   : > { %v24981_v56 = vsel %vm19093_vm10, 4294967295, %v24980_v56  ;;  %24983 = vst [vmem:[#allocation166_spill] sm:$0xff] %v19103_v41  ;;  %v24987_v8 = vsel %vm19119_vm5, 4294967295, %v24986_v8  ;;  %vm24990_vm11 = vcmp.lt.s32.totalorder %v18584_v25, 16  ;;  %vm24991_vm3 = vcmp.ge.s32.totalorder %v18584_v25, 0  ;;  %v25000_v25 = vld [vmem:[#allocation92_spill] sm:$0xff]  ;;  %14925 = vmatmul.mubr.msk.bf16.gmra.mrb[36].mxu1 %vm19081_vm2, %v19103_v41  ;;  %15081 = vmatmul.mubr.msk.bf16.vlgmr.msra.gmra.mrb[104].mxu0 %vm19081_vm2, %v19103_v41 }
 0x36d   : > { %24982 = vst [vmem:[#allocation165_spill] sm:$0xff] %v24981_v56  ;;  %24988 = vst [vmem:[#allocation167_spill] sm:$0xff] %v24987_v8  ;;  %v24992_v18 = vmov 0  ;;  %v7189_v4 = vmul.f32 %v18832_v24, %v7041_v32  ;;  %v24995_v59 = vand.u32 31, %v24994_v16  ;;  %vm24998_vm12 = vcmp.ge.f32.partialorder %v18982_v13, 0.0  ;;  %v5650_v16 = vpop.f32.mrb[51].mxu0  ;;  %15225 = vmatpush3.bf16.msra.mxu0 %v18705_v62  ;;  %14990 = vmatprep.subr.bf16.mxu1 %v15866_v39 }
 0x36e   : > { %vm19136_vm9 = vmand %vm24991_vm3, %vm24990_vm11  ;;  %v19150_v27 = vsel %vm24998_vm12, %v18982_v13, %v7178_v26  ;;  %v6032_v52 = vadd.f32 %v5888_v51, %v25000_v25  ;;  %vm25001_vm11 = vcmp.lt.s32.totalorder %v18578_v53, 16  ;;  %vm25002_vm12 = vcmp.ge.s32.totalorder %v18578_v53, 0  ;;  %v25006_v51 = vld [vmem:[#allocation23_spill] sm:$0xff]  ;;  %v25011_v25 = vld [vmem:[#allocation36_spill] sm:$0xff]  ;;  %15226 = vmatprep.subr.bf16.mxu0 %v15871_v61  ;;  %14991 = vmatpush3.bf16.msra.mxu1 %v15866_v39 }
 0x36f   : > { %v24993_v18 = vsel %vm19136_vm9, 4294967295, %v24992_v18  ;;  %vm19143_vm14 = vcmp.ge.s32.totalorder %v24995_v59, 1  ;;  %24999 = vst [vmem:[#allocation66_spill] sm:$0xff] %v19150_v27  ;;  %v7188_v59 = vmul.f32 %v18832_v24, %v19052_v15  ;;  %vm19166_vm3 = vmand %vm25002_vm12, %vm25001_vm11  ;;  %v25003_v13 = vmov 0  ;;  %v25012_v41 = vld [vmem:[#allocation9_spill] sm:$0xff]  ;;  %v15873_v62 = vld [vmem:[%s23672_s3 + $0x50] sm:$0xff]  }
 0x370   : > { %v25004_v13 = vsel %vm19166_vm3, 4294967295, %v25003_v13  ;;  %v25007_v49 = vand.u32 31, %v25006_v51  ;;  %v25008_v26 = vmov 0  ;;  %v6030_v34 = vadd.f32 %v5886_v11, %v25011_v25  ;;  %v25023_v25 = vld [vmem:[#allocation77_spill] sm:$0xff]  ;;  %v15868_v39 = vld [vmem:[%s23672_s3 + $0x28] sm:$0xff]  }
 0x371   : > { %25005 = vst [vmem:[#allocation114_spill] sm:$0xff] %v25004_v13  ;;  %v5887_v31 = vadd.f32 %v5650_v16, %v25012_v41  ;;  %vm25013_vm7 = vcmp.lt.s32.totalorder %v18588_v58, 16  ;;  %vm25014_vm2 = vcmp.ge.s32.totalorder %v18588_v58, 0  ;;  %v25015_v53 = vmov 0  ;;  %v19199_v58 = vld [vmem:[%s23672_s3 + $0x20] sm:$0xff]   ;;  %v25021_v41 = vld [vmem:[#allocation94_spill] sm:$0xff]  ;;  %15227 = vmatpush3.bf16.msra.mxu0 %v15871_v61 }
 0x372   : > { %vm19172_vm6 = vcmp.le.s32.totalorder %v25007_v49, 16  ;;  %vm19182_vm4 = vmand %vm25014_vm2, %vm25013_vm7  ;;  %vm7112_vm11 = vcmp.ge.f32.partialorder %v19052_v15, 0.0  ;;  %v6294_v51 = vshra.s32 %v19088_v10, 5  ;;  %v19202_v19 = vadd.s32 560, %v16193_v45  ;;  %14992 = vmatprep.subr.bf16.mxu1 %v19199_v58  ;;  %15228 = vmatprep.subr.bf16.mxu0 %v15873_v62 }
 0x373   : > { %v25009_v26 = vsel %vm19172_vm6, 4294967295, %v25008_v26  ;;  %v25016_v53 = vsel %vm19182_vm4, 4294967295, %v25015_v53  ;;  %vm25017_vm6 = vcmp.ge.f32.partialorder %v7041_v32, 0.0  ;;  %v19218_v10 = vadd.f32 %v18793_v20, %v6032_v52  ;;  %v25029_v52 = vld [vmem:[#allocation125_spill] sm:$0xff]  ;;  %14993 = vmatpush3.bf16.msra.mxu1 %v19199_v58 }
 0x374   : > { %25010 = vst [vmem:[#allocation92_spill] sm:$0xff] %v25009_v26  ;;  %v19194_v11 = vsel %vm25017_vm6, %v7041_v32, %v7189_v4  ;;  %25018 = vst [vmem:[#allocation23_spill] sm:$0xff] %v19202_v19  ;;  %v19210_v4 = vmul.f32 %v18832_v24, %v19035_v22  ;;  %vm25019_vm6 = vcmp.ge.f32.partialorder %v19041_v28, 0.0  ;;  %v6031_v16 = vadd.f32 %v5887_v31, %v25021_v41  ;;  %v14854_v41 = vpop.f32.mrb[52].mxu0  ;;  %v15875_v58 = vld [vmem:[%s23672_s3 + $0x60] sm:$0xff]  }
 0x375   : > { %v19215_v32 = vsel %vm25019_vm6, %v19041_v28, %v7190_v57  ;;  %v19225_v49 = vadd.s32 4294967295, %v6293_v9  ;;  %v19231_v28 = vpack.c.bf16 %v24942_v43, %v19150_v27  ;;  %v19234_v57 = vadd.f32 %v18793_v20, %v6030_v34  ;;  %vm25025_vm6 = vmand %vm19136_vm9, %vm18976_vm13  ;;  %v5663_v44 = vpop.f32.mrb[53].mxu0  ;;  %15229 = vmatpush3.bf16.msra.mxu0 %v15873_v62  ;;  %14994 = vmatprep.subr.bf16.mxu1 %v15868_v39 }
 0x376   : > { %25020 = vst [vmem:[#allocation36_spill] sm:$0xff] %v19215_v32  ;;  %v19239_v31 = vsel %vm7112_vm11, %v19052_v15, %v7188_v59  ;;  %vm19248_vm2 = vmpackc.low %vm19182_vm4, %vm25025_vm6  ;;  %v25026_v9 = vmov 0  ;;  %v7045_v15 = vadd.f32 %v18793_v20, %v6031_v16  ;;  %v25032_v38 = vmov 0  ;;  %v25040_v16 = vld [vmem:[#allocation67_spill] sm:$0xff] }
 0x377   : > { %25022 = vst [vmem:[#allocation9_spill] sm:$0xff] %v19225_v49  ;;  %25024 = vst [vmem:[#allocation94_spill] sm:$0xff] %v19231_v28  ;;  %v25027_v9 = vsel %vm19248_vm2, 4294967295, %v25026_v9  ;;  %v19258_v59 = vpack.c.bf16 %v19194_v11, %v19239_v31  ;;  %v25035_v28 = vld [vmem:[#allocation124_spill] sm:$0xff]  ;;  %v19273_v34 = vadd.s32 4294967295, %v6294_v51  ;;  %v19277_v49 = vpack.c.bf16 %v24942_v43, %v19215_v32  ;;  %14995 = vmatpush3.bf16.msra.mxu1 %v15868_v39 }
 0x378   : > { %25028 = vst [vmem:[#allocation77_spill] sm:$0xff] %v25027_v9  ;;  %vm25031_vm11 = vmand %vm19166_vm3, %vm18999_vm0  ;;  %v5892_v13 = vadd.f32 %v14854_v41, %v25038_v37  ;;  %v6299_v61 = vshra.s32 %v19202_v19, 5  ;;  %v15874_v51 = vld [vmem:[%s23672_s3 + $0x58] sm:$0xff]   ;;  %v7177_v37 = vmul.f32 %v18832_v24, %v19099_v54  ;;  %v7194_v41 = vmul.f32 %v18832_v24, %v19218_v10 }
 0x379   : > { %25030 = vst [vmem:[#allocation125_spill] sm:$0xff] %v19258_v59  ;;  %vm19266_vm6 = vmpackc.low %vm24975_vm15, %vm25031_vm11  ;;  %14928 = vmatprep.mubr.msk.bf16.mxu1 %vm19248_vm2, %v19258_v59  ;;  %15084 = vmatprep.mubr.msk.bf16.mxu0 %vm19248_vm2, %v19258_v59  ;;  %v5890_v29 = vadd.f32 %v5663_v44, %v25040_v16  ;;  %vm25041_vm11 = vcmp.lt.s32.totalorder %v18593_v47, 16  ;;  %vm25042_vm0 = vcmp.ge.s32.totalorder %v18593_v47, 0  ;;  %v7193_v5 = vmul.f32 %v18832_v24, %v7045_v15  ;;  %v25049_v44 = vld [vmem:[#allocation89_spill] sm:$0xff]  ;;  %v25160_v59 = vld [vmem:[#allocation11_spill] sm:$0xff] }
 0x37a   : > { %v25033_v38 = vsel %vm19266_vm6, 4294967295, %v25032_v38  ;;  %25036 = vst [vmem:[#allocation124_spill] sm:$0xff] %v19273_v34  ;;  %25037 = vst [vmem:[#allocation169_spill] sm:$0xff] %v19277_v49  ;;  %v14855_v34 = vpop.f32.mrb[54].mxu0  ;;  %v25046_v14 = vand.u32 31, %v25045_v23  ;;  %14929 = vmatmul.mubr.msk.bf16.gmra.mrb[40].mxu1 %vm19266_vm6, %v19277_v49  ;;  %15085 = vmatmul.mubr.msk.bf16.gmra.mrb[108].mxu0 %vm19266_vm6, %v19277_v49  ;;  %v7192_v23 = vmul.f32 %v18832_v24, %v19234_v57  ;;  %vm7101_vm4 = vcmp.ge.f32.partialorder %v19099_v54, 0.0 }
 0x37b   : > { %25034 = vst [vmem:[#allocation168_spill] sm:$0xff] %v25033_v38  ;;  %vm19305_vm12 = vmand %vm25042_vm0, %vm25041_vm11  ;;  %v6036_v34 = vadd.f32 %v5892_v13, %v25049_v44  ;;  %v5666_v47 = vpop.f32.mrb[55].mxu0  ;;  %vm25050_vm0 = vcmp.lt.s32.totalorder %v18590_v2, 16  ;;  %vm25051_vm11 = vcmp.ge.s32.totalorder %v18590_v2, 0  ;;  %v25055_v13 = vld [vmem:[#allocation115_spill] sm:$0xff]  ;;  %v25057_v44 = vmov 0  ;;  %15230 = vmatprep.subr.bf16.mxu0 %v15874_v51 }
 0x37c   : > { %vm19312_vm3 = vcmp.ge.s32.totalorder %v25046_v14, 1  ;;  %vm19330_vm7 = vmand %vm25051_vm11, %vm25050_vm0  ;;  %v25052_v14 = vmov 0  ;;  %v25056_v16 = vand.u32 31, %v25055_v13  ;;  %v25062_v13 = vld [vmem:[#allocation91_spill] sm:$0xff]  ;;  %v25063_v38 = vld [vmem:[#allocation69_spill] sm:$0xff]  ;;  %vm25064_vm11 = vcmp.lt.s32.totalorder %v18615_v33, 16  ;;  %15231 = vmatpush3.bf16.msra.mxu0 %v15874_v51 }
 0x37d   : > { %v25053_v14 = vsel %vm19330_vm7, 4294967295, %v25052_v14  ;;  %vm25060_vm0 = vmand %vm18846_vm1, %vm18768_vm8  ;;  %v5891_v49 = vadd.f32 %v5666_v47, %v25063_v38  ;;  %vm25065_vm13 = vcmp.ge.s32.totalorder %v18615_v33, 0  ;;  %v25066_v9 = vmov 0  ;;  %v15869_v33 = vld [vmem:[%s23672_s3 + $0x30] sm:$0xff]   ;;  %15232 = vmatprep.subr.bf16.mxu0 %v15875_v58 }
 0x37e   : > { %25054 = vst [vmem:[#allocation71_spill] sm:$0xff] %v25053_v14  ;;  %vm19336_vm2 = vcmp.le.s32.totalorder %v25056_v16, 16  ;;  %v19351_v2 = vsel %vm25060_vm0, %v18910_v6, 0.0  ;;  %v6034_v16 = vadd.f32 %v5890_v29, %v25062_v13  ;;  %vm19359_vm9 = vmand %vm25065_vm13, %vm25064_vm11  ;;  %vm7116_vm6 = vcmp.ge.f32.partialorder %v19234_v57, 0.0  ;;  %v25095_v13 = vld [vmem:[#allocation10_spill] sm:$0xff]  ;;  %14996 = vmatprep.subr.bf16.mxu1 %v15869_v33  ;;  %v25301_v14 = vld [vmem:[#allocation56_spill] sm:$0xff] }
 0x37f   : > { %v25058_v44 = vsel %vm19336_vm2, 4294967295, %v25057_v44  ;;  %25061 = vst [vmem:[#allocation67_spill] sm:$0xff] %v19351_v2  ;;  %v25067_v9 = vsel %vm19359_vm9, 4294967295, %v25066_v9  ;;  %vm23949_vm1 = vmand %vm19305_vm12, %vm19143_vm14  ;;  %vm25068_vm8 = vcmp.ge.f32.partialorder %v7045_v15, 0.0  ;;  %v19376_v6 = vadd.s32 4294967295, %v6299_v61  ;;  %14997 = vmatpush3.bf16.msra.mxu1 %v15869_v33  ;;  %v15877_v33 = vld [vmem:[%s23672_s3 + $0x100] sm:$0xff]  }
 0x380   : > { %25059 = vst [vmem:[#allocation122_spill] sm:$0xff] %v25058_v44  ;;  %v19370_v0 = vsel %vm25068_vm8, %v7045_v15, %v7193_v5  ;;  %v25070_v29 = vshra.s32 %v19031_v17, 5  ;;  %vm25071_vm13 = vcmp.ge.f32.partialorder %v19218_v10, 0.0  ;;  %v19391_v62 = vadd.f32 %v18793_v20, %v6036_v34  ;;  %v25073_v15 = vld [vmem:[#allocation63_spill] sm:$0xff]  ;;  %15233 = vmatpush3.bf16.msra.mxu0 %v15875_v58 }
 0x381   : > { %25069 = vst [vmem:[#allocation117_spill] sm:$0xff] %v19376_v6  ;;  %v19388_v5 = vsel %vm25071_vm13, %v19218_v10, %v7194_v41  ;;  %v6035_v61 = vadd.f32 %v5891_v49, %v25073_v15  ;;  %vm25074_vm0 = vnez %v25009_v26  ;;  %v19401_v47 = vsel %vm7101_vm4, %v19099_v54, %v7177_v37  ;;  %vm19424_vm4 = vmpackc.low %vm19359_vm9, %vm23949_vm1  ;;  %v14858_v37 = vpop.f32.mrb[56].mxu0  ;;  %v15878_v58 = vld [vmem:[%s23672_s3 + $0x70] sm:$0xff]  }
 0x382   : > { %v19380_v38 = vadd.s32 4294967295, %v25070_v29  ;;  %25072 = vst [vmem:[#allocation89_spill] sm:$0xff] %v19388_v5  ;;  %25075 = vst [vmem:[#allocation115_spill] sm:$0xff] %v19401_v47  ;;  %vm25076_vm8 = vnez %v24927_v3  ;;  %v19410_v34 = vadd.f32 %v18793_v20, %v6034_v16  ;;  %v19415_v49 = vsel %vm7116_vm6, %v19234_v57, %v7192_v23  ;;  %v5679_v29 = vpop.f32.mrb[57].mxu0  ;;  %v25281_v6 = vld [vmem:[#allocation95_spill] sm:$0xff] }
 0x383   : > { %v19406_v10 = vsel %vm25076_vm8, %v18890_v1, 0.0  ;;  %v25078_v3 = vmov 0  ;;  %vm25081_vm11 = vnez %v24945_v35  ;;  %vm25082_vm6 = vnez %v24916_v7  ;;  %vm25086_vm1 = vmand %vm19330_vm7, %vm25074_vm0  ;;  %v14859_v15 = vpop.f32.mrb[58].mxu0 }
 0x384   : > { %25077 = vst [vmem:[#allocation91_spill] sm:$0xff] %v19406_v10  ;;  %v25079_v3 = vsel %vm19424_vm4, 4294967295, %v25078_v3  ;;  %vm25083_vm10 = vmand %vm25081_vm11, %vm25082_vm6  ;;  %v7049_v54 = vadd.f32 %v18793_v20, %v6035_v61  ;;  %v19441_v57 = vpack.c.bf16 %v19370_v0, %v19415_v49  ;;  %v25087_v35 = vmov 0 }
 0x385   : > { %25080 = vst [vmem:[#allocation69_spill] sm:$0xff] %v25079_v3  ;;  %v19436_v1 = vsel %vm25083_vm10, %v19055_v12, 0.0  ;;  %vm19449_vm13 = vmpackc.low %vm24975_vm15, %vm25086_vm1  ;;  %vm25090_vm6 = vcmp.ge.f32.partialorder %v19035_v22, 0.0  ;;  %vm25092_vm8 = vnez %v24963_v48  ;;  %v19468_v23 = vpack.c.bf16 %v24942_v43, %v19388_v5  ;;  %v25122_v3 = vld [vmem:[#allocation70_spill] sm:$0xff] }
 0x386   : > { %25084 = vst [vmem:[#allocation63_spill] sm:$0xff] %v19436_v1  ;;  %25085 = vst [vmem:[#allocation170_spill] sm:$0xff] %v19441_v57  ;;  %v25088_v35 = vsel %vm19449_vm13, 4294967295, %v25087_v35  ;;  %v19459_v7 = vsel %vm25090_vm6, %v19035_v22, %v19210_v4  ;;  %v19464_v12 = vsel %vm25092_vm8, %v19022_v40, 0.0  ;;  %v5896_v16 = vadd.f32 %v14858_v37, %v25095_v13  ;;  %v15872_v22 = vld [vmem:[%s23672_s3 + $0x38] sm:$0xff]   ;;  %v15876_v4 = vld [vmem:[%s23672_s3 + $0x68] sm:$0xff]   ;;  %14932 = vmatprep.mubr.msk.bf16.mxu1 %vm19424_vm4, %v19441_v57 }
 0x387   : > { %25089 = vst [vmem:[#allocation171_spill] sm:$0xff] %v25088_v35  ;;  %25091 = vst [vmem:[#allocation172_spill] sm:$0xff] %v19459_v7  ;;  %vm25096_vm8 = vcmp.lt.s32.totalorder %v25023_v25, 16  ;;  %vm25097_vm6 = vcmp.ge.s32.totalorder %v25023_v25, 0  ;;  %v25098_v48 = vmov 0  ;;  %v7198_v39 = vmul.f32 %v18832_v24, %v19391_v62  ;;  %15088 = vmatprep.mubr.msk.bf16.mxu0 %vm19424_vm4, %v19441_v57  ;;  %v25101_v25 = vld [vmem:[#allocation46_spill] sm:$0xff]  ;;  %14933 = vmatmul.mubr.msk.bf16.gmra.mrb[44].mxu1 %vm19449_vm13, %v19468_v23 }
 0x388   : > { %25093 = vst [vmem:[#allocation173_spill] sm:$0xff] %v19464_v12  ;;  %25094 = vst [vmem:[#allocation174_spill] sm:$0xff] %v19468_v23  ;;  %v5894_v51 = vadd.f32 %v5679_v29, %v25101_v25  ;;  %v7197_v37 = vmul.f32 %v18832_v24, %v7049_v54  ;;  %v25106_v13 = vld [vmem:[#allocation27_spill] sm:$0xff]  ;;  %v25108_v42 = vmov 0  ;;  %15089 = vmatmul.mubr.msk.bf16.gmra.mrb[112].mxu0 %vm19449_vm13, %v19468_v23  ;;  %v25118_v29 = vmov 0  ;;  %v25121_v35 = vld [vmem:[#allocation93_spill] sm:$0xff]  ;;  %14998 = vmatprep.subr.bf16.mxu1 %v15872_v22 }
 0x389   : > { %vm19480_vm11 = vmand %vm25097_vm6, %vm25096_vm8  ;;  %vm25102_vm8 = vcmp.lt.s32.totalorder %v25029_v52, 16  ;;  %vm25103_vm6 = vcmp.ge.s32.totalorder %v25029_v52, 0  ;;  %v25107_v40 = vand.u32 31, %v25106_v13  ;;  %v25110_v25 = vld [vmem:[#allocation55_spill] sm:$0xff]  ;;  %v5682_v52 = vpop.f32.mrb[59].mxu0  ;;  %v25113_v13 = vmov 0  ;;  %15234 = vmatprep.subr.bf16.mxu0 %v15876_v4  ;;  %14999 = vmatpush3.bf16.msra.mxu1 %v15872_v22 }
 0x38a   : > { %v25099_v48 = vsel %vm19480_vm11, 4294967295, %v25098_v48  ;;  %vm19502_vm1 = vmand %vm25103_vm6, %vm25102_vm8  ;;  %v6040_v15 = vadd.f32 %v5896_v16, %v25110_v25  ;;  %vm25111_vm8 = vcmp.lt.s32.totalorder %v25035_v28, 16  ;;  %vm25112_vm6 = vcmp.ge.s32.totalorder %v25035_v28, 0  ;;  %v25116_v16 = vld [vmem:[#allocation119_spill] sm:$0xff]  ;;  %15235 = vmatpush3.bf16.msra.mxu0 %v15876_v4  ;;  %15144 = vmatprep.subr.bf16.mxu1 %v15877_v33 }
 0x38b   : > { %25100 = vst [vmem:[#allocation10_spill] sm:$0xff] %v25099_v48  ;;  %vm19509_vm0 = vcmp.ge.s32.totalorder %v25107_v40, 1  ;;  %v7196_v40 = vmul.f32 %v18832_v24, %v19410_v34  ;;  %vm19528_vm10 = vmand %vm25112_vm6, %vm25111_vm8  ;;  %v25117_v25 = vand.u32 31, %v25116_v16  ;;  %v6038_v23 = vadd.f32 %v5894_v51, %v25121_v35  ;;  %15236 = vmatprep.subr.bf16.mxu0 %v15878_v58 }
 0x38c   : > { %v25109_v42 = vsel %vm19509_vm0, 4294967295, %v25108_v42  ;;  %v25114_v13 = vsel %vm19528_vm10, 4294967295, %v25113_v13  ;;  %v5895_v57 = vadd.f32 %v5682_v52, %v25122_v3  ;;  %vm25123_vm13 = vcmp.lt.s32.totalorder %v25039_v46, 16 }
 0x38d   : > { %25115 = vst [vmem:[#allocation46_spill] sm:$0xff] %v25114_v13  ;;  %vm19534_vm4 = vcmp.le.s32.totalorder %v25117_v25, 16  ;;  %vm25124_vm7 = vcmp.ge.s32.totalorder %v25039_v46, 0  ;;  %v25127_v16 = vrot.slane %v19351_v2, 1  ;;  %v25128_v25 = vld [vmem:[#allocation113_spill] sm:$0xff]  ;;  %vm25140_vm0 = vcmp.lt.s32.totalorder %v16193_v45, 7 }
 0x38e   : > { %v25119_v29 = vsel %vm19534_vm4, 4294967295, %v25118_v29  ;;  %vm19545_vm8 = vmand %vm25124_vm7, %vm25123_vm13  ;;  %vm25129_vm4 = vcmp.lt.s32.totalorder %v16193_v45, 7  ;;  %vm25131_vm13 = vcmp.ge.f32.partialorder %v7049_v54, 0.0  ;;  %vm25135_vm7 = vnez %v24981_v56  ;;  %15237 = vmatpush3.bf16.msra.mxu0 %v15878_v58  ;;  %v25391_v13 = vld [vmem:[#allocation17_spill] sm:$0xff] }
 0x38f   : > { %25120 = vst [vmem:[#allocation27_spill] sm:$0xff] %v25119_v29  ;;  %v19555_v35 = vsel %vm25129_vm4, %v25128_v25, %v25127_v16  ;;  %v19564_v46 = vsel %vm25131_vm13, %v7049_v54, %v7197_v37  ;;  %vm25132_vm4 = vcmp.ge.f32.partialorder %v19391_v62, 0.0  ;;  %v19578_v16 = vadd.f32 %v18793_v20, %v6040_v15  ;;  %v25134_v54 = vld [vmem:[#allocation32_spill] sm:$0xff]  ;;  %vm25136_vm6 = vmand %vm19119_vm5, %vm25135_vm7  ;;  %v14862_v15 = vpop.f32.mrb[60].mxu0 }
 0x390   : > { %25130 = vst [vmem:[#allocation55_spill] sm:$0xff] %v19555_v35  ;;  %v19575_v52 = vsel %vm25132_vm4, %v19391_v62, %v7198_v39  ;;  %v6039_v37 = vadd.f32 %v5895_v57, %v25134_v54  ;;  %v19591_v51 = vsel %vm25136_vm6, %v19459_v7, 0.0  ;;  %v25138_v62 = vld [vmem:[#allocation28_spill] sm:$0xff]  ;;  %v25139_v39 = vrot.slane %v19436_v1, 1  ;;  %vm25142_vm4 = vmand %vm19502_vm1, %vm19312_vm3  ;;  %v5695_v56 = vpop.f32.mrb[61].mxu0  ;;  %v25661_v35 = vld [vmem:[#allocation103_spill] sm:$0xff] }
 0x391   : > { %25133 = vst [vmem:[#allocation119_spill] sm:$0xff] %v19575_v52  ;;  %25137 = vst [vmem:[#allocation93_spill] sm:$0xff] %v19591_v51  ;;  %v19604_v54 = vadd.f32 %v18793_v20, %v6038_v23  ;;  %vm25141_vm6 = vcmp.ge.f32.partialorder %v19410_v34, 0.0  ;;  %vm25146_vm7 = vnez %v24993_v18  ;;  %v25152_v18 = vmov 0 }
 0x392   : > { %v19600_v57 = vsel %vm25140_vm0, %v25128_v25, %v25139_v39  ;;  %v19609_v3 = vsel %vm25141_vm6, %v19410_v34, %v7196_v40  ;;  %vm19618_vm9 = vmpackc.low %vm19545_vm8, %vm25142_vm4  ;;  %v25143_v39 = vmov 0  ;;  %vm25147_vm6 = vnez %v24948_v50  ;;  %v25155_v50 = vld [vmem:[#allocation41_spill] sm:$0xff] }
 0x393   : > { %v25144_v39 = vsel %vm19618_vm9, 4294967295, %v25143_v39  ;;  %vm25148_vm5 = vmand %vm25146_vm7, %vm25147_vm6  ;;  %v7053_v23 = vadd.f32 %v18793_v20, %v6039_v37  ;;  %v19635_v40 = vpack.c.bf16 %v19564_v46, %v19609_v3  ;;  %vm25157_vm6 = vnez %v25016_v53  ;;  %v15879_v53 = vld [vmem:[%s23672_s3 + $0x78] sm:$0xff]  }
 0x394   : > { %25145 = vst [vmem:[#allocation70_spill] sm:$0xff] %v25144_v39  ;;  %v19630_v34 = vsel %vm25148_vm5, %v19239_v31, 0.0  ;;  %vm25151_vm4 = vmand %vm19528_vm10, %vm19336_vm2  ;;  %v19652_v31 = vsel %vm19480_vm11, %v19401_v47, 0.0  ;;  %v19657_v37 = vsel %vm25157_vm6, %v19194_v11, 0.0  ;;  %v19661_v41 = vpack.c.bf16 %v24942_v43, %v19575_v52  ;;  %v25166_v47 = vld [vmem:[#allocation121_spill] sm:$0xff]  ;;  %15238 = vmatprep.subr.bf16.mxu0 %v15879_v53 }
 0x395   : > { %25149 = vst [vmem:[#allocation113_spill] sm:$0xff] %v19630_v34  ;;  %25150 = vst [vmem:[#allocation32_spill] sm:$0xff] %v19635_v40  ;;  %v5900_v7 = vadd.f32 %v14862_v15, %v25160_v59  ;;  %v7202_v11 = vmul.f32 %v18832_v24, %v19578_v16  ;;  %14936 = vmatprep.mubr.msk.bf16.mxu1 %vm19618_vm9, %v19635_v40  ;;  %15092 = vmatprep.mubr.msk.bf16.mxu0 %vm19618_vm9, %v19635_v40  ;;  %v25161_v59 = vld [vmem:[#allocation72_spill] sm:$0xff]  ;;  %v14863_v15 = vpop.f32.mrb[62].mxu0  ;;  %vm25162_vm6 = vcmp.lt.s32.totalorder %v18647_v36, 16  ;;  %v25182_v39 = vld [vmem:[#allocation53_spill] sm:$0xff] }
 0x396   : > { %vm19643_vm0 = vmpackc.low %vm24975_vm15, %vm25151_vm4  ;;  %25156 = vst [vmem:[#allocation41_spill] sm:$0xff] %v19652_v31  ;;  %v5898_v4 = vadd.f32 %v5695_v56, %v25161_v59  ;;  %vm25163_vm4 = vcmp.ge.s32.totalorder %v18647_v36, 0  ;;  %v7201_v22 = vmul.f32 %v18832_v24, %v7053_v23  ;;  %v25167_v48 = vand.u32 31, %v25166_v47  ;;  %v25170_v59 = vld [vmem:[#allocation40_spill] sm:$0xff]  ;;  %v5698_v36 = vpop.f32.mrb[63].mxu0  ;;  %15239 = vmatpush3.bf16.msra.mxu0 %v15879_v53 }
 0x397   : > { %v25153_v18 = vsel %vm19643_vm0, 4294967295, %v25152_v18  ;;  %25158 = vst [vmem:[#allocation175_spill] sm:$0xff] %v19657_v37  ;;  %25159 = vst [vmem:[#allocation176_spill] sm:$0xff] %v19661_v41  ;;  %v6044_v15 = vadd.f32 %v5900_v7, %v25170_v59  ;;  %14937 = vmatmul.mubr.msk.bf16.gmra.mrb[48].mxu1 %vm19643_vm0, %v19661_v41  ;;  %15093 = vmatmul.mubr.msk.bf16.gmra.mrb[116].mxu0 %vm19643_vm0, %v19661_v41  ;;  %v7200_v47 = vmul.f32 %v18832_v24, %v19604_v54  ;;  %v25176_v7 = vld [vmem:[#allocation120_spill] sm:$0xff]  ;;  %v25178_v56 = vmov 0 }
 0x398   : > { %25154 = vst [vmem:[#allocation28_spill] sm:$0xff] %v25153_v18  ;;  %vm19683_vm5 = vmand %vm25163_vm4, %vm25162_vm6  ;;  %vm19690_vm13 = vcmp.ge.s32.totalorder %v25167_v48, 1  ;;  %vm25171_vm4 = vcmp.lt.s32.totalorder %v18650_v21, 16  ;;  %vm25172_vm6 = vcmp.ge.s32.totalorder %v18650_v21, 0  ;;  %v25173_v48 = vmov 0  ;;  %v25181_v18 = vld [vmem:[#allocation38_spill] sm:$0xff] }
 0x399   : > { %vm19709_vm7 = vmand %vm25172_vm6, %vm25171_vm4  ;;  %v25177_v59 = vand.u32 31, %v25176_v7  ;;  %v6042_v41 = vadd.f32 %v5898_v4, %v25181_v18  ;;  %v5899_v40 = vadd.f32 %v5698_v36, %v25182_v39  ;;  %vm25183_vm0 = vcmp.lt.s32.totalorder %v18652_v63, 16  ;;  %v25209_v36 = vld [vmem:[#allocation129_spill] sm:$0xff] }
 0x39a   : > { %v25174_v48 = vsel %vm19709_vm7, 4294967295, %v25173_v48  ;;  %vm25184_vm11 = vcmp.ge.s32.totalorder %v18652_v63, 0  ;;  %v25185_v21 = vmov 0  ;;  %vm25187_vm6 = vmand %vm19305_vm12, %vm19143_vm14  ;;  %vm25190_vm4 = vcmp.ge.f32.partialorder %v7053_v23, 0.0 }
 0x39b   : > { %25175 = vst [vmem:[#allocation11_spill] sm:$0xff] %v25174_v48  ;;  %vm19715_vm9 = vcmp.le.s32.totalorder %v25177_v59, 16  ;;  %vm19725_vm2 = vmand %vm25184_vm11, %vm25183_vm0  ;;  %v19739_v63 = vsel %vm25187_vm6, %v19415_v49, 0.0  ;;  %vm25189_vm11 = vnez %v25109_v42  ;;  %v19746_v39 = vsel %vm25190_vm4, %v7053_v23, %v7201_v22  ;;  %v25195_v49 = vld [vmem:[#allocation45_spill] sm:$0xff]  ;;  %v25197_v23 = vld [vmem:[#allocation26_spill] sm:$0xff] }
 0x39c   : > { %v25179_v56 = vsel %vm19715_vm9, 4294967295, %v25178_v56  ;;  %v25186_v21 = vsel %vm19725_vm2, 4294967295, %v25185_v21  ;;  %25188 = vst [vmem:[#allocation121_spill] sm:$0xff] %v19739_v63  ;;  %vm23979_vm0 = vmand %vm19683_vm5, %vm25189_vm11  ;;  %vm25191_vm10 = vnez %v25067_v9  ;;  %vm25193_vm9 = vcmp.ge.f32.partialorder %v19578_v16, 0.0  ;;  %v25217_v59 = vld [vmem:[#allocation14_spill] sm:$0xff] }
 0x39d   : > { %25180 = vst [vmem:[#allocation72_spill] sm:$0xff] %v25179_v56  ;;  %v19751_v58 = vsel %vm25191_vm10, %v19370_v0, 0.0  ;;  %v19756_v55 = vsel %vm25193_vm9, %v19578_v16, %v7202_v11  ;;  %v7058_v32 = vadd.f32 %v18793_v20, %v6044_v15  ;;  %v6043_v18 = vadd.f32 %v5899_v40, %v25195_v49  ;;  %vm19791_vm6 = vmpackc.low %vm19725_vm2, %vm23979_vm0  ;;  %v25229_v48 = vld [vmem:[#allocation126_spill] sm:$0xff] }
 0x39e   : > { %25192 = vst [vmem:[#allocation40_spill] sm:$0xff] %v19751_v58  ;;  %25194 = vst [vmem:[#allocation120_spill] sm:$0xff] %v19756_v55  ;;  %vm25196_vm14 = vnez %v25119_v29  ;;  %v25198_v22 = vand.u32 31, %v25197_v23  ;;  %v25199_v9 = vmov 0  ;;  %v25202_v0 = vrot.slane %v19630_v34, 1  ;;  %v14866_v23 = vpop.f32.mrb[64].mxu0 }
 0x39f   : > { %vm25203_vm9 = vcmp.lt.s32.totalorder %v16193_v45, 7  ;;  %v7056_v11 = vadd.f32 %v18793_v20, %v6042_v41  ;;  %vm25205_vm10 = vcmp.ge.f32.partialorder %v19604_v54, 0.0  ;;  %v25206_v15 = vmov 0  ;;  %v25218_v41 = vld [vmem:[#allocation130_spill] sm:$0xff] }
 0x3a0   : > { %vm19766_vm4 = vcmp.le.s32.totalorder %v25198_v22, 16  ;;  %v19775_v16 = vsel %vm25203_vm9, %v25128_v25, %v25202_v0  ;;  %v19782_v4 = vsel %vm25205_vm10, %v19604_v54, %v7200_v47  ;;  %v25207_v15 = vsel %vm19791_vm6, 4294967295, %v25206_v15  ;;  %vm25211_vm10 = vmand %vm19709_vm7, %vm25196_vm14  ;;  %v25215_v0 = vld [vmem:[#allocation128_spill] sm:$0xff]  ;;  %v5711_v54 = vpop.f32.mrb[65].mxu0 }
 0x3a1   : > { %v25200_v9 = vsel %vm19766_vm4, 4294967295, %v25199_v9  ;;  %25204 = vst [vmem:[#allocation53_spill] sm:$0xff] %v19775_v16  ;;  %25208 = vst [vmem:[#allocation45_spill] sm:$0xff] %v25207_v15  ;;  %v7057_v47 = vadd.f32 %v18793_v20, %v6043_v18  ;;  %v19802_v49 = vpack.c.bf16 %v19746_v39, %v19782_v4  ;;  %v25212_v22 = vmov 0  ;;  %v14867_v18 = vpop.f32.mrb[66].mxu0 }
 0x3a2   : > { %25201 = vst [vmem:[#allocation38_spill] sm:$0xff] %v25200_v9  ;;  %vm19810_vm0 = vmpackc.low %vm24975_vm15, %vm25211_vm10  ;;  %v19820_v40 = vpack.c.bf16 %v24942_v43, %v19756_v55  ;;  %v5904_v7 = vadd.f32 %v14866_v23, %v25217_v59  ;;  %vm25219_vm9 = vcmp.lt.s32.totalorder %v25138_v62, 16  ;;  %vm25220_vm12 = vcmp.ge.s32.totalorder %v25138_v62, 0  ;;  %v25224_v59 = vld [vmem:[#allocation74_spill] sm:$0xff]  ;;  %v25389_v62 = vld [vmem:[#allocation76_spill] sm:$0xff] }
 0x3a3   : > { %25210 = vst [vmem:[#allocation26_spill] sm:$0xff] %v19802_v49  ;;  %v25213_v22 = vsel %vm19810_vm0, 4294967295, %v25212_v22  ;;  %vm19829_vm7 = vmand %vm25220_vm12, %vm25219_vm9  ;;  %v25221_v53 = vmov 0  ;;  %v7206_v44 = vmul.f32 %v18832_v24, %v7058_v32  ;;  %14940 = vmatprep.mubr.msk.bf16.mxu1 %vm19791_vm6, %v19802_v49  ;;  %15096 = vmatprep.mubr.msk.bf16.mxu0 %vm19791_vm6, %v19802_v49  ;;  %v5902_v23 = vadd.f32 %v5711_v54, %v25224_v59  ;;  %v25233_v54 = vld [vmem:[#allocation31_spill] sm:$0xff]  ;;  %v25246_v49 = vld [vmem:[#allocation16_spill] sm:$0xff] }
 0x3a4   : > { %25214 = vst [vmem:[#allocation129_spill] sm:$0xff] %v25213_v22  ;;  %25216 = vst [vmem:[#allocation128_spill] sm:$0xff] %v19820_v40  ;;  %v25222_v53 = vsel %vm19829_vm7, 4294967295, %v25221_v53  ;;  %vm25225_vm10 = vcmp.lt.s32.totalorder %v18663_v30, 16  ;;  %vm25226_vm12 = vcmp.ge.s32.totalorder %v18663_v30, 0  ;;  %v7205_v29 = vmul.f32 %v18832_v24, %v7057_v47  ;;  %14941 = vmatmul.mubr.msk.bf16.gmra.mrb[52].mxu1 %vm19810_vm0, %v19820_v40  ;;  %15097 = vmatmul.mubr.msk.bf16.gmra.mrb[120].mxu0 %vm19810_vm0, %v19820_v40  ;;  %v5714_v30 = vpop.f32.mrb[67].mxu0 }
 0x3a5   : > { %25223 = vst [vmem:[#allocation14_spill] sm:$0xff] %v25222_v53  ;;  %vm19845_vm9 = vmand %vm25226_vm12, %vm25225_vm10  ;;  %v25230_v55 = vand.u32 31, %v25229_v48  ;;  %v6048_v18 = vadd.f32 %v5904_v7, %v25233_v54  ;;  %v7204_v59 = vmul.f32 %v18832_v24, %v7056_v11  ;;  %vm25234_vm10 = vcmp.lt.s32.totalorder %v25155_v50, 16  ;;  %v25239_v7 = vld [vmem:[#allocation79_spill] sm:$0xff]  ;;  %v25245_v40 = vld [vmem:[#allocation101_spill] sm:$0xff] }
 0x3a6   : > { %vm25235_vm12 = vcmp.ge.s32.totalorder %v25155_v50, 0  ;;  %v25236_v48 = vmov 0  ;;  %v25241_v54 = vmov 0  ;;  %v19879_v22 = vadd.s32 544, %v16193_v45  ;;  %vm25244_vm0 = vmand %vm19502_vm1, %vm19312_vm3  ;;  %v25472_v53 = vld [vmem:[#allocation108_spill] sm:$0xff] }
 0x3a7   : > { %vm19852_vm2 = vcmp.ge.s32.totalorder %v25230_v55, 1  ;;  %vm19868_vm14 = vmand %vm25235_vm12, %vm25234_vm10  ;;  %v25240_v55 = vand.u32 31, %v25239_v7  ;;  %v19887_v50 = vsel %vm25244_vm0, %v19609_v3, 0.0  ;;  %v6046_v15 = vadd.f32 %v5902_v23, %v25245_v40  ;;  %v25257_v23 = vld [vmem:[#allocation24_spill] sm:$0xff] }
 0x3a8   : > { %v25237_v48 = vsel %vm19868_vm14, 4294967295, %v25236_v48  ;;  %v5903_v52 = vadd.f32 %v5714_v30, %v25246_v49  ;;  %vm25247_vm10 = vcmp.lt.s32.totalorder %v18679_v60, 16  ;;  %vm25248_vm12 = vcmp.ge.s32.totalorder %v18679_v60, 0  ;;  %vm23996_vm1 = vmand %vm19845_vm9, %vm19690_vm13 }
 0x3a9   : > { %25238 = vst [vmem:[#allocation130_spill] sm:$0xff] %v25237_v48  ;;  %vm19874_vm6 = vcmp.le.s32.totalorder %v25240_v55, 16  ;;  %vm7128_vm11 = vcmp.ge.f32.partialorder %v7056_v11, 0.0  ;;  %v25251_v61 = vrot.slane %v19739_v63, 1  ;;  %vm25252_vm3 = vcmp.lt.s32.totalorder %v16193_v45, 7  ;;  %v25262_v55 = vld [vmem:[#allocation43_spill] sm:$0xff] }
 0x3aa   : > { %v25242_v54 = vsel %vm19874_vm6, 4294967295, %v25241_v54  ;;  %vm19895_vm6 = vmand %vm25248_vm12, %vm25247_vm10  ;;  %v19909_v3 = vsel %vm19545_vm8, %v19564_v46, 0.0  ;;  %vm25255_vm0 = vcmp.ge.f32.partialorder %v7057_v47, 0.0  ;;  %v19919_v40 = vadd.s32 552, %v16193_v45 }
 0x3ab   : > { %25243 = vst [vmem:[#allocation74_spill] sm:$0xff] %v25242_v54  ;;  %v19904_v27 = vsel %vm25252_vm3, %v25128_v25, %v25251_v61  ;;  %25254 = vst [vmem:[#allocation31_spill] sm:$0xff] %v19909_v3  ;;  %v19916_v60 = vsel %vm25255_vm0, %v7057_v47, %v7205_v29  ;;  %v25256_v49 = vrot.slane %v19739_v63, 2  ;;  %vm25258_vm10 = vcmp.lt.s32.totalorder %v16193_v45, 6  ;;  %v25274_v29 = vld [vmem:[#allocation75_spill] sm:$0xff] }
 0x3ac   : > { %25253 = vst [vmem:[#allocation126_spill] sm:$0xff] %v19904_v27  ;;  %vm25260_vm8 = vcmp.ge.f32.partialorder %v7058_v32, 0.0  ;;  %v7062_v46 = vadd.f32 %v18793_v20, %v6048_v18  ;;  %v6047_v61 = vadd.f32 %v5903_v52, %v25262_v55  ;;  %vm25263_vm12 = vnez %v25179_v56  ;;  %vm19948_vm0 = vmpackc.low %vm19895_vm6, %vm23996_vm1  ;;  %v25267_v52 = vld [vmem:[#allocation134_spill] sm:$0xff]  ;;  %v25275_v56 = vld [vmem:[#allocation81_spill] sm:$0xff] }
 0x3ad   : > { %v19926_v30 = vsel %vm25258_vm10, %v25257_v23, %v25256_v49  ;;  %v19929_v28 = vsel %vm25260_vm8, %v7058_v32, %v7206_v44  ;;  %vm23999_vm3 = vmand %vm19868_vm14, %vm25263_vm12  ;;  %v7060_v47 = vadd.f32 %v18793_v20, %v6046_v15  ;;  %v19939_v27 = vsel %vm7128_vm11, %v7056_v11, %v7204_v59  ;;  %v14870_v49 = vpop.f32.mrb[68].mxu0  ;;  %v25272_v11 = vld [vmem:[#allocation131_spill] sm:$0xff] }
 0x3ae   : > { %25259 = vst [vmem:[#allocation79_spill] sm:$0xff] %v19926_v30  ;;  %25261 = vst [vmem:[#allocation101_spill] sm:$0xff] %v19929_v28  ;;  %v25264_v44 = vmov 0  ;;  %v6297_v32 = vshra.s32 %v19879_v22, 5  ;;  %v7061_v18 = vadd.f32 %v18793_v20, %v6047_v61  ;;  %v19960_v59 = vpack.c.bf16 %v19916_v60, %v19939_v27  ;;  %v5727_v48 = vpop.f32.mrb[69].mxu0 }
 0x3af   : > { %v25265_v44 = vsel %vm19948_vm0, 4294967295, %v25264_v44  ;;  %vm19968_vm11 = vmpackc.low %vm24975_vm15, %vm23999_vm3  ;;  %v25269_v55 = vmov 0  ;;  %v19977_v15 = vpack.c.bf16 %v24942_v43, %v19929_v28  ;;  %v5908_v30 = vadd.f32 %v14870_v49, %v25274_v29  ;;  %v25276_v29 = vld [vmem:[#allocation13_spill] sm:$0xff]  ;;  %v14871_v28 = vpop.f32.mrb[70].mxu0 }
 0x3b0   : > { %25266 = vst [vmem:[#allocation16_spill] sm:$0xff] %v25265_v44  ;;  %25268 = vst [vmem:[#allocation43_spill] sm:$0xff] %v19960_v59  ;;  %v25270_v55 = vsel %vm19968_vm11, 4294967295, %v25269_v55  ;;  %v6298_v19 = vshra.s32 %v19919_v40, 5  ;;  %v7210_v61 = vmul.f32 %v18832_v24, %v7062_v46  ;;  %14944 = vmatprep.mubr.msk.bf16.mxu1 %vm19948_vm0, %v19960_v59  ;;  %15100 = vmatprep.mubr.msk.bf16.mxu0 %vm19948_vm0, %v19960_v59  ;;  %vm25277_vm8 = vcmp.lt.s32.totalorder %v25209_v36, 16  ;;  %v25300_v59 = vld [vmem:[#allocation37_spill] sm:$0xff] }
 0x3b1   : > { %25271 = vst [vmem:[#allocation134_spill] sm:$0xff] %v25270_v55  ;;  %25273 = vst [vmem:[#allocation131_spill] sm:$0xff] %v19977_v15  ;;  %v5906_v49 = vadd.f32 %v5727_v48, %v25276_v29  ;;  %vm25278_vm3 = vcmp.ge.s32.totalorder %v25209_v36, 0  ;;  %v7209_v3 = vmul.f32 %v18832_v24, %v7061_v18  ;;  %v25282_v16 = vand.u32 31, %v25281_v6  ;;  %v25285_v48 = vld [vmem:[#allocation39_spill] sm:$0xff]  ;;  %14945 = vmatmul.mubr.msk.bf16.gmra.mrb[56].mxu1 %vm19968_vm11, %v19977_v15  ;;  %v5730_v36 = vpop.f32.mrb[71].mxu0 }
 0x3b2   : > { %vm19999_vm10 = vmand %vm25278_vm3, %vm25277_vm8  ;;  %v25283_v26 = vmov 0  ;;  %v6052_v28 = vadd.f32 %v5908_v30, %v25285_v48  ;;  %15101 = vmatmul.mubr.msk.bf16.gmra.mrb[124].mxu0 %vm19968_vm11, %v19977_v15  ;;  %v7208_v29 = vmul.f32 %v18832_v24, %v7060_v47  ;;  %vm25286_vm3 = vcmp.lt.s32.totalorder %v25215_v0, 16 }
 0x3b3   : > { %vm20006_vm12 = vcmp.ge.s32.totalorder %v25282_v16, 1  ;;  %vm25287_vm8 = vcmp.ge.s32.totalorder %v25215_v0, 0  ;;  %v25288_v6 = vmov 0  ;;  %v25291_v16 = vld [vmem:[#allocation30_spill] sm:$0xff]  ;;  %v25293_v48 = vmov 0 }
 0x3b4   : > { %v25284_v26 = vsel %vm20006_vm12, 4294967295, %v25283_v26  ;;  %vm20022_vm1 = vmand %vm25287_vm8, %vm25286_vm3  ;;  %v25292_v30 = vand.u32 31, %v25291_v16  ;;  %v25296_v55 = vrot.slane %v19652_v31, 1  ;;  %v25297_v15 = vrot.slane %v19591_v51, 1  ;;  %v25320_v51 = vld [vmem:[#allocation42_spill] sm:$0xff] }
 0x3b5   : > { %v25289_v6 = vsel %vm20022_vm1, 4294967295, %v25288_v6  ;;  %vm25298_vm11 = vcmp.lt.s32.totalorder %v16193_v45, 7  ;;  %v6050_v0 = vadd.f32 %v5906_v49, %v25300_v59  ;;  %v5907_v5 = vadd.f32 %v5730_v36, %v25301_v14  ;;  %v25335_v36 = vld [vmem:[#allocation139_spill] sm:$0xff] }
 0x3b6   : > { %25290 = vst [vmem:[#allocation75_spill] sm:$0xff] %v25289_v6  ;;  %vm20028_vm0 = vcmp.le.s32.totalorder %v25292_v30, 16  ;;  %v20038_v44 = vsel %vm25298_vm11, %v25297_v15, %v25296_v55  ;;  %vm25302_vm3 = vcmp.lt.s32.totalorder %v25218_v41, 16  ;;  %vm25303_vm8 = vcmp.ge.s32.totalorder %v25218_v41, 0  ;;  %v25306_v30 = vld [vmem:[#allocation66_spill] sm:$0xff]  ;;  %vm25307_vm11 = vmand %vm19829_vm7, %vm19766_vm4 }
 0x3b7   : > { %v25294_v48 = vsel %vm20028_vm0, 4294967295, %v25293_v48  ;;  %25299 = vst [vmem:[#allocation13_spill] sm:$0xff] %v20038_v44  ;;  %vm20046_vm14 = vmand %vm25303_vm8, %vm25302_vm3  ;;  %vm7132_vm0 = vcmp.ge.f32.partialorder %v7060_v47, 0.0  ;;  %v20056_v15 = vsel %vm25307_vm11, %v25306_v30, 0.0  ;;  %v25309_v59 = vrot.slane %v19887_v50, 1  ;;  %v25396_v44 = vld [vmem:[#allocation133_spill] sm:$0xff] }
 0x3b8   : > { %25295 = vst [vmem:[#allocation81_spill] sm:$0xff] %v25294_v48  ;;  %25308 = vst [vmem:[#allocation95_spill] sm:$0xff] %v20056_v15  ;;  %vm25310_vm12 = vcmp.lt.s32.totalorder %v16193_v45, 7  ;;  %v25312_v41 = vrot.slane %v19887_v50, 2  ;;  %vm25313_vm3 = vcmp.lt.s32.totalorder %v16193_v45, 6  ;;  %vm25315_vm11 = vcmp.ge.f32.partialorder %v7061_v18, 0.0 }
 0x3b9   : > { %v20063_v14 = vsel %vm25310_vm12, %v25128_v25, %v25309_v59  ;;  %v20077_v49 = vsel %vm25315_vm11, %v7061_v18, %v7209_v3  ;;  %vm25316_vm12 = vnez %v25109_v42  ;;  %vm25321_vm11 = vnez %v25242_v54 }
 0x3ba   : > { %25311 = vst [vmem:[#allocation39_spill] sm:$0xff] %v20063_v14  ;;  %v20070_v55 = vsel %vm25313_vm3, %v25257_v23, %v25312_v41  ;;  %vm25317_vm4 = vmand %vm19683_vm5, %vm25316_vm12  ;;  %vm25318_vm3 = vcmp.ge.f32.partialorder %v7062_v46, 0.0  ;;  %v7066_v41 = vadd.f32 %v18793_v20, %v6052_v28  ;;  %v7064_v3 = vadd.f32 %v18793_v20, %v6050_v0 }
 0x3bb   : > { %25314 = vst [vmem:[#allocation30_spill] sm:$0xff] %v20070_v55  ;;  %v20086_v30 = vsel %vm25317_vm4, %v19782_v4, 0.0  ;;  %v20089_v59 = vsel %vm25318_vm3, %v7062_v46, %v7210_v61  ;;  %v6051_v55 = vadd.f32 %v5907_v5, %v25320_v51  ;;  %vm24021_vm8 = vmand %vm20022_vm1, %vm25321_vm11  ;;  %v20098_v33 = vsel %vm7132_vm0, %v7060_v47, %v7208_v29  ;;  %v25326_v5 = vld [vmem:[#allocation136_spill] sm:$0xff]  ;;  %v14874_v61 = vpop.f32.mrb[72].mxu0  ;;  %v25334_v29 = vld [vmem:[#allocation15_spill] sm:$0xff] }
 0x3bc   : > { %25319 = vst [vmem:[#allocation37_spill] sm:$0xff] %v20089_v59  ;;  %vm25322_vm5 = vmand %vm19999_vm10, %vm19852_vm2  ;;  %v25323_v42 = vmov 0  ;;  %v20113_v51 = vadd.s32 4294967295, %v6297_v32  ;;  %v24023_v4 = vrot.slane %v20056_v15, 1  ;;  %vm25327_vm0 = vnez %v25186_v21  ;;  %v25332_v21 = vld [vmem:[#allocation137_spill] sm:$0xff] }
 0x3bd   : > { %vm20107_vm4 = vmpackc.low %vm20046_vm14, %vm25322_vm5  ;;  %v20119_v46 = vsel %vm25327_vm0, %v19746_v39, 0.0  ;;  %v7065_v47 = vadd.f32 %v18793_v20, %v6051_v55  ;;  %v20124_v18 = vpack.c.bf16 %v20077_v49, %v20098_v33  ;;  %v25329_v32 = vmov 0  ;;  %v5743_v55 = vpop.f32.mrb[73].mxu0 }
 0x3be   : > { %v25324_v42 = vsel %vm20107_vm4, 4294967295, %v25323_v42  ;;  %vm20132_vm5 = vmpackc.low %vm24975_vm15, %vm24021_vm8  ;;  %v20138_v20 = vadd.s32 4294967295, %v6298_v19  ;;  %v20143_v28 = vpack.c.bf16 %v24942_v43, %v20089_v59  ;;  %v5912_v0 = vadd.f32 %v14874_v61, %v25334_v29  ;;  %v25339_v61 = vld [vmem:[#allocation73_spill] sm:$0xff]  ;;  %v14875_v54 = vpop.f32.mrb[74].mxu0  ;;  %v25503_v59 = vld [vmem:[#allocation146_spill] sm:$0xff] }
 0x3bf   : > { %25325 = vst [vmem:[#allocation56_spill] sm:$0xff] %v25324_v42  ;;  %25328 = vst [vmem:[#allocation66_spill] sm:$0xff] %v20124_v18  ;;  %v25330_v32 = vsel %vm20132_vm5, 4294967295, %v25329_v32  ;;  %v25336_v14 = vrot.slane %v19652_v31, 1  ;;  %vm25337_vm0 = vcmp.lt.s32.totalorder %v16193_v45, 7  ;;  %v7214_v39 = vmul.f32 %v18832_v24, %v7066_v41  ;;  %14948 = vmatprep.mubr.msk.bf16.mxu1 %vm20107_vm4, %v20124_v18  ;;  %15104 = vmatprep.mubr.msk.bf16.mxu0 %vm20107_vm4, %v20124_v18  ;;  %v25344_v31 = vld [vmem:[#allocation105_spill] sm:$0xff] }
 0x3c0   : > { %25331 = vst [vmem:[#allocation42_spill] sm:$0xff] %v25330_v32  ;;  %25333 = vst [vmem:[#allocation136_spill] sm:$0xff] %v20143_v28  ;;  %v5910_v29 = vadd.f32 %v5743_v55, %v25339_v61  ;;  %vm25340_vm8 = vcmp.lt.s32.totalorder %v25267_v52, 16  ;;  %vm25341_vm3 = vcmp.ge.s32.totalorder %v25267_v52, 0  ;;  %v25345_v6 = vand.u32 31, %v25344_v31  ;;  %v25348_v55 = vld [vmem:[#allocation47_spill] sm:$0xff]  ;;  %14949 = vmatmul.mubr.msk.bf16.gmra.mrb[60].mxu1 %vm20132_vm5, %v20143_v28  ;;  %15105 = vmatmul.mubr.msk.bf16.gmra.mrb[128].mxu0 %vm20132_vm5, %v20143_v28 }
 0x3c1   : > { %v20154_v19 = vsel %vm25337_vm0, %v25336_v14, %v24023_v4  ;;  %vm20168_vm12 = vmand %vm25341_vm3, %vm25340_vm8  ;;  %v7213_v4 = vmul.f32 %v18832_v24, %v7065_v47  ;;  %v6056_v54 = vadd.f32 %v5912_v0, %v25348_v55  ;;  %v5746_v52 = vpop.f32.mrb[75].mxu0  ;;  %v20189_v24 = vld [vmem:[%s23673_s4 + $0x1] ss:$0 sm:$0xff]  ;;  %vm25349_vm8 = vcmp.lt.s32.totalorder %v25272_v11, 16  ;;  %v25354_v0 = vld [vmem:[#allocation90_spill] sm:$0xff] }
 0x3c2   : > { %25338 = vst [vmem:[#allocation137_spill] sm:$0xff] %v20154_v19  ;;  %vm20175_vm11 = vcmp.ge.s32.totalorder %v25345_v6, 1  ;;  %v7212_v31 = vmul.f32 %v20189_v24, %v7064_v3  ;;  %vm25350_vm3 = vcmp.ge.s32.totalorder %v25272_v11, 0  ;;  %v25351_v6 = vmov 0  ;;  %vm25359_vm5 = vmand %vm19845_vm9, %vm19690_vm13  ;;  %v25361_v28 = vld [vmem:[#allocation96_spill] sm:$0xff]  ;;  %v25362_v18 = vld [vmem:[#allocation18_spill] sm:$0xff] }
 0x3c3   : > { %vm20196_vm4 = vmand %vm25350_vm3, %vm25349_vm8  ;;  %v25355_v61 = vand.u32 31, %v25354_v0  ;;  %v25356_v55 = vmov 0  ;;  %v20214_v11 = vsel %vm25359_vm5, %v19939_v27, 0.0  ;;  %v6054_v42 = vadd.f32 %v5910_v29, %v25361_v28  ;;  %v20247_v29 = vld [vmem:[%s23673_s4] ss:$0 sm:$0xff]  ;;  %v25385_v32 = vld [vmem:[#allocation140_spill] sm:$0xff] }
 0x3c4   : > { %v25352_v6 = vsel %vm20196_vm4, 4294967295, %v25351_v6  ;;  %25360 = vst [vmem:[#allocation73_spill] sm:$0xff] %v20214_v11  ;;  %v5911_v9 = vadd.f32 %v5746_v52, %v25362_v18  ;;  %vm25363_vm8 = vcmp.lt.s32.totalorder %v25275_v56, 16  ;;  %vm25364_vm3 = vcmp.ge.s32.totalorder %v25275_v56, 0  ;;  %v25441_v0 = vld [vmem:[#allocation144_spill] sm:$0xff] }
 0x3c5   : > { %25353 = vst [vmem:[#allocation15_spill] sm:$0xff] %v25352_v6  ;;  %vm20202_vm0 = vcmp.le.s32.totalorder %v25355_v61, 16  ;;  %vm20222_vm1 = vmand %vm25364_vm3, %vm25363_vm8  ;;  %vm7136_vm7 = vcmp.ge.f32.partialorder %v7064_v3, 0.0  ;;  %v20231_v27 = vsel %vm19895_vm6, %v19916_v60, 0.0  ;;  %vm25367_vm13 = vnez %v25284_v26  ;;  %v25371_v60 = vld [vmem:[#allocation44_spill] sm:$0xff] }
 0x3c6   : > { %v25357_v55 = vsel %vm20202_vm0, 4294967295, %v25356_v55  ;;  %vm24037_vm9 = vmand %vm20168_vm12, %vm25367_vm13  ;;  %vm25368_vm5 = vcmp.ge.f32.partialorder %v7065_v47, 0.0  ;;  %vm25369_vm8 = vcmp.ge.f32.partialorder %v7066_v41, 0.0  ;;  %v7070_v7 = vadd.f32 %v20247_v29, %v6056_v54  ;;  %v25379_v54 = vld [vmem:[#allocation141_spill] sm:$0xff]  ;;  %v25418_v6 = vld [vmem:[#allocation88_spill] sm:$0xff] }
 0x3c7   : > { %25358 = vst [vmem:[#allocation139_spill] sm:$0xff] %v25357_v55  ;;  %v20238_v56 = vsel %vm25368_vm5, %v7065_v47, %v7213_v4  ;;  %v20242_v28 = vsel %vm25369_vm8, %v7066_v41, %v7214_v39  ;;  %v6055_v52 = vadd.f32 %v5911_v9, %v25371_v60  ;;  %vm25372_vm6 = vnez %v25294_v48  ;;  %vm20271_vm8 = vmpackc.low %vm20222_vm1, %vm24037_vm9 }
 0x3c8   : > { %25370 = vst [vmem:[#allocation105_spill] sm:$0xff] %v20242_v28  ;;  %v25373_v4 = vrot.slane %v20086_v30, 2  ;;  %vm25374_vm5 = vcmp.lt.s32.totalorder %v16193_v45, 6  ;;  %v7068_v39 = vadd.f32 %v20247_v29, %v6054_v42  ;;  %v7284_v61 = vsel %vm7136_vm7, %v7064_v3, %v7212_v31  ;;  %vm25381_vm7 = vmand %vm20196_vm4, %vm25372_vm6 }
 0x3c9   : > { %v25376_v9 = vmov 0  ;;  %v7069_v3 = vadd.f32 %v20247_v29, %v6055_v52  ;;  %v20281_v31 = vpack.c.bf16 %v20238_v56, %v7284_v61  ;;  %vm20289_vm9 = vmpackc.low %vm24975_vm15, %vm25381_vm7  ;;  %v25382_v18 = vmov 0 }
 0x3ca   : > { %v20260_v41 = vsel %vm25374_vm5, %v25257_v23, %v25373_v4  ;;  %v25377_v9 = vsel %vm20271_vm8, 4294967295, %v25376_v9  ;;  %v14878_v4 = vpop.f32.mrb[76].mxu0  ;;  %v25383_v18 = vsel %vm20289_vm9, 4294967295, %v25382_v18  ;;  %v20298_v47 = vpack.c.bf16 %v24942_v43, %v20242_v28  ;;  %vm25387_vm6 = vmand %vm19999_vm10, %vm19852_vm2 }
 0x3cb   : > { %25375 = vst [vmem:[#allocation47_spill] sm:$0xff] %v20260_v41  ;;  %25378 = vst [vmem:[#allocation90_spill] sm:$0xff] %v25377_v9  ;;  %v20306_v60 = vsel %vm25387_vm6, %v20098_v33, 0.0  ;;  %v5916_v8 = vadd.f32 %v14878_v4, %v25389_v62  ;;  %v5759_v42 = vpop.f32.mrb[77].mxu0  ;;  %v25390_v41 = vld [vmem:[#allocation142_spill] sm:$0xff]  ;;  %v7218_v52 = vmul.f32 %v20189_v24, %v7070_v7  ;;  %14952 = vmatprep.mubr.msk.bf16.mxu1 %vm20271_vm8, %v20281_v31  ;;  %15108 = vmatprep.mubr.msk.bf16.mxu0 %vm20271_vm8, %v20281_v31  ;;  %v25398_v48 = vmov 0 }
 0x3cc   : > { %25380 = vst [vmem:[#allocation96_spill] sm:$0xff] %v20281_v31  ;;  %25384 = vst [vmem:[#allocation18_spill] sm:$0xff] %v25383_v18  ;;  %v5914_v40 = vadd.f32 %v5759_v42, %v25391_v13  ;;  %v14879_v33 = vpop.f32.mrb[78].mxu0  ;;  %vm25392_vm2 = vcmp.lt.s32.totalorder %v25326_v5, 16  ;;  %vm25393_vm10 = vcmp.ge.s32.totalorder %v25326_v5, 0  ;;  %v7217_v4 = vmul.f32 %v20189_v24, %v7069_v3  ;;  %v25400_v5 = vld [vmem:[#allocation97_spill] sm:$0xff]  ;;  %14953 = vmatmul.mubr.msk.bf16.gmra.mrb[64].mxu1 %vm20289_vm9, %v20298_v47 }
 0x3cd   : > { %25386 = vst [vmem:[#allocation44_spill] sm:$0xff] %v20298_v47  ;;  %25388 = vst [vmem:[#allocation141_spill] sm:$0xff] %v20306_v60  ;;  %v25397_v19 = vand.u32 31, %v25396_v44  ;;  %v20337_v42 = vsel %vm20046_vm14, %v20077_v49, 0.0  ;;  %v6060_v13 = vadd.f32 %v5916_v8, %v25400_v5  ;;  %15109 = vmatmul.mubr.msk.bf16.gmra.mrb[132].mxu0 %vm20289_vm9, %v20298_v47  ;;  %v5762_v44 = vpop.f32.mrb[79].mxu0  ;;  %v25403_v16 = vmov 0 }
 0x3ce   : > { %vm20323_vm6 = vmand %vm25393_vm10, %vm25392_vm2  ;;  %vm25401_vm2 = vcmp.lt.s32.totalorder %v25332_v21, 16  ;;  %vm25402_vm10 = vcmp.ge.s32.totalorder %v25332_v21, 0  ;;  %v25406_v49 = vld [vmem:[#allocation132_spill] sm:$0xff]  ;;  %v25408_v33 = vmov 0  ;;  %v25411_v5 = vld [vmem:[#allocation50_spill] sm:$0xff]  ;;  %vm25413_vm7 = vcmp.lt.s32.totalorder %v25335_v36, 16 }
 0x3cf   : > { %vm20330_vm3 = vcmp.ge.s32.totalorder %v25397_v19, 1  ;;  %v7216_v19 = vmul.f32 %v20189_v24, %v7068_v39  ;;  %vm20351_vm14 = vmand %vm25402_vm10, %vm25401_vm2  ;;  %v25407_v8 = vand.u32 31, %v25406_v49  ;;  %v6058_v18 = vadd.f32 %v5914_v40, %v25411_v5  ;;  %v25412_v47 = vld [vmem:[#allocation107_spill] sm:$0xff]  ;;  %v25417_v31 = vld [vmem:[#allocation153_spill] sm:$0xff] }
 0x3d0   : > { %v25399_v48 = vsel %vm20330_vm3, 4294967295, %v25398_v48  ;;  %v25404_v16 = vsel %vm20351_vm14, 4294967295, %v25403_v16  ;;  %v5915_v9 = vadd.f32 %v5762_v44, %v25412_v47  ;;  %vm25414_vm9 = vcmp.ge.s32.totalorder %v25335_v36, 0  ;;  %v25420_v49 = vld [vmem:[#allocation82_spill] sm:$0xff]  ;;  %v25510_v62 = vld [vmem:[#allocation151_spill] sm:$0xff]  ;;  %v25514_v21 = vld [vmem:[#allocation20_spill] sm:$0xff] }
 0x3d1   : > { %25405 = vst [vmem:[#allocation140_spill] sm:$0xff] %v25404_v16  ;;  %vm20357_vm5 = vcmp.le.s32.totalorder %v25407_v8, 16  ;;  %vm20367_vm8 = vmand %vm25414_vm9, %vm25413_vm7  ;;  %vm7140_vm2 = vcmp.ge.f32.partialorder %v7068_v39, 0.0  ;;  %vm25419_vm10 = vnez %v25418_v6  ;;  %vm25421_vm4 = vnez %v25420_v49  ;;  %v25432_v49 = vld [vmem:[#allocation49_spill] sm:$0xff] }
 0x3d2   : > { %v25409_v33 = vsel %vm20357_vm5, 4294967295, %v25408_v33  ;;  %vm25422_vm3 = vmand %vm25419_vm10, %vm25421_vm4  ;;  %v25424_v40 = vrot.slane %v20214_v11, 2  ;;  %vm25425_vm5 = vcmp.lt.s32.totalorder %v16193_v45, 6  ;;  %v7074_v14 = vadd.f32 %v20247_v29, %v6060_v13 }
 0x3d3   : > { %25410 = vst [vmem:[#allocation76_spill] sm:$0xff] %v25409_v33  ;;  %v20377_v8 = vsel %vm25422_vm3, %v25417_v31, 0.0  ;;  %vm25427_vm9 = vmand %vm20168_vm12, %vm25367_vm13  ;;  %vm25429_vm3 = vcmp.ge.f32.partialorder %v7069_v3, 0.0  ;;  %v6059_v26 = vadd.f32 %v5915_v9, %v25432_v49  ;;  %v25436_v9 = vld [vmem:[#allocation143_spill] sm:$0xff]  ;;  %v25438_v49 = vmov 0 }
 0x3d4   : > { %25423 = vst [vmem:[#allocation142_spill] sm:$0xff] %v20377_v8  ;;  %v20384_v47 = vsel %vm25425_vm5, %v25257_v23, %v25424_v40  ;;  %v20392_v6 = vsel %vm25427_vm9, %v7284_v61, 0.0  ;;  %vm24061_vm4 = vmand %vm20323_vm6, %vm20175_vm11  ;;  %v20399_v31 = vsel %vm25429_vm3, %v7069_v3, %v7217_v4  ;;  %vm25430_vm5 = vcmp.ge.f32.partialorder %v7070_v7, 0.0 }
 0x3d5   : > { %25426 = vst [vmem:[#allocation17_spill] sm:$0xff] %v20384_v47  ;;  %25428 = vst [vmem:[#allocation133_spill] sm:$0xff] %v20392_v6  ;;  %v20403_v5 = vsel %vm25430_vm5, %v7070_v7, %v7218_v52  ;;  %v7072_v40 = vadd.f32 %v20247_v29, %v6058_v18  ;;  %v7288_v3 = vsel %vm7140_vm2, %v7068_v39, %v7216_v19  ;;  %v25433_v7 = vmov 0  ;;  %v14882_v19 = vpop.f32.mrb[80].mxu0  ;;  %v25444_v39 = vld [vmem:[#allocation86_spill] sm:$0xff] }
 0x3d6   : > { %25431 = vst [vmem:[#allocation97_spill] sm:$0xff] %v20403_v5  ;;  %vm24052_vm12 = vmand %vm20351_vm14, %vm20202_vm0  ;;  %v24057_v52 = vrot.slane %v20377_v8, 1  ;;  %v20430_v18 = vsel %vm20222_vm1, %v20238_v56, 0.0  ;;  %v7073_v4 = vadd.f32 %v20247_v29, %v6059_v26  ;;  %v20435_v13 = vpack.c.bf16 %v20399_v31, %v7288_v3  ;;  %v25443_v26 = vld [vmem:[#allocation19_spill] sm:$0xff]  ;;  %v5775_v61 = vpop.f32.mrb[81].mxu0 }
 0x3d7   : > { %vm20420_vm13 = vmpackc.low %vm20367_vm8, %vm24061_vm4  ;;  %v20451_v56 = vpack.c.bf16 %v24942_v43, %v20403_v5  ;;  %v5920_v36 = vadd.f32 %v14882_v19, %v25443_v26  ;;  %v25445_v44 = vrot.slane %v19406_v10, 1  ;;  %v25448_v16 = vrot.slane %v19351_v2, 1  ;;  %v25450_v26 = vld [vmem:[#allocation109_spill] sm:$0xff] }
 0x3d8   : > { %v25434_v7 = vsel %vm20420_vm13, 4294967295, %v25433_v7  ;;  %25437 = vst [vmem:[#allocation50_spill] sm:$0xff] %v20435_v13  ;;  %vm20443_vm2 = vmpackc.low %vm24975_vm15, %vm24052_vm12  ;;  %vm25446_vm12 = vcmp.lt.s32.totalorder %v16193_v45, 7  ;;  %v7222_v19 = vmul.f32 %v20189_v24, %v7074_v14  ;;  %14956 = vmatprep.mubr.msk.bf16.mxu1 %vm20420_vm13, %v20435_v13  ;;  %15112 = vmatprep.mubr.msk.bf16.mxu0 %vm20420_vm13, %v20435_v13  ;;  %v5918_v28 = vadd.f32 %v5775_v61, %v25450_v26  ;;  %v25459_v61 = vld [vmem:[#allocation68_spill] sm:$0xff] }
 0x3d9   : > { %25435 = vst [vmem:[#allocation132_spill] sm:$0xff] %v25434_v7  ;;  %v25439_v49 = vsel %vm20443_vm2, 4294967295, %v25438_v49  ;;  %25442 = vst [vmem:[#allocation153_spill] sm:$0xff] %v20451_v56  ;;  %v7601_v47 = vsel %vm25446_vm12, %v25445_v44, %v24057_v52  ;;  %v25447_v55 = vmov %v25445_v44  ;;  %v14883_v44 = vpop.f32.mrb[82].mxu0  ;;  %vm25452_vm3 = vcmp.ge.s32.totalorder %v25379_v54, 0  ;;  %14957 = vmatmul.mubr.msk.bf16.gmra.mrb[68].mxu1 %vm20443_vm2, %v20451_v56  ;;  %15113 = vmatmul.mubr.msk.bf16.gmra.mrb[136].mxu0 %vm20443_vm2, %v20451_v56  ;;  %v25471_v56 = vld [vmem:[#allocation52_spill] sm:$0xff] }
 0x3da   : > { %25440 = vst [vmem:[#allocation107_spill] sm:$0xff] %v25439_v49  ;;  %vm25449_vm1 = vmmov %vm25446_vm12  ;;  %vm25451_vm12 = vcmp.lt.s32.totalorder %v25379_v54, 16  ;;  %v6064_v26 = vadd.f32 %v5920_v36, %v25459_v61  ;;  %v5778_v54 = vpop.f32.mrb[83].mxu0  ;;  %v7220_v44 = vmul.f32 %v20189_v24, %v7072_v40  ;;  %v25465_v36 = vld [vmem:[#allocation135_spill] sm:$0xff]  ;;  %v25467_v61 = vmov 0 }
 0x3db   : > { %v7602_v5 = vsel %vm25449_vm1, %v25448_v16, %v25447_v55  ;;  %vm20480_vm5 = vmand %vm25452_vm3, %vm25451_vm12  ;;  %v7221_v55 = vmul.f32 %v20189_v24, %v7073_v4  ;;  %v25455_v16 = vld [vmem:[#allocation80_spill] sm:$0xff]  ;;  %vm25460_vm3 = vcmp.lt.s32.totalorder %v25385_v32, 16  ;;  %vm25461_vm12 = vcmp.ge.s32.totalorder %v25385_v32, 0 }
 0x3dc   : > { %v25456_v2 = vand.u32 31, %v25455_v16  ;;  %vm20503_vm10 = vmand %vm25461_vm12, %vm25460_vm3  ;;  %v25466_v16 = vand.u32 31, %v25465_v36  ;;  %v20513_v7 = vpack.c.bf16 %v7601_v47, %v7602_v5  ;;  %v6062_v13 = vadd.f32 %v5918_v28, %v25471_v56 }
 0x3dd   : > { %v5919_v11 = vadd.f32 %v5778_v54, %v25472_v53  ;;  %vm25473_vm7 = vcmp.lt.s32.totalorder %v25390_v41, 16  ;;  %vm25474_vm3 = vcmp.ge.s32.totalorder %v25390_v41, 0  ;;  %vm7144_vm1 = vcmp.ge.f32.partialorder %v7072_v40, 0.0 }
 0x3de   : > { %vm20487_vm9 = vcmp.ge.s32.totalorder %v25456_v2, 1  ;;  %v25462_v2 = vmov 0  ;;  %vm20509_vm4 = vcmp.le.s32.totalorder %v25466_v16, 16  ;;  %25470 = vst [vmem:[#allocation49_spill] sm:$0xff] %v20513_v7  ;;  %vm20522_vm12 = vmand %vm25474_vm3, %vm25473_vm7  ;;  %v25477_v36 = vrot.slane %v20306_v60, 2 }
 0x3df   : > { %v25463_v2 = vsel %vm20503_vm10, 4294967295, %v25462_v2  ;;  %v25468_v61 = vsel %vm20509_vm4, 4294967295, %v25467_v61  ;;  %vm25478_vm2 = vcmp.lt.s32.totalorder %v16193_v45, 6  ;;  %vm25480_vm13 = vnez %v25399_v48 }
 0x3e0   : > { %25464 = vst [vmem:[#allocation88_spill] sm:$0xff] %v25463_v2  ;;  %25469 = vst [vmem:[#allocation82_spill] sm:$0xff] %v25468_v61  ;;  %v20531_v47 = vsel %vm25478_vm2, %v25257_v23, %v25477_v36  ;;  %vm25481_vm14 = vcmp.ge.f32.partialorder %v7073_v4, 0.0  ;;  %v25482_v41 = vrot.slane %v20056_v15, 1  ;;  %vm25483_vm7 = vcmp.lt.s32.totalorder %v16193_v45, 7  ;;  %v25487_v36 = vld [vmem:[#allocation54_spill] sm:$0xff] }
 0x3e1   : > { %25479 = vst [vmem:[#allocation143_spill] sm:$0xff] %v20531_v47  ;;  %vm24078_vm0 = vmand %vm20480_vm5, %vm25480_vm13  ;;  %v20539_v53 = vsel %vm25481_vm14, %v7073_v4, %v7221_v55  ;;  %vm25485_vm2 = vcmp.ge.f32.partialorder %v7074_v14, 0.0  ;;  %v7078_v16 = vadd.f32 %v20247_v29, %v6064_v26  ;;  %v6063_v49 = vadd.f32 %v5919_v11, %v25487_v36  ;;  %v25495_v26 = vld [vmem:[#allocation147_spill] sm:$0xff]  ;;  %v14886_v36 = vpop.f32.mrb[84].mxu0  ;;  %v25505_v4 = vld [vmem:[#allocation110_spill] sm:$0xff] }
 0x3e2   : > { %v20546_v5 = vsel %vm25483_vm7, %v25482_v41, %v25128_v25  ;;  %v20550_v54 = vsel %vm25485_vm2, %v7074_v14, %v7222_v19  ;;  %vm25488_vm3 = vnez %v25409_v33  ;;  %v25489_v55 = vrot.slane %v20392_v6, 2  ;;  %vm20574_vm2 = vmpackc.low %vm20522_vm12, %vm24078_vm0  ;;  %v5791_v56 = vpop.f32.mrb[85].mxu0  ;;  %v25506_v15 = vld [vmem:[#allocation149_spill] sm:$0xff]  ;;  %v25508_v47 = vld [vmem:[#allocation35_spill] sm:$0xff] }
 0x3e3   : > { %25484 = vst [vmem:[#allocation144_spill] sm:$0xff] %v20546_v5  ;;  %25486 = vst [vmem:[#allocation19_spill] sm:$0xff] %v20550_v54  ;;  %vm25490_vm7 = vcmp.lt.s32.totalorder %v16193_v45, 6  ;;  %v7076_v14 = vadd.f32 %v20247_v29, %v6062_v13  ;;  %v7292_v19 = vsel %vm7144_vm1, %v7072_v40, %v7220_v44  ;;  %v25492_v11 = vmov 0 }
 0x3e4   : > { %v20564_v41 = vsel %vm25490_vm7, %v25257_v23, %v25489_v55  ;;  %v25493_v11 = vsel %vm20574_vm2, 4294967295, %v25492_v11  ;;  %vm25496_vm1 = vmand %vm20323_vm6, %vm20175_vm11  ;;  %v7077_v13 = vadd.f32 %v20247_v29, %v6063_v49  ;;  %v20589_v44 = vpack.c.bf16 %v20539_v53, %v7292_v19 }
 0x3e5   : > { %25491 = vst [vmem:[#allocation86_spill] sm:$0xff] %v20564_v41  ;;  %25494 = vst [vmem:[#allocation109_spill] sm:$0xff] %v25493_v11  ;;  %v20585_v40 = vsel %vm25496_vm1, %v7288_v3, 0.0  ;;  %v25500_v55 = vmov 0  ;;  %v20607_v3 = vpack.c.bf16 %v24942_v43, %v20550_v54  ;;  %v20612_v49 = vsel %vm20367_vm8, %v20399_v31, 0.0  ;;  %v25507_v41 = vld [vmem:[#allocation162_spill] sm:$0xff] }
 0x3e6   : > { %25497 = vst [vmem:[#allocation80_spill] sm:$0xff] %v20585_v40  ;;  %25498 = vst [vmem:[#allocation68_spill] sm:$0xff] %v20589_v44  ;;  %v5924_v28 = vadd.f32 %v14886_v36, %v25505_v4  ;;  %vm25509_vm11 = vnez %v25508_v47  ;;  %vm25511_vm6 = vnez %v25510_v62  ;;  %v7226_v5 = vmul.f32 %v20189_v24, %v7078_v16  ;;  %14960 = vmatprep.mubr.msk.bf16.mxu1 %vm20574_vm2, %v20589_v44  ;;  %v14887_v4 = vpop.f32.mrb[86].mxu0  ;;  %v25519_v36 = vld [vmem:[#allocation138_spill] sm:$0xff]  ;;  %v25534_v11 = vld [vmem:[#allocation51_spill] sm:$0xff] }
 0x3e7   : > { %vm25499_vm7 = vmand %vm20503_vm10, %vm25488_vm3  ;;  %25504 = vst [vmem:[#allocation52_spill] sm:$0xff] %v20607_v3  ;;  %15116 = vmatprep.mubr.msk.bf16.mxu0 %vm20574_vm2, %v20589_v44  ;;  %v5922_v31 = vadd.f32 %v5791_v56, %v25514_v21  ;;  %vm25515_vm8 = vcmp.lt.s32.totalorder %v25436_v9, 16  ;;  %vm25516_vm1 = vcmp.ge.s32.totalorder %v25436_v9, 0  ;;  %v25520_v62 = vand.u32 31, %v25519_v36  ;;  %v25523_v21 = vld [vmem:[#allocation99_spill] sm:$0xff]  ;;  %v5794_v9 = vpop.f32.mrb[87].mxu0 }
 0x3e8   : > { %vm20597_vm14 = vmpackc.low %vm24975_vm15, %vm25499_vm7  ;;  %v6068_v4 = vadd.f32 %v5924_v28, %v25523_v21  ;;  %v7224_v36 = vmul.f32 %v20189_v24, %v7076_v14  ;;  %v25529_v28 = vld [vmem:[#allocation33_spill] sm:$0xff]  ;;  %v25531_v56 = vmov 0  ;;  %vm25543_vm3 = vcmp.ge.f32.partialorder %v7078_v16, 0.0  ;;  %v25592_v54 = vld [vmem:[#allocation22_spill] sm:$0xff] }
 0x3e9   : > { %v25501_v55 = vsel %vm20597_vm14, 4294967295, %v25500_v55  ;;  %vm25512_vm4 = vmand %vm25509_vm11, %vm25511_vm6  ;;  %vm20644_vm6 = vcmp.ge.s32.totalorder %v25520_v62, 1  ;;  %14961 = vmatmul.mubr.msk.bf16.gmra.mrb[72].mxu1 %vm20597_vm14, %v20607_v3  ;;  %15117 = vmatmul.mubr.msk.bf16.gmra.mrb[140].mxu0 %vm20597_vm14, %v20607_v3  ;;  %v25526_v62 = vmov 0  ;;  %v25530_v21 = vand.u32 31, %v25529_v28  ;;  %v25535_v3 = vld [vmem:[#allocation111_spill] sm:$0xff] }
 0x3ea   : > { %25502 = vst [vmem:[#allocation135_spill] sm:$0xff] %v25501_v55  ;;  %v20623_v7 = vsel %vm25512_vm4, %v25507_v41, 0.0  ;;  %vm20637_vm11 = vmand %vm25516_vm1, %vm25515_vm8  ;;  %v7225_v41 = vmul.f32 %v20189_v24, %v7077_v13  ;;  %vm25524_vm1 = vcmp.lt.s32.totalorder %v25441_v0, 16  ;;  %vm25525_vm8 = vcmp.ge.s32.totalorder %v25441_v0, 0  ;;  %v25619_v0 = vld [vmem:[#allocation36_spill] sm:$0xff] }
 0x3eb   : > { %25513 = vst [vmem:[#allocation108_spill] sm:$0xff] %v20623_v7  ;;  %vm20661_vm0 = vmand %vm25525_vm8, %vm25524_vm1  ;;  %vm20667_vm7 = vcmp.le.s32.totalorder %v25530_v21, 16  ;;  %v6066_v55 = vadd.f32 %v5922_v31, %v25534_v11  ;;  %v5923_v44 = vadd.f32 %v5794_v9, %v25535_v3  ;;  %vm25536_vm4 = vcmp.lt.s32.totalorder %v25444_v39, 16  ;;  %v25546_v3 = vld [vmem:[#allocation100_spill] sm:$0xff] }
 0x3ec   : > { %v25527_v62 = vsel %vm20661_vm0, 4294967295, %v25526_v62  ;;  %v25532_v56 = vsel %vm20667_vm7, 4294967295, %v25531_v56  ;;  %vm25537_vm14 = vcmp.ge.s32.totalorder %v25444_v39, 0  ;;  %vm7148_vm1 = vcmp.ge.f32.partialorder %v7076_v14, 0.0 }
 0x3ed   : > { %25528 = vst [vmem:[#allocation54_spill] sm:$0xff] %v25527_v62  ;;  %25533 = vst [vmem:[#allocation147_spill] sm:$0xff] %v25532_v56  ;;  %v25540_v28 = vrot.slane %v20377_v8, 1  ;;  %vm25541_vm8 = vcmp.lt.s32.totalorder %v16193_v45, 7  ;;  %v24091_v31 = vrot.slane %v20623_v7, 1  ;;  %v20699_v9 = vsel %vm25543_vm3, %v7078_v16, %v7226_v5  ;;  %v25566_v62 = vld [vmem:[#allocation154_spill] sm:$0xff] }
 0x3ee   : > { %vm20677_vm2 = vmand %vm25537_vm14, %vm25536_vm4  ;;  %vm25542_vm4 = vcmp.ge.f32.partialorder %v7077_v13, 0.0  ;;  %25544 = vst [vmem:[#allocation146_spill] sm:$0xff] %v20699_v9  ;;  %v7082_v11 = vadd.f32 %v20247_v29, %v6068_v4  ;;  %v6067_v8 = vadd.f32 %v5923_v44, %v25546_v3  ;;  %vm25547_vm14 = vnez %v25468_v61  ;;  %v25555_v44 = vld [vmem:[#allocation83_spill] sm:$0xff]  ;;  %v14890_v4 = vpop.f32.mrb[88].mxu0  ;;  %v25561_v3 = vld [vmem:[#allocation152_spill] sm:$0xff] }
 0x3ef   : > { %v20686_v21 = vsel %vm25541_vm8, %v25540_v28, %v25128_v25  ;;  %v20695_v39 = vsel %vm25542_vm4, %v7077_v13, %v7225_v41  ;;  %vm25545_vm8 = vmand %vm20480_vm5, %vm25480_vm13  ;;  %v25548_v5 = vrot.slane %v20585_v40, 2  ;;  %vm25549_vm3 = vcmp.lt.s32.totalorder %v16193_v45, 6  ;;  %v25565_v13 = vld [vmem:[#allocation21_spill] sm:$0xff]  ;;  %v5807_v61 = vpop.f32.mrb[89].mxu0 }
 0x3f0   : > { %v20706_v28 = vsel %vm25545_vm8, %v7292_v19, 0.0  ;;  %v7080_v52 = vadd.f32 %v20247_v29, %v6066_v55  ;;  %v7296_v16 = vsel %vm7148_vm1, %v7076_v14, %v7224_v36  ;;  %vm25551_vm13 = vmand %vm20637_vm11, %vm20487_vm9  ;;  %v25552_v19 = vmov 0 }
 0x3f1   : > { %v20720_v48 = vsel %vm25549_vm3, %v25257_v23, %v25548_v5  ;;  %vm20730_vm5 = vmpackc.low %vm20677_vm2, %vm25551_vm13  ;;  %v20739_v55 = vsel %vm20522_vm12, %v20539_v53, 0.0  ;;  %v7081_v14 = vadd.f32 %v20247_v29, %v6067_v8  ;;  %v20743_v41 = vpack.c.bf16 %v20695_v39, %v7296_v16  ;;  %v14891_v5 = vpop.f32.mrb[90].mxu0 }
 0x3f2   : > { %25550 = vst [vmem:[#allocation110_spill] sm:$0xff] %v20720_v48  ;;  %v25553_v19 = vsel %vm20730_vm5, 4294967295, %v25552_v19  ;;  %vm25557_vm1 = vmand %vm20661_vm0, %vm25547_vm14  ;;  %v25558_v36 = vmov 0  ;;  %v25562_v8 = vrot.slane %v19464_v12, 1  ;;  %vm25563_vm8 = vcmp.lt.s32.totalorder %v16193_v45, 7 }
 0x3f3   : > { %25554 = vst [vmem:[#allocation149_spill] sm:$0xff] %v25553_v19  ;;  %25556 = vst [vmem:[#allocation162_spill] sm:$0xff] %v20743_v41  ;;  %v20765_v53 = vpack.c.bf16 %v24942_v43, %v20699_v9  ;;  %v5928_v48 = vadd.f32 %v14890_v4, %v25565_v13  ;;  %v25568_v2 = vrot.slane %v19436_v1, 1  ;;  %14964 = vmatprep.mubr.msk.bf16.mxu1 %vm20730_vm5, %v20743_v41  ;;  %15120 = vmatprep.mubr.msk.bf16.mxu0 %vm20730_vm5, %v20743_v41  ;;  %v25570_v13 = vld [vmem:[#allocation112_spill] sm:$0xff]  ;;  %v25607_v10 = vmov 0 }
 0x3f4   : > { %vm20751_vm3 = vmpackc.low %vm24975_vm15, %vm25557_vm1  ;;  %v7597_v32 = vsel %vm25563_vm8, %v25562_v8, %v24091_v31  ;;  %v25567_v33 = vmov %v25562_v8  ;;  %v7230_v31 = vmul.f32 %v20189_v24, %v7082_v11  ;;  %v5926_v4 = vadd.f32 %v5807_v61, %v25570_v13  ;;  %v25579_v61 = vld [vmem:[#allocation58_spill] sm:$0xff] }
 0x3f5   : > { %v25559_v36 = vsel %vm20751_vm3, 4294967295, %v25558_v36  ;;  %25564 = vst [vmem:[#allocation151_spill] sm:$0xff] %v20765_v53  ;;  %vm25569_vm12 = vmmov %vm25563_vm8  ;;  %vm25571_vm8 = vcmp.lt.s32.totalorder %v25495_v26, 16  ;;  %vm25572_vm1 = vcmp.ge.s32.totalorder %v25495_v26, 0  ;;  %v6072_v5 = vadd.f32 %v5928_v48, %v25579_v61  ;;  %14965 = vmatmul.mubr.msk.bf16.gmra.mrb[76].mxu1 %vm20751_vm3, %v20765_v53  ;;  %15121 = vmatmul.mubr.msk.bf16.gmra.mrb[144].mxu0 %vm20751_vm3, %v20765_v53  ;;  %v5810_v26 = vpop.f32.mrb[91].mxu0  ;;  %v25585_v48 = vld [vmem:[#allocation145_spill] sm:$0xff] }
 0x3f6   : > { %25560 = vst [vmem:[#allocation35_spill] sm:$0xff] %v25559_v36  ;;  %v7598_v8 = vsel %vm25569_vm12, %v25568_v2, %v25567_v33  ;;  %vm20789_vm13 = vmand %vm25572_vm1, %vm25571_vm8  ;;  %v7229_v33 = vmul.f32 %v20189_v24, %v7081_v14  ;;  %v25575_v2 = vld [vmem:[#allocation84_spill] sm:$0xff]  ;;  %v7228_v13 = vmul.f32 %v20189_v24, %v7080_v52  ;;  %vm25580_vm1 = vcmp.lt.s32.totalorder %v25503_v59, 16  ;;  %v25591_v53 = vld [vmem:[#allocation106_spill] sm:$0xff] }
 0x3f7   : > { %v25576_v12 = vand.u32 31, %v25575_v2  ;;  %vm25581_vm8 = vcmp.ge.s32.totalorder %v25503_v59, 0  ;;  %v25586_v2 = vand.u32 31, %v25585_v48  ;;  %v25587_v61 = vmov 0  ;;  %v25626_v48 = vld [vmem:[#allocation25_spill] sm:$0xff]  ;;  %v25679_v59 = vld [vmem:[#allocation48_spill] sm:$0xff] }
 0x3f8   : > { %vm20812_vm12 = vmand %vm25581_vm8, %vm25580_vm1  ;;  %v20822_v19 = vpack.c.bf16 %v7597_v32, %v7598_v8  ;;  %v6070_v41 = vadd.f32 %v5926_v4, %v25591_v53  ;;  %v5927_v40 = vadd.f32 %v5810_v26, %v25592_v54  ;;  %vm25593_vm3 = vcmp.lt.s32.totalorder %v25506_v15, 16 }
 0x3f9   : > { %vm20796_vm4 = vcmp.ge.s32.totalorder %v25576_v12, 1  ;;  %v25582_v12 = vmov 0  ;;  %vm20818_vm5 = vcmp.le.s32.totalorder %v25586_v2, 16  ;;  %vm25594_vm1 = vcmp.ge.s32.totalorder %v25506_v15, 0  ;;  %v25605_v2 = vld [vmem:[#allocation57_spill] sm:$0xff] }
 0x3fa   : > { %v25583_v12 = vsel %vm20812_vm12, 4294967295, %v25582_v12  ;;  %v25588_v61 = vsel %vm20818_vm5, 4294967295, %v25587_v61  ;;  %25590 = vst [vmem:[#allocation99_spill] sm:$0xff] %v20822_v19  ;;  %vm20831_vm8 = vmand %vm25594_vm1, %vm25593_vm3  ;;  %vm7152_vm14 = vcmp.ge.f32.partialorder %v7080_v52, 0.0  ;;  %v25597_v8 = vrot.slane %v20706_v28, 2 }
 0x3fb   : > { %25584 = vst [vmem:[#allocation20_spill] sm:$0xff] %v25583_v12  ;;  %25589 = vst [vmem:[#allocation138_spill] sm:$0xff] %v25588_v61  ;;  %vm25598_vm0 = vcmp.lt.s32.totalorder %v16193_v45, 6  ;;  %vm25600_vm1 = vcmp.ge.f32.partialorder %v7081_v14, 0.0  ;;  %vm25601_vm10 = vcmp.ge.f32.partialorder %v7082_v11, 0.0  ;;  %v7086_v26 = vadd.f32 %v20247_v29, %v6072_v5 }
 0x3fc   : > { %v20842_v53 = vsel %vm25598_vm0, %v25257_v23, %v25597_v8  ;;  %vm24116_vm3 = vmand %vm20789_vm13, %vm20644_vm6  ;;  %v20849_v15 = vsel %vm25600_vm1, %v7081_v14, %v7229_v33  ;;  %v20852_v54 = vsel %vm25601_vm10, %v7082_v11, %v7230_v31  ;;  %v6071_v8 = vadd.f32 %v5927_v40, %v25605_v2  ;;  %v25606_v14 = vld [vmem:[#allocation157_spill] sm:$0xff]  ;;  %v25610_v40 = vld [vmem:[#allocation158_spill] sm:$0xff] }
 0x3fd   : > { %25599 = vst [vmem:[#allocation33_spill] sm:$0xff] %v20842_v53  ;;  %25602 = vst [vmem:[#allocation51_spill] sm:$0xff] %v20852_v54  ;;  %v7084_v47 = vadd.f32 %v20247_v29, %v6070_v41  ;;  %v7300_v11 = vsel %vm7152_vm14, %v7080_v52, %v7228_v13  ;;  %v20885_v31 = vpack.c.bf16 %v19600_v57, %v20686_v21  ;;  %v25612_v52 = vrot.slane %v20623_v7, 1  ;;  %v14894_v13 = vpop.f32.mrb[92].mxu0  ;;  %v25618_v21 = vld [vmem:[#allocation161_spill] sm:$0xff]  ;;  %v25622_v2 = vld [vmem:[#allocation160_spill] sm:$0xff] }
 0x3fe   : > { %vm25603_vm5 = vmand %vm20637_vm11, %vm20487_vm9  ;;  %vm25613_vm14 = vcmp.lt.s32.totalorder %v16193_v45, 7  ;;  %v20897_v41 = vsel %vm20677_vm2, %v20695_v39, 0.0  ;;  %v7085_v33 = vadd.f32 %v20247_v29, %v6071_v8  ;;  %v20901_v5 = vpack.c.bf16 %v20849_v15, %v7300_v11  ;;  %v25620_v39 = vld [vmem:[#allocation114_spill] sm:$0xff]  ;;  %v5823_v19 = vpop.f32.mrb[93].mxu0 }
 0x3ff   : > { %v20859_v4 = vsel %vm25603_vm5, %v7296_v16, 0.0  ;;  %vm24114_vm0 = vmand %vm20812_vm12, %vm20667_vm7  ;;  %25611 = vst [vmem:[#allocation83_spill] sm:$0xff] %v20885_v31  ;;  %v20892_v16 = vsel %vm25613_vm14, %v25612_v52, %v25128_v25  ;;  %v25615_v57 = vmov 0  ;;  %vm25621_vm5 = vnez %v25620_v39  ;;  %v25627_v31 = vld [vmem:[#allocation150_spill] sm:$0xff] }
 0x400   : > { %25604 = vst [vmem:[#allocation111_spill] sm:$0xff] %v20859_v4  ;;  %vm20877_vm9 = vmpackc.low %vm20831_vm8, %vm24116_vm3  ;;  %vm25623_vm1 = vnez %v25622_v2  ;;  %v20925_v52 = vpack.c.bf16 %v24942_v43, %v20852_v54  ;;  %v5932_v53 = vadd.f32 %v14894_v13, %v25626_v48  ;;  %v25628_v7 = vand.u32 31, %v25627_v31  ;;  %v25631_v2 = vld [vmem:[#allocation116_spill] sm:$0xff]  ;;  %v14895_v48 = vpop.f32.mrb[94].mxu0 }
 0x401   : > { %v25608_v10 = vsel %vm20877_vm9, 4294967295, %v25607_v10  ;;  %25614 = vst [vmem:[#allocation152_spill] sm:$0xff] %v20901_v5  ;;  %vm20909_vm11 = vmpackc.low %vm24975_vm15, %vm24114_vm0  ;;  %14968 = vmatprep.mubr.msk.bf16.mxu1 %vm20877_vm9, %v20901_v5  ;;  %15124 = vmatprep.mubr.msk.bf16.mxu0 %vm20877_vm9, %v20901_v5  ;;  %v5930_v36 = vadd.f32 %v5823_v19, %v25631_v2  ;;  %v7233_v31 = vmul.f32 %v20189_v24, %v7085_v33  ;;  %v25636_v13 = vld [vmem:[#allocation148_spill] sm:$0xff]  ;;  %v25638_v56 = vmov 0 }
 0x402   : > { %25609 = vst [vmem:[#allocation100_spill] sm:$0xff] %v25608_v10  ;;  %v25616_v57 = vsel %vm20909_vm11, 4294967295, %v25615_v57  ;;  %vm25624_vm10 = vmand %vm25621_vm5, %vm25623_vm1  ;;  %vm20932_vm0 = vcmp.ge.s32.totalorder %v25628_v7, 1  ;;  %vm25632_vm1 = vcmp.lt.s32.totalorder %v25555_v44, 16  ;;  %v25637_v32 = vand.u32 31, %v25636_v13  ;;  %v25641_v19 = vld [vmem:[#allocation60_spill] sm:$0xff]  ;;  %14969 = vmatmul.mubr.msk.bf16.gmra.mrb[80].mxu1 %vm20909_vm11, %v20925_v52  ;;  %15125 = vmatmul.mubr.msk.bf16.gmra.mrb[148].mxu0 %vm20909_vm11, %v20925_v52 }
 0x403   : > { %25617 = vst [vmem:[#allocation21_spill] sm:$0xff] %v25616_v57  ;;  %v20921_v8 = vsel %vm25624_vm10, %v25619_v0, 0.0  ;;  %25625 = vst [vmem:[#allocation154_spill] sm:$0xff] %v20925_v52  ;;  %v7234_v0 = vmul.f32 %v20189_v24, %v7086_v26  ;;  %vm25633_vm10 = vcmp.ge.s32.totalorder %v25555_v44, 0  ;;  %v6076_v2 = vadd.f32 %v5932_v53, %v25641_v19  ;;  %v5826_v44 = vpop.f32.mrb[95].mxu0  ;;  %v25650_v57 = vld [vmem:[#allocation102_spill] sm:$0xff] }
 0x404   : > { %vm20948_vm5 = vmand %vm25633_vm10, %vm25632_vm1  ;;  %vm20955_vm2 = vcmp.le.s32.totalorder %v25637_v32, 16  ;;  %v7232_v48 = vmul.f32 %v20189_v24, %v7084_v47  ;;  %vm25642_vm1 = vcmp.lt.s32.totalorder %v25561_v3, 16  ;;  %vm25643_vm10 = vcmp.ge.s32.totalorder %v25561_v3, 0  ;;  %v25651_v10 = vld [vmem:[#allocation78_spill] sm:$0xff] }
 0x405   : > { %v25639_v56 = vsel %vm20955_vm2, 4294967295, %v25638_v56  ;;  %vm20971_vm14 = vmand %vm25643_vm10, %vm25642_vm1  ;;  %v25644_v32 = vmov 0  ;;  %v25647_v53 = vrot.slane %v19657_v37, 1  ;;  %v25648_v13 = vrot.slane %v19630_v34, 1 }
 0x406   : > { %25640 = vst [vmem:[#allocation112_spill] sm:$0xff] %v25639_v56  ;;  %v25645_v32 = vsel %vm20971_vm14, 4294967295, %v25644_v32  ;;  %vm25649_vm3 = vcmp.lt.s32.totalorder %v16193_v45, 7  ;;  %v6074_v52 = vadd.f32 %v5930_v36, %v25650_v57  ;;  %v5931_v5 = vadd.f32 %v5826_v44, %v25651_v10  ;;  %v25659_v10 = vld [vmem:[#allocation9_spill] sm:$0xff]  ;;  %v25663_v44 = vld [vmem:[#allocation124_spill] sm:$0xff] }
 0x407   : > { %25646 = vst [vmem:[#allocation84_spill] sm:$0xff] %v25645_v32  ;;  %v7594_v19 = vsel %vm25649_vm3, %v25648_v13, %v25647_v53  ;;  %vm25652_vm11 = vcmp.lt.s32.totalorder %v25566_v62, 16  ;;  %vm25653_vm9 = vcmp.ge.s32.totalorder %v25566_v62, 0  ;;  %v24129_v12 = vrot.slane %v20921_v8, 1  ;;  %vm25656_vm3 = vmand %vm20789_vm13, %vm20644_vm6  ;;  %v25713_v32 = vld [vmem:[#allocation92_spill] sm:$0xff] }
 0x408   : > { %vm20987_vm7 = vmand %vm25653_vm9, %vm25652_vm11  ;;  %v20999_v36 = vsel %vm25656_vm3, %v7300_v11, 0.0  ;;  %vm25658_vm11 = vcmp.ge.f32.partialorder %v7085_v33, 0.0  ;;  %vm25660_vm12 = vcmp.ge.f32.partialorder %v7086_v26, 0.0  ;;  %v7090_v1 = vadd.f32 %v20247_v29, %v6076_v2 }
 0x409   : > { %25657 = vst [vmem:[#allocation58_spill] sm:$0xff] %v20999_v36  ;;  %vm24133_vm9 = vmand %vm20948_vm5, %vm20796_vm4  ;;  %v21006_v62 = vsel %vm25658_vm11, %v7085_v33, %v7233_v31  ;;  %v21011_v57 = vsel %vm25660_vm12, %v7086_v26, %v7234_v0  ;;  %v6075_v11 = vadd.f32 %v5931_v5, %v25661_v35  ;;  %vm25662_vm6 = vnez %v25588_v61  ;;  %v25710_v61 = vld [vmem:[#allocation89_spill] sm:$0xff] }
 0x40a   : > { %vm24130_vm13 = vmand %vm20971_vm14, %vm25662_vm6  ;;  %v25664_v33 = vmov %v25647_v53  ;;  %vm25665_vm12 = vcmp.lt.s32.totalorder %v16193_v45, 7  ;;  %v25666_v0 = vrot.slane %v20859_v4, 1  ;;  %v25668_v31 = vrot.slane %v20859_v4, 2 }
 0x40b   : > { %v7593_v26 = vsel %vm25665_vm12, %v25664_v33, %v24129_v12  ;;  %vm25667_vm10 = vmmov %vm25665_vm12  ;;  %vm25669_vm3 = vcmp.lt.s32.totalorder %v16193_v45, 6  ;;  %v7088_v53 = vadd.f32 %v20247_v29, %v6074_v52  ;;  %vm25671_vm11 = vcmp.ge.f32.partialorder %v7084_v47, 0.0  ;;  %v25684_v12 = vld [vmem:[#allocation29_spill] sm:$0xff] }
 0x40c   : > { %v21032_v5 = vsel %vm25667_vm10, %v25128_v25, %v25666_v0  ;;  %v21039_v2 = vsel %vm25669_vm3, %v25257_v23, %v25668_v31  ;;  %v7304_v13 = vsel %vm25671_vm11, %v7084_v47, %v7232_v48  ;;  %vm21050_vm10 = vmpackc.low %vm20987_vm7, %vm24133_vm9  ;;  %v25672_v35 = vmov 0  ;;  %v14898_v0 = vpop.f32.mrb[96].mxu0 }
 0x40d   : > { %25670 = vst [vmem:[#allocation145_spill] sm:$0xff] %v21039_v2  ;;  %v25673_v35 = vsel %vm21050_vm10, 4294967295, %v25672_v35  ;;  %v21059_v52 = vsel %vm20831_vm8, %v20849_v15, 0.0  ;;  %v7089_v48 = vadd.f32 %v20247_v29, %v6075_v11  ;;  %v21064_v33 = vpack.c.bf16 %v21006_v62, %v7304_v13  ;;  %vm21072_vm11 = vmpackc.low %vm24975_vm15, %vm24130_vm13  ;;  %v5839_v2 = vpop.f32.mrb[97].mxu0 }
 0x40e   : > { %25674 = vst [vmem:[#allocation106_spill] sm:$0xff] %v25673_v35  ;;  %v25676_v31 = vmov 0  ;;  %v25680_v15 = vand.u32 31, %v25679_v59  ;;  %v25681_v54 = vmov 0  ;;  %v21084_v11 = vpack.c.bf16 %v24942_v43, %v21011_v57  ;;  %v14899_v34 = vpop.f32.mrb[98].mxu0  ;;  %v25709_v35 = vld [vmem:[#allocation123_spill] sm:$0xff] }
 0x40f   : > { %25675 = vst [vmem:[#allocation22_spill] sm:$0xff] %v21064_v33  ;;  %v25677_v31 = vsel %vm21072_vm11, 4294967295, %v25676_v31  ;;  %v5936_v47 = vadd.f32 %v14898_v0, %v25684_v12  ;;  %vm25685_vm13 = vcmp.lt.s32.totalorder %v25606_v14, 16  ;;  %vm25686_vm12 = vcmp.ge.s32.totalorder %v25606_v14, 0  ;;  %14972 = vmatprep.mubr.msk.bf16.mxu1 %vm21050_vm10, %v21064_v33  ;;  %15128 = vmatprep.mubr.msk.bf16.mxu0 %vm21050_vm10, %v21064_v33  ;;  %v25690_v12 = vld [vmem:[#allocation118_spill] sm:$0xff] }
 0x410   : > { %25678 = vst [vmem:[#allocation57_spill] sm:$0xff] %v25677_v31  ;;  %vm21078_vm8 = vcmp.ge.s32.totalorder %v25680_v15, 1  ;;  %25683 = vst [vmem:[#allocation157_spill] sm:$0xff] %v21084_v11  ;;  %v21096_v59 = vpack.c.bf16 %v7593_v26, %v7594_v19  ;;  %v7238_v15 = vmul.f32 %v20189_v24, %v7090_v1  ;;  %v5934_v0 = vadd.f32 %v5839_v2, %v25690_v12  ;;  %v25699_v2 = vld [vmem:[#allocation59_spill] sm:$0xff]  ;;  %v21146_v31 = vld [vmem:[%s23672_s3 + $0x140] sm:$0xff]  }
 0x411   : > { %v25682_v54 = vsel %vm21078_vm8, 4294967295, %v25681_v54  ;;  %vm21092_vm3 = vmand %vm25686_vm12, %vm25685_vm13  ;;  %v7237_v14 = vmul.f32 %v20189_v24, %v7089_v48  ;;  %vm25691_vm13 = vcmp.lt.s32.totalorder %v25610_v40, 16  ;;  %vm25692_vm12 = vcmp.ge.s32.totalorder %v25610_v40, 0  ;;  %14973 = vmatmul.mubr.msk.bf16.gmra.mrb[84].mxu1 %vm21072_vm11, %v21084_v11  ;;  %15129 = vmatmul.mubr.msk.bf16.gmra.mrb[152].mxu0 %vm21072_vm11, %v21084_v11  ;;  %v5842_v40 = vpop.f32.mrb[99].mxu0  ;;  %25707 = vst [vmem:[#allocation36_spill] sm:$0xff] %v21146_v31  ;;  %v25708_v11 = vld [vmem:[#allocation104_spill] sm:$0xff] }
 0x412   : > { %25689 = vst [vmem:[#allocation158_spill] sm:$0xff] %v21096_v59  ;;  %vm21111_vm9 = vmand %vm25692_vm12, %vm25691_vm13  ;;  %v25693_v19 = vmov 0  ;;  %v25695_v26 = vand.u32 31, %v19031_v17  ;;  %v25696_v59 = vmov 0  ;;  %v6080_v34 = vadd.f32 %v5936_v47, %v25699_v2  ;;  %15384 = vmatprep.subr.bf16.mxu0 %v21146_v31 }
 0x413   : > { %v25694_v19 = vsel %vm21111_vm9, 4294967295, %v25693_v19  ;;  %vm25700_vm13 = vcmp.lt.s32.totalorder %v25618_v21, 16  ;;  %vm25701_vm12 = vcmp.ge.s32.totalorder %v25618_v21, 0  ;;  %v7236_v12 = vmul.f32 %v20189_v24, %v7088_v53 }
 0x414   : > { %vm21117_vm6 = vcmp.le.s32.totalorder %v25695_v26, 16  ;;  %vm21132_vm1 = vmand %vm25701_vm12, %vm25700_vm13  ;;  %v25704_v47 = vrot.slane %v19751_v58, 1  ;;  %v25705_v26 = vrot.slane %v19739_v63, 1  ;;  %vm25706_vm10 = vcmp.lt.s32.totalorder %v16193_v45, 7  ;;  %v25711_v63 = vld [vmem:[#allocation71_spill] sm:$0xff] }
 0x415   : > { %v25697_v59 = vsel %vm21117_vm6, 4294967295, %v25696_v59  ;;  %v6078_v21 = vadd.f32 %v5934_v0, %v25708_v11  ;;  %v5935_v33 = vadd.f32 %v5842_v40, %v25709_v35  ;;  %vm25712_vm11 = vnez %v25711_v63  ;;  %v25717_v63 = vld [vmem:[#allocation53_spill] sm:$0xff] }
 0x416   : > { %25698 = vst [vmem:[#allocation161_spill] sm:$0xff] %v25697_v59  ;;  %v7590_v2 = vsel %vm25706_vm10, %v25705_v26, %v25704_v47  ;;  %vm25714_vm10 = vnez %v25713_v32  ;;  %v7094_v11 = vadd.f32 %v20247_v29, %v6080_v34  ;;  %vm25716_vm6 = vcmp.ge.f32.partialorder %v7089_v48, 0.0  ;;  %v25722_v34 = vld [vmem:[#allocation61_spill] sm:$0xff]  ;;  %v14902_v26 = vpop.f32.mrb[100].mxu0 }
 0x417   : > { %vm25715_vm14 = vmand %vm25712_vm11, %vm25714_vm10  ;;  %v21165_v35 = vsel %vm25716_vm6, %v7089_v48, %v7237_v14  ;;  %v25719_v32 = vrot.slane %v20999_v36, 1  ;;  %vm25721_vm6 = vcmp.ge.f32.partialorder %v7090_v1, 0.0  ;;  %v6079_v40 = vadd.f32 %v5935_v33, %v25722_v34 }
 0x418   : > { %v21160_v47 = vsel %vm25715_vm14, %v25710_v61, 0.0  ;;  %v21175_v61 = vpack.c.bf16 %v25717_v63, %v20892_v16  ;;  %vm25720_vm14 = vcmp.lt.s32.totalorder %v16193_v45, 7  ;;  %v21187_v14 = vsel %vm25721_vm6, %v7090_v1, %v7238_v15  ;;  %vm25723_vm11 = vmand %vm21092_vm3, %vm20932_vm0 }
 0x419   : > { %v21183_v48 = vsel %vm25720_vm14, %v25128_v25, %v25719_v32  ;;  %vm21197_vm10 = vmpackc.low %vm21132_vm1, %vm25723_vm11  ;;  %v25724_v16 = vmov 0  ;;  %v25727_v1 = vrot.slane %v20999_v36, 2  ;;  %vm25728_vm6 = vcmp.lt.s32.totalorder %v16193_v45, 6  ;;  %v25731_v32 = vld [vmem:[#allocation117_spill] sm:$0xff] }
 0x41a   : > { %25718 = vst [vmem:[#allocation114_spill] sm:$0xff] %v21175_v61  ;;  %v25725_v16 = vsel %vm21197_vm10, 4294967295, %v25724_v16  ;;  %v7092_v15 = vadd.f32 %v20247_v29, %v6078_v21  ;;  %vm25730_vm8 = vcmp.ge.f32.partialorder %v7088_v53, 0.0  ;;  %vm25732_vm14 = vmand %vm21111_vm9, %vm20955_vm2  ;;  %v25733_v34 = vmov 0 }
 0x41b   : > { %25726 = vst [vmem:[#allocation160_spill] sm:$0xff] %v25725_v16  ;;  %v21208_v33 = vsel %vm25728_vm6, %v25257_v23, %v25727_v1  ;;  %v7308_v63 = vsel %vm25730_vm8, %v7088_v53, %v7236_v12  ;;  %vm21220_vm13 = vmpackc.low %vm24975_vm15, %vm25732_vm14  ;;  %v21235_v12 = vsel %vm20987_vm7, %v21006_v62, 0.0  ;;  %v7093_v21 = vadd.f32 %v20247_v29, %v6079_v40  ;;  %v25746_v40 = vld [vmem:[#allocation98_spill] sm:$0xff]  ;;  %v25761_v16 = vld [vmem:[#allocation23_spill] sm:$0xff] }
 0x41c   : > { %25729 = vst [vmem:[#allocation25_spill] sm:$0xff] %v21208_v33  ;;  %v25734_v34 = vsel %vm21220_vm13, 4294967295, %v25733_v34  ;;  %vm25736_vm8 = vmand %vm20948_vm5, %vm20796_vm4  ;;  %v21239_v0 = vpack.c.bf16 %v21165_v35, %v7308_v63  ;;  %vm25738_vm14 = vcmp.lt.s32.totalorder %v25659_v10, 16  ;;  %vm25739_vm6 = vcmp.ge.s32.totalorder %v25659_v10, 0  ;;  %v5855_v33 = vpop.f32.mrb[101].mxu0 }
 0x41d   : > { %25735 = vst [vmem:[#allocation150_spill] sm:$0xff] %v25734_v34  ;;  %v21230_v53 = vsel %vm25736_vm8, %v7304_v13, 0.0  ;;  %vm21245_vm11 = vmand %vm25739_vm6, %vm25738_vm14  ;;  %v25742_v7 = vand.u32 31, %v19879_v22  ;;  %v21257_v62 = vpack.c.bf16 %v24942_v43, %v21187_v14  ;;  %v7242_v13 = vmul.f32 %v20189_v24, %v7094_v11 }
 0x41e   : > { %25737 = vst [vmem:[#allocation116_spill] sm:$0xff] %v21239_v0  ;;  %v5940_v1 = vadd.f32 %v14902_v26, %v25746_v40  ;;  %vm25747_vm7 = vcmp.lt.s32.totalorder %v25663_v44, 16  ;;  %vm25748_vm5 = vcmp.ge.s32.totalorder %v25663_v44, 0  ;;  %v25749_v10 = vmov 0  ;;  %14976 = vmatprep.mubr.msk.bf16.mxu1 %vm21197_vm10, %v21239_v0  ;;  %15132 = vmatprep.mubr.msk.bf16.mxu0 %vm21197_vm10, %v21239_v0  ;;  %v25754_v44 = vld [vmem:[#allocation34_spill] sm:$0xff]  ;;  %v14903_v40 = vpop.f32.mrb[102].mxu0 }
 0x41f   : > { %vm21251_vm4 = vcmp.ge.s32.totalorder %v25742_v7, 1  ;;  %25745 = vst [vmem:[#allocation148_spill] sm:$0xff] %v21257_v62  ;;  %vm21265_vm8 = vmand %vm25748_vm5, %vm25747_vm7  ;;  %v25751_v22 = vrot.slane %v21160_v47, 1  ;;  %v25752_v7 = vrot.slane %v19751_v58, 1  ;;  %vm25753_vm14 = vcmp.lt.s32.totalorder %v16193_v45, 7  ;;  %v25760_v58 = vld [vmem:[#allocation62_spill] sm:$0xff]  ;;  %14977 = vmatmul.mubr.msk.bf16.gmra.mrb[88].mxu1 %vm21220_vm13, %v21257_v62  ;;  %15133 = vmatmul.mubr.msk.bf16.gmra.mrb[156].mxu0 %vm21220_vm13, %v21257_v62 }
 0x420   : > { %v25750_v10 = vsel %vm21265_vm8, 4294967295, %v25749_v10  ;;  %v5938_v26 = vadd.f32 %v5855_v33, %v25754_v44  ;;  %v7241_v31 = vmul.f32 %v20189_v24, %v7093_v21  ;;  %vm25755_vm5 = vcmp.lt.s32.totalorder %v19380_v38, 16  ;;  %v25768_v44 = vld [vmem:[#allocation127_spill] sm:$0xff] }
 0x421   : > { %v7589_v61 = vsel %vm25753_vm14, %v25752_v7, %v25751_v22  ;;  %vm25756_vm12 = vcmp.ge.s32.totalorder %v19380_v38, 0  ;;  %v25757_v22 = vmov 0  ;;  %v6084_v56 = vadd.f32 %v5940_v1, %v25760_v58  ;;  %v5858_v38 = vpop.f32.mrb[103].mxu0  ;;  %v26013_v33 = vld [vmem:[#allocation63_spill] sm:$0xff] }
 0x422   : > { %vm21287_vm14 = vmand %vm25756_vm12, %vm25755_vm5  ;;  %v25762_v0 = vand.u32 31, %v25761_v16  ;;  %vm25765_vm12 = vnez %v25682_v54  ;;  %v7240_v58 = vmul.f32 %v20189_v24, %v7092_v15  ;;  %v25767_v16 = vld [vmem:[#allocation65_spill] sm:$0xff]  ;;  %v5939_v40 = vadd.f32 %v5858_v38, %v25768_v44  ;;  %v25795_v38 = vld [vmem:[#allocation10_spill] sm:$0xff] }
 0x423   : > { %v25758_v22 = vsel %vm21287_vm14, 4294967295, %v25757_v22  ;;  %vm24158_vm5 = vmand %vm21245_vm11, %vm25765_vm12  ;;  %v6082_v1 = vadd.f32 %v5938_v26, %v25767_v16  ;;  %vm25772_vm10 = vcmp.lt.s32.totalorder %v16193_v45, 7  ;;  %vm25773_vm7 = vcmp.ge.f32.partialorder %v7094_v11, 0.0  ;;  %v25792_v26 = vld [vmem:[#allocation165_spill] sm:$0xff] }
 0x424   : > { %25759 = vst [vmem:[#allocation60_spill] sm:$0xff] %v25758_v22  ;;  %vm21295_vm6 = vcmp.le.s32.totalorder %v25762_v0, 16  ;;  %v21310_v0 = vpack.c.bf16 %v7589_v61, %v7590_v2  ;;  %vm21321_vm13 = vmpackc.low %vm21265_vm8, %vm24158_vm5  ;;  %v25771_v2 = vrot.slane %v20921_v8, 1  ;;  %v21333_v16 = vsel %vm25773_vm7, %v7094_v11, %v7242_v13  ;;  %v25783_v13 = vld [vmem:[#allocation122_spill] sm:$0xff]  ;;  %v25828_v22 = vld [vmem:[#allocation172_spill] sm:$0xff] }
 0x425   : > { %25774 = vst [vmem:[#allocation78_spill] sm:$0xff] %v21333_v16  ;;  %vm25775_vm2 = vcmp.ge.f32.partialorder %v7093_v21, 0.0  ;;  %vm25776_vm5 = vnez %v25697_v59  ;;  %v7098_v34 = vadd.f32 %v20247_v29, %v6084_v56  ;;  %v7096_v62 = vadd.f32 %v20247_v29, %v6082_v1  ;;  %v25827_v59 = vld [vmem:[#allocation115_spill] sm:$0xff] }
 0x426   : > { %25766 = vst [vmem:[#allocation102_spill] sm:$0xff] %v21310_v0  ;;  %v7592_v61 = vsel %vm25772_vm10, %v25771_v2, %v25128_v25  ;;  %v7313_v44 = vsel %vm25775_vm2, %v7093_v21, %v7241_v31  ;;  %vm24165_vm9 = vmand %vm21287_vm14, %vm25776_vm5  ;;  %v25777_v0 = vld [vmem:[#allocation64_spill] sm:$0xff]  ;;  %v25780_v31 = vld [vmem:[#allocation119_spill] sm:$0xff]  ;;  %vm25784_vm7 = vnez %v25783_v13  ;;  %vm25787_vm12 = vcmp.lt.s32.totalorder %v16193_v45, 7 }
 0x427   : > { %v6083_v2 = vadd.f32 %v5939_v40, %v25777_v0  ;;  %vm21349_vm10 = vmpackc.low %vm24975_vm15, %vm24165_vm9  ;;  %v25781_v21 = vld [vmem:[#allocation46_spill] sm:$0xff]  ;;  %v25786_v0 = vrot.slane %v21230_v53, 1  ;;  %vm25789_vm5 = vcmp.ge.f32.partialorder %v7092_v15, 0.0  ;;  %vm25796_vm14 = vnez %v25795_v38 }
 0x428   : > { %vm25782_vm2 = vnez %v25781_v21  ;;  %vm25788_vm9 = vmand %vm21092_vm3, %vm20932_vm0  ;;  %v7312_v13 = vsel %vm25789_vm5, %v7092_v15, %v7240_v58  ;;  %v21391_v37 = vsel %vm21132_vm1, %v21165_v35, 0.0  ;;  %v7244_v39 = vmul.f32 %v20189_v24, %v7096_v62  ;;  %v25807_v35 = vld [vmem:[#allocation31_spill] sm:$0xff] }
 0x429   : > { %vm25785_vm8 = vmand %vm25782_vm2, %vm25784_vm7  ;;  %v21366_v1 = vsel %vm25787_vm12, %v25128_v25, %v25786_v0  ;;  %v21374_v21 = vsel %vm25788_vm9, %v7308_v63, 0.0  ;;  %vm25793_vm2 = vnez %v25792_v26  ;;  %v7097_v15 = vadd.f32 %v20247_v29, %v6083_v2  ;;  %v25831_v0 = vld [vmem:[#allocation126_spill] sm:$0xff] }
 0x42a   : > { %v21359_v56 = vsel %vm25785_vm8, %v25780_v31, 0.0  ;;  %v25790_v31 = vld [vmem:[#allocation167_spill] sm:$0xff]  ;;  %v13159_v63 = vpack.c.bf16 %v7313_v44, %v7312_v13  ;;  %vm25799_vm0 = vcmp.lt.s32.totalorder %v20113_v51, 16  ;;  %vm25800_vm9 = vcmp.ge.s32.totalorder %v20113_v51, 0 }
 0x42b   : > { %vm25791_vm8 = vnez %v25790_v31  ;;  %vm21399_vm3 = vmand %vm25800_vm9, %vm25799_vm0  ;;  %v13162_v26 = vpack.c.bf16 %v24942_v43, %v21333_v16  ;;  %vm25804_vm1 = vcmp.ge.s32.totalorder %v20138_v20, 0  ;;  %v25808_v51 = vrot.slane %v25807_v35, 1 }
 0x42c   : > { %vm25794_vm7 = vmand %vm25791_vm8, %vm25793_vm2  ;;  %vm7168_vm8 = vcmp.ge.f32.partialorder %v7096_v62, 0.0  ;;  %v25809_v38 = vrot.slane %v19887_v50, 1  ;;  %vm25810_vm2 = vcmp.lt.s32.totalorder %v16193_v45, 7  ;;  %vm25812_vm0 = vcmp.ge.s32.totalorder %v25731_v32, 0  ;;  %14980 = vmatprep.mubr.msk.bf16.mxu1 %vm21321_vm13, %v13159_v63  ;;  %15136 = vmatprep.mubr.msk.bf16.mxu0 %vm21321_vm13, %v13159_v63  ;;  %v25818_v63 = vld [vmem:[#allocation120_spill] sm:$0xff] }
 0x42d   : > { %vm21384_vm12 = vmpackc.low %vm25796_vm14, %vm25794_vm7  ;;  %vm25803_vm14 = vcmp.lt.s32.totalorder %v20138_v20, 16  ;;  %vm25811_vm7 = vcmp.lt.s32.totalorder %v25731_v32, 16  ;;  %v7246_v40 = vmul.f32 %v20189_v24, %v7098_v34  ;;  %v7245_v29 = vmul.f32 %v20189_v24, %v7097_v15  ;;  %14981 = vmatmul.mubr.msk.bf16.gmra.mrb[92].mxu1 %vm21349_vm10, %v13162_v26  ;;  %15137 = vmatmul.mubr.msk.bf16.gmra.mrb[160].mxu0 %vm21349_vm10, %v13162_v26 }
 0x42e   : > { %vm21409_vm5 = vmand %vm25804_vm1, %vm25803_vm14  ;;  %v7586_v2 = vsel %vm25810_vm2, %v25809_v38, %v25808_v51  ;;  %vm7169_vm14 = vcmp.ge.f32.partialorder %v7097_v15, 0.0  ;;  %v25815_v24 = vrot.slane %v21359_v56, 1  ;;  %v25816_v32 = vmov %v25808_v51  ;;  %v25819_v38 = vld [vmem:[#allocation11_spill] sm:$0xff] }
 0x42f   : > { %vm21425_vm9 = vmand %vm25812_vm0, %vm25811_vm7  ;;  %vm25817_vm13 = vcmp.lt.s32.totalorder %v16193_v45, 7  ;;  %vm25820_vm7 = vnez %v25819_v38  ;;  %v25821_v51 = vld [vmem:[#allocation27_spill] sm:$0xff]  ;;  %v25824_v26 = vrot.slane %v21230_v53, 2  ;;  %vm25825_vm10 = vcmp.lt.s32.totalorder %v16193_v45, 6  ;;  %v25847_v38 = vld [vmem:[#allocation130_spill] sm:$0xff] }
 0x430   : > { %vm6804_vm2 = vmand %vm21399_vm3, %vm21251_vm4  ;;  %v7585_v7 = vsel %vm25817_vm13, %v25816_v32, %v25815_v24  ;;  %vm25822_vm0 = vnez %v25821_v51  ;;  %v25829_v16 = vpack.c.bf16 %v25827_v59, %v25828_v22  ;;  %v7316_v24 = vsel %vm7168_vm8, %v7096_v62, %v7244_v39 }
 0x431   : > { %vm25823_vm1 = vmand %vm25820_vm7, %vm25822_vm0  ;;  %v21463_v31 = vsel %vm25825_vm10, %v25257_v23, %v25824_v26  ;;  %v7317_v32 = vsel %vm7169_vm14, %v7097_v15, %v7245_v29  ;;  %v21478_v51 = vpack.c.bf16 %v7585_v7, %v7586_v2  ;;  %vm25833_vm8 = vcmp.ge.f32.partialorder %v7098_v34, 0.0  ;;  %v25849_v26 = vld [vmem:[#allocation72_spill] sm:$0xff] }
 0x432   : > { %v21456_v11 = vsel %vm25823_vm1, %v25818_v63, 0.0  ;;  %25826 = vst [vmem:[#allocation9_spill] sm:$0xff] %v21463_v31  ;;  %15000 = vmatprep.mubr.msk.bf16.mxu1 %vm21384_vm12, %v25829_v16  ;;  %vm13350_vm1 = vmpackc.low %vm21409_vm5, %vm6804_vm2  ;;  %v13351_v22 = vpack.c.bf16 %v7317_v32, %v7316_v24  ;;  %v21483_v16 = vpack.c.bf16 %v25831_v0, %v7592_v61  ;;  %v21490_v62 = vsel %vm25833_vm8, %v7098_v34, %v7246_v40  ;;  %v25860_v63 = vld [vmem:[#allocation38_spill] sm:$0xff]  ;;  %v25878_v31 = vld [vmem:[#allocation15_spill] sm:$0xff] }
 0x433   : > { %25830 = vst [vmem:[#allocation103_spill] sm:$0xff] %v21478_v51  ;;  %vm24171_vm12 = vmand %vm21425_vm9, %vm21295_vm6  ;;  %vm25834_vm14 = vnez %v25682_v54  ;;  %v24173_v15 = vrot.slane %v21456_v11, 1  ;;  %v25836_v61 = vrot.slane %v20119_v46, 1  ;;  %v25837_v29 = vrot.slane %v20086_v30, 1  ;;  %v15880_v51 = vld [vmem:[%s23672_s3 + $0x108] sm:$0xff]   ;;  %v15921_v40 = vld [vmem:[%s23672_s3 + $0x100] sm:$0xff]  }
 0x434   : > { %25832 = vst [vmem:[#allocation124_spill] sm:$0xff] %v21483_v16  ;;  %vm25835_vm13 = vmand %vm21245_vm11, %vm25834_vm14  ;;  %vm25838_vm7 = vcmp.lt.s32.totalorder %v16193_v45, 7  ;;  %v25839_v7 = vrot.slane %v21374_v21, 1  ;;  %v25841_v54 = vrot.slane %v21374_v21, 2  ;;  %15140 = vmatprep.mubr.msk.bf16.mxu0 %vm13350_vm1, %v13351_v22  ;;  %vm25848_vm8 = vnez %v25847_v38  ;;  %v25858_v22 = vld [vmem:[#allocation14_spill] sm:$0xff]  ;;  %v25891_v16 = vld [vmem:[#allocation85_spill] sm:$0xff] }
 0x435   : > { %v21497_v39 = vsel %vm25835_vm13, %v7312_v13, 0.0  ;;  %v7582_v2 = vsel %vm25838_vm7, %v25837_v29, %v25836_v61  ;;  %vm25840_vm0 = vmmov %vm25838_vm7  ;;  %v25846_v13 = vld [vmem:[#allocation101_spill] sm:$0xff]  ;;  %vm25850_vm14 = vnez %v25849_v26  ;;  %v25852_v61 = vrot.slane %v20231_v27, 1 }
 0x436   : > { %v21511_v34 = vsel %vm25840_vm0, %v25128_v25, %v25839_v7  ;;  %vm25842_vm11 = vmmov %vm25825_vm10  ;;  %v25853_v29 = vld [vmem:[#allocation73_spill] sm:$0xff]  ;;  %vm25859_vm1 = vnez %v25858_v22  ;;  %v21706_v3 = vsel %vm21409_vm5, %v7317_v32, 0.0  ;;  %v25938_v17 = vrot.slane %v20739_v55, 1 }
 0x437   : > { %v21518_v9 = vsel %vm25842_vm11, %v25257_v23, %v25841_v54  ;;  %vm21526_vm10 = vmpackc.low %vm24975_vm15, %vm24171_vm12  ;;  %v25854_v7 = vrot.slane %v25853_v29, 1  ;;  %vm25861_vm11 = vnez %v25860_v63  ;;  %v13354_v63 = vpack.c.bf16 %v24942_v43, %v21490_v62 }
 0x438   : > { %25843 = vst [vmem:[#allocation48_spill] sm:$0xff] %v21518_v9  ;;  %vm25851_vm13 = vmand %vm25848_vm8, %vm25850_vm14  ;;  %v25877_v9 = vld [vmem:[#allocation105_spill] sm:$0xff]  ;;  %v7694_v20 = vrot.slane %v20921_v8, 2 }
 0x439   : > { %v21536_v0 = vsel %vm25851_vm13, %v25846_v13, 0.0  ;;  %vm25855_vm7 = vmmov %vm25840_vm0  ;;  %vm25856_vm0 = vnez %v25750_v10  ;;  %v25863_v13 = vrot.slane %v20119_v46, 1  ;;  %v25866_v10 = vld [vmem:[#allocation75_spill] sm:$0xff]  ;;  %15141 = vmatmul.mubr.msk.bf16.gmra.mrb[164].mxu0 %vm21526_vm10, %v13354_v63  ;;  %v25893_v63 = vrot.slane %v20337_v42, 1  ;;  %v26003_v8 = vld [vmem:[#allocation173_spill] sm:$0xff] }
 0x43a   : > { %v7578_v54 = vsel %vm25855_vm7, %v25854_v7, %v25852_v61  ;;  %v21546_v59 = vsel %vm25856_vm0, %v7313_v44, 0.0  ;;  %vm25862_vm12 = vmand %vm25859_vm1, %vm25861_vm11  ;;  %v24176_v26 = vrot.slane %v21536_v0, 1  ;;  %v25865_v61 = vld [vmem:[#allocation37_spill] sm:$0xff]  ;;  %vm25867_vm13 = vnez %v25866_v10  ;;  %v25868_v44 = vld [vmem:[#allocation74_spill] sm:$0xff] }
 0x43b   : > { %25857 = vst [vmem:[#allocation29_spill] sm:$0xff] %v21546_v59  ;;  %vm13167_vm8 = vmpackc.low %vm24975_vm15, %vm25862_vm12  ;;  %v25873_v10 = vrot.slane %v20306_v60, 1  ;;  %vm25879_vm1 = vnez %v25878_v31  ;;  %v25887_v31 = vrot.slane %v21160_v47, 1  ;;  %v25906_v60 = vld [vmem:[#allocation13_spill] sm:$0xff]  ;;  %v15882_v59 = vld [vmem:[%s23672_s3 + $0x118] sm:$0xff]  }
 0x43c   : > { %vm25864_vm14 = vmmov %vm25855_vm7  ;;  %vm25869_vm7 = vnez %v25868_v44 }
 0x43d   : > { %v7581_v38 = vsel %vm25864_vm14, %v25863_v13, %v24173_v15  ;;  %vm25870_vm0 = vmand %vm25867_vm13, %vm25869_vm7  ;;  %v25872_v15 = vrot.slane %v20337_v42, 1 }
 0x43e   : > { %v21567_v7 = vsel %vm25870_vm0, %v25865_v61, 0.0  ;;  %v21575_v13 = vpack.c.bf16 %v7581_v38, %v7582_v2  ;;  %vm25874_vm15 = vmmov %vm25864_vm14  ;;  %v25875_v61 = vrot.slane %v20231_v27, 1  ;;  %v25880_v2 = vld [vmem:[#allocation81_spill] sm:$0xff]  ;;  %vm25892_vm0 = vnez %v25891_v16 }
 0x43f   : > { %v7574_v44 = vsel %vm25874_vm15, %v25873_v10, %v25872_v15  ;;  %vm25876_vm12 = vmmov %vm25864_vm14  ;;  %v24182_v22 = vrot.slane %v21567_v7, 1  ;;  %vm25881_vm11 = vnez %v25880_v2  ;;  %v25884_v15 = vrot.slane %v20392_v6, 1  ;;  %v25905_v6 = vld [vmem:[#allocation137_spill] sm:$0xff] }
 0x440   : > { %25871 = vst [vmem:[#allocation118_spill] sm:$0xff] %v21575_v13  ;;  %v7577_v43 = vsel %vm25876_vm12, %v25875_v61, %v24176_v26  ;;  %vm25882_vm14 = vmand %vm25879_vm1, %vm25881_vm11  ;;  %v25883_v13 = vrot.slane %v20430_v18, 1  ;;  %v25886_v61 = vld [vmem:[#allocation94_spill] sm:$0xff] }
 0x441   : > { %v21596_v38 = vsel %vm25882_vm14, %v25877_v9, 0.0  ;;  %vm25885_vm13 = vmmov %vm25876_vm12  ;;  %15001 = vmatmul.mubr.msk.bf16.vlgmr.msra.gmra.mrb[96].mxu1 %vm13167_vm8, %v25886_v61  ;;  %v21615_v2 = vpack.c.bf16 %v7577_v43, %v7578_v54  ;;  %v25895_v43 = vld [vmem:[#allocation97_spill] sm:$0xff]  ;;  %v25896_v61 = vld [vmem:[#allocation140_spill] sm:$0xff] }
 0x442   : > { %v7570_v10 = vsel %vm25885_vm13, %v25884_v15, %v25883_v13  ;;  %vm25888_vm7 = vmmov %vm25876_vm12  ;;  %v25890_v15 = vld [vmem:[#allocation155_spill] sm:$0xff]  ;;  %15145 = vmatpush3.bf16.msra.mxu1 %v15921_v40  ;;  %vm25897_vm8 = vnez %v25896_v61  ;;  %v25902_v13 = vld [vmem:[#allocation80_spill] sm:$0xff] }
 0x443   : > { %v21613_v9 = vsel %vm25888_vm7, %v25887_v31, %v25128_v25  ;;  %25889 = vst [vmem:[#allocation59_spill] sm:$0xff] %v21615_v2  ;;  %15004 = vmatprep.mubr.msk.bf16.mxu1 %vm25892_vm0, %v25890_v15  ;;  %vm25894_vm10 = vmmov %vm25888_vm7  ;;  %v25898_v31 = vld [vmem:[#allocation139_spill] sm:$0xff]  ;;  %v25901_v15 = vrot.slane %v20612_v49, 1  ;;  %v25903_v26 = vrot.slane %v25902_v13, 1  ;;  %15146 = vmatprep.subr.bf16.mxu1 %v15880_v51  ;;  %v25912_v2 = vrot.slane %v21497_v39, 1 }
 0x444   : > { %v7573_v54 = vsel %vm25894_vm10, %v25893_v63, %v24182_v22  ;;  %vm25899_vm15 = vnez %v25898_v31  ;;  %vm25904_vm1 = vmmov %vm25888_vm7  ;;  %v25907_v63 = vpack.c.bf16 %v25905_v6, %v25906_v60  ;;  %v15881_v61 = vld [vmem:[%s23672_s3 + $0x110] sm:$0xff]   ;;  %v25909_v31 = vrot.slane %v21596_v38, 1 }
 0x445   : > { %vm25900_vm12 = vmand %vm25897_vm8, %vm25899_vm15  ;;  %v7566_v40 = vsel %vm25904_vm1, %v25903_v26, %v25901_v15  ;;  %v25910_v22 = vrot.slane %v20430_v18, 1 }
 0x446   : > { %v21637_v16 = vsel %vm25900_vm12, %v25895_v43, 0.0  ;;  %15240 = vmatprep.mubr.bf16.mxu0 %v25907_v63  ;;  %v21652_v43 = vpack.c.bf16 %v7573_v54, %v7574_v44  ;;  %vm25911_vm11 = vmmov %vm25904_vm1  ;;  %v25915_v63 = vld [vmem:[#allocation19_spill] sm:$0xff]  ;;  %v25916_v44 = vld [vmem:[#allocation88_spill] sm:$0xff]  ;;  %15147 = vmatpush3.bf16.msra.mxu1 %v15880_v51 }
 0x447   : > { %v7569_v26 = vsel %vm25911_vm11, %v25910_v22, %v25909_v31  ;;  %vm25913_vm14 = vmmov %vm25904_vm1  ;;  %vm25917_vm13 = vnez %v25916_v44  ;;  %v25918_v54 = vld [vmem:[#allocation76_spill] sm:$0xff]  ;;  %v25921_v22 = vrot.slane %v20739_v55, 1  ;;  %v25922_v31 = vrot.slane %v20706_v28, 1  ;;  %15148 = vmatprep.subr.bf16.mxu1 %v15881_v61  ;;  %v25940_v51 = vld [vmem:[#allocation51_spill] sm:$0xff] }
 0x448   : > { %25908 = vst [vmem:[#allocation104_spill] sm:$0xff] %v21652_v43  ;;  %v7543_v60 = vsel %vm25913_vm14, %v25128_v25, %v25912_v2  ;;  %v21666_v6 = vpack.c.bf16 %v7569_v26, %v7570_v10  ;;  %vm25919_vm7 = vnez %v25918_v54  ;;  %vm25923_vm10 = vmmov %vm25904_vm1  ;;  %v21687_v10 = vsel %vm6804_vm2, %v7316_v24, 0.0  ;;  %v25927_v54 = vld [vmem:[#allocation146_spill] sm:$0xff] }
 0x449   : > { %vm25920_vm0 = vmand %vm25917_vm13, %vm25919_vm7  ;;  %v7562_v15 = vsel %vm25923_vm10, %v25922_v31, %v25921_v22  ;;  %v25924_v2 = vrot.slane %v21637_v16, 1  ;;  %v25925_v26 = vrot.slane %v20612_v49, 1  ;;  %v25930_v22 = vld [vmem:[#allocation82_spill] sm:$0xff] }
 0x44a   : > { %25914 = vst [vmem:[#allocation123_spill] sm:$0xff] %v21666_v6  ;;  %v21674_v43 = vsel %vm25920_vm0, %v25915_v63, 0.0  ;;  %vm25926_vm8 = vmmov %vm25904_vm1  ;;  %v25928_v6 = vld [vmem:[#allocation54_spill] sm:$0xff]  ;;  %vm25931_vm12 = vnez %v25930_v22  ;;  %15149 = vmatpush3.bf16.msra.mxu1 %v15881_v61  ;;  %v15883_v61 = vld [vmem:[%s23672_s3 + $0x120] sm:$0xff]  }
 0x44b   : > { %v7565_v63 = vsel %vm25926_vm8, %v25925_v26, %v25924_v2  ;;  %v7510_v44 = vrot.slane %v21674_v43, 1  ;;  %vm25929_vm15 = vnez %v25928_v6  ;;  %v25934_v2 = vrot.slane %v20897_v41, 1  ;;  %vm25936_vm4 = vmmov %vm25926_vm8  ;;  %15150 = vmatprep.subr.bf16.mxu1 %v15882_v59 }
 0x44c   : > { %vm25932_vm1 = vmand %vm25929_vm15, %vm25931_vm12  ;;  %v21708_v24 = vpack.c.bf16 %v7565_v63, %v7566_v40  ;;  %v25935_v26 = vrot.slane %v20859_v4, 1  ;;  %v25941_v40 = vld [vmem:[#allocation20_spill] sm:$0xff]  ;;  %v25943_v63 = vld [vmem:[#allocation147_spill] sm:$0xff] }
 0x44d   : > { %v21702_v58 = vsel %vm25932_vm1, %v25927_v54, 0.0  ;;  %vm25937_vm3 = vmmov %vm25936_vm4  ;;  %vm25942_vm2 = vnez %v25941_v40  ;;  %vm25944_vm11 = vnez %v25943_v63  ;;  %v25952_v40 = vrot.slane %v20897_v41, 1 }
 0x44e   : > { %25933 = vst [vmem:[#allocation89_spill] sm:$0xff] %v21708_v24  ;;  %v7514_v31 = vrot.slane %v21702_v58, 1  ;;  %v7558_v6 = vsel %vm25936_vm4, %v25935_v26, %v25934_v2  ;;  %v7560_v54 = vsel %vm25937_vm3, %v7510_v44, %v25128_v25  ;;  %vm25939_vm5 = vmmov %vm25937_vm3  ;;  %v25946_v2 = vrot.slane %v21059_v52, 1  ;;  %15151 = vmatpush3.bf16.msra.mxu1 %v15882_v59  ;;  %v15890_v59 = vld [vmem:[%s23672_s3 + $0x158] sm:$0xff]  }
 0x44f   : > { %v7561_v32 = vsel %vm25939_vm5, %v25938_v17, %v7510_v44  ;;  %vm25945_vm14 = vmand %vm25942_vm2, %vm25944_vm11  ;;  %v25947_v26 = vrot.slane %v20999_v36, 1  ;;  %v21744_v17 = vpack.c.bf16 %v21032_v5, %v7560_v54  ;;  %v25955_v36 = vld [vmem:[#allocation156_spill] sm:$0xff]  ;;  %15152 = vmatprep.subr.bf16.mxu1 %v15883_v61 }
 0x450   : > { %v21730_v22 = vsel %vm25945_vm14, %v25940_v51, 0.0  ;;  %vm25948_vm13 = vmmov %vm25937_vm3  ;;  %v21741_v44 = vpack.c.bf16 %v7561_v32, %v7562_v15  ;;  %vm25956_vm10 = vnez %v25955_v36  ;;  %v25957_v15 = vld [vmem:[#allocation55_spill] sm:$0xff]  ;;  %v25958_v5 = vld [vmem:[#allocation144_spill] sm:$0xff] }
 0x451   : > { %v7554_v24 = vsel %vm25948_vm13, %v25947_v26, %v25946_v2  ;;  %25950 = vst [vmem:[#allocation92_spill] sm:$0xff] %v21744_v17  ;;  %vm25951_vm7 = vmmov %vm25937_vm3  ;;  %v15887_v2 = vld [vmem:[%s23672_s3 + $0x148] sm:$0xff]   ;;  %v25954_v26 = vld [vmem:[#allocation159_spill] sm:$0xff]  ;;  %v25959_v54 = vpack.c.bf16 %v25957_v15, %v25958_v5 }
 0x452   : > { %25949 = vst [vmem:[#allocation71_spill] sm:$0xff] %v21741_v44  ;;  %v7556_v51 = vsel %vm25951_vm7, %v7514_v31, %v25128_v25  ;;  %vm25953_vm0 = vmmov %vm25937_vm3  ;;  %15005 = vmatmul.mubr.msk.bf16.gmra.mrb[100].mxu1 %vm25956_vm10, %v25954_v26  ;;  %v7518_v44 = vrot.slane %v21730_v22, 1  ;;  %v25966_v36 = vld [vmem:[#allocation163_spill] sm:$0xff]  ;;  %v25969_v15 = vld [vmem:[#allocation49_spill] sm:$0xff]  ;;  %vm25973_vm3 = vnez %v25694_v19  ;;  %v25981_v19 = vrot.slane %v21059_v52, 1 }
 0x453   : > { %v7557_v63 = vsel %vm25953_vm0, %v25952_v40, %v7514_v31  ;;  %15241 = vmatmul.mubr.bf16.vlgmr.msra.gmra.mrb[168].mxu0 %v25959_v54  ;;  %v21765_v17 = vpack.c.bf16 %v21183_v48, %v7556_v51  ;;  %v25961_v31 = vld [vmem:[#allocation84_spill] sm:$0xff]  ;;  %v25963_v40 = vld [vmem:[#allocation138_spill] sm:$0xff]  ;;  %v25967_v26 = vld [vmem:[#allocation87_spill] sm:$0xff]  ;;  %v25970_v48 = vrot.slane %v21235_v12, 1  ;;  %v25971_v51 = vrot.slane %v21230_v53, 1  ;;  %15153 = vmatpush3.bf16.msra.mxu1 %v15883_v61 }
 0x454   : > { %v21762_v32 = vpack.c.bf16 %v7557_v63, %v7558_v6  ;;  %vm25962_vm8 = vnez %v25961_v31  ;;  %vm25964_vm15 = vnez %v25963_v40  ;;  %vm25968_vm1 = vnez %v25967_v26  ;;  %15244 = vmatprep.mubr.bf16.mxu0 %v25969_v15  ;;  %vm25972_vm4 = vmmov %vm25953_vm0  ;;  %v15891_v61 = vld [vmem:[%s23672_s3 + $0x160] sm:$0xff]  }
 0x455   : > { %vm25965_vm12 = vmand %vm25962_vm8, %vm25964_vm15  ;;  %15008 = vmatprep.mubr.msk.bf16.mxu1 %vm25968_vm1, %v25966_v36  ;;  %v7550_v63 = vsel %vm25972_vm4, %v25971_v51, %v25970_v48  ;;  %v25977_v54 = vrot.slane %v21391_v37, 1  ;;  %v25978_v31 = vrot.slane %v21374_v21, 1  ;;  %v25983_v48 = vld [vmem:[#allocation36_spill] sm:$0xff] }
 0x456   : > { %25960 = vst [vmem:[#allocation53_spill] sm:$0xff] %v21762_v32  ;;  %v21774_v4 = vsel %vm25965_vm12, %v21011_v57, 0.0  ;;  %v25974_v57 = vld [vmem:[#allocation112_spill] sm:$0xff]  ;;  %vm25979_vm11 = vmmov %vm25953_vm0  ;;  %15385 = vmatpush3.bf16.msra.mxu0 %v25983_v48  ;;  %v25987_v48 = vrot.slane %v21235_v12, 1  ;;  %vm25999_vm12 = vcmp.lt.s32.totalorder %v16193_v45, 6 }
 0x457   : > { %v7522_v6 = vrot.slane %v21774_v4, 1  ;;  %vm25975_vm5 = vnez %v25974_v57  ;;  %v7546_v40 = vsel %vm25979_vm11, %v25978_v31, %v25977_v54  ;;  %vm25980_vm14 = vmmov %vm25953_vm0  ;;  %15386 = vmatprep.subr.bf16.mxu0 %v15887_v2 }
 0x458   : > { %vm25976_vm2 = vmand %vm25973_vm3, %vm25975_vm5  ;;  %v7552_v26 = vsel %vm25980_vm14, %v7518_v44, %v25128_v25 }
 0x459   : > { %v21793_v5 = vsel %vm25976_vm2, %v21187_v14, 0.0  ;;  %vm25982_vm13 = vmmov %vm25953_vm0  ;;  %v21818_v31 = vpack.c.bf16 %v21366_v1, %v7552_v26  ;;  %v7549_v57 = vsel %vm25953_vm0, %v25987_v48, %v7522_v6  ;;  %v25990_v26 = vrot.slane %v21391_v37, 1 }
 0x45a   : > { %v7553_v14 = vsel %vm25982_vm13, %v25981_v19, %v7518_v44  ;;  %v7526_v51 = vrot.slane %v21793_v5, 1  ;;  %v15889_v44 = vld [vmem:[%s23672_s3 + $0x150] sm:$0xff]   ;;  %vm25986_vm7 = vmmov %vm25953_vm0  ;;  %v21840_v36 = vpack.c.bf16 %v7549_v57, %v7550_v63  ;;  %15387 = vmatpush3.bf16.msra.mxu0 %v15887_v2  ;;  %v15884_v57 = vld [vmem:[%s23672_s3 + $0x128] sm:$0xff]   ;;  %v7698_v48 = vrot.slane %v21160_v47, 2 }
 0x45b   : > { %v21815_v54 = vpack.c.bf16 %v7553_v14, %v7554_v24  ;;  %25985 = vst [vmem:[#allocation117_spill] sm:$0xff] %v21818_v31  ;;  %v7548_v19 = vsel %vm25986_vm7, %v7522_v6, %v25128_v25  ;;  %vm25989_vm10 = vmmov %vm25953_vm0  ;;  %15388 = vmatprep.subr.bf16.mxu0 %v15889_v44  ;;  %15154 = vmatprep.subr.bf16.mxu1 %v15884_v57 }
 0x45c   : > { %v21831_v24 = vpack.c.bf16 %v21511_v34, %v7548_v19  ;;  %v7544_v1 = vsel %vm25989_vm10, %v7526_v51, %v25128_v25  ;;  %vm25991_vm8 = vmmov %vm25953_vm0  ;;  %25992 = vst [vmem:[#allocation34_spill] sm:$0xff] %v21840_v36  ;;  %v25998_v19 = vrot.slane %v21497_v39, 2  ;;  %v7706_v36 = vrot.slane %v21456_v11, 2  ;;  %15155 = vmatpush3.bf16.msra.mxu1 %v15884_v57 }
 0x45d   : > { %25984 = vst [vmem:[#allocation61_spill] sm:$0xff] %v21815_v54  ;;  %v7545_v14 = vsel %vm25991_vm8, %v25990_v26, %v7526_v51  ;;  %v21844_v31 = vpack.c.bf16 %v7543_v60, %v7544_v1  ;;  %v25995_v54 = vld [vmem:[#allocation108_spill] sm:$0xff]  ;;  %vm25996_vm15 = vmand %vm21425_vm9, %vm21295_vm6  ;;  %v26000_v60 = vld [vmem:[#allocation39_spill] sm:$0xff]  ;;  %v26006_v1 = vrot.slane %v21687_v10, 2 }
 0x45e   : > { %25988 = vst [vmem:[#allocation98_spill] sm:$0xff] %v21831_v24  ;;  %v21842_v15 = vpack.c.bf16 %v7545_v14, %v7546_v40  ;;  %v24195_v6 = vrot.slane %v25995_v54, 2  ;;  %v21853_v34 = vsel %vm25996_vm15, %v21490_v62, 0.0  ;;  %v21860_v63 = vsel %vm25999_vm12, %v25257_v23, %v25998_v19  ;;  %vm26002_vm6 = vmmov %vm25953_vm0  ;;  %v26008_v14 = vld [vmem:[#allocation166_spill] sm:$0xff]  ;;  %v26009_v19 = vld [vmem:[#allocation164_spill] sm:$0xff]  ;;  %15389 = vmatpush3.bf16.msra.mxu0 %v15889_v44 }
 0x45f   : > { %25994 = vst [vmem:[#allocation23_spill] sm:$0xff] %v21844_v31  ;;  %25997 = vst [vmem:[#allocation65_spill] sm:$0xff] %v21853_v34  ;;  %v21864_v40 = vpack.c.bf16 %v26000_v60, %v21613_v9  ;;  %v26001_v62 = vrot.slane %v21687_v10, 1  ;;  %v26004_v9 = vrot.slane %v26003_v8, 2  ;;  %vm26010_vm4 = vnez %v26009_v19  ;;  %v26011_v60 = vld [vmem:[#allocation83_spill] sm:$0xff]  ;;  %v26018_v31 = vld [vmem:[#allocation77_spill] sm:$0xff]  ;;  %15390 = vmatprep.subr.bf16.mxu0 %v15890_v59 }
 0x460   : > { %25993 = vst [vmem:[#allocation62_spill] sm:$0xff] %v21842_v15  ;;  %vm26005_vm9 = vmmov %vm25999_vm12  ;;  %15009 = vmatmul.mubr.msk.bf16.gmra.mrb[104].mxu1 %vm26010_vm4, %v26008_v14  ;;  %15245 = vmatmul.mubr.bf16.gmra.mrb[172].mxu0 %v26011_v60  ;;  %v26014_v54 = vrot.slane %v26013_v33, 2  ;;  %vm26019_vm2 = vnez %v26018_v31  ;;  %v26020_v14 = vld [vmem:[#allocation99_spill] sm:$0xff]  ;;  %v26033_v44 = vld [vmem:[#allocation40_spill] sm:$0xff] }
 0x461   : > { %v21873_v51 = vsel %vm26002_vm6, %v25128_v25, %v26001_v62  ;;  %v7813_v2 = vsel %vm26005_vm9, %v26004_v9, %v24195_v6  ;;  %vm26007_vm1 = vmmov %vm26005_vm9  ;;  %v26012_v62 = vmov %v26004_v9  ;;  %v26017_v6 = vld [vmem:[#allocation125_spill] sm:$0xff]  ;;  %15248 = vmatprep.mubr.bf16.mxu0 %v26020_v14  ;;  %v26022_v8 = vld [vmem:[#allocation175_spill] sm:$0xff] }
 0x462   : > { %v21893_v26 = vsel %vm26007_vm1, %v25257_v23, %v26006_v1  ;;  %vm26015_vm3 = vmmov %vm26007_vm1  ;;  %v7702_v1 = vrot.slane %v21359_v56, 2  ;;  %15012 = vmatprep.mubr.msk.bf16.mxu1 %vm26019_vm2, %v26017_v6  ;;  %v26023_v60 = vrot.slane %v26022_v8, 2  ;;  %v26030_v6 = vld [vmem:[#allocation79_spill] sm:$0xff]  ;;  %15391 = vmatpush3.bf16.msra.mxu0 %v15890_v59  ;;  %v26059_v59 = vrot.slane %v20231_v27, 2 }
 0x463   : > { %v7814_v47 = vsel %vm26015_vm3, %v26014_v54, %v26012_v62  ;;  %vm26016_vm5 = vmmov %vm26007_vm1  ;;  %v26026_v62 = vld [vmem:[#allocation113_spill] sm:$0xff]  ;;  %15392 = vmatprep.subr.bf16.mxu0 %v15891_v61 }
 0x464   : > { %v7808_v9 = vsel %vm26016_vm5, %v7694_v20, %v25257_v23  ;;  %v21913_v19 = vpack.c.bf16 %v7813_v2, %v7814_v47  ;;  %vm26024_vm11 = vmmov %vm26007_vm1  ;;  %v26025_v54 = vmov %v26023_v60  ;;  %v26027_v15 = vrot.slane %v26026_v62, 2 }
 0x465   : > { %v7809_v33 = vsel %vm26024_vm11, %v26023_v60, %v7694_v20  ;;  %vm26028_vm14 = vmmov %vm26007_vm1  ;;  %v21929_v2 = vpack.c.bf16 %v26030_v6, %v7808_v9  ;;  %v7710_v60 = vrot.slane %v21536_v0, 2  ;;  %v26037_v9 = vld [vmem:[#allocation121_spill] sm:$0xff]  ;;  %v26040_v6 = vld [vmem:[#allocation30_spill] sm:$0xff] }
 0x466   : > { %26021 = vst [vmem:[#allocation127_spill] sm:$0xff] %v21913_v19  ;;  %v7810_v24 = vsel %vm26028_vm14, %v26027_v15, %v26025_v54  ;;  %vm26032_vm13 = vmmov %vm26007_vm1  ;;  %v15885_v15 = vld [vmem:[%s23672_s3 + $0x130] sm:$0xff]   ;;  %v26038_v8 = vrot.slane %v26037_v9, 2  ;;  %15393 = vmatpush3.bf16.msra.mxu0 %v15891_v61 }
 0x467   : > { %v21926_v31 = vpack.c.bf16 %v7809_v33, %v7810_v24  ;;  %26031 = vst [vmem:[#allocation119_spill] sm:$0xff] %v21929_v2  ;;  %v7804_v20 = vsel %vm26032_vm13, %v7698_v48, %v25257_v23  ;;  %v26034_v24 = vrot.slane %v26033_v44, 2  ;;  %vm26035_vm7 = vmmov %vm26007_vm1  ;;  %15156 = vmatprep.subr.bf16.mxu1 %v15885_v15 }
 0x468   : > { %vm26039_vm0 = vmmov %vm26007_vm1  ;;  %v21952_v2 = vpack.c.bf16 %v26040_v6, %v7804_v20  ;;  %v26050_v6 = vrot.slane %v20119_v46, 2  ;;  %v15892_v46 = vld [vmem:[%s23672_s3 + $0x168] sm:$0xff]   ;;  %15157 = vmatpush3.bf16.msra.mxu1 %v15885_v15  ;;  %v15894_v15 = vld [vmem:[%s23672_s3 + $0x170] sm:$0xff]  }
 0x469   : > { %26029 = vst [vmem:[#allocation64_spill] sm:$0xff] %v21926_v31  ;;  %v7805_v33 = vsel %vm26035_vm7, %v26034_v24, %v7698_v48  ;;  %v26036_v47 = vmov %v26034_v24  ;;  %v7714_v31 = vrot.slane %v21567_v7, 2  ;;  %vm26042_vm10 = vmmov %vm26039_vm0  ;;  %v26043_v48 = vrot.slane %v25807_v35, 2  ;;  %15394 = vmatprep.subr.bf16.mxu0 %v15892_v46 }
 0x46a   : > { %v7806_v54 = vsel %vm26039_vm0, %v26038_v8, %v26036_v47  ;;  %v7800_v19 = vsel %vm26042_vm10, %v7702_v1, %v25257_v23  ;;  %vm26044_vm8 = vmmov %vm26039_vm0  ;;  %v26046_v47 = vrot.slane %v19887_v50, 2  ;;  %v26052_v50 = vmov %v26050_v6  ;;  %15395 = vmatpush3.bf16.msra.mxu0 %v15892_v46 }
 0x46b   : > { %v21955_v62 = vpack.c.bf16 %v7805_v33, %v7806_v54  ;;  %v7801_v44 = vsel %vm26044_vm8, %v26043_v48, %v7702_v1  ;;  %v26045_v24 = vmov %v26043_v48  ;;  %vm26047_vm15 = vmmov %vm26039_vm0  ;;  %v26048_v33 = vld [vmem:[#allocation47_spill] sm:$0xff]  ;;  %v26053_v35 = vrot.slane %v20086_v30, 2  ;;  %15396 = vmatprep.subr.bf16.mxu0 %v15894_v15 }
 0x46c   : > { %v7802_v20 = vsel %vm26047_vm15, %v26046_v47, %v26045_v24  ;;  %v21973_v8 = vpack.c.bf16 %v26048_v33, %v7800_v19  ;;  %vm26049_vm12 = vmmov %vm26039_vm0  ;;  %v26055_v19 = vld [vmem:[#allocation17_spill] sm:$0xff]  ;;  %v7718_v47 = vrot.slane %v21596_v38, 2  ;;  %v26061_v33 = vmov %v26059_v59 }
 0x46d   : > { %26041 = vst [vmem:[#allocation46_spill] sm:$0xff] %v21955_v62  ;;  %v21970_v9 = vpack.c.bf16 %v7801_v44, %v7802_v20  ;;  %v7796_v54 = vsel %vm26049_vm12, %v7706_v36, %v25257_v23  ;;  %vm26051_vm6 = vmmov %vm26039_vm0  ;;  %v26119_v46 = vrot.slane %v20897_v41, 2 }
 0x46e   : > { %v7797_v1 = vsel %vm26051_vm6, %v26050_v6, %v7706_v36  ;;  %vm26054_vm9 = vmmov %vm26039_vm0  ;;  %v21989_v44 = vpack.c.bf16 %v26055_v19, %v7796_v54  ;;  %v15888_v36 = vld [vmem:[%s23672_s3 + $0x138] sm:$0xff]   ;;  %v26062_v54 = vrot.slane %v25853_v29, 2  ;;  %15397 = vmatpush3.bf16.msra.mxu0 %v15894_v15 }
 0x46f   : > { %v7798_v48 = vsel %vm26054_vm9, %v26053_v35, %v26052_v50  ;;  %vm26057_vm1 = vmmov %vm26039_vm0  ;;  %v7722_v50 = vrot.slane %v21637_v16, 2  ;;  %v26064_v35 = vld [vmem:[#allocation169_spill] sm:$0xff]  ;;  %v26065_v19 = vld [vmem:[#allocation168_spill] sm:$0xff]  ;;  %15158 = vmatprep.subr.bf16.mxu1 %v15888_v36 }
 0x470   : > { %26056 = vst [vmem:[#allocation122_spill] sm:$0xff] %v21989_v44  ;;  %v7792_v24 = vsel %vm26057_vm1, %v7710_v60, %v25257_v23  ;;  %v22001_v57 = vpack.c.bf16 %v7797_v1, %v7798_v48  ;;  %vm26060_vm4 = vmmov %vm26039_vm0  ;;  %vm26066_vm5 = vnez %v26065_v19  ;;  %v26067_v1 = vld [vmem:[#allocation114_spill] sm:$0xff]  ;;  %v26069_v44 = vld [vmem:[#allocation143_spill] sm:$0xff]  ;;  %15159 = vmatpush3.bf16.msra.mxu1 %v15888_v36 }
 0x471   : > { %v7793_v20 = vsel %vm26060_vm4, %v26059_v59, %v7710_v60  ;;  %vm26063_vm3 = vmmov %vm26039_vm0  ;;  %15013 = vmatmul.mubr.msk.bf16.gmra.mrb[108].mxu1 %vm26066_vm5, %v26064_v35  ;;  %15249 = vmatmul.mubr.bf16.gmra.mrb[176].mxu0 %v26067_v1  ;;  %v7726_v60 = vrot.slane %v21674_v43, 2  ;;  %v26072_v59 = vld [vmem:[#allocation170_spill] sm:$0xff]  ;;  %v26076_v35 = vrot.slane %v20337_v42, 2  ;;  %v26086_v42 = vrot.slane %v20430_v18, 2  ;;  %v15895_v36 = vld [vmem:[%s23672_s3 + $0x178] sm:$0xff]  }
 0x472   : > { %26058 = vst [vmem:[#allocation167_spill] sm:$0xff] %v22001_v57  ;;  %v7794_v6 = vsel %vm26063_vm3, %v26062_v54, %v26061_v33  ;;  %v22021_v57 = vpack.c.bf16 %v26069_v44, %v7792_v24  ;;  %vm26071_vm2 = vmmov %vm26039_vm0  ;;  %v26073_v33 = vld [vmem:[#allocation69_spill] sm:$0xff]  ;;  %v26075_v54 = vld [vmem:[#allocation158_spill] sm:$0xff]  ;;  %15398 = vmatprep.subr.bf16.mxu0 %v15895_v36 }
 0x473   : > { %v22018_v48 = vpack.c.bf16 %v7793_v20, %v7794_v6  ;;  %v7788_v27 = vsel %vm26071_vm2, %v7714_v31, %v25257_v23  ;;  %vm26074_vm11 = vnez %v26073_v33  ;;  %15252 = vmatprep.mubr.bf16.mxu0 %v26075_v54  ;;  %vm26077_vm14 = vmmov %vm26039_vm0  ;;  %v26078_v44 = vmov %v26076_v35  ;;  %v26079_v24 = vld [vmem:[#allocation141_spill] sm:$0xff]  ;;  %15399 = vmatpush3.bf16.msra.mxu0 %v15895_v36 }
 0x474   : > { %26070 = vst [vmem:[#allocation10_spill] sm:$0xff] %v22021_v57  ;;  %15016 = vmatprep.mubr.msk.bf16.mxu1 %vm26074_vm11, %v26072_v59  ;;  %v7789_v20 = vsel %vm26077_vm14, %v26076_v35, %v7714_v31  ;;  %v26080_v6 = vrot.slane %v26079_v24, 2  ;;  %vm26081_vm13 = vmmov %vm26039_vm0  ;;  %v26082_v57 = vld [vmem:[#allocation86_spill] sm:$0xff]  ;;  %v7730_v33 = vrot.slane %v21702_v58, 2  ;;  %v7785_v35 = vsel %vm26039_vm0, %v26086_v42, %v7718_v47  ;;  %v22058_v58 = vld [vmem:[%s23672_s3 + $0x1c0] sm:$0xff]  }
 0x475   : > { %26068 = vst [vmem:[#allocation165_spill] sm:$0xff] %v22018_v48  ;;  %v22042_v43 = vpack.c.bf16 %v26082_v57, %v7788_v27  ;;  %vm26085_vm7 = vmmov %vm26039_vm0  ;;  %v26087_v61 = vmov %v26086_v42  ;;  %v26088_v57 = vld [vmem:[#allocation133_spill] sm:$0xff]  ;;  %15304 = vmatprep.subr.bf16.mxu1 %v22058_v58  ;;  %v26180_v36 = vrot.slane %v21687_v10, 1 }
 0x476   : > { %v7790_v19 = vsel %vm26081_vm13, %v26080_v6, %v26078_v44  ;;  %v7784_v31 = vsel %vm26085_vm7, %v7718_v47, %v25257_v23  ;;  %v7734_v44 = vrot.slane %v21730_v22, 2  ;;  %v26089_v27 = vrot.slane %v26088_v57, 2  ;;  %vm26090_vm10 = vmmov %vm26039_vm0 }
 0x477   : > { %26083 = vst [vmem:[#allocation31_spill] sm:$0xff] %v22042_v43  ;;  %v22045_v59 = vpack.c.bf16 %v7789_v20, %v7790_v19  ;;  %v26091_v20 = vld [vmem:[#allocation110_spill] sm:$0xff]  ;;  %vm26093_vm8 = vmmov %vm26039_vm0  ;;  %v7738_v19 = vrot.slane %v21774_v4, 2  ;;  %v26095_v43 = vrot.slane %v20612_v49, 2 }
 0x478   : > { %v7786_v47 = vsel %vm26090_vm10, %v26089_v27, %v26087_v61  ;;  %v22070_v22 = vpack.c.bf16 %v26091_v20, %v7784_v31  ;;  %v7780_v6 = vsel %vm26093_vm8, %v7722_v50, %v25257_v23  ;;  %vm26096_vm15 = vmmov %vm26039_vm0  ;;  %v26098_v61 = vrot.slane %v25902_v13, 2  ;;  %v26100_v27 = vld [vmem:[#allocation33_spill] sm:$0xff] }
 0x479   : > { %26084 = vst [vmem:[#allocation120_spill] sm:$0xff] %v22045_v59  ;;  %v22076_v42 = vpack.c.bf16 %v7785_v35, %v7786_v47  ;;  %v7781_v18 = vsel %vm26096_vm15, %v26095_v43, %v7722_v50  ;;  %v26097_v59 = vmov %v26095_v43  ;;  %vm26099_vm12 = vmmov %vm26039_vm0  ;;  %v22089_v20 = vpack.c.bf16 %v26100_v27, %v7780_v6  ;;  %v26110_v6 = vld [vmem:[#allocation145_spill] sm:$0xff] }
 0x47a   : > { %26092 = vst [vmem:[#allocation11_spill] sm:$0xff] %v22070_v22  ;;  %v7782_v31 = vsel %vm26099_vm12, %v26098_v61, %v26097_v59  ;;  %vm26103_vm6 = vmmov %vm26039_vm0  ;;  %v26104_v35 = vrot.slane %v20739_v55, 2  ;;  %v26107_v43 = vrot.slane %v20706_v28, 2  ;;  %v26116_v55 = vld [vmem:[#allocation161_spill] sm:$0xff] }
 0x47b   : > { %26094 = vst [vmem:[#allocation27_spill] sm:$0xff] %v22076_v42  ;;  %26101 = vst [vmem:[#allocation115_spill] sm:$0xff] %v22089_v20  ;;  %v22091_v22 = vpack.c.bf16 %v7781_v18, %v7782_v31  ;;  %v7776_v4 = vsel %vm26103_vm6, %v7726_v60, %v25257_v23  ;;  %v26113_v31 = vld [vmem:[#allocation78_spill] sm:$0xff]  ;;  %vm26117_vm5 = vnez %v26116_v55  ;;  %v26128_v55 = vld [vmem:[#allocation171_spill] sm:$0xff] }
 0x47c   : > { %vm26105_vm9 = vmmov %vm26039_vm0  ;;  %v26106_v49 = vmov %v26104_v35  ;;  %v22109_v18 = vpack.c.bf16 %v26110_v6, %v7776_v4  ;;  %vm26129_vm13 = vnez %v26128_v55  ;;  %v26142_v55 = vld [vmem:[#allocation9_spill] sm:$0xff] }
 0x47d   : > { %26102 = vst [vmem:[#allocation172_spill] sm:$0xff] %v22091_v22  ;;  %v7777_v50 = vsel %vm26105_vm9, %v26104_v35, %v7726_v60  ;;  %vm26108_vm1 = vmmov %vm26039_vm0  ;;  %v26114_v60 = vld [vmem:[#allocation60_spill] sm:$0xff]  ;;  %v26121_v35 = vmov %v26119_v46  ;;  %vm26154_vm9 = vcmp.lt.s32.totalorder %v16193_v45, 7 }
 0x47e   : > { %v7778_v59 = vsel %vm26108_vm1, %v26107_v43, %v26106_v49  ;;  %26111 = vst [vmem:[#allocation101_spill] sm:$0xff] %v22109_v18  ;;  %vm26112_vm4 = vmmov %vm26039_vm0  ;;  %vm26115_vm3 = vnez %v26114_v60  ;;  %v26127_v60 = vld [vmem:[#allocation174_spill] sm:$0xff]  ;;  %v26130_v18 = vld [vmem:[#allocation124_spill] sm:$0xff] }
 0x47f   : > { %v22106_v47 = vpack.c.bf16 %v7777_v50, %v7778_v59  ;;  %v7772_v61 = vsel %vm26112_vm4, %v7730_v33, %v25257_v23  ;;  %vm26118_vm2 = vmand %vm26115_vm3, %vm26117_vm5  ;;  %v26122_v50 = vld [vmem:[#allocation111_spill] sm:$0xff]  ;;  %v26125_v59 = vld [vmem:[#allocation25_spill] sm:$0xff]  ;;  %15017 = vmatmul.mubr.msk.bf16.gmra.mrb[112].mxu1 %vm26129_vm13, %v26127_v60  ;;  %15253 = vmatmul.mubr.bf16.gmra.mrb[180].mxu0 %v26130_v18 }
 0x480   : > { %v7386_v27 = vsel %vm26118_vm2, %v26113_v31, 0.0  ;;  %vm26120_vm11 = vmmov %vm26039_vm0  ;;  %v26123_v49 = vrot.slane %v26122_v50, 2  ;;  %v22135_v6 = vpack.c.bf16 %v26125_v59, %v7772_v61  ;;  %v7742_v61 = vrot.slane %v21793_v5, 2  ;;  %v26135_v50 = vld [vmem:[#allocation70_spill] sm:$0xff] }
 0x481   : > { %26109 = vst [vmem:[#allocation126_spill] sm:$0xff] %v22106_v47  ;;  %v7773_v4 = vsel %vm26120_vm11, %v26119_v46, %v7730_v33  ;;  %vm26124_vm14 = vmmov %vm26039_vm0  ;;  %v7530_v31 = vrot.slane %v7386_v27, 1  ;;  %v26133_v33 = vrot.slane %v21059_v52, 2  ;;  %vm26136_vm10 = vnez %v26135_v50 }
 0x482   : > { %v7774_v43 = vsel %vm26124_vm14, %v26123_v49, %v26121_v35  ;;  %26126 = vst [vmem:[#allocation130_spill] sm:$0xff] %v22135_v6  ;;  %vm26132_vm7 = vmmov %vm26039_vm0  ;;  %v26134_v35 = vld [vmem:[#allocation32_spill] sm:$0xff]  ;;  %v26137_v49 = vld [vmem:[#allocation102_spill] sm:$0xff] }
 0x483   : > { %v22141_v47 = vpack.c.bf16 %v7773_v4, %v7774_v43  ;;  %v7768_v41 = vsel %vm26132_vm7, %v7734_v44, %v25257_v23  ;;  %v7769_v46 = vsel %vm26039_vm0, %v26133_v33, %v7734_v44  ;;  %15020 = vmatprep.mubr.msk.bf16.mxu1 %vm26136_vm10, %v26134_v35  ;;  %15256 = vmatprep.mubr.bf16.mxu0 %v26137_v49  ;;  %v26139_v43 = vld [vmem:[#allocation58_spill] sm:$0xff]  ;;  %vm26141_vm8 = vmmov %vm26039_vm0  ;;  %v7746_v44 = vrot.slane %v7386_v27, 2 }
 0x484   : > { %v26138_v4 = vmov %v26133_v33  ;;  %v26140_v59 = vrot.slane %v26139_v43, 2  ;;  %v22162_v6 = vpack.c.bf16 %v26142_v55, %v7768_v41  ;;  %vm26144_vm15 = vmmov %vm26039_vm0  ;;  %v26146_v35 = vrot.slane %v21235_v12, 2  ;;  %v26151_v43 = vld [vmem:[#allocation48_spill] sm:$0xff] }
 0x485   : > { %26131 = vst [vmem:[#allocation72_spill] sm:$0xff] %v22141_v47  ;;  %v7764_v5 = vsel %vm26144_vm15, %v7738_v19, %v25257_v23  ;;  %vm26147_vm12 = vmmov %vm26039_vm0  ;;  %v7540_v15 = vsel %vm26154_vm9, %v7530_v31, %v25128_v25 }
 0x486   : > { %v7770_v60 = vsel %vm26141_vm8, %v26140_v59, %v26138_v4  ;;  %26143 = vst [vmem:[#allocation73_spill] sm:$0xff] %v22162_v6  ;;  %v7765_v52 = vsel %vm26147_vm12, %v26146_v35, %v7738_v19  ;;  %v26148_v50 = vmov %v26146_v35  ;;  %v26149_v4 = vrot.slane %v21230_v53, 2  ;;  %vm26150_vm6 = vmmov %vm26039_vm0 }
 0x487   : > { %v22167_v33 = vpack.c.bf16 %v7769_v46, %v7770_v60  ;;  %v22180_v59 = vpack.c.bf16 %v26151_v43, %v7764_v5  ;;  %v26155_v46 = vld [vmem:[#allocation29_spill] sm:$0xff]  ;;  %vm26157_vm1 = vmmov %vm26154_vm9  ;;  %v26159_v19 = vrot.slane %v21497_v39, 1  ;;  %v22200_v35 = vpack.c.bf16 %v21873_v51, %v7540_v15  ;;  %15257 = vmatmul.mubr.bf16.gmra.mrb[184].mxu0 %v21864_v40 }
 0x488   : > { %v7766_v41 = vsel %vm26150_vm6, %v26149_v4, %v26148_v50  ;;  %v26156_v60 = vrot.slane %v26155_v46, 1  ;;  %vm26160_vm4 = vmmov %vm26157_vm1  ;;  %v26164_v50 = vrot.slane %v21391_v37, 2  ;;  %v26171_v15 = vrot.slane %v26155_v46, 2  ;;  %v26183_v46 = vld [vmem:[#allocation93_spill] sm:$0xff] }
 0x489   : > { %26145 = vst [vmem:[#allocation14_spill] sm:$0xff] %v22167_v33  ;;  %26152 = vst [vmem:[#allocation38_spill] sm:$0xff] %v22180_v59  ;;  %v22182_v27 = vpack.c.bf16 %v7765_v52, %v7766_v41  ;;  %v26167_v41 = vrot.slane %v21374_v21, 2  ;;  %v26175_v37 = vrot.slane %v21497_v39, 2  ;;  %v26184_v39 = vrot.slane %v26183_v46, 1  ;;  %v26279_v46 = vld [vmem:[#allocation21_spill] sm:$0xff] }
 0x48a   : > { %v7541_v12 = vsel %vm26157_vm1, %v26156_v60, %v7530_v31  ;;  %v26158_v53 = vmov %v26156_v60  ;;  %26162 = vst [vmem:[#allocation74_spill] sm:$0xff] %v22200_v35  ;;  %vm26163_vm3 = vmmov %vm26039_vm0  ;;  %v26166_v4 = vmov %v26164_v50  ;;  %v26174_v21 = vmov %v26171_v15 }
 0x48b   : > { %26153 = vst [vmem:[#allocation37_spill] sm:$0xff] %v22182_v27  ;;  %v7542_v55 = vsel %vm26160_vm4, %v26159_v19, %v26158_v53  ;;  %v7760_v52 = vsel %vm26163_vm3, %v7742_v61, %v25257_v23  ;;  %vm26165_vm5 = vmmov %vm26039_vm0  ;;  %v7534_v19 = vrot.slane %v21853_v34, 1  ;;  %v26309_v27 = vld [vmem:[#allocation142_spill] sm:$0xff] }
 0x48c   : > { %v22197_v5 = vpack.c.bf16 %v7541_v12, %v7542_v55  ;;  %v7761_v31 = vsel %vm26165_vm5, %v26164_v50, %v7742_v61  ;;  %vm26168_vm2 = vmmov %vm26039_vm0  ;;  %v22216_v60 = vpack.c.bf16 %v21860_v63, %v7760_v52  ;;  %v26179_v52 = vrot.slane %v21706_v3, 1 }
 0x48d   : > { %v7762_v43 = vsel %vm26168_vm2, %v26167_v41, %v26166_v4  ;;  %vm26170_vm11 = vmmov %vm26039_vm0 }
 0x48e   : > { %26161 = vst [vmem:[#allocation75_spill] sm:$0xff] %v22197_v5  ;;  %26169 = vst [vmem:[#allocation105_spill] sm:$0xff] %v22216_v60  ;;  %v7756_v51 = vsel %vm26170_vm11, %v7746_v44, %v25257_v23  ;;  %v22225_v61 = vpack.c.bf16 %v7761_v31, %v7762_v43  ;;  %v26188_v31 = vld [vmem:[#allocation28_spill] sm:$0xff]  ;;  %v26192_v41 = vmov %v26179_v52 }
 0x48f   : > { %vm26172_vm14 = vmmov %vm26039_vm0  ;;  %v22234_v53 = vpack.c.bf16 %v21893_v26, %v7756_v51  ;;  %v26187_v26 = vld [vmem:[#allocation176_spill] sm:$0xff]  ;;  %vm26189_vm10 = vnez %v26188_v31  ;;  %v26195_v51 = vld [vmem:[#allocation26_spill] sm:$0xff] }
 0x490   : > { %v7757_v12 = vsel %vm26172_vm14, %v26171_v15, %v7746_v44  ;;  %26173 = vst [vmem:[#allocation15_spill] sm:$0xff] %v22225_v61  ;;  %vm26176_vm13 = vmmov %vm26039_vm0  ;;  %15021 = vmatmul.mubr.msk.bf16.gmra.mrb[116].mxu1 %vm26189_vm10, %v26187_v26  ;;  %v26196_v15 = vld [vmem:[#allocation45_spill] sm:$0xff]  ;;  %v7749_v26 = vrot.slane %v21706_v3, 2  ;;  %v26204_v31 = vld [vmem:[#allocation128_spill] sm:$0xff] }
 0x491   : > { %v7758_v63 = vsel %vm26176_vm13, %v26175_v37, %v26174_v21  ;;  %26177 = vst [vmem:[#allocation81_spill] sm:$0xff] %v22234_v53  ;;  %vm26181_vm7 = vmmov %vm26157_vm1  ;;  %vm26197_vm12 = vnez %v26196_v15  ;;  %v26210_v15 = vld [vmem:[#allocation118_spill] sm:$0xff]  ;;  %v26268_v37 = vld [vmem:[#allocation71_spill] sm:$0xff]  ;;  %v15082_v21 = vpop.f32.mrb[104].mxu0 }
 0x492   : > { %v22237_v55 = vpack.c.bf16 %v7757_v12, %v7758_v63  ;;  %v22245_v44 = vsel %vm26181_vm7, %v26180_v36, %v26179_v52  ;;  %vm26185_vm0 = vmmov %vm26157_vm1  ;;  %15024 = vmatprep.mubr.msk.bf16.mxu1 %vm26197_vm12, %v26195_v51  ;;  %v26198_v12 = vld [vmem:[#allocation103_spill] sm:$0xff]  ;;  %v26199_v63 = vrot.slane %v20086_v30, 1  ;;  %v26208_v51 = vld [vmem:[#allocation16_spill] sm:$0xff] }
 0x493   : > { %26182 = vst [vmem:[#allocation155_spill] sm:$0xff] %v22245_v44  ;;  %v22252_v50 = vsel %vm26185_vm0, %v25128_v25, %v26184_v39  ;;  %vm26190_vm8 = vmmov %vm26185_vm0  ;;  %15260 = vmatprep.mubr.bf16.mxu0 %v26198_v12  ;;  %v26207_v30 = vld [vmem:[#allocation43_spill] sm:$0xff]  ;;  %vm26209_vm4 = vnez %v26208_v51  ;;  %v26292_v53 = vld [vmem:[#allocation117_spill] sm:$0xff] }
 0x494   : > { %26178 = vst [vmem:[#allocation94_spill] sm:$0xff] %v22237_v55  ;;  %26186 = vst [vmem:[#allocation85_spill] sm:$0xff] %v22252_v50  ;;  %v22261_v4 = vsel %vm26190_vm8, %v7534_v19, %v25128_v25  ;;  %v26219_v51 = vld [vmem:[#allocation131_spill] sm:$0xff]  ;;  %v26296_v55 = vld [vmem:[#allocation34_spill] sm:$0xff] }
 0x495   : > { %26191 = vst [vmem:[#allocation97_spill] sm:$0xff] %v22261_v4  ;;  %vm26193_vm15 = vmmov %vm26185_vm0 }
 0x496   : > { %v22267_v43 = vsel %vm26193_vm15, %v26192_v41, %v7534_v19  ;;  %vm26200_vm6 = vmmov %vm26185_vm0  ;;  %v26201_v19 = vrot.slane %v21359_v56, 1  ;;  %v26205_v41 = vld [vmem:[#allocation129_spill] sm:$0xff]  ;;  %v24212_v56 = vrot.slane %v21853_v34, 2  ;;  %v26272_v34 = vld [vmem:[#allocation35_spill] sm:$0xff] }
 0x497   : > { %26194 = vst [vmem:[#allocation140_spill] sm:$0xff] %v22267_v43  ;;  %v7583_v52 = vsel %vm26200_vm6, %v25128_v25, %v26199_v63  ;;  %vm26202_vm9 = vmmov %vm26185_vm0  ;;  %vm26206_vm1 = vnez %v26205_v41  ;;  %v26211_v63 = vrot.slane %v25853_v29, 1  ;;  %v26262_v41 = vld [vmem:[#allocation52_spill] sm:$0xff] }
 0x498   : > { %v7584_v36 = vsel %vm26202_vm9, %v26201_v19, %v25128_v25  ;;  %15025 = vmatmul.mubr.msk.bf16.gmra.mrb[120].mxu1 %vm26206_vm1, %v26204_v31  ;;  %vm26212_vm3 = vmmov %vm26185_vm0  ;;  %v26215_v19 = vrot.slane %v21687_v10, 2  ;;  %v26217_v31 = vrot.slane %v21456_v11, 1  ;;  %v26222_v10 = vld [vmem:[#allocation66_spill] sm:$0xff]  ;;  %v26226_v11 = vrot.slane %v26079_v24, 1 }
 0x499   : > { %v22287_v39 = vpack.c.bf16 %v7583_v52, %v7584_v36  ;;  %15028 = vmatprep.mubr.msk.bf16.mxu1 %vm26209_vm4, %v26207_v30  ;;  %v7579_v3 = vsel %vm26212_vm3, %v25128_v25, %v26211_v63  ;;  %vm26213_vm5 = vmmov %vm26168_vm2  ;;  %v26220_v63 = vld [vmem:[#allocation134_spill] sm:$0xff] }
 0x49a   : > { %v22308_v52 = vsel %vm26213_vm5, %v7749_v26, %v24212_v56  ;;  %v22314_v36 = vsel %vm26168_vm2, %v26215_v19, %v7749_v26  ;;  %vm26218_vm11 = vmmov %vm26185_vm0  ;;  %vm26221_vm14 = vnez %v26220_v63  ;;  %v26223_v26 = vld [vmem:[#allocation56_spill] sm:$0xff]  ;;  %v26225_v19 = vld [vmem:[#allocation59_spill] sm:$0xff] }
 0x49b   : > { %26203 = vst [vmem:[#allocation139_spill] sm:$0xff] %v22287_v39  ;;  %15261 = vmatmul.mubr.bf16.gmra.mrb[188].mxu0 %v22287_v39  ;;  %26214 = vst [vmem:[#allocation80_spill] sm:$0xff] %v22308_v52  ;;  %v7580_v29 = vsel %vm26218_vm11, %v26217_v31, %v25128_v25  ;;  %vm26224_vm13 = vnez %v26223_v26  ;;  %v26229_v63 = vld [vmem:[#allocation136_spill] sm:$0xff]  ;;  %v26230_v56 = vld [vmem:[#allocation42_spill] sm:$0xff] }
 0x49c   : > { %15264 = vmatprep.mubr.bf16.mxu0 %v26210_v15  ;;  %26216 = vst [vmem:[#allocation137_spill] sm:$0xff] %v22314_v36  ;;  %v22323_v30 = vpack.c.bf16 %v7579_v3, %v7580_v29  ;;  %vm26227_vm7 = vmmov %vm26185_vm0  ;;  %v26228_v3 = vrot.slane %v21536_v0, 1  ;;  %vm26231_vm10 = vnez %v26230_v56  ;;  %v26233_v24 = vld [vmem:[#allocation90_spill] sm:$0xff]  ;;  %v26235_v26 = vld [vmem:[#allocation104_spill] sm:$0xff] }
 0x49d   : > { %v7575_v31 = vsel %vm26227_vm7, %v25128_v25, %v26226_v11  ;;  %vm26234_vm8 = vnez %v26233_v24  ;;  %v26236_v11 = vrot.slane %v26088_v57, 1  ;;  %vm26237_vm15 = vmmov %vm26185_vm0  ;;  %v26244_v57 = vld [vmem:[#allocation132_spill] sm:$0xff]  ;;  %v26246_v24 = vld [vmem:[#allocation123_spill] sm:$0xff]  ;;  %vm26273_vm7 = vnez %v26272_v34 }
 0x49e   : > { %v7576_v29 = vsel %vm26185_vm0, %v26228_v3, %v25128_v25  ;;  %vm26239_vm12 = vmmov %vm26185_vm0  ;;  %vm26245_vm9 = vnez %v26244_v57  ;;  %v26257_v57 = vld [vmem:[#allocation89_spill] sm:$0xff]  ;;  %v26276_v36 = vld [vmem:[#allocation100_spill] sm:$0xff] }
 0x49f   : > { %v7571_v0 = vsel %vm26237_vm15, %v25128_v25, %v26236_v11  ;;  %v26247_v11 = vrot.slane %v25902_v13, 1  ;;  %vm26248_vm1 = vmmov %vm26185_vm0  ;;  %v26255_v13 = vld [vmem:[#allocation109_spill] sm:$0xff] }
 0x4a0   : > { %15029 = vmatmul.mubr.msk.bf16.gmra.mrb[124].mxu1 %vm26221_vm14, %v26219_v51  ;;  %v22343_v51 = vpack.c.bf16 %v7575_v31, %v7576_v29  ;;  %v26238_v31 = vrot.slane %v21567_v7, 1  ;;  %v26240_v29 = vld [vmem:[#allocation44_spill] sm:$0xff]  ;;  %vm26250_vm4 = vmmov %vm26185_vm0  ;;  %vm26256_vm5 = vnez %v26255_v13 }
 0x4a1   : > { %15032 = vmatprep.mubr.msk.bf16.mxu1 %vm26224_vm13, %v26222_v10  ;;  %v26232_v10 = vld [vmem:[#allocation96_spill] sm:$0xff]  ;;  %v7567_v7 = vsel %vm26248_vm1, %v25128_v25, %v26247_v11  ;;  %v26258_v11 = vrot.slane %v20706_v28, 1  ;;  %vm26259_vm2 = vmmov %vm26185_vm0  ;;  %v26263_v28 = vld [vmem:[#allocation135_spill] sm:$0xff] }
 0x4a2   : > { %v7572_v56 = vsel %vm26239_vm12, %v26238_v31, %v25128_v25  ;;  %vm26261_vm11 = vmmov %vm26185_vm0  ;;  %vm26264_vm14 = vnez %v26263_v28  ;;  %vm26277_vm0 = vnez %v26276_v36  ;;  %v26281_v36 = vld [vmem:[#allocation22_spill] sm:$0xff] }
 0x4a3   : > { %15265 = vmatmul.mubr.bf16.gmra.mrb[192].mxu0 %v22323_v30  ;;  %v22363_v3 = vpack.c.bf16 %v7571_v0, %v7572_v56  ;;  %v26249_v0 = vrot.slane %v21596_v38, 1  ;;  %v7563_v38 = vsel %vm26259_vm2, %v25128_v25, %v26258_v11  ;;  %v26265_v11 = vld [vmem:[#allocation162_spill] sm:$0xff] }
 0x4a4   : > { %15268 = vmatprep.mubr.bf16.mxu0 %v26225_v19 }
 0x4a5   : > { %v7568_v31 = vsel %vm26250_vm4, %v26249_v0, %v25128_v25 }
 0x4a6   : > { %v22383_v56 = vpack.c.bf16 %v7567_v7, %v7568_v31  ;;  %v14922_v7 = vpop.f32.mrb[32].mxu1  ;;  %v26260_v31 = vrot.slane %v21637_v16, 1 }
 0x4a7   : > { %v22398_v0 = vpop.f32.mrb[33].mxu1  ;;  %v26266_v7 = vld [vmem:[#allocation149_spill] sm:$0xff] }
 0x4a8   : > { %15033 = vmatmul.mubr.msk.bf16.gmra.mrb[128].mxu1 %vm26231_vm10, %v26229_v63  ;;  %v26241_v63 = vld [vmem:[#allocation18_spill] sm:$0xff]  ;;  %vm26267_vm13 = vnez %v26266_v7  ;;  %v26274_v7 = vld [vmem:[#allocation92_spill] sm:$0xff]  ;;  %vm26280_vm10 = vnez %v26279_v46 }
 0x4a9   : > { %15036 = vmatprep.mubr.msk.bf16.mxu1 %vm26234_vm8, %v26232_v10  ;;  %vm26242_vm6 = vnez %v26241_v63  ;;  %v26243_v10 = vld [vmem:[#allocation50_spill] sm:$0xff]  ;;  %v26252_v63 = vld [vmem:[#allocation107_spill] sm:$0xff] }
 0x4aa   : > { %vm26253_vm3 = vnez %v26252_v63  ;;  %v14923_v63 = vpop.f32.mrb[34].mxu1 }
 0x4ab   : > { %15269 = vmatmul.mubr.bf16.gmra.mrb[196].mxu0 %v22343_v51 }
 0x4ac   : > { %15272 = vmatprep.mubr.bf16.mxu0 %v26235_v26 }
 0x4b0   : > { %15037 = vmatmul.mubr.msk.bf16.gmra.mrb[132].mxu1 %vm26242_vm6, %v26240_v29  ;;  %v26251_v29 = vld [vmem:[#allocation153_spill] sm:$0xff] }
 0x4b1   : > { %15040 = vmatprep.mubr.msk.bf16.mxu1 %vm26245_vm9, %v26243_v10  ;;  %v26254_v10 = vld [vmem:[#allocation68_spill] sm:$0xff]  ;;  %vm26312_vm9 = vcmp.lt.s32.totalorder %v16193_v45, 6 }
 0x4b2   : > { %vm26313_vm1 = vmmov %vm26312_vm9 }
 0x4b3   : > { %15273 = vmatmul.mubr.bf16.gmra.mrb[200].mxu0 %v22363_v3  ;;  %vm26321_vm4 = vmmov %vm26313_vm1 }
 0x4b4   : > { %15276 = vmatprep.mubr.bf16.mxu0 %v26246_v24  ;;  %vm26333_vm2 = vmmov %vm26313_vm1 }
 0x4b8   : > { %15041 = vmatmul.mubr.msk.bf16.gmra.mrb[136].mxu1 %vm26253_vm3, %v26251_v29  ;;  %v7564_v29 = vsel %vm26261_vm11, %v26260_v31, %v25128_v25  ;;  %vm26323_vm3 = vmmov %vm26313_vm1 }
 0x4b9   : > { %15044 = vmatprep.mubr.msk.bf16.mxu1 %vm26256_vm5, %v26254_v10  ;;  %v22405_v13 = vpack.c.bf16 %v7563_v38, %v7564_v29  ;;  %v22407_v10 = vpop.f32.mrb[35].mxu1  ;;  %v22419_v38 = vpop.f32.mrb[105].mxu0  ;;  %vm26329_vm5 = vmmov %vm26313_vm1 }
 0x4ba   : > { %v14926_v16 = vpop.f32.mrb[36].mxu1  ;;  %26269 = vst [vmem:[#allocation13_spill] sm:$0xff] %v22419_v38  ;;  %v15083_v29 = vpop.f32.mrb[106].mxu0  ;;  %v26290_v38 = vld [vmem:[#allocation57_spill] sm:$0xff]  ;;  %vm26518_vm11 = vmmov %vm26313_vm1 }
 0x4bb   : > { %15277 = vmatmul.mubr.bf16.gmra.mrb[204].mxu0 %v22383_v56  ;;  %v22417_v25 = vpop.f32.mrb[37].mxu1  ;;  %v22423_v28 = vpop.f32.mrb[107].mxu0  ;;  %vm26291_vm15 = vnez %v26290_v38 }
 0x4bc   : > { %15280 = vmatprep.mubr.bf16.mxu0 %v26257_v57  ;;  %v14927_v31 = vpop.f32.mrb[38].mxu1  ;;  %26270 = vst [vmem:[#allocation19_spill] sm:$0xff] %v22423_v28  ;;  %v15086_v16 = vpop.f32.mrb[108].mxu0 }
 0x4bd   : > { %v22421_v63 = vpop.f32.mrb[39].mxu1  ;;  %v22435_v29 = vpop.f32.mrb[109].mxu0 }
 0x4be   : > { %v14930_v21 = vpop.f32.mrb[40].mxu1  ;;  %v15087_v4 = vpop.f32.mrb[110].mxu0 }
 0x4bf   : > { %v22433_v31 = vpop.f32.mrb[41].mxu1  ;;  %v22439_v34 = vpop.f32.mrb[111].mxu0  ;;  %v26284_v21 = vld [vmem:[#allocation61_spill] sm:$0xff] }
 0x4c0   : > { %15045 = vmatmul.mubr.msk.bf16.gmra.mrb[140].mxu1 %vm26264_vm14, %v26262_v41  ;;  %v26271_v41 = vld [vmem:[#allocation151_spill] sm:$0xff]  ;;  %v14931_v52 = vpop.f32.mrb[42].mxu1  ;;  %v22452_v4 = vld [vmem:[%s23672_s3 + $0x200] sm:$0xff]   ;;  %v15090_v16 = vpop.f32.mrb[112].mxu0  ;;  %vm26519_vm14 = vmmov %vm26313_vm1 }
 0x4c1   : > { %15048 = vmatprep.mubr.msk.bf16.mxu1 %vm26267_vm13, %v26265_v11  ;;  %v26275_v11 = vld [vmem:[#allocation152_spill] sm:$0xff]  ;;  %v22437_v50 = vpop.f32.mrb[43].mxu1  ;;  %26285 = vst [vmem:[#allocation88_spill] sm:$0xff] %v22452_v4  ;;  %15544 = vmatprep.subr.bf16.mxu0 %v22452_v4  ;;  %v22457_v46 = vpop.f32.mrb[113].mxu0  ;;  %vm26527_vm13 = vmmov %vm26313_vm1 }
 0x4c2   : > { %v14934_v52 = vpop.f32.mrb[44].mxu1  ;;  %v15091_v43 = vpop.f32.mrb[114].mxu0  ;;  %v26294_v16 = vld [vmem:[#allocation160_spill] sm:$0xff] }
 0x4c3   : > { %15281 = vmatmul.mubr.bf16.gmra.mrb[208].mxu0 %v22405_v13  ;;  %v22455_v44 = vpop.f32.mrb[45].mxu1  ;;  %v26293_v52 = vld [vmem:[#allocation116_spill] sm:$0xff]  ;;  %vm26295_vm12 = vnez %v26294_v16  ;;  %v26304_v16 = vld [vmem:[#allocation98_spill] sm:$0xff] }
 0x4c4   : > { %15284 = vmatprep.mubr.bf16.mxu0 %v26268_v37  ;;  %26286 = vst [vmem:[#allocation76_spill] sm:$0xff] %v22455_v44 }
 0x4c8   : > { %15049 = vmatmul.mubr.msk.bf16.gmra.mrb[144].mxu1 %vm26273_vm7, %v26271_v41  ;;  %v26278_v41 = vld [vmem:[#allocation154_spill] sm:$0xff]  ;;  %vm26528_vm7 = vmmov %vm26313_vm1 }
 0x4c9   : > { %15052 = vmatprep.mubr.msk.bf16.mxu1 %vm26277_vm0, %v26275_v11  ;;  %v26282_v11 = vld [vmem:[#allocation106_spill] sm:$0xff]  ;;  %vm26584_vm0 = vmmov %vm26313_vm1 }
 0x4ca   : > { %vm26283_vm8 = vnez %v26282_v11  ;;  %v26289_v11 = vld [vmem:[#allocation157_spill] sm:$0xff] }
 0x4cb   : > { %15285 = vmatmul.mubr.bf16.gmra.mrb[212].mxu0 %v26274_v7 }
 0x4cc   : > { %15288 = vmatprep.mubr.bf16.mxu0 %v21762_v32 }
 0x4d0   : > { %15053 = vmatmul.mubr.msk.bf16.gmra.mrb[148].mxu1 %vm26280_vm10, %v26278_v41  ;;  %v14935_v41 = vpop.f32.mrb[46].mxu1  ;;  %vm26587_vm10 = vmmov %vm26584_vm0 }
 0x4d1   : > { %15056 = vmatprep.mubr.msk.bf16.mxu1 %vm26283_vm8, %v26281_v36  ;;  %v22459_v28 = vpop.f32.mrb[47].mxu1  ;;  %v22461_v36 = vpop.f32.mrb[115].mxu0 }
 0x4d2   : > { %26287 = vst [vmem:[#allocation146_spill] sm:$0xff] %v22459_v28  ;;  %26288 = vst [vmem:[#allocation54_spill] sm:$0xff] %v22461_v36  ;;  %v14938_v60 = vpop.f32.mrb[48].mxu1  ;;  %v15094_v35 = vpop.f32.mrb[116].mxu0  ;;  %v26302_v28 = vld [vmem:[#allocation150_spill] sm:$0xff] }
 0x4d3   : > { %15289 = vmatmul.mubr.bf16.gmra.mrb[216].mxu0 %v21765_v17  ;;  %v22471_v41 = vpop.f32.mrb[49].mxu1  ;;  %v22473_v43 = vpop.f32.mrb[117].mxu0  ;;  %vm26303_vm6 = vnez %v26302_v28  ;;  %v26306_v60 = vld [vmem:[#allocation49_spill] sm:$0xff]  ;;  %v26307_v35 = vld [vmem:[#allocation62_spill] sm:$0xff] }
 0x4d4   : > { %15292 = vmatprep.mubr.bf16.mxu0 %v26284_v21  ;;  %26297 = vst [vmem:[#allocation82_spill] sm:$0xff] %v22471_v41  ;;  %26298 = vst [vmem:[#allocation51_spill] sm:$0xff] %v22473_v43  ;;  %v14939_v61 = vpop.f32.mrb[50].mxu1  ;;  %v15095_v5 = vpop.f32.mrb[118].mxu0  ;;  %v26308_v41 = vld [vmem:[#allocation67_spill] sm:$0xff] }
 0x4d5   : > { %v22475_v59 = vpop.f32.mrb[51].mxu1  ;;  %v22477_v38 = vpop.f32.mrb[119].mxu0  ;;  %v24229_v43 = vrot.slane %v26308_v41, 2 }
 0x4d6   : > { %26299 = vst [vmem:[#allocation20_spill] sm:$0xff] %v22475_v59  ;;  %26300 = vst [vmem:[#allocation147_spill] sm:$0xff] %v22477_v38  ;;  %v14942_v61 = vpop.f32.mrb[52].mxu1  ;;  %v15098_v5 = vpop.f32.mrb[120].mxu0  ;;  %v7686_v59 = vrot.slane %v26309_v27, 2  ;;  %v15896_v27 = vld [vmem:[%s23672_s3 + $0x1c8] sm:$0xff]  }
 0x4d7   : > { %v22488_v36 = vpop.f32.mrb[53].mxu1  ;;  %v22490_v38 = vpop.f32.mrb[121].mxu0  ;;  %v26316_v5 = vld [vmem:[#allocation83_spill] sm:$0xff] }
 0x4d8   : > { %15057 = vmatmul.mubr.msk.bf16.gmra.mrb[152].mxu1 %vm26291_vm15, %v26289_v11  ;;  %v26301_v11 = vld [vmem:[#allocation148_spill] sm:$0xff]  ;;  %26310 = vst [vmem:[#allocation159_spill] sm:$0xff] %v22488_v36  ;;  %26311 = vst [vmem:[#allocation156_spill] sm:$0xff] %v22490_v38  ;;  %v14943_v28 = vpop.f32.mrb[54].mxu1 }
 0x4d9   : > { %15060 = vmatprep.mubr.msk.bf16.mxu1 %vm26295_vm12, %v26293_v52  ;;  %v26305_v52 = vld [vmem:[#allocation91_spill] sm:$0xff] }
 0x4da   : > { %v7685_v44 = vrot.slane %v26305_v52, 2  ;;  %v26317_v28 = vld [vmem:[#allocation23_spill] sm:$0xff] }
 0x4db   : > { %15293 = vmatmul.mubr.bf16.gmra.mrb[220].mxu0 %v26292_v53 }
 0x4dc   : > { %15296 = vmatprep.mubr.bf16.mxu0 %v26296_v55  ;;  %v7817_v6 = vsel %vm26312_vm9, %v7685_v44, %v7686_v59  ;;  %v7818_v52 = vsel %vm26313_vm1, %v24229_v43, %v7685_v44  ;;  %v15897_v44 = vld [vmem:[%s23672_s3 + $0x1d0] sm:$0xff]  }
 0x4dd   : > { %v26319_v43 = vld [vmem:[#allocation63_spill] sm:$0xff] }
 0x4de   : > { %v26320_v41 = vrot.slane %v26319_v43, 2 }
 0x4e0   : > { %15061 = vmatmul.mubr.msk.bf16.gmra.mrb[156].mxu1 %vm26303_vm6, %v26301_v11  ;;  %v15099_v11 = vpop.f32.mrb[122].mxu0 }
 0x4e1   : > { %15160 = vmatprep.mubr.bf16.mxu1 %v26306_v60  ;;  %v22498_v60 = vpop.f32.mrb[55].mxu1  ;;  %v22500_v61 = vpop.f32.mrb[123].mxu0  ;;  %v22507_v11 = vpack.c.bf16 %v7817_v6, %v7818_v52 }
 0x4e2   : > { %26314 = vst [vmem:[#allocation55_spill] sm:$0xff] %v22498_v60  ;;  %26315 = vst [vmem:[#allocation144_spill] sm:$0xff] %v22500_v61  ;;  %v14946_v60 = vpop.f32.mrb[56].mxu1  ;;  %v15102_v6 = vpop.f32.mrb[124].mxu0 }
 0x4e3   : > { %15297 = vmatmul.mubr.bf16.gmra.mrb[224].mxu0 %v26304_v16  ;;  %26318 = vst [vmem:[#allocation84_spill] sm:$0xff] %v22507_v11  ;;  %v22520_v52 = vpop.f32.mrb[57].mxu1  ;;  %v22522_v36 = vpop.f32.mrb[125].mxu0  ;;  %v15903_v60 = vld [vmem:[%s23672_s3 + $0x208] sm:$0xff]  }
 0x4e4   : > { %15300 = vmatprep.mubr.bf16.mxu0 %v26307_v35  ;;  %26322 = vst [vmem:[#allocation138_spill] sm:$0xff] %v22520_v52 }
 0x4e8   : > { %15161 = vmatmul.mubr.bf16.vlgmr.msra.gmra.mrb[160].mxu1 %v26316_v5  ;;  %v7815_v5 = vsel %vm26321_vm4, %v25257_v23, %v26320_v41  ;;  %v15898_v41 = vld [vmem:[%s23672_s3 + $0x1d8] sm:$0xff]  }
 0x4e9   : > { %15164 = vmatprep.mubr.bf16.mxu1 %v26020_v14  ;;  %15305 = vmatpush3.bf16.msra.mxu1 %v22058_v58  ;;  %v7816_v58 = vsel %vm26323_vm3, %v7686_v59, %v25257_v23  ;;  %v15103_v14 = vpop.f32.mrb[126].mxu0  ;;  %v26327_v59 = vld [vmem:[#allocation113_spill] sm:$0xff] }
 0x4ea   : > { %15306 = vmatprep.subr.bf16.mxu1 %v15896_v27  ;;  %v22527_v61 = vpack.c.bf16 %v7815_v5, %v7816_v58  ;;  %v22531_v38 = vpop.f32.mrb[127].mxu0  ;;  %v26326_v14 = vld [vmem:[#allocation127_spill] sm:$0xff]  ;;  %v15899_v58 = vld [vmem:[%s23672_s3 + $0x1e0] sm:$0xff]  }
 0x4eb   : > { %15301 = vmatmul.mubr.bf16.gmra.mrb[228].mxu0 %v26317_v28  ;;  %v15106_v6 = vpop.f32.mrb[128].mxu0 }
 0x4ec   : > { %15400 = vmatprep.mubr.bf16.mxu0 %v22507_v11  ;;  %v14947_v11 = vpop.f32.mrb[58].mxu1  ;;  %26324 = vst [vmem:[#allocation163_spill] sm:$0xff] %v22527_v61 }
 0x4ed   : > { %15307 = vmatpush3.bf16.msra.mxu1 %v15896_v27  ;;  %v22529_v43 = vpop.f32.mrb[59].mxu1  ;;  %v26328_v27 = vrot.slane %v26327_v59, 2  ;;  %v26331_v59 = vld [vmem:[#allocation108_spill] sm:$0xff] }
 0x4ee   : > { %26325 = vst [vmem:[#allocation87_spill] sm:$0xff] %v22529_v43  ;;  %15308 = vmatprep.subr.bf16.mxu1 %v15897_v44  ;;  %v14950_v5 = vpop.f32.mrb[60].mxu1  ;;  %v26332_v43 = vrot.slane %v26331_v59, 2  ;;  %v15901_v59 = vld [vmem:[%s23672_s3 + $0x1f0] sm:$0xff]  }
 0x4ef   : > { %v7811_v11 = vsel %vm26329_vm5, %v25257_v23, %v26328_v27 }
 0x4f0   : > { %15165 = vmatmul.mubr.bf16.gmra.mrb[164].mxu1 %v26067_v1  ;;  %v7812_v27 = vsel %vm26333_vm2, %v26332_v43, %v25257_v23  ;;  %v15906_v43 = vld [vmem:[%s23672_s3 + $0x218] sm:$0xff]  }
 0x4f1   : > { %15168 = vmatprep.mubr.bf16.mxu1 %v26075_v54  ;;  %15309 = vmatpush3.bf16.msra.mxu1 %v15897_v44  ;;  %v15905_v44 = vld [vmem:[%s23672_s3 + $0x210] sm:$0xff]   ;;  %v22564_v52 = vpack.c.bf16 %v7811_v11, %v7812_v27  ;;  %v26334_v11 = vld [vmem:[#allocation64_spill] sm:$0xff]  ;;  %v15907_v27 = vld [vmem:[%s23672_s3 + $0x220] sm:$0xff]  }
 0x4f2   : > { %15310 = vmatprep.subr.bf16.mxu1 %v15898_v41 }
 0x4f3   : > { %15401 = vmatmul.mubr.bf16.vlgmr.msra.gmra.mrb[232].mxu0 %v22527_v61  ;;  %v22555_v61 = vpop.f32.mrb[61].mxu1 }
 0x4f4   : > { %15404 = vmatprep.mubr.bf16.mxu0 %v26326_v14  ;;  %15545 = vmatpush3.bf16.msra.mxu0 %v22452_v4  ;;  %26330 = vst [vmem:[#allocation112_spill] sm:$0xff] %v22555_v61  ;;  %v22557_v4 = vpop.f32.mrb[129].mxu0  ;;  %v14951_v5 = vpop.f32.mrb[62].mxu1  ;;  %v15900_v61 = vld [vmem:[%s23672_s3 + $0x1e8] sm:$0xff]  }
 0x4f5   : > { %15546 = vmatprep.subr.bf16.mxu0 %v15903_v60  ;;  %v15107_v6 = vpop.f32.mrb[130].mxu0  ;;  %v22566_v14 = vpop.f32.mrb[63].mxu1  ;;  %15311 = vmatpush3.bf16.msra.mxu1 %v15898_v41 }
 0x4f6   : > { %v22568_v54 = vpop.f32.mrb[131].mxu0  ;;  %15312 = vmatprep.subr.bf16.mxu1 %v15899_v58  ;;  %v14954_v41 = vpop.f32.mrb[64].mxu1 }
 0x4f7   : > { %v22586_v5 = vpop.f32.mrb[65].mxu1  ;;  %v15904_v41 = vld [vmem:[%s23672_s3 + $0x1f8] sm:$0xff]  }
 0x4f8   : > { %15547 = vmatpush3.bf16.msra.mxu0 %v15903_v60  ;;  %15169 = vmatmul.mubr.bf16.gmra.mrb[168].mxu1 %v26130_v18  ;;  %v15110_v60 = vpop.f32.mrb[132].mxu0  ;;  %26335 = vst [vmem:[#allocation36_spill] sm:$0xff] %v22586_v5  ;;  %v14955_v23 = vpop.f32.mrb[66].mxu1 }
 0x4f9   : > { %15548 = vmatprep.subr.bf16.mxu0 %v15905_v44  ;;  %15172 = vmatprep.mubr.bf16.mxu1 %v26137_v49  ;;  %v22588_v6 = vpop.f32.mrb[133].mxu0  ;;  %v22600_v60 = vld [vmem:[%s23672_s3 + $0x228] sm:$0xff]  }
 0x4fa   : > { %15313 = vmatpush3.bf16.msra.mxu1 %v15899_v58  ;;  %v15111_v45 = vpop.f32.mrb[134].mxu0  ;;  %v22590_v58 = vpop.f32.mrb[67].mxu1  ;;  %26337 = vst [vmem:[#allocation173_spill] sm:$0xff] %v22600_v60 }
 0x4fb   : > { %15405 = vmatmul.mubr.bf16.gmra.mrb[236].mxu0 %v22564_v52  ;;  %15314 = vmatprep.subr.bf16.mxu1 %v15900_v61  ;;  %26336 = vst [vmem:[#allocation39_spill] sm:$0xff] %v22590_v58  ;;  %v26338_v45 = vld [vmem:[#allocation119_spill] sm:$0xff]  ;;  %v14958_v23 = vpop.f32.mrb[68].mxu1 }
 0x4fc   : > { %15408 = vmatprep.mubr.bf16.mxu0 %v26334_v11  ;;  %15549 = vmatpush3.bf16.msra.mxu0 %v15905_v44  ;;  %v22592_v44 = vpop.f32.mrb[135].mxu0  ;;  %v22615_v58 = vld [vmem:[%s23672_s3 + $0x230] sm:$0xff]   ;;  %v22617_v5 = vpop.f32.mrb[69].mxu1 }
 0x4fd   : > { %15550 = vmatprep.subr.bf16.mxu0 %v15906_v43  ;;  %26339 = vst [vmem:[#allocation166_spill] sm:$0xff] %v22615_v58  ;;  %26340 = vst [vmem:[#allocation164_spill] sm:$0xff] %v22617_v5 }
 0x4fe   : > { %15315 = vmatpush3.bf16.msra.mxu1 %v15900_v61  ;;  %v15114_v61 = vpop.f32.mrb[136].mxu0 }
 0x4ff   : > { %15316 = vmatprep.subr.bf16.mxu1 %v15901_v59 }
 0x500   : > { %15551 = vmatpush3.bf16.msra.mxu0 %v15906_v43  ;;  %15173 = vmatmul.mubr.bf16.gmra.mrb[172].mxu1 %v21864_v40  ;;  %v22610_v43 = vld [vmem:[%s23672_s3 + $0x80] sm:$0xff]  }
 0x501   : > { %15552 = vmatprep.subr.bf16.mxu0 %v15907_v27  ;;  %15176 = vmatprep.mubr.bf16.mxu1 %v26198_v12  ;;  %v22631_v12 = vld [vmem:[%s23672_s3 + $0x238] sm:$0xff]  }
 0x502   : > { %15317 = vmatpush3.bf16.msra.mxu1 %v15901_v59  ;;  %v14959_v59 = vpop.f32.mrb[70].mxu1  ;;  %26343 = vst [vmem:[#allocation175_spill] sm:$0xff] %v22631_v12 }
 0x503   : > { %15409 = vmatmul.mubr.bf16.gmra.mrb[240].mxu0 %v26338_v45  ;;  %15318 = vmatprep.subr.bf16.mxu1 %v15904_v41  ;;  %v22621_v23 = vpop.f32.mrb[71].mxu1 }
 0x504   : > { %15412 = vmatprep.mubr.bf16.mxu0 %v21955_v62  ;;  %15553 = vmatpush3.bf16.msra.mxu0 %v15907_v27  ;;  %v22619_v62 = vpop.f32.mrb[137].mxu0  ;;  %26341 = vst [vmem:[#allocation125_spill] sm:$0xff] %v22621_v23 }
 0x505   : > { %15554 = vmatprep.subr.bf16.mxu0 %v22600_v60  ;;  %v15115_v27 = vpop.f32.mrb[138].mxu0 }
 0x506   : > { %v22623_v61 = vpop.f32.mrb[139].mxu0  ;;  %15319 = vmatpush3.bf16.msra.mxu1 %v15904_v41  ;;  %v14962_v41 = vpop.f32.mrb[72].mxu1 }
 0x507   : > { %26342 = vst [vmem:[#allocation77_spill] sm:$0xff] %v22623_v61  ;;  %15464 = vmatprep.subr.bf16.mxu1 %v22610_v43  ;;  %v15118_v59 = vpop.f32.mrb[140].mxu0  ;;  %v22639_v27 = vpop.f32.mrb[73].mxu1  ;;  %v26348_v41 = vld [vmem:[#allocation167_spill] sm:$0xff] }
 0x508   : > { %15555 = vmatpush3.bf16.msra.mxu0 %v22600_v60  ;;  %15177 = vmatmul.mubr.bf16.gmra.mrb[176].mxu1 %v22287_v39  ;;  %26344 = vst [vmem:[#allocation79_spill] sm:$0xff] %v22639_v27  ;;  %v22641_v60 = vpop.f32.mrb[141].mxu0  ;;  %v14963_v23 = vpop.f32.mrb[74].mxu1 }
 0x509   : > { %15556 = vmatprep.subr.bf16.mxu0 %v22615_v58  ;;  %15180 = vmatprep.mubr.bf16.mxu1 %v26210_v15  ;;  %26345 = vst [vmem:[#allocation40_spill] sm:$0xff] %v22641_v60  ;;  %v15119_v5 = vpop.f32.mrb[142].mxu0  ;;  %v22643_v61 = vpop.f32.mrb[75].mxu1 }
 0x50a   : > { %26346 = vst [vmem:[#allocation121_spill] sm:$0xff] %v22643_v61  ;;  %v22645_v39 = vpop.f32.mrb[143].mxu0  ;;  %v14966_v59 = vpop.f32.mrb[76].mxu1 }
 0x50b   : > { %15413 = vmatmul.mubr.bf16.gmra.mrb[244].mxu0 %v21952_v2  ;;  %26347 = vst [vmem:[#allocation30_spill] sm:$0xff] %v22645_v39  ;;  %v22652_v27 = vpop.f32.mrb[77].mxu1 }
 0x50c   : > { %15416 = vmatprep.mubr.bf16.mxu0 %v21970_v9  ;;  %15557 = vmatpush3.bf16.msra.mxu0 %v22615_v58  ;;  %v15122_v58 = vpop.f32.mrb[144].mxu0  ;;  %26349 = vst [vmem:[#allocation47_spill] sm:$0xff] %v22652_v27  ;;  %v14967_v5 = vpop.f32.mrb[78].mxu1 }
 0x50d   : > { %15558 = vmatprep.subr.bf16.mxu0 %v22631_v12  ;;  %v22654_v23 = vpop.f32.mrb[145].mxu0  ;;  %v22656_v60 = vpop.f32.mrb[79].mxu1 }
 0x50e   : > { %26350 = vst [vmem:[#allocation17_spill] sm:$0xff] %v22654_v23  ;;  %v15123_v61 = vpop.f32.mrb[146].mxu0  ;;  %26351 = vst [vmem:[#allocation169_spill] sm:$0xff] %v22656_v60  ;;  %v14970_v59 = vpop.f32.mrb[80].mxu1 }
 0x50f   : > { %v22658_v39 = vpop.f32.mrb[147].mxu0 }
 0x510   : > { %15559 = vmatpush3.bf16.msra.mxu0 %v22631_v12  ;;  %15181 = vmatmul.mubr.bf16.gmra.mrb[180].mxu1 %v22323_v30  ;;  %26352 = vst [vmem:[#allocation168_spill] sm:$0xff] %v22658_v39  ;;  %v26353_v12 = vld [vmem:[#allocation122_spill] sm:$0xff]  ;;  %v15126_v58 = vpop.f32.mrb[148].mxu0 }
 0x511   : > { %15184 = vmatprep.mubr.bf16.mxu1 %v26225_v19  ;;  %v22666_v27 = vpop.f32.mrb[149].mxu0  ;;  %v26358_v39 = vld [vmem:[#allocation10_spill] sm:$0xff] }
 0x512   : > { %26355 = vst [vmem:[#allocation143_spill] sm:$0xff] %v22666_v27  ;;  %v15127_v61 = vpop.f32.mrb[150].mxu0 }
 0x513   : > { %15417 = vmatmul.mubr.bf16.gmra.mrb[248].mxu0 %v21973_v8  ;;  %v22670_v60 = vpop.f32.mrb[151].mxu0 }
 0x514   : > { %15420 = vmatprep.mubr.bf16.mxu0 %v26348_v41  ;;  %v22664_v41 = vpop.f32.mrb[81].mxu1  ;;  %26357 = vst [vmem:[#allocation69_spill] sm:$0xff] %v22670_v60  ;;  %v15130_v58 = vpop.f32.mrb[152].mxu0  ;;  %v26364_v60 = vld [vmem:[#allocation31_spill] sm:$0xff] }
 0x515   : > { %26354 = vst [vmem:[#allocation114_spill] sm:$0xff] %v22664_v41  ;;  %v14971_v5 = vpop.f32.mrb[82].mxu1  ;;  %v22678_v41 = vpop.f32.mrb[153].mxu0 }
 0x516   : > { %v22668_v23 = vpop.f32.mrb[83].mxu1  ;;  %26361 = vst [vmem:[#allocation86_spill] sm:$0xff] %v22678_v41  ;;  %v15131_v61 = vpop.f32.mrb[154].mxu0 }
 0x517   : > { %26356 = vst [vmem:[#allocation170_spill] sm:$0xff] %v22668_v23  ;;  %v14974_v59 = vpop.f32.mrb[84].mxu1  ;;  %v22682_v23 = vpop.f32.mrb[155].mxu0 }
 0x518   : > { %15185 = vmatmul.mubr.bf16.gmra.mrb[184].mxu1 %v22343_v51  ;;  %26363 = vst [vmem:[#allocation110_spill] sm:$0xff] %v22682_v23  ;;  %v15134_v58 = vpop.f32.mrb[156].mxu0  ;;  %v26368_v23 = vld [vmem:[#allocation11_spill] sm:$0xff] }
 0x519   : > { %15188 = vmatprep.mubr.bf16.mxu1 %v26235_v26  ;;  %v26359_v26 = vld [vmem:[#allocation120_spill] sm:$0xff] }
 0x51b   : > { %15421 = vmatmul.mubr.bf16.gmra.mrb[252].mxu0 %v26353_v12 }
 0x51c   : > { %15424 = vmatprep.mubr.bf16.mxu0 %v22018_v48  ;;  %v22676_v48 = vpop.f32.mrb[85].mxu1 }
 0x51d   : > { %26360 = vst [vmem:[#allocation141_spill] sm:$0xff] %v22676_v48  ;;  %v14975_v5 = vpop.f32.mrb[86].mxu1  ;;  %v22690_v48 = vpop.f32.mrb[157].mxu0 }
 0x51e   : > { %v22680_v27 = vpop.f32.mrb[87].mxu1  ;;  %26366 = vst [vmem:[#allocation145_spill] sm:$0xff] %v22690_v48  ;;  %v15135_v61 = vpop.f32.mrb[158].mxu0 }
 0x51f   : > { %26362 = vst [vmem:[#allocation133_spill] sm:$0xff] %v22680_v27  ;;  %v14978_v59 = vpop.f32.mrb[88].mxu1  ;;  %v22694_v27 = vpop.f32.mrb[159].mxu0 }
 0x520   : > { %15189 = vmatmul.mubr.bf16.gmra.mrb[188].mxu1 %v22363_v3  ;;  %v15138_v58 = vpop.f32.mrb[160].mxu0 }
 0x521   : > { %15192 = vmatprep.mubr.bf16.mxu1 %v26246_v24 }
 0x523   : > { %15425 = vmatmul.mubr.bf16.gmra.mrb[0].mxu0 %v26358_v39 }
 0x524   : > { %15428 = vmatprep.mubr.bf16.mxu0 %v26359_v26  ;;  %v22688_v26 = vpop.f32.mrb[89].mxu1 }
 0x525   : > { %26365 = vst [vmem:[#allocation33_spill] sm:$0xff] %v22688_v26  ;;  %v14979_v5 = vpop.f32.mrb[90].mxu1  ;;  %v22702_v26 = vpop.f32.mrb[161].mxu0 }
 0x526   : > { %v22692_v41 = vpop.f32.mrb[91].mxu1  ;;  %26370 = vst [vmem:[#allocation161_spill] sm:$0xff] %v22702_v26  ;;  %v15139_v61 = vpop.f32.mrb[162].mxu0 }
 0x527   : > { %26367 = vst [vmem:[#allocation78_spill] sm:$0xff] %v22692_v41  ;;  %v14982_v59 = vpop.f32.mrb[92].mxu1  ;;  %v22706_v41 = vpop.f32.mrb[163].mxu0 }
 0x528   : > { %15193 = vmatmul.mubr.bf16.gmra.mrb[192].mxu1 %v22383_v56  ;;  %26372 = vst [vmem:[#allocation25_spill] sm:$0xff] %v22706_v41  ;;  %v15142_v58 = vpop.f32.mrb[164].mxu0 }
 0x529   : > { %15196 = vmatprep.mubr.bf16.mxu1 %v26257_v57 }
 0x52b   : > { %15429 = vmatmul.mubr.bf16.gmra.mrb[4].mxu0 %v26364_v60 }
 0x52c   : > { %15432 = vmatprep.mubr.bf16.mxu0 %v22076_v42  ;;  %v22700_v42 = vpop.f32.mrb[93].mxu1 }
 0x52d   : > { %26369 = vst [vmem:[#allocation60_spill] sm:$0xff] %v22700_v42  ;;  %v14983_v5 = vpop.f32.mrb[94].mxu1  ;;  %v22712_v42 = vpop.f32.mrb[165].mxu0 }
 0x52e   : > { %v22704_v48 = vpop.f32.mrb[95].mxu1  ;;  %26374 = vst [vmem:[#allocation174_spill] sm:$0xff] %v22712_v42 }
 0x52f   : > { %26371 = vst [vmem:[#allocation111_spill] sm:$0xff] %v22704_v48  ;;  %v15002_v59 = vpop.f32.mrb[96].mxu1  ;;  %v15143_v48 = vpop.f32.mrb[166].mxu0 }
 0x530   : > { %15197 = vmatmul.mubr.bf16.gmra.mrb[196].mxu1 %v22405_v13  ;;  %v22717_v41 = vpop.f32.mrb[167].mxu0 }
 0x531   : > { %15200 = vmatprep.mubr.bf16.mxu1 %v26268_v37  ;;  %v26373_v37 = vld [vmem:[#allocation126_spill] sm:$0xff]  ;;  %26375 = vst [vmem:[#allocation171_spill] sm:$0xff] %v22717_v41  ;;  %v15242_v58 = vpop.f32.mrb[168].mxu0 }
 0x533   : > { %15433 = vmatmul.mubr.bf16.gmra.mrb[8].mxu0 %v26368_v23 }
 0x534   : > { %15436 = vmatprep.mubr.bf16.mxu0 %v22091_v22  ;;  %v8382_v22 = vpop.f32.mrb[97].mxu1 }
 0x535   : > { %v22715_v5 = vadd.f32 %v8382_v22, %v22398_v0  ;;  %v15003_v61 = vpop.f32.mrb[98].mxu1  ;;  %v22726_v0 = vpop.f32.mrb[169].mxu0 }
 0x536   : > { %v8385_v26 = vpop.f32.mrb[99].mxu1  ;;  %v15243_v41 = vpop.f32.mrb[170].mxu0 }
 0x537   : > { %v15006_v59 = vpop.f32.mrb[100].mxu1 }
 0x538   : > { %15201 = vmatmul.mubr.bf16.gmra.mrb[200].mxu1 %v26274_v7  ;;  %v22720_v7 = vadd.f32 %v8385_v26, %v22407_v10  ;;  %v8398_v22 = vpop.f32.mrb[101].mxu1  ;;  %v22729_v26 = vpop.f32.mrb[171].mxu0 }
 0x539   : > { %15204 = vmatprep.mubr.bf16.mxu1 %v21762_v32  ;;  %v26376_v32 = vld [vmem:[#allocation101_spill] sm:$0xff]  ;;  %v8399_v48 = vadd.f32 %v8398_v22, %v22417_v25  ;;  %v15007_v61 = vpop.f32.mrb[102].mxu1  ;;  %v15246_v41 = vpop.f32.mrb[172].mxu0 }
 0x53a   : > { %v8401_v42 = vpop.f32.mrb[103].mxu1  ;;  %v22742_v22 = vpop.f32.mrb[173].mxu0 }
 0x53b   : > { %15437 = vmatmul.mubr.bf16.gmra.mrb[12].mxu0 %v22089_v20  ;;  %v22732_v10 = vadd.f32 %v22435_v29, %v8399_v48  ;;  %v15010_v25 = vpop.f32.mrb[104].mxu1 }
 0x53c   : > { %15440 = vmatprep.mubr.bf16.mxu0 %v26373_v37  ;;  %v8414_v58 = vpop.f32.mrb[105].mxu1  ;;  %v26383_v25 = vld [vmem:[#allocation54_spill] sm:$0xff] }
 0x53d   : > { %26377 = vst [vmem:[#allocation124_spill] sm:$0xff] %v22732_v10  ;;  %v8415_v29 = vadd.f32 %v8414_v58, %v22433_v31  ;;  %v15011_v48 = vpop.f32.mrb[106].mxu1  ;;  %v26385_v31 = vld [vmem:[#allocation37_spill] sm:$0xff] }
 0x53f   : > { %v22748_v10 = vadd.f32 %v22457_v46, %v8415_v29  ;;  %v26387_v46 = vld [vmem:[#allocation76_spill] sm:$0xff] }
 0x540   : > { %15205 = vmatmul.mubr.bf16.gmra.mrb[204].mxu1 %v21765_v17 }
 0x541   : > { %15208 = vmatprep.mubr.bf16.mxu1 %v26284_v21  ;;  %26381 = vst [vmem:[#allocation102_spill] sm:$0xff] %v22748_v10 }
 0x543   : > { %15441 = vmatmul.mubr.bf16.gmra.mrb[16].mxu0 %v26376_v32  ;;  %v8402_v32 = vadd.f32 %v8401_v42, %v22421_v63  ;;  %v15247_v42 = vpop.f32.mrb[174].mxu0  ;;  %v8417_v63 = vpop.f32.mrb[107].mxu1 }
 0x544   : > { %15444 = vmatprep.mubr.bf16.mxu0 %v22141_v47  ;;  %v26378_v47 = vld [vmem:[#allocation130_spill] sm:$0xff]  ;;  %v22745_v61 = vpop.f32.mrb[175].mxu0  ;;  %v15014_v58 = vpop.f32.mrb[108].mxu1 }
 0x545   : > { %v22738_v59 = vadd.f32 %v22439_v34, %v8402_v32  ;;  %26380 = vst [vmem:[#allocation70_spill] sm:$0xff] %v22745_v61  ;;  %v8418_v32 = vadd.f32 %v8417_v63, %v22437_v50  ;;  %v26382_v34 = vld [vmem:[#allocation73_spill] sm:$0xff]  ;;  %v15250_v48 = vpop.f32.mrb[176].mxu0  ;;  %v8430_v42 = vpop.f32.mrb[109].mxu1  ;;  %v26393_v58 = vld [vmem:[#allocation147_spill] sm:$0xff] }
 0x546   : > { %v8431_v29 = vadd.f32 %v8430_v42, %v26387_v46  ;;  %v15015_v10 = vpop.f32.mrb[110].mxu1  ;;  %v26396_v42 = vld [vmem:[#allocation15_spill] sm:$0xff] }
 0x547   : > { %26379 = vst [vmem:[#allocation32_spill] sm:$0xff] %v22738_v59  ;;  %v22754_v41 = vadd.f32 %v26383_v25, %v8418_v32  ;;  %v22758_v59 = vpop.f32.mrb[177].mxu0  ;;  %v8433_v63 = vpop.f32.mrb[111].mxu1  ;;  %v26391_v32 = vld [vmem:[#allocation146_spill] sm:$0xff] }
 0x548   : > { %15209 = vmatmul.mubr.bf16.gmra.mrb[208].mxu1 %v26292_v53  ;;  %26386 = vst [vmem:[#allocation9_spill] sm:$0xff] %v22758_v59  ;;  %v15251_v50 = vpop.f32.mrb[178].mxu0  ;;  %v8434_v25 = vadd.f32 %v8433_v63, %v26391_v32  ;;  %v26395_v59 = vld [vmem:[#allocation75_spill] sm:$0xff] }
 0x549   : > { %15212 = vmatprep.mubr.bf16.mxu1 %v26296_v55  ;;  %26384 = vst [vmem:[#allocation58_spill] sm:$0xff] %v22754_v41  ;;  %v26392_v41 = vld [vmem:[#allocation38_spill] sm:$0xff] }
 0x54a   : > { %v22770_v48 = vadd.f32 %v26393_v58, %v8434_v25  ;;  %v26402_v25 = vld [vmem:[#allocation20_spill] sm:$0xff] }
 0x54b   : > { %15445 = vmatmul.mubr.bf16.gmra.mrb[20].mxu0 %v26378_v47 }
 0x54c   : > { %15448 = vmatprep.mubr.bf16.mxu0 %v22167_v33  ;;  %26394 = vst [vmem:[#allocation176_spill] sm:$0xff] %v22770_v48  ;;  %v26403_v48 = vld [vmem:[#allocation74_spill] sm:$0xff] }
 0x550   : > { %15213 = vmatmul.mubr.bf16.gmra.mrb[212].mxu1 %v26304_v16  ;;  %v22761_v16 = vpop.f32.mrb[179].mxu0 }
 0x551   : > { %15216 = vmatprep.mubr.bf16.mxu1 %v26307_v35  ;;  %26388 = vst [vmem:[#allocation48_spill] sm:$0xff] %v22761_v16 }
 0x552   : > { %v15018_v10 = vpop.f32.mrb[112].mxu1  ;;  %v15254_v46 = vpop.f32.mrb[180].mxu0 }
 0x553   : > { %15449 = vmatmul.mubr.bf16.gmra.mrb[24].mxu0 %v26382_v34  ;;  %v26389_v34 = vld [vmem:[#allocation51_spill] sm:$0xff]  ;;  %v8446_v50 = vpop.f32.mrb[113].mxu1  ;;  %v22774_v16 = vpop.f32.mrb[181].mxu0  ;;  %v26405_v10 = vld [vmem:[#allocation144_spill] sm:$0xff] }
 0x554   : > { %15452 = vmatprep.mubr.bf16.mxu0 %v26385_v31  ;;  %v22764_v61 = vadd.f32 %v26389_v34, %v8431_v29  ;;  %26397 = vst [vmem:[#allocation28_spill] sm:$0xff] %v22774_v16  ;;  %v26398_v34 = vld [vmem:[#allocation82_spill] sm:$0xff]  ;;  %v15255_v63 = vpop.f32.mrb[182].mxu0  ;;  %v26407_v16 = vld [vmem:[#allocation99_spill] sm:$0xff] }
 0x555   : > { %v8447_v29 = vadd.f32 %v8446_v50, %v26398_v34  ;;  %v26408_v50 = vld [vmem:[#allocation94_spill] sm:$0xff] }
 0x556   : > { %26390 = vst [vmem:[#allocation29_spill] sm:$0xff] %v22764_v61  ;;  %v15019_v61 = vpop.f32.mrb[114].mxu1 }
 0x557   : > { %v8449_v32 = vpop.f32.mrb[115].mxu1 }
 0x558   : > { %15217 = vmatmul.mubr.bf16.gmra.mrb[216].mxu1 %v26317_v28  ;;  %v22777_v28 = vpop.f32.mrb[183].mxu0  ;;  %v8450_v58 = vadd.f32 %v8449_v32, %v26402_v25 }
 0x559   : > { %15220 = vmatprep.mubr.bf16.mxu1 %v26395_v59  ;;  %26399 = vst [vmem:[#allocation26_spill] sm:$0xff] %v22777_v28 }
 0x55a   : > { %v22786_v46 = vadd.f32 %v26405_v10, %v8450_v58  ;;  %v15258_v34 = vpop.f32.mrb[184].mxu0  ;;  %v15912_v58 = vld [vmem:[%s23672_s3 + $0x88] sm:$0xff]   ;;  %v26411_v10 = vld [vmem:[#allocation55_spill] sm:$0xff] }
 0x55b   : > { %15453 = vmatmul.mubr.bf16.gmra.mrb[28].mxu0 %v26392_v41  ;;  %v26400_v41 = vld [vmem:[#allocation156_spill] sm:$0xff]  ;;  %v22790_v28 = vpop.f32.mrb[185].mxu0  ;;  %v26412_v34 = vld [vmem:[#allocation81_spill] sm:$0xff] }
 0x55c   : > { %15456 = vmatprep.mubr.bf16.mxu0 %v26396_v42  ;;  %v22780_v31 = vadd.f32 %v26400_v41, %v8447_v29  ;;  %v26404_v42 = vld [vmem:[#allocation105_spill] sm:$0xff]  ;;  %26406 = vst [vmem:[#allocation128_spill] sm:$0xff] %v22786_v46  ;;  %v26409_v41 = vld [vmem:[#allocation159_spill] sm:$0xff]  ;;  %v15259_v32 = vpop.f32.mrb[186].mxu0 }
 0x55d   : > { %v26418_v46 = vld [vmem:[#allocation87_spill] sm:$0xff] }
 0x55e   : > { %26401 = vst [vmem:[#allocation45_spill] sm:$0xff] %v22780_v31 }
 0x560   : > { %15221 = vmatmul.mubr.bf16.gmra.mrb[220].mxu1 %v26403_v48  ;;  %v22793_v48 = vpop.f32.mrb[187].mxu0 }
 0x561   : > { %15320 = vmatprep.mubr.bf16.mxu1 %v26407_v16 }
 0x563   : > { %15457 = vmatmul.mubr.bf16.gmra.mrb[32].mxu0 %v26404_v42  ;;  %v15022_v61 = vpop.f32.mrb[116].mxu1 }
 0x564   : > { %15460 = vmatprep.mubr.bf16.mxu0 %v26408_v50  ;;  %v8462_v63 = vpop.f32.mrb[117].mxu1 }
 0x565   : > { %v8463_v29 = vadd.f32 %v8462_v63, %v26409_v41  ;;  %v15023_v31 = vpop.f32.mrb[118].mxu1  ;;  %v26415_v41 = vld [vmem:[#allocation127_spill] sm:$0xff] }
 0x566   : > { %v8465_v25 = vpop.f32.mrb[119].mxu1  ;;  %v26414_v31 = vld [vmem:[#allocation158_spill] sm:$0xff] }
 0x567   : > { %v22799_v16 = vadd.f32 %v22522_v36, %v8463_v29  ;;  %v8466_v61 = vadd.f32 %v8465_v25, %v26411_v10  ;;  %v15913_v36 = vld [vmem:[%s23672_s3 + $0x90] sm:$0xff]   ;;  %v26416_v10 = vld [vmem:[#allocation138_spill] sm:$0xff] }
 0x568   : > { %15321 = vmatmul.mubr.bf16.vlgmr.msra.gmra.mrb[224].mxu1 %v26067_v1 }
 0x569   : > { %26410 = vst [vmem:[#allocation129_spill] sm:$0xff] %v22799_v16  ;;  %v22805_v63 = vadd.f32 %v22531_v38, %v8466_v61  ;;  %15324 = vmatprep.mubr.bf16.mxu1 %v26414_v31  ;;  %15465 = vmatpush3.bf16.msra.mxu1 %v22610_v43 }
 0x56a   : > { %15466 = vmatprep.subr.bf16.mxu1 %v15912_v58 }
 0x56b   : > { %15461 = vmatmul.mubr.bf16.gmra.mrb[36].mxu0 %v26412_v34  ;;  %26413 = vst [vmem:[#allocation43_spill] sm:$0xff] %v22805_v63  ;;  %v15026_v29 = vpop.f32.mrb[120].mxu1 }
 0x56c   : > { %15560 = vmatprep.mubr.bf16.mxu0 %v26415_v41  ;;  %v8478_v25 = vpop.f32.mrb[121].mxu1  ;;  %v15914_v29 = vld [vmem:[%s23672_s3 + $0x98] sm:$0xff]  }
 0x56d   : > { %v8479_v16 = vadd.f32 %v8478_v25, %v26416_v10  ;;  %v15027_v38 = vpop.f32.mrb[122].mxu1  ;;  %15467 = vmatpush3.bf16.msra.mxu1 %v15912_v58 }
 0x56e   : > { %v15262_v32 = vpop.f32.mrb[188].mxu0  ;;  %v8481_v31 = vpop.f32.mrb[123].mxu1  ;;  %15468 = vmatprep.subr.bf16.mxu1 %v15913_v36 }
 0x56f   : > { %v22813_v1 = vpop.f32.mrb[189].mxu0  ;;  %v22819_v43 = vadd.f32 %v22557_v4, %v8479_v16  ;;  %v8482_v41 = vadd.f32 %v8481_v31, %v26418_v46  ;;  %v15915_v46 = vld [vmem:[%s23672_s3 + $0xa0] sm:$0xff]  }
 0x570   : > { %v15263_v61 = vpop.f32.mrb[190].mxu0  ;;  %15325 = vmatmul.mubr.bf16.gmra.mrb[228].mxu1 %v26130_v18  ;;  %v26420_v16 = vld [vmem:[#allocation13_spill] sm:$0xff] }
 0x571   : > { %v22816_v63 = vpop.f32.mrb[191].mxu0  ;;  %26417 = vst [vmem:[#allocation16_spill] sm:$0xff] %v22819_v43  ;;  %v22828_v32 = vadd.f32 %v22568_v54, %v8482_v41  ;;  %15328 = vmatprep.mubr.bf16.mxu1 %v26137_v49  ;;  %15469 = vmatpush3.bf16.msra.mxu1 %v15913_v36  ;;  %v22837_v18 = vadd.f32 %v26420_v16, %v22715_v5  ;;  %v26422_v54 = vld [vmem:[#allocation112_spill] sm:$0xff]  ;;  %v26423_v36 = vld [vmem:[#allocation19_spill] sm:$0xff]  ;;  %v15916_v16 = vld [vmem:[%s23672_s3 + $0xa8] sm:$0xff]  }
 0x572   : > { %15470 = vmatprep.subr.bf16.mxu1 %v15914_v29  ;;  %v22844_v61 = vadd.f32 %v26423_v36, %v22720_v7  ;;  %v26452_v43 = vld [vmem:[#allocation143_spill] sm:$0xff] }
 0x573   : > { %15561 = vmatmul.mubr.bf16.vlgmr.msra.gmra.mrb[40].mxu0 %v22564_v52  ;;  %26419 = vst [vmem:[#allocation118_spill] sm:$0xff] %v22828_v32  ;;  %v15030_v4 = vpop.f32.mrb[124].mxu1  ;;  %26421 = vst [vmem:[#allocation131_spill] sm:$0xff] %v22837_v18 }
 0x574   : > { %15564 = vmatprep.mubr.bf16.mxu0 %v26334_v11  ;;  %v8494_v25 = vpop.f32.mrb[125].mxu1  ;;  %26424 = vst [vmem:[#allocation134_spill] sm:$0xff] %v22844_v61 }
 0x575   : > { %v8495_v41 = vadd.f32 %v8494_v25, %v26422_v54  ;;  %v15031_v49 = vpop.f32.mrb[126].mxu1  ;;  %15471 = vmatpush3.bf16.msra.mxu1 %v15914_v29  ;;  %v26427_v25 = vld [vmem:[#allocation103_spill] sm:$0xff]  ;;  %v26428_v29 = vld [vmem:[#allocation46_spill] sm:$0xff] }
 0x576   : > { %v15266_v58 = vpop.f32.mrb[192].mxu0  ;;  %v8497_v31 = vpop.f32.mrb[127].mxu1  ;;  %15472 = vmatprep.subr.bf16.mxu1 %v15915_v46 }
 0x577   : > { %v22839_v10 = vpop.f32.mrb[193].mxu0  ;;  %v22849_v58 = vadd.f32 %v22588_v6, %v8495_v41  ;;  %v8498_v5 = vadd.f32 %v8497_v31, %v22566_v14  ;;  %v15917_v14 = vld [vmem:[%s23672_s3 + $0xb0] sm:$0xff]  }
 0x578   : > { %v15267_v38 = vpop.f32.mrb[194].mxu0  ;;  %15329 = vmatmul.mubr.bf16.gmra.mrb[232].mxu1 %v21864_v40  ;;  %v26429_v40 = vld [vmem:[#allocation36_spill] sm:$0xff] }
 0x579   : > { %v22846_v4 = vpop.f32.mrb[195].mxu0  ;;  %26425 = vst [vmem:[#allocation66_spill] sm:$0xff] %v22849_v58  ;;  %v22858_v7 = vadd.f32 %v22592_v44, %v8498_v5  ;;  %15332 = vmatprep.mubr.bf16.mxu1 %v26427_v25  ;;  %15473 = vmatpush3.bf16.msra.mxu1 %v15915_v46  ;;  %v26431_v25 = vld [vmem:[#allocation39_spill] sm:$0xff] }
 0x57a   : > { %15474 = vmatprep.subr.bf16.mxu1 %v15916_v16 }
 0x57b   : > { %15565 = vmatmul.mubr.bf16.gmra.mrb[44].mxu0 %v26338_v45  ;;  %26426 = vst [vmem:[#allocation56_spill] sm:$0xff] %v22858_v7  ;;  %v15034_v6 = vpop.f32.mrb[128].mxu1  ;;  %v26432_v7 = vld [vmem:[#allocation139_spill] sm:$0xff] }
 0x57c   : > { %15568 = vmatprep.mubr.bf16.mxu0 %v26428_v29  ;;  %v8510_v41 = vpop.f32.mrb[129].mxu1 }
 0x57d   : > { %v8511_v38 = vadd.f32 %v8510_v41, %v26429_v40  ;;  %v15035_v36 = vpop.f32.mrb[130].mxu1  ;;  %15475 = vmatpush3.bf16.msra.mxu1 %v15916_v16  ;;  %v26433_v41 = vld [vmem:[#allocation77_spill] sm:$0xff] }
 0x57e   : > { %v15270_v54 = vpop.f32.mrb[196].mxu0  ;;  %v8513_v31 = vpop.f32.mrb[131].mxu1  ;;  %15476 = vmatprep.subr.bf16.mxu1 %v15917_v14 }
 0x57f   : > { %v22865_v49 = vpop.f32.mrb[197].mxu0  ;;  %v22871_v46 = vadd.f32 %v22619_v62, %v8511_v38  ;;  %v8514_v6 = vadd.f32 %v8513_v31, %v26431_v25  ;;  %v15918_v54 = vld [vmem:[%s23672_s3 + $0xb8] sm:$0xff]  }
 0x580   : > { %v15271_v44 = vpop.f32.mrb[198].mxu0  ;;  %15333 = vmatmul.mubr.bf16.gmra.mrb[236].mxu1 %v26432_v7 }
 0x581   : > { %v22868_v5 = vpop.f32.mrb[199].mxu0  ;;  %26430 = vst [vmem:[#allocation59_spill] sm:$0xff] %v22871_v46  ;;  %v22880_v40 = vadd.f32 %v26433_v41, %v8514_v6  ;;  %15336 = vmatprep.mubr.bf16.mxu1 %v26210_v15  ;;  %15477 = vmatpush3.bf16.msra.mxu1 %v15917_v14  ;;  %v26435_v44 = vld [vmem:[#allocation164_spill] sm:$0xff]  ;;  %v26438_v15 = vld [vmem:[#allocation125_spill] sm:$0xff] }
 0x582   : > { %15478 = vmatprep.subr.bf16.mxu1 %v15918_v54  ;;  %v26436_v6 = vld [vmem:[#allocation40_spill] sm:$0xff] }
 0x583   : > { %15569 = vmatmul.mubr.bf16.gmra.mrb[48].mxu0 %v21952_v2  ;;  %26434 = vst [vmem:[#allocation136_spill] sm:$0xff] %v22880_v40  ;;  %v15038_v62 = vpop.f32.mrb[132].mxu1  ;;  %v26439_v14 = vld [vmem:[#allocation88_spill] sm:$0xff] }
 0x584   : > { %15572 = vmatprep.mubr.bf16.mxu0 %v21970_v9  ;;  %v8526_v38 = vpop.f32.mrb[133].mxu1  ;;  %v26440_v62 = vld [vmem:[#allocation30_spill] sm:$0xff] }
 0x585   : > { %v8527_v31 = vadd.f32 %v8526_v38, %v26435_v44  ;;  %v15039_v25 = vpop.f32.mrb[134].mxu1  ;;  %15479 = vmatpush3.bf16.msra.mxu1 %v15918_v54  ;;  %v26442_v38 = vld [vmem:[#allocation167_spill] sm:$0xff] }
 0x586   : > { %v15274_v16 = vpop.f32.mrb[200].mxu0  ;;  %v8529_v46 = vpop.f32.mrb[135].mxu1  ;;  %15624 = vmatprep.subr.bf16.mxu1 %v26439_v14 }
 0x587   : > { %v22884_v36 = vpop.f32.mrb[201].mxu0  ;;  %v22890_v41 = vadd.f32 %v26436_v6, %v8527_v31  ;;  %v8530_v40 = vadd.f32 %v8529_v46, %v26438_v15 }
 0x588   : > { %v15275_v7 = vpop.f32.mrb[202].mxu0  ;;  %15337 = vmatmul.mubr.bf16.gmra.mrb[240].mxu1 %v22323_v30 }
 0x589   : > { %v22887_v58 = vpop.f32.mrb[203].mxu0  ;;  %26437 = vst [vmem:[#allocation42_spill] sm:$0xff] %v22890_v41  ;;  %v22897_v16 = vadd.f32 %v26440_v62, %v8530_v40  ;;  %15340 = vmatprep.mubr.bf16.mxu1 %v26225_v19  ;;  %v26443_v7 = vld [vmem:[#allocation79_spill] sm:$0xff]  ;;  %v26444_v41 = vld [vmem:[#allocation17_spill] sm:$0xff]  ;;  %v26447_v19 = vld [vmem:[#allocation168_spill] sm:$0xff] }
 0x58a   : > { %v26446_v40 = vld [vmem:[#allocation121_spill] sm:$0xff] }
 0x58b   : > { %15573 = vmatmul.mubr.bf16.gmra.mrb[52].mxu0 %v21973_v8  ;;  %26441 = vst [vmem:[#allocation96_spill] sm:$0xff] %v22897_v16  ;;  %v15042_v44 = vpop.f32.mrb[136].mxu1 }
 0x58c   : > { %15576 = vmatprep.mubr.bf16.mxu0 %v26442_v38  ;;  %v8542_v25 = vpop.f32.mrb[137].mxu1 }
 0x58d   : > { %v8543_v46 = vadd.f32 %v8542_v25, %v26443_v7  ;;  %v15043_v6 = vpop.f32.mrb[138].mxu1  ;;  %v26450_v25 = vld [vmem:[#allocation165_spill] sm:$0xff] }
 0x58e   : > { %v15278_v54 = vpop.f32.mrb[204].mxu0  ;;  %v8545_v14 = vpop.f32.mrb[139].mxu1 }
 0x58f   : > { %v22901_v31 = vpop.f32.mrb[205].mxu0  ;;  %v22907_v32 = vadd.f32 %v26444_v41, %v8543_v46  ;;  %v8546_v62 = vadd.f32 %v8545_v14, %v26446_v40  ;;  %v26449_v54 = vld [vmem:[#allocation104_spill] sm:$0xff]  ;;  %v26451_v41 = vld [vmem:[#allocation47_spill] sm:$0xff] }
 0x590   : > { %v15279_v15 = vpop.f32.mrb[206].mxu0  ;;  %15341 = vmatmul.mubr.bf16.gmra.mrb[244].mxu1 %v22343_v51 }
 0x591   : > { %v22904_v30 = vpop.f32.mrb[207].mxu0  ;;  %26445 = vst [vmem:[#allocation90_spill] sm:$0xff] %v22907_v32  ;;  %v22913_v44 = vadd.f32 %v26447_v19, %v8546_v62  ;;  %15344 = vmatprep.mubr.bf16.mxu1 %v26449_v54  ;;  %v26454_v62 = vld [vmem:[#allocation169_spill] sm:$0xff] }
 0x592   : > { %v26455_v54 = vld [vmem:[#allocation69_spill] sm:$0xff] }
 0x593   : > { %15577 = vmatmul.mubr.bf16.gmra.mrb[56].mxu0 %v26353_v12  ;;  %26448 = vst [vmem:[#allocation44_spill] sm:$0xff] %v22913_v44  ;;  %v15046_v7 = vpop.f32.mrb[140].mxu1  ;;  %v26459_v44 = vld [vmem:[#allocation86_spill] sm:$0xff] }
 0x594   : > { %15580 = vmatprep.mubr.bf16.mxu0 %v26450_v25  ;;  %v8558_v15 = vpop.f32.mrb[141].mxu1 }
 0x595   : > { %v8559_v46 = vadd.f32 %v8558_v15, %v26451_v41  ;;  %v15047_v32 = vpop.f32.mrb[142].mxu1 }
 0x596   : > { %v15282_v6 = vpop.f32.mrb[208].mxu0  ;;  %v8561_v40 = vpop.f32.mrb[143].mxu1 }
 0x597   : > { %v22917_v16 = vpop.f32.mrb[209].mxu0  ;;  %v22923_v61 = vadd.f32 %v26452_v43, %v8559_v46  ;;  %v8562_v19 = vadd.f32 %v8561_v40, %v26454_v62  ;;  %v26457_v6 = vld [vmem:[#allocation120_spill] sm:$0xff]  ;;  %v26458_v43 = vld [vmem:[#allocation114_spill] sm:$0xff] }
 0x598   : > { %v15283_v14 = vpop.f32.mrb[210].mxu0  ;;  %15345 = vmatmul.mubr.bf16.gmra.mrb[248].mxu1 %v22363_v3 }
 0x599   : > { %v22920_v51 = vpop.f32.mrb[211].mxu0  ;;  %26453 = vst [vmem:[#allocation18_spill] sm:$0xff] %v22923_v61  ;;  %v22929_v7 = vadd.f32 %v26455_v54, %v8562_v19  ;;  %15348 = vmatprep.mubr.bf16.mxu1 %v26246_v24  ;;  %v26461_v19 = vld [vmem:[#allocation170_spill] sm:$0xff] }
 0x59a   : > { %v26462_v24 = vld [vmem:[#allocation110_spill] sm:$0xff] }
 0x59b   : > { %15581 = vmatmul.mubr.bf16.gmra.mrb[60].mxu0 %v26358_v39  ;;  %26456 = vst [vmem:[#allocation50_spill] sm:$0xff] %v22929_v7  ;;  %v15050_v32 = vpop.f32.mrb[144].mxu1  ;;  %v26466_v7 = vld [vmem:[#allocation145_spill] sm:$0xff] }
 0x59c   : > { %15584 = vmatprep.mubr.bf16.mxu0 %v26457_v6  ;;  %v8574_v41 = vpop.f32.mrb[145].mxu1 }
 0x59d   : > { %v8575_v46 = vadd.f32 %v8574_v41, %v26458_v43  ;;  %v15051_v61 = vpop.f32.mrb[146].mxu1 }
 0x59e   : > { %v15286_v15 = vpop.f32.mrb[212].mxu0  ;;  %v8577_v62 = vpop.f32.mrb[147].mxu1 }
 0x59f   : > { %v22933_v14 = vpop.f32.mrb[213].mxu0  ;;  %v22939_v18 = vadd.f32 %v26459_v44, %v8575_v46  ;;  %v8578_v54 = vadd.f32 %v8577_v62, %v26461_v19  ;;  %v26464_v15 = vld [vmem:[#allocation27_spill] sm:$0xff]  ;;  %v26465_v44 = vld [vmem:[#allocation141_spill] sm:$0xff] }
 0x5a0   : > { %v15287_v40 = vpop.f32.mrb[214].mxu0  ;;  %15349 = vmatmul.mubr.bf16.gmra.mrb[252].mxu1 %v22383_v56 }
 0x5a1   : > { %v22936_v3 = vpop.f32.mrb[215].mxu0  ;;  %26460 = vst [vmem:[#allocation132_spill] sm:$0xff] %v22939_v18  ;;  %v22945_v32 = vadd.f32 %v26462_v24, %v8578_v54  ;;  %15352 = vmatprep.mubr.bf16.mxu1 %v26257_v57  ;;  %v26468_v54 = vld [vmem:[#allocation133_spill] sm:$0xff] }
 0x5a3   : > { %15585 = vmatmul.mubr.bf16.gmra.mrb[64].mxu0 %v26364_v60  ;;  %26463 = vst [vmem:[#allocation123_spill] sm:$0xff] %v22945_v32  ;;  %v15054_v61 = vpop.f32.mrb[148].mxu1  ;;  %v26473_v32 = vld [vmem:[#allocation161_spill] sm:$0xff] }
 0x5a4   : > { %15588 = vmatprep.mubr.bf16.mxu0 %v26464_v15  ;;  %v8590_v43 = vpop.f32.mrb[149].mxu1  ;;  %v26470_v61 = vld [vmem:[#allocation71_spill] sm:$0xff] }
 0x5a5   : > { %v8591_v46 = vadd.f32 %v8590_v43, %v26465_v44  ;;  %v15055_v18 = vpop.f32.mrb[150].mxu1 }
 0x5a6   : > { %v15290_v41 = vpop.f32.mrb[216].mxu0  ;;  %v8593_v19 = vpop.f32.mrb[151].mxu1 }
 0x5a7   : > { %v22949_v40 = vpop.f32.mrb[217].mxu0  ;;  %v22955_v60 = vadd.f32 %v26466_v7, %v8591_v46  ;;  %v8594_v24 = vadd.f32 %v8593_v19, %v26468_v54  ;;  %v26471_v41 = vld [vmem:[#allocation172_spill] sm:$0xff]  ;;  %v26472_v7 = vld [vmem:[#allocation33_spill] sm:$0xff] }
 0x5a8   : > { %v15291_v62 = vpop.f32.mrb[218].mxu0  ;;  %15353 = vmatmul.mubr.bf16.gmra.mrb[0].mxu1 %v22405_v13 }
 0x5a9   : > { %v22952_v56 = vpop.f32.mrb[219].mxu0  ;;  %26467 = vst [vmem:[#allocation153_spill] sm:$0xff] %v22955_v60  ;;  %v22961_v57 = vadd.f32 %v22694_v27, %v8594_v24  ;;  %15356 = vmatprep.mubr.bf16.mxu1 %v26470_v61  ;;  %v26475_v27 = vld [vmem:[#allocation78_spill] sm:$0xff]  ;;  %v26476_v61 = vld [vmem:[#allocation92_spill] sm:$0xff] }
 0x5ab   : > { %15589 = vmatmul.mubr.bf16.gmra.mrb[68].mxu0 %v26368_v23  ;;  %26469 = vst [vmem:[#allocation107_spill] sm:$0xff] %v22961_v57  ;;  %v15058_v18 = vpop.f32.mrb[152].mxu1  ;;  %v26479_v57 = vld [vmem:[#allocation53_spill] sm:$0xff] }
 0x5ac   : > { %15592 = vmatprep.mubr.bf16.mxu0 %v26471_v41  ;;  %v8606_v44 = vpop.f32.mrb[153].mxu1  ;;  %v26477_v18 = vld [vmem:[#allocation25_spill] sm:$0xff] }
 0x5ad   : > { %v8607_v46 = vadd.f32 %v8606_v44, %v26472_v7  ;;  %v15059_v60 = vpop.f32.mrb[154].mxu1 }
 0x5ae   : > { %v15294_v43 = vpop.f32.mrb[220].mxu0  ;;  %v8609_v54 = vpop.f32.mrb[155].mxu1 }
 0x5af   : > { %v22965_v62 = vpop.f32.mrb[221].mxu0  ;;  %v22971_v23 = vadd.f32 %v26473_v32, %v8607_v46  ;;  %v8610_v24 = vadd.f32 %v8609_v54, %v26475_v27  ;;  %v26480_v32 = vld [vmem:[#allocation60_spill] sm:$0xff] }
 0x5b0   : > { %v15295_v19 = vpop.f32.mrb[222].mxu0  ;;  %15357 = vmatmul.mubr.bf16.gmra.mrb[4].mxu1 %v26476_v61 }
 0x5b1   : > { %v22968_v13 = vpop.f32.mrb[223].mxu0  ;;  %26474 = vst [vmem:[#allocation68_spill] sm:$0xff] %v22971_v23  ;;  %v22977_v43 = vadd.f32 %v26477_v18, %v8610_v24  ;;  %15360 = vmatprep.mubr.bf16.mxu1 %v26479_v57  ;;  %v26483_v24 = vld [vmem:[#allocation111_spill] sm:$0xff]  ;;  %v26484_v57 = vld [vmem:[#allocation101_spill] sm:$0xff] }
 0x5b3   : > { %15593 = vmatmul.mubr.bf16.gmra.mrb[72].mxu0 %v22089_v20  ;;  %26478 = vst [vmem:[#allocation109_spill] sm:$0xff] %v22977_v43  ;;  %v15062_v60 = vpop.f32.mrb[156].mxu1  ;;  %v26481_v20 = vld [vmem:[#allocation174_spill] sm:$0xff] }
 0x5b4   : > { %15596 = vmatprep.mubr.bf16.mxu0 %v26373_v37  ;;  %v8622_v7 = vpop.f32.mrb[157].mxu1  ;;  %v26485_v60 = vld [vmem:[#allocation171_spill] sm:$0xff] }
 0x5b5   : > { %v8623_v46 = vadd.f32 %v8622_v7, %v26480_v32  ;;  %v15063_v23 = vpop.f32.mrb[158].mxu1  ;;  %v26487_v7 = vld [vmem:[#allocation72_spill] sm:$0xff] }
 0x5b6   : > { %v15298_v44 = vpop.f32.mrb[224].mxu0  ;;  %v8625_v27 = vpop.f32.mrb[159].mxu1 }
 0x5b7   : > { %v22981_v19 = vpop.f32.mrb[225].mxu0  ;;  %v22987_v41 = vadd.f32 %v26481_v20, %v8623_v46  ;;  %v8626_v18 = vadd.f32 %v8625_v27, %v26483_v24 }
 0x5b8   : > { %v15299_v54 = vpop.f32.mrb[226].mxu0  ;;  %15361 = vmatmul.mubr.bf16.gmra.mrb[8].mxu1 %v21765_v17 }
 0x5b9   : > { %v22984_v61 = vpop.f32.mrb[227].mxu0  ;;  %26482 = vst [vmem:[#allocation89_spill] sm:$0xff] %v22987_v41  ;;  %v22993_v44 = vadd.f32 %v26485_v60, %v8626_v18  ;;  %15364 = vmatprep.mubr.bf16.mxu1 %v26284_v21 }
 0x5bb   : > { %15597 = vmatmul.mubr.bf16.gmra.mrb[76].mxu0 %v26484_v57  ;;  %26486 = vst [vmem:[#allocation52_spill] sm:$0xff] %v22993_v44  ;;  %v15162_v23 = vpop.f32.mrb[160].mxu1  ;;  %v26491_v44 = vld [vmem:[#allocation98_spill] sm:$0xff] }
 0x5bc   : > { %15600 = vmatprep.mubr.bf16.mxu0 %v26487_v7  ;;  %v9301_v54 = vpop.f32.mrb[161].mxu1 }
 0x5bd   : > { %v23000_v20 = vadd.f32 %v22726_v0, %v9301_v54  ;;  %v15163_v46 = vpop.f32.mrb[162].mxu1 }
 0x5be   : > { %v15302_v32 = vpop.f32.mrb[228].mxu0  ;;  %v9304_v17 = vpop.f32.mrb[163].mxu1 }
 0x5bf   : > { %v22997_v43 = vpop.f32.mrb[229].mxu0  ;;  %v23005_v18 = vadd.f32 %v22729_v26, %v9304_v17 }
 0x5c0   : > { %v15303_v27 = vpop.f32.mrb[230].mxu0  ;;  %15365 = vmatmul.mubr.bf16.gmra.mrb[12].mxu1 %v26292_v53  ;;  %v26490_v53 = vld [vmem:[#allocation70_spill] sm:$0xff] }
 0x5c1   : > { %v23002_v24 = vpop.f32.mrb[231].mxu0  ;;  %15368 = vmatprep.mubr.bf16.mxu1 %v26296_v55  ;;  %v26492_v55 = vld [vmem:[#allocation73_spill] sm:$0xff] }
 0x5c3   : > { %15601 = vmatmul.mubr.bf16.gmra.mrb[80].mxu0 %v26378_v47  ;;  %v15166_v21 = vpop.f32.mrb[164].mxu1 }
 0x5c4   : > { %15604 = vmatprep.mubr.bf16.mxu0 %v22167_v33  ;;  %v9317_v0 = vpop.f32.mrb[165].mxu1  ;;  %v26493_v21 = vld [vmem:[#allocation37_spill] sm:$0xff] }
 0x5c5   : > { %v23014_v32 = vadd.f32 %v22742_v22, %v9317_v0  ;;  %v15167_v54 = vpop.f32.mrb[166].mxu1 }
 0x5c6   : > { %v15402_v60 = vpop.f32.mrb[232].mxu0  ;;  %v9320_v26 = vpop.f32.mrb[167].mxu1  ;;  %v26495_v54 = vld [vmem:[#allocation9_spill] sm:$0xff] }
 0x5c7   : > { %v23011_v23 = vpop.f32.mrb[233].mxu0  ;;  %v23019_v17 = vadd.f32 %v26490_v53, %v9320_v26 }
 0x5c8   : > { %26488 = vst [vmem:[#allocation135_spill] sm:$0xff] %v23011_v23  ;;  %v15403_v46 = vpop.f32.mrb[234].mxu0  ;;  %15369 = vmatmul.mubr.bf16.gmra.mrb[16].mxu1 %v26491_v44  ;;  %v26498_v44 = vld [vmem:[#allocation48_spill] sm:$0xff] }
 0x5c9   : > { %v23016_v27 = vpop.f32.mrb[235].mxu0  ;;  %15372 = vmatprep.mubr.bf16.mxu1 %v26307_v35  ;;  %v26501_v35 = vld [vmem:[#allocation38_spill] sm:$0xff] }
 0x5ca   : > { %26489 = vst [vmem:[#allocation162_spill] sm:$0xff] %v23016_v27 }
 0x5cb   : > { %15605 = vmatmul.mubr.bf16.gmra.mrb[84].mxu0 %v26492_v55  ;;  %v15170_v60 = vpop.f32.mrb[168].mxu1  ;;  %v26500_v55 = vld [vmem:[#allocation23_spill] sm:$0xff] }
 0x5cc   : > { %15608 = vmatprep.mubr.bf16.mxu0 %v26493_v21  ;;  %v9333_v22 = vpop.f32.mrb[169].mxu1 }
 0x5cd   : > { %v23028_v46 = vadd.f32 %v26495_v54, %v9333_v22  ;;  %v15171_v27 = vpop.f32.mrb[170].mxu1 }
 0x5ce   : > { %v15406_v23 = vpop.f32.mrb[236].mxu0  ;;  %v9336_v26 = vpop.f32.mrb[171].mxu1 }
 0x5cf   : > { %v23025_v0 = vpop.f32.mrb[237].mxu0  ;;  %26496 = vst [vmem:[#allocation151_spill] sm:$0xff] %v23028_v46  ;;  %v23033_v33 = vadd.f32 %v26498_v44, %v9336_v26  ;;  %v26502_v23 = vld [vmem:[#allocation15_spill] sm:$0xff]  ;;  %v26510_v46 = vld [vmem:[#allocation74_spill] sm:$0xff] }
 0x5d0   : > { %26494 = vst [vmem:[#allocation149_spill] sm:$0xff] %v23025_v0  ;;  %v15407_v41 = vpop.f32.mrb[238].mxu0  ;;  %15373 = vmatmul.mubr.bf16.gmra.mrb[20].mxu1 %v26500_v55  ;;  %v26507_v55 = vld [vmem:[#allocation26_spill] sm:$0xff] }
 0x5d1   : > { %v23030_v53 = vpop.f32.mrb[239].mxu0  ;;  %26499 = vst [vmem:[#allocation152_spill] sm:$0xff] %v23033_v33  ;;  %15376 = vmatprep.mubr.bf16.mxu1 %v26395_v59  ;;  %v26504_v41 = vld [vmem:[#allocation28_spill] sm:$0xff] }
 0x5d2   : > { %26497 = vst [vmem:[#allocation35_spill] sm:$0xff] %v23030_v53 }
 0x5d3   : > { %15609 = vmatmul.mubr.bf16.gmra.mrb[88].mxu0 %v26501_v35  ;;  %v15174_v60 = vpop.f32.mrb[172].mxu1  ;;  %v26509_v35 = vld [vmem:[#allocation41_spill] sm:$0xff] }
 0x5d4   : > { %15612 = vmatprep.mubr.bf16.mxu0 %v26502_v23  ;;  %v9349_v22 = vpop.f32.mrb[173].mxu1  ;;  %v7681_v59 = vrot.slane %v26509_v35, 2  ;;  %v26512_v60 = vld [vmem:[#allocation155_spill] sm:$0xff] }
 0x5d5   : > { %v23042_v27 = vadd.f32 %v26504_v41, %v9349_v22  ;;  %v15175_v53 = vpop.f32.mrb[174].mxu1  ;;  %v26515_v22 = vld [vmem:[#allocation95_spill] sm:$0xff] }
 0x5d6   : > { %v15410_v0 = vpop.f32.mrb[240].mxu0  ;;  %v9352_v26 = vpop.f32.mrb[175].mxu1  ;;  %v26514_v53 = vld [vmem:[#allocation93_spill] sm:$0xff]  ;;  %v7682_v41 = vrot.slane %v26515_v22, 2 }
 0x5d7   : > { %v23039_v54 = vpop.f32.mrb[241].mxu0  ;;  %26505 = vst [vmem:[#allocation154_spill] sm:$0xff] %v23042_v27  ;;  %v23047_v33 = vadd.f32 %v26507_v55, %v9352_v26  ;;  %v26511_v0 = vld [vmem:[#allocation140_spill] sm:$0xff] }
 0x5d8   : > { %26503 = vst [vmem:[#allocation100_spill] sm:$0xff] %v23039_v54  ;;  %v15411_v21 = vpop.f32.mrb[242].mxu0  ;;  %15377 = vmatmul.mubr.bf16.gmra.mrb[24].mxu1 %v26510_v46  ;;  %v26513_v54 = vpack.c.bf16 %v26511_v0, %v26512_v60  ;;  %v7821_v46 = vsel %vm26518_vm11, %v7681_v59, %v7682_v41 }
 0x5d9   : > { %v23044_v44 = vpop.f32.mrb[243].mxu0  ;;  %26508 = vst [vmem:[#allocation22_spill] sm:$0xff] %v23047_v33  ;;  %v24267_v21 = vrot.slane %v26514_v53, 2  ;;  %v26522_v33 = vld [vmem:[#allocation97_spill] sm:$0xff] }
 0x5da   : > { %26506 = vst [vmem:[#allocation21_spill] sm:$0xff] %v23044_v44  ;;  %15380 = vmatprep.mubr.bf16.mxu1 %v26513_v54 }
 0x5db   : > { %15613 = vmatmul.mubr.bf16.gmra.mrb[92].mxu0 %v26404_v42  ;;  %v15178_v44 = vpop.f32.mrb[176].mxu1  ;;  %v7822_v0 = vsel %vm26519_vm14, %v24267_v21, %v7681_v59  ;;  %v26524_v59 = vld [vmem:[#allocation67_spill] sm:$0xff] }
 0x5dc   : > { %15616 = vmatprep.mubr.bf16.mxu0 %v26408_v50  ;;  %v9365_v26 = vpop.f32.mrb[177].mxu1  ;;  %v7824_v44 = vpack.c.bf16 %v7821_v46, %v7822_v0  ;;  %v26525_v21 = vrot.slane %v26524_v59, 2  ;;  %v26529_v0 = vld [vmem:[#allocation84_spill] sm:$0xff] }
 0x5dd   : > { %v23067_v54 = vadd.f32 %v22790_v28, %v9365_v26  ;;  %v15179_v50 = vpop.f32.mrb[178].mxu1  ;;  %v26526_v28 = vld [vmem:[#allocation24_spill] sm:$0xff] }
 0x5de   : > { %v15414_v23 = vpop.f32.mrb[244].mxu0  ;;  %v9368_v42 = vpop.f32.mrb[179].mxu1  ;;  %v7819_v26 = vsel %vm26527_vm13, %v26526_v28, %v26525_v21 }
 0x5df   : > { %v23058_v55 = vpop.f32.mrb[245].mxu0  ;;  %v23072_v23 = vadd.f32 %v22793_v48, %v9368_v42  ;;  %v7820_v48 = vsel %vm26528_vm7, %v7682_v41, %v26526_v28 }
 0x5e0   : > { %26516 = vst [vmem:[#allocation106_spill] sm:$0xff] %v23058_v55  ;;  %v15415_v60 = vpop.f32.mrb[246].mxu0  ;;  %v26521_v55 = vld [vmem:[#allocation85_spill] sm:$0xff] }
 0x5e1   : > { %v23069_v22 = vpop.f32.mrb[247].mxu0  ;;  %v26523_v27 = vpack.c.bf16 %v26521_v55, %v26522_v33 }
 0x5e2   : > { %26520 = vst [vmem:[#allocation61_spill] sm:$0xff] %v23069_v22 }
 0x5e3   : > { %15381 = vmatmul.mubr.bf16.gmra.mrb[28].mxu1 %v26523_v27  ;;  %15617 = vmatmul.mubr.bf16.gmra.mrb[96].mxu0 %v26412_v34  ;;  %v15182_v50 = vpop.f32.mrb[180].mxu1  ;;  %v7825_v27 = vpack.c.bf16 %v7819_v26, %v7820_v48 }
 0x5e4   : > { %15480 = vmatprep.mubr.bf16.mxu1 %v7824_v44  ;;  %v9381_v22 = vpop.f32.mrb[181].mxu1  ;;  %v15922_v44 = vld [vmem:[%s23672_s3 + $0x200] sm:$0xff]  }
 0x5e5   : > { %v23089_v33 = vadd.f32 %v22813_v1, %v9381_v22  ;;  %v15183_v42 = vpop.f32.mrb[182].mxu1  ;;  %v15923_v1 = vld [vmem:[%s23672_s3 + $0x208] sm:$0xff]  }
 0x5e6   : > { %v15418_v60 = vpop.f32.mrb[248].mxu0  ;;  %v9384_v55 = vpop.f32.mrb[183].mxu1 }
 0x5e7   : > { %v23083_v53 = vpop.f32.mrb[249].mxu0  ;;  %v23094_v21 = vadd.f32 %v22816_v63, %v9384_v55  ;;  %v26530_v55 = vld [vmem:[#allocation163_spill] sm:$0xff] }
 0x5e8   : > { %v15419_v34 = vpop.f32.mrb[250].mxu0 }
 0x5e9   : > { %v23091_v46 = vpop.f32.mrb[251].mxu0  ;;  %v15924_v34 = vld [vmem:[%s23672_s3 + $0x210] sm:$0xff]  }
 0x5eb   : > { %15481 = vmatmul.mubr.bf16.vlgmr.msra.gmra.mrb[32].mxu1 %v7825_v27  ;;  %v15186_v41 = vpop.f32.mrb[184].mxu1 }
 0x5ec   : > { %15484 = vmatprep.mubr.bf16.mxu1 %v26529_v0  ;;  %15632 = vmatpush3.bf16.msra.mxu1 %v15922_v44  ;;  %v9397_v59 = vpop.f32.mrb[185].mxu1  ;;  %v26531_v0 = vld [vmem:[#allocation127_spill] sm:$0xff] }
 0x5ed   : > { %15625 = vmatprep.subr.bf16.mxu1 %v15923_v1  ;;  %v23106_v63 = vadd.f32 %v22839_v10, %v9397_v59  ;;  %v15187_v50 = vpop.f32.mrb[186].mxu1  ;;  %v15925_v10 = vld [vmem:[%s23672_s3 + $0x218] sm:$0xff]  }
 0x5ee   : > { %v15422_v22 = vpop.f32.mrb[252].mxu0  ;;  %v9400_v48 = vpop.f32.mrb[187].mxu1 }
 0x5ef   : > { %v23103_v26 = vpop.f32.mrb[253].mxu0  ;;  %v23114_v27 = vadd.f32 %v22846_v4, %v9400_v48 }
 0x5f0   : > { %v15423_v60 = vpop.f32.mrb[254].mxu0  ;;  %15633 = vmatpush3.bf16.msra.mxu1 %v15923_v1 }
 0x5f1   : > { %v23108_v42 = vpop.f32.mrb[255].mxu0  ;;  %15626 = vmatprep.subr.bf16.mxu1 %v15924_v34 }
 0x5f3   : > { %15485 = vmatmul.mubr.bf16.gmra.mrb[36].mxu1 %v26530_v55  ;;  %v15190_v44 = vpop.f32.mrb[188].mxu1 }
 0x5f4   : > { %15488 = vmatprep.mubr.bf16.mxu1 %v26531_v0  ;;  %15634 = vmatpush3.bf16.msra.mxu1 %v15924_v34  ;;  %v9413_v41 = vpop.f32.mrb[189].mxu1  ;;  %v15926_v34 = vld [vmem:[%s23672_s3 + $0x220] sm:$0xff]  }
 0x5f5   : > { %15627 = vmatprep.subr.bf16.mxu1 %v15925_v10  ;;  %v23124_v59 = vadd.f32 %v22865_v49, %v9413_v41  ;;  %v15191_v4 = vpop.f32.mrb[190].mxu1  ;;  %v26534_v49 = vld [vmem:[#allocation173_spill] sm:$0xff] }
 0x5f6   : > { %v15426_v1 = vpop.f32.mrb[0].mxu0  ;;  %v9416_v60 = vpop.f32.mrb[191].mxu1 }
 0x5f7   : > { %v23121_v22 = vpop.f32.mrb[1].mxu0  ;;  %v23132_v55 = vadd.f32 %v22868_v5, %v9416_v60  ;;  %v15927_v5 = vld [vmem:[%s23672_s3 + $0x228] sm:$0xff]  }
 0x5f8   : > { %26532 = vst [vmem:[#allocation157_spill] sm:$0xff] %v23121_v22  ;;  %v15427_v50 = vpop.f32.mrb[2].mxu0  ;;  %15635 = vmatpush3.bf16.msra.mxu1 %v15925_v10  ;;  %v26537_v60 = vld [vmem:[#allocation166_spill] sm:$0xff] }
 0x5f9   : > { %v23126_v48 = vpop.f32.mrb[3].mxu0  ;;  %15628 = vmatprep.subr.bf16.mxu1 %v15926_v34  ;;  %v26594_v22 = vld [vmem:[#allocation66_spill] sm:$0xff] }
 0x5fa   : > { %26533 = vst [vmem:[#allocation57_spill] sm:$0xff] %v23126_v48 }
 0x5fb   : > { %15489 = vmatmul.mubr.bf16.gmra.mrb[40].mxu1 %v22564_v52  ;;  %v15194_v0 = vpop.f32.mrb[192].mxu1 }
 0x5fc   : > { %15492 = vmatprep.mubr.bf16.mxu1 %v26334_v11  ;;  %15636 = vmatpush3.bf16.msra.mxu1 %v15926_v34  ;;  %v9429_v44 = vpop.f32.mrb[193].mxu1 }
 0x5fd   : > { %15629 = vmatprep.subr.bf16.mxu1 %v26534_v49  ;;  %v23140_v41 = vadd.f32 %v22884_v36, %v9429_v44  ;;  %v15195_v4 = vpop.f32.mrb[194].mxu1  ;;  %v26538_v36 = vld [vmem:[#allocation175_spill] sm:$0xff] }
 0x5fe   : > { %v15430_v10 = vpop.f32.mrb[4].mxu0  ;;  %v9432_v52 = vpop.f32.mrb[195].mxu1 }
 0x5ff   : > { %v23137_v1 = vpop.f32.mrb[5].mxu0  ;;  %v23149_v34 = vadd.f32 %v22887_v58, %v9432_v52 }
 0x600   : > { %26535 = vst [vmem:[#allocation117_spill] sm:$0xff] %v23137_v1  ;;  %v15431_v50 = vpop.f32.mrb[6].mxu0  ;;  %15637 = vmatpush3.bf16.msra.mxu1 %v15927_v5  ;;  %v26589_v1 = vld [vmem:[#allocation43_spill] sm:$0xff] }
 0x601   : > { %v23145_v11 = vpop.f32.mrb[7].mxu0  ;;  %15630 = vmatprep.subr.bf16.mxu1 %v26537_v60 }
 0x602   : > { %26536 = vst [vmem:[#allocation116_spill] sm:$0xff] %v23145_v11 }
 0x603   : > { %15493 = vmatmul.mubr.bf16.gmra.mrb[44].mxu1 %v26338_v45  ;;  %v15198_v49 = vpop.f32.mrb[196].mxu1 }
 0x604   : > { %15496 = vmatprep.mubr.bf16.mxu1 %v26428_v29  ;;  %15638 = vmatpush3.bf16.msra.mxu1 %v26537_v60  ;;  %v9445_v10 = vpop.f32.mrb[197].mxu1 }
 0x605   : > { %15631 = vmatprep.subr.bf16.mxu1 %v26538_v36  ;;  %v23158_v4 = vadd.f32 %v22901_v31, %v9445_v10  ;;  %v15199_v50 = vpop.f32.mrb[198].mxu1 }
 0x606   : > { %v15434_v0 = vpop.f32.mrb[8].mxu0  ;;  %v9448_v58 = vpop.f32.mrb[199].mxu1 }
 0x607   : > { %v23155_v44 = vpop.f32.mrb[9].mxu0  ;;  %v23164_v29 = vadd.f32 %v22904_v30, %v9448_v58 }
 0x608   : > { %26539 = vst [vmem:[#allocation160_spill] sm:$0xff] %v23155_v44  ;;  %v15435_v5 = vpop.f32.mrb[10].mxu0  ;;  %15639 = vmatpush3.bf16.msra.mxu1 %v26538_v36 }
 0x609   : > { %v23161_v45 = vpop.f32.mrb[11].mxu0 }
 0x60a   : > { %26540 = vst [vmem:[#allocation34_spill] sm:$0xff] %v23161_v45 }
 0x60b   : > { %15497 = vmatmul.mubr.bf16.gmra.mrb[48].mxu1 %v21952_v2  ;;  %v15202_v52 = vpop.f32.mrb[200].mxu1 }
 0x60c   : > { %15500 = vmatprep.mubr.bf16.mxu1 %v21970_v9  ;;  %v9461_v49 = vpop.f32.mrb[201].mxu1 }
 0x60d   : > { %v23171_v31 = vadd.f32 %v22917_v16, %v9461_v49  ;;  %v15203_v10 = vpop.f32.mrb[202].mxu1 }
 0x60e   : > { %v15438_v60 = vpop.f32.mrb[12].mxu0  ;;  %v9464_v50 = vpop.f32.mrb[203].mxu1 }
 0x60f   : > { %v23168_v0 = vpop.f32.mrb[13].mxu0  ;;  %v23176_v30 = vadd.f32 %v22920_v51, %v9464_v50 }
 0x610   : > { %26541 = vst [vmem:[#allocation148_spill] sm:$0xff] %v23168_v0  ;;  %v15439_v36 = vpop.f32.mrb[14].mxu0 }
 0x611   : > { %v23173_v5 = vpop.f32.mrb[15].mxu0 }
 0x612   : > { %26542 = vst [vmem:[#allocation150_spill] sm:$0xff] %v23173_v5 }
 0x613   : > { %15501 = vmatmul.mubr.bf16.gmra.mrb[52].mxu1 %v21973_v8  ;;  %v15206_v2 = vpop.f32.mrb[204].mxu1 }
 0x614   : > { %15504 = vmatprep.mubr.bf16.mxu1 %v26442_v38  ;;  %v9477_v58 = vpop.f32.mrb[205].mxu1 }
 0x615   : > { %v23183_v16 = vadd.f32 %v22933_v14, %v9477_v58  ;;  %v15207_v60 = vpop.f32.mrb[206].mxu1 }
 0x616   : > { %v15442_v9 = vpop.f32.mrb[16].mxu0  ;;  %v9480_v10 = vpop.f32.mrb[207].mxu1 }
 0x617   : > { %v23180_v52 = vpop.f32.mrb[17].mxu0  ;;  %v23188_v51 = vadd.f32 %v22936_v3, %v9480_v10 }
 0x618   : > { %26543 = vst [vmem:[#allocation91_spill] sm:$0xff] %v23180_v52  ;;  %v15443_v49 = vpop.f32.mrb[18].mxu0 }
 0x619   : > { %v23185_v36 = vpop.f32.mrb[19].mxu0 }
 0x61a   : > { %26544 = vst [vmem:[#allocation49_spill] sm:$0xff] %v23185_v36 }
 0x61b   : > { %15505 = vmatmul.mubr.bf16.gmra.mrb[56].mxu1 %v26353_v12  ;;  %v15210_v8 = vpop.f32.mrb[208].mxu1 }
 0x61c   : > { %15508 = vmatprep.mubr.bf16.mxu1 %v26450_v25  ;;  %v9493_v50 = vpop.f32.mrb[209].mxu1 }
 0x61d   : > { %v23195_v14 = vadd.f32 %v22949_v40, %v9493_v50  ;;  %v15211_v9 = vpop.f32.mrb[210].mxu1 }
 0x61e   : > { %v15446_v38 = vpop.f32.mrb[20].mxu0  ;;  %v9496_v60 = vpop.f32.mrb[211].mxu1 }
 0x61f   : > { %v23192_v2 = vpop.f32.mrb[21].mxu0  ;;  %v23200_v3 = vadd.f32 %v22952_v56, %v9496_v60  ;;  %v26549_v60 = vld [vmem:[#allocation31_spill] sm:$0xff] }
 0x620   : > { %26545 = vst [vmem:[#allocation62_spill] sm:$0xff] %v23192_v2  ;;  %v15447_v58 = vpop.f32.mrb[22].mxu0 }
 0x621   : > { %v23197_v49 = vpop.f32.mrb[23].mxu0 }
 0x622   : > { %26546 = vst [vmem:[#allocation142_spill] sm:$0xff] %v23197_v49 }
 0x623   : > { %15509 = vmatmul.mubr.bf16.gmra.mrb[60].mxu1 %v26358_v39  ;;  %v15214_v12 = vpop.f32.mrb[212].mxu1 }
 0x624   : > { %15512 = vmatprep.mubr.bf16.mxu1 %v26457_v6  ;;  %v9509_v10 = vpop.f32.mrb[213].mxu1 }
 0x625   : > { %v23207_v40 = vadd.f32 %v22965_v62, %v9509_v10  ;;  %v15215_v38 = vpop.f32.mrb[214].mxu1 }
 0x626   : > { %v15450_v25 = vpop.f32.mrb[24].mxu0  ;;  %v9512_v9 = vpop.f32.mrb[215].mxu1 }
 0x627   : > { %v23204_v8 = vpop.f32.mrb[25].mxu0  ;;  %v23212_v56 = vadd.f32 %v22968_v13, %v9512_v9  ;;  %v26552_v9 = vld [vmem:[#allocation11_spill] sm:$0xff] }
 0x628   : > { %26547 = vst [vmem:[#allocation83_spill] sm:$0xff] %v23204_v8  ;;  %v15451_v50 = vpop.f32.mrb[26].mxu0 }
 0x629   : > { %v23209_v58 = vpop.f32.mrb[27].mxu0 }
 0x62a   : > { %26548 = vst [vmem:[#allocation63_spill] sm:$0xff] %v23209_v58 }
 0x62b   : > { %15513 = vmatmul.mubr.bf16.gmra.mrb[64].mxu1 %v26549_v60  ;;  %v15218_v39 = vpop.f32.mrb[216].mxu1  ;;  %v26553_v60 = vld [vmem:[#allocation172_spill] sm:$0xff] }
 0x62c   : > { %15516 = vmatprep.mubr.bf16.mxu1 %v26464_v15  ;;  %v9525_v12 = vpop.f32.mrb[217].mxu1 }
 0x62d   : > { %v23219_v62 = vadd.f32 %v22981_v19, %v9525_v12  ;;  %v15219_v10 = vpop.f32.mrb[218].mxu1 }
 0x62e   : > { %v15454_v6 = vpop.f32.mrb[28].mxu0  ;;  %v9528_v50 = vpop.f32.mrb[219].mxu1 }
 0x62f   : > { %v23216_v25 = vpop.f32.mrb[29].mxu0  ;;  %v23224_v13 = vadd.f32 %v22984_v61, %v9528_v50  ;;  %v26556_v50 = vld [vmem:[#allocation115_spill] sm:$0xff] }
 0x630   : > { %26550 = vst [vmem:[#allocation113_spill] sm:$0xff] %v23216_v25  ;;  %v15455_v38 = vpop.f32.mrb[30].mxu0 }
 0x631   : > { %v23221_v8 = vpop.f32.mrb[31].mxu0 }
 0x632   : > { %26551 = vst [vmem:[#allocation108_spill] sm:$0xff] %v23221_v8 }
 0x633   : > { %15517 = vmatmul.mubr.bf16.gmra.mrb[68].mxu1 %v26552_v9  ;;  %v15222_v15 = vpop.f32.mrb[220].mxu1 }
 0x634   : > { %15520 = vmatprep.mubr.bf16.mxu1 %v26553_v60  ;;  %v9541_v6 = vpop.f32.mrb[221].mxu1 }
 0x635   : > { %v23231_v19 = vadd.f32 %v22997_v43, %v9541_v6  ;;  %v15223_v12 = vpop.f32.mrb[222].mxu1 }
 0x636   : > { %v15458_v39 = vpop.f32.mrb[32].mxu0  ;;  %v9544_v38 = vpop.f32.mrb[223].mxu1 }
 0x637   : > { %v23228_v58 = vpop.f32.mrb[33].mxu0  ;;  %v23236_v61 = vadd.f32 %v23002_v24, %v9544_v38 }
 0x638   : > { %26554 = vst [vmem:[#allocation64_spill] sm:$0xff] %v23228_v58  ;;  %v15459_v10 = vpop.f32.mrb[34].mxu0 }
 0x639   : > { %v23233_v25 = vpop.f32.mrb[35].mxu0 }
 0x63a   : > { %26555 = vst [vmem:[#allocation119_spill] sm:$0xff] %v23233_v25  ;;  %v26559_v25 = vld [vmem:[#allocation131_spill] sm:$0xff] }
 0x63b   : > { %15521 = vmatmul.mubr.bf16.gmra.mrb[72].mxu1 %v26556_v50  ;;  %v15322_v9 = vpop.f32.mrb[224].mxu1 }
 0x63c   : > { %15524 = vmatprep.mubr.bf16.mxu1 %v26373_v37  ;;  %v10024_v15 = vpop.f32.mrb[225].mxu1  ;;  %v26560_v37 = vld [vmem:[#allocation134_spill] sm:$0xff] }
 0x63d   : > { %v10279_v43 = vadd.f32 %v10024_v15, %v23000_v20  ;;  %v15323_v6 = vpop.f32.mrb[226].mxu1 }
 0x63e   : > { %v15462_v60 = vpop.f32.mrb[36].mxu0  ;;  %v10027_v10 = vpop.f32.mrb[227].mxu1 }
 0x63f   : > { %v23240_v39 = vpop.f32.mrb[37].mxu0  ;;  %v23246_v8 = vadd.f32 %v10279_v43, %v26559_v25  ;;  %v10280_v24 = vadd.f32 %v10027_v10, %v23005_v18  ;;  %v26561_v18 = vld [vmem:[#allocation124_spill] sm:$0xff] }
 0x640   : > { %26557 = vst [vmem:[#allocation122_spill] sm:$0xff] %v23240_v39  ;;  %v15463_v12 = vpop.f32.mrb[38].mxu0 }
 0x641   : > { %v23243_v58 = vpop.f32.mrb[39].mxu0  ;;  %v23251_v38 = vadd.f32 %v10280_v24, %v26560_v37  ;;  %v26563_v37 = vld [vmem:[#allocation14_spill] sm:$0xff] }
 0x642   : > { %26558 = vst [vmem:[#allocation10_spill] sm:$0xff] %v23243_v58 }
 0x643   : > { %15525 = vmatmul.mubr.bf16.gmra.mrb[76].mxu1 %v26484_v57  ;;  %v15326_v50 = vpop.f32.mrb[228].mxu1 }
 0x644   : > { %15528 = vmatprep.mubr.bf16.mxu1 %v26487_v7  ;;  %v10040_v20 = vpop.f32.mrb[229].mxu1  ;;  %v26562_v7 = vld [vmem:[#allocation32_spill] sm:$0xff] }
 0x645   : > { %v10283_v15 = vadd.f32 %v10040_v20, %v23014_v32  ;;  %v15327_v6 = vpop.f32.mrb[230].mxu1 }
 0x646   : > { %v15562_v9 = vpop.f32.mrb[40].mxu0  ;;  %v10043_v25 = vpop.f32.mrb[231].mxu1  ;;  %v26564_v6 = vld [vmem:[#allocation151_spill] sm:$0xff] }
 0x647   : > { %v23254_v60 = vpop.f32.mrb[41].mxu0  ;;  %v23260_v10 = vadd.f32 %v10283_v15, %v26561_v18  ;;  %v10284_v57 = vadd.f32 %v10043_v25, %v23019_v17  ;;  %v26565_v17 = vld [vmem:[#allocation102_spill] sm:$0xff] }
 0x648   : > { %v15563_v12 = vpop.f32.mrb[42].mxu0 }
 0x649   : > { %v23257_v43 = vpop.f32.mrb[43].mxu0  ;;  %v23265_v24 = vadd.f32 %v10284_v57, %v26562_v7  ;;  %v26567_v7 = vld [vmem:[#allocation73_spill] sm:$0xff] }
 0x64b   : > { %15529 = vmatmul.mubr.bf16.gmra.mrb[80].mxu1 %v26378_v47  ;;  %v15330_v50 = vpop.f32.mrb[232].mxu1  ;;  %v26566_v47 = vld [vmem:[#allocation152_spill] sm:$0xff] }
 0x64c   : > { %15532 = vmatprep.mubr.bf16.mxu1 %v26563_v37  ;;  %v10056_v32 = vpop.f32.mrb[233].mxu1  ;;  %v26568_v37 = vld [vmem:[#allocation58_spill] sm:$0xff] }
 0x64d   : > { %v10287_v12 = vadd.f32 %v10056_v32, %v26564_v6  ;;  %v15331_v58 = vpop.f32.mrb[234].mxu1 }
 0x64e   : > { %v15566_v9 = vpop.f32.mrb[44].mxu0  ;;  %v10059_v15 = vpop.f32.mrb[235].mxu1 }
 0x64f   : > { %v23268_v20 = vpop.f32.mrb[45].mxu0  ;;  %v23274_v25 = vadd.f32 %v10287_v12, %v26565_v17  ;;  %v10288_v57 = vadd.f32 %v10059_v15, %v26566_v47  ;;  %v26569_v9 = vld [vmem:[#allocation37_spill] sm:$0xff] }
 0x650   : > { %v15567_v39 = vpop.f32.mrb[46].mxu0  ;;  %v26571_v15 = vld [vmem:[#allocation29_spill] sm:$0xff] }
 0x651   : > { %v23271_v18 = vpop.f32.mrb[47].mxu0  ;;  %v23279_v50 = vadd.f32 %v10288_v57, %v26568_v37  ;;  %v26570_v39 = vld [vmem:[#allocation154_spill] sm:$0xff] }
 0x652   : > { %v26573_v37 = vld [vmem:[#allocation38_spill] sm:$0xff] }
 0x653   : > { %15533 = vmatmul.mubr.bf16.gmra.mrb[84].mxu1 %v26567_v7  ;;  %v15334_v49 = vpop.f32.mrb[236].mxu1  ;;  %v26572_v7 = vld [vmem:[#allocation22_spill] sm:$0xff] }
 0x654   : > { %15536 = vmatprep.mubr.bf16.mxu1 %v26569_v9  ;;  %v10072_v32 = vpop.f32.mrb[237].mxu1  ;;  %v26574_v9 = vld [vmem:[#allocation176_spill] sm:$0xff] }
 0x655   : > { %v10291_v6 = vadd.f32 %v10072_v32, %v26570_v39  ;;  %v15335_v36 = vpop.f32.mrb[238].mxu1 }
 0x656   : > { %v15570_v2 = vpop.f32.mrb[48].mxu0  ;;  %v10075_v12 = vpop.f32.mrb[239].mxu1 }
 0x657   : > { %v23282_v58 = vpop.f32.mrb[49].mxu0  ;;  %v23288_v47 = vadd.f32 %v10291_v6, %v26571_v15  ;;  %v10292_v57 = vadd.f32 %v10075_v12, %v26572_v7  ;;  %v26575_v2 = vld [vmem:[#allocation15_spill] sm:$0xff]  ;;  %v26576_v12 = vld [vmem:[#allocation45_spill] sm:$0xff] }
 0x658   : > { %v15571_v52 = vpop.f32.mrb[50].mxu0 }
 0x659   : > { %v23285_v17 = vpop.f32.mrb[51].mxu0  ;;  %v23293_v49 = vadd.f32 %v10292_v57, %v26574_v9  ;;  %v26578_v9 = vld [vmem:[#allocation128_spill] sm:$0xff] }
 0x65b   : > { %15537 = vmatmul.mubr.bf16.gmra.mrb[88].mxu1 %v26573_v37  ;;  %v15338_v5 = vpop.f32.mrb[240].mxu1  ;;  %v26577_v37 = vld [vmem:[#allocation105_spill] sm:$0xff] }
 0x65c   : > { %15540 = vmatprep.mubr.bf16.mxu1 %v26575_v2  ;;  %v10088_v32 = vpop.f32.mrb[241].mxu1  ;;  %v26580_v2 = vld [vmem:[#allocation137_spill] sm:$0xff] }
 0x65d   : > { %v10295_v52 = vadd.f32 %v10088_v32, %v23067_v54  ;;  %v15339_v39 = vpop.f32.mrb[242].mxu1  ;;  %v26582_v54 = vld [vmem:[#allocation65_spill] sm:$0xff] }
 0x65e   : > { %v15574_v0 = vpop.f32.mrb[52].mxu0  ;;  %v10091_v6 = vpop.f32.mrb[243].mxu1 }
 0x65f   : > { %v23296_v36 = vpop.f32.mrb[53].mxu0  ;;  %v23302_v7 = vadd.f32 %v10295_v52, %v26576_v12  ;;  %v10296_v57 = vadd.f32 %v10091_v6, %v23072_v23  ;;  %v26579_v0 = vld [vmem:[#allocation80_spill] sm:$0xff]  ;;  %v26585_v23 = vld [vmem:[#allocation93_spill] sm:$0xff] }
 0x660   : > { %v15575_v45 = vpop.f32.mrb[54].mxu0  ;;  %v26581_v44 = vpack.c.bf16 %v26579_v0, %v26580_v2  ;;  %v26586_v6 = vrot.slane %v26585_v23, 2 }
 0x661   : > { %v23299_v15 = vpop.f32.mrb[55].mxu0  ;;  %v23307_v5 = vadd.f32 %v10296_v57, %v26578_v9  ;;  %v26583_v45 = vrot.slane %v26582_v54, 2 }
 0x662   : > { %v7823_v57 = vsel %vm26587_vm10, %v26526_v28, %v26586_v6 }
 0x663   : > { %15541 = vmatmul.mubr.bf16.gmra.mrb[92].mxu1 %v26577_v37  ;;  %v7752_v32 = vsel %vm26584_vm0, %v26583_v45, %v26526_v28  ;;  %v15342_v39 = vpop.f32.mrb[244].mxu1  ;;  %v26588_v45 = vld [vmem:[#allocation129_spill] sm:$0xff] }
 0x664   : > { %15620 = vmatprep.mubr.bf16.mxu1 %v26581_v44  ;;  %v10104_v12 = vpop.f32.mrb[245].mxu1  ;;  %v7859_v0 = vpack.c.bf16 %v7823_v57, %v7752_v32 }
 0x665   : > { %v10299_v37 = vadd.f32 %v10104_v12, %v23089_v33  ;;  %v15343_v44 = vpop.f32.mrb[246].mxu1 }
 0x666   : > { %v15578_v52 = vpop.f32.mrb[56].mxu0  ;;  %v10107_v2 = vpop.f32.mrb[247].mxu1 }
 0x667   : > { %v23317_v11 = vpop.f32.mrb[57].mxu0  ;;  %v23328_v39 = vadd.f32 %v10299_v37, %v26588_v45  ;;  %v10300_v52 = vadd.f32 %v10107_v2, %v23094_v21  ;;  %v26590_v37 = vld [vmem:[#allocation16_spill] sm:$0xff] }
 0x668   : > { %v15579_v9 = vpop.f32.mrb[58].mxu0 }
 0x669   : > { %v23325_v54 = vpop.f32.mrb[59].mxu0  ;;  %v23332_v23 = vadd.f32 %v10300_v52, %v26589_v1 }
 0x66b   : > { %15621 = vmatmul.mubr.bf16.vlgmr.msra.gmra.mrb[96].mxu1 %v7859_v0  ;;  %v15346_v48 = vpop.f32.mrb[248].mxu1  ;;  %v26591_v0 = vld [vmem:[#allocation118_spill] sm:$0xff] }
 0x66c   : > { %v10120_v28 = vpop.f32.mrb[249].mxu1 }
 0x66d   : > { %v10303_v33 = vadd.f32 %v10120_v28, %v23106_v63  ;;  %v15347_v32 = vpop.f32.mrb[250].mxu1 }
 0x66e   : > { %v15582_v35 = vpop.f32.mrb[60].mxu0  ;;  %v10123_v57 = vpop.f32.mrb[251].mxu1 }
 0x66f   : > { %v23334_v6 = vpop.f32.mrb[61].mxu0  ;;  %v23340_v9 = vadd.f32 %v10303_v33, %v26590_v37  ;;  %v10304_v21 = vadd.f32 %v10123_v57, %v23114_v27  ;;  %v26595_v57 = vld [vmem:[#allocation56_spill] sm:$0xff] }
 0x670   : > { %v15583_v12 = vpop.f32.mrb[62].mxu0 }
 0x671   : > { %v23337_v44 = vpop.f32.mrb[63].mxu0  ;;  %v23344_v1 = vadd.f32 %v10304_v21, %v26591_v0 }
 0x673   : > { %26592 = vst [vmem:[#allocation126_spill] sm:$0xff] %v23344_v1  ;;  %v15350_v48 = vpop.f32.mrb[252].mxu1 }
 0x674   : > { %v10136_v45 = vpop.f32.mrb[253].mxu1 }
 0x675   : > { %v10307_v63 = vadd.f32 %v10136_v45, %v23124_v59  ;;  %v15351_v35 = vpop.f32.mrb[254].mxu1 }
 0x676   : > { %v15586_v2 = vpop.f32.mrb[64].mxu0  ;;  %v10139_v32 = vpop.f32.mrb[255].mxu1 }
 0x677   : > { %v23346_v52 = vpop.f32.mrb[65].mxu0  ;;  %v23352_v33 = vadd.f32 %v10307_v63, %v26594_v22  ;;  %v10308_v27 = vadd.f32 %v10139_v32, %v23132_v55  ;;  %v26599_v63 = vld [vmem:[#allocation136_spill] sm:$0xff] }
 0x678   : > { %v15587_v28 = vpop.f32.mrb[66].mxu0 }
 0x679   : > { %v23349_v12 = vpop.f32.mrb[67].mxu0  ;;  %v23356_v37 = vadd.f32 %v10308_v27, %v26595_v57 }
 0x67a   : > { %26593 = vst [vmem:[#allocation130_spill] sm:$0xff] %v23349_v12  ;;  %v26598_v12 = vld [vmem:[#allocation59_spill] sm:$0xff] }
 0x67b   : > { %26596 = vst [vmem:[#allocation54_spill] sm:$0xff] %v23356_v37  ;;  %v15354_v21 = vpop.f32.mrb[0].mxu1 }
 0x67c   : > { %v10152_v48 = vpop.f32.mrb[1].mxu1 }
 0x67d   : > { %v10311_v59 = vadd.f32 %v10152_v48, %v23140_v41  ;;  %v15355_v45 = vpop.f32.mrb[2].mxu1 }
 0x67e   : > { %v15590_v0 = vpop.f32.mrb[68].mxu0  ;;  %v10155_v28 = vpop.f32.mrb[3].mxu1 }
 0x67f   : > { %v23358_v2 = vpop.f32.mrb[69].mxu0  ;;  %v23364_v22 = vadd.f32 %v10311_v59, %v26598_v12  ;;  %v10312_v55 = vadd.f32 %v10155_v28, %v23149_v34  ;;  %v26603_v59 = vld [vmem:[#allocation96_spill] sm:$0xff] }
 0x680   : > { %v15591_v35 = vpop.f32.mrb[70].mxu0 }
 0x681   : > { %v23361_v1 = vpop.f32.mrb[71].mxu0  ;;  %v23368_v32 = vadd.f32 %v10312_v55, %v26599_v63 }
 0x682   : > { %26597 = vst [vmem:[#allocation76_spill] sm:$0xff] %v23361_v1  ;;  %v26602_v1 = vld [vmem:[#allocation42_spill] sm:$0xff] }
 0x683   : > { %26600 = vst [vmem:[#allocation51_spill] sm:$0xff] %v23368_v32  ;;  %v15358_v27 = vpop.f32.mrb[4].mxu1 }
 0x684   : > { %v10168_v21 = vpop.f32.mrb[5].mxu1 }
 0x685   : > { %v10315_v41 = vadd.f32 %v10168_v21, %v23158_v4  ;;  %v15359_v48 = vpop.f32.mrb[6].mxu1 }
 0x686   : > { %v15594_v57 = vpop.f32.mrb[72].mxu0  ;;  %v10171_v35 = vpop.f32.mrb[7].mxu1 }
 0x687   : > { %v23370_v0 = vpop.f32.mrb[73].mxu0  ;;  %v23376_v12 = vadd.f32 %v10315_v41, %v26602_v1  ;;  %v10316_v34 = vadd.f32 %v10171_v35, %v23164_v29  ;;  %v26607_v41 = vld [vmem:[#allocation44_spill] sm:$0xff] }
 0x688   : > { %v15595_v45 = vpop.f32.mrb[74].mxu0 }
 0x689   : > { %v23373_v37 = vpop.f32.mrb[75].mxu0  ;;  %v23380_v28 = vadd.f32 %v10316_v34, %v26603_v59 }
 0x68a   : > { %26601 = vst [vmem:[#allocation146_spill] sm:$0xff] %v23373_v37  ;;  %v26606_v37 = vld [vmem:[#allocation90_spill] sm:$0xff] }
 0x68b   : > { %26604 = vst [vmem:[#allocation147_spill] sm:$0xff] %v23380_v28  ;;  %v15362_v55 = vpop.f32.mrb[8].mxu1 }
 0x68c   : > { %v10184_v27 = vpop.f32.mrb[9].mxu1 }
 0x68d   : > { %v10319_v4 = vadd.f32 %v10184_v27, %v23171_v31  ;;  %v15363_v21 = vpop.f32.mrb[10].mxu1 }
 0x68e   : > { %v15598_v63 = vpop.f32.mrb[76].mxu0  ;;  %v10187_v45 = vpop.f32.mrb[11].mxu1 }
 0x68f   : > { %v23382_v57 = vpop.f32.mrb[77].mxu0  ;;  %v23388_v1 = vadd.f32 %v10319_v4, %v26606_v37  ;;  %v10320_v29 = vadd.f32 %v10187_v45, %v23176_v30  ;;  %v26611_v4 = vld [vmem:[#allocation50_spill] sm:$0xff] }
 0x690   : > { %v15599_v48 = vpop.f32.mrb[78].mxu0 }
 0x691   : > { %v23385_v32 = vpop.f32.mrb[79].mxu0  ;;  %v23392_v35 = vadd.f32 %v10320_v29, %v26607_v41 }
 0x692   : > { %26605 = vst [vmem:[#allocation75_spill] sm:$0xff] %v23385_v32  ;;  %v26610_v32 = vld [vmem:[#allocation18_spill] sm:$0xff] }
 0x693   : > { %26608 = vst [vmem:[#allocation82_spill] sm:$0xff] %v23392_v35  ;;  %v15366_v34 = vpop.f32.mrb[12].mxu1 }
 0x694   : > { %v10200_v55 = vpop.f32.mrb[13].mxu1 }
 0x695   : > { %v10323_v31 = vadd.f32 %v10200_v55, %v23183_v16  ;;  %v15367_v27 = vpop.f32.mrb[14].mxu1 }
 0x696   : > { %v15602_v59 = vpop.f32.mrb[80].mxu0  ;;  %v10203_v48 = vpop.f32.mrb[15].mxu1 }
 0x697   : > { %v23394_v63 = vpop.f32.mrb[81].mxu0  ;;  %v23400_v37 = vadd.f32 %v10323_v31, %v26610_v32  ;;  %v10324_v30 = vadd.f32 %v10203_v48, %v23188_v51  ;;  %v26615_v31 = vld [vmem:[#allocation123_spill] sm:$0xff] }
 0x698   : > { %v15603_v21 = vpop.f32.mrb[82].mxu0 }
 0x699   : > { %v23397_v28 = vpop.f32.mrb[83].mxu0  ;;  %v23404_v45 = vadd.f32 %v10324_v30, %v26611_v4 }
 0x69a   : > { %26609 = vst [vmem:[#allocation156_spill] sm:$0xff] %v23397_v28  ;;  %v26614_v28 = vld [vmem:[#allocation132_spill] sm:$0xff] }
 0x69b   : > { %26612 = vst [vmem:[#allocation20_spill] sm:$0xff] %v23404_v45  ;;  %v15370_v29 = vpop.f32.mrb[16].mxu1 }
 0x69c   : > { %v10216_v34 = vpop.f32.mrb[17].mxu1 }
 0x69d   : > { %v10327_v16 = vadd.f32 %v10216_v34, %v23195_v14  ;;  %v15371_v55 = vpop.f32.mrb[18].mxu1 }
 0x69e   : > { %v15606_v41 = vpop.f32.mrb[84].mxu0  ;;  %v10219_v21 = vpop.f32.mrb[19].mxu1 }
 0x69f   : > { %v23406_v59 = vpop.f32.mrb[85].mxu0  ;;  %v23412_v32 = vadd.f32 %v10327_v16, %v26614_v28  ;;  %v10328_v51 = vadd.f32 %v10219_v21, %v23200_v3  ;;  %v26619_v16 = vld [vmem:[#allocation107_spill] sm:$0xff] }
 0x6a0   : > { %v15607_v27 = vpop.f32.mrb[86].mxu0 }
 0x6a1   : > { %v23409_v35 = vpop.f32.mrb[87].mxu0  ;;  %v23416_v48 = vadd.f32 %v10328_v51, %v26615_v31 }
 0x6a2   : > { %26613 = vst [vmem:[#allocation144_spill] sm:$0xff] %v23409_v35  ;;  %v26618_v35 = vld [vmem:[#allocation153_spill] sm:$0xff] }
 0x6a3   : > { %26616 = vst [vmem:[#allocation99_spill] sm:$0xff] %v23416_v48  ;;  %v15374_v30 = vpop.f32.mrb[20].mxu1 }
 0x6a4   : > { %v10232_v29 = vpop.f32.mrb[21].mxu1 }
 0x6a5   : > { %v10331_v14 = vadd.f32 %v10232_v29, %v23207_v40  ;;  %v15375_v34 = vpop.f32.mrb[22].mxu1 }
 0x6a6   : > { %v15610_v4 = vpop.f32.mrb[88].mxu0  ;;  %v10235_v27 = vpop.f32.mrb[23].mxu1 }
 0x6a7   : > { %v23418_v41 = vpop.f32.mrb[89].mxu0  ;;  %v23424_v28 = vadd.f32 %v10331_v14, %v26618_v35  ;;  %v10332_v3 = vadd.f32 %v10235_v27, %v23212_v56  ;;  %v26623_v14 = vld [vmem:[#allocation109_spill] sm:$0xff] }
 0x6a8   : > { %v15611_v55 = vpop.f32.mrb[90].mxu0 }
 0x6a9   : > { %v23421_v45 = vpop.f32.mrb[91].mxu0  ;;  %v23428_v21 = vadd.f32 %v10332_v3, %v26619_v16 }
 0x6aa   : > { %26617 = vst [vmem:[#allocation94_spill] sm:$0xff] %v23421_v45  ;;  %v26621_v45 = vld [vmem:[#allocation68_spill] sm:$0xff] }
 0x6ab   : > { %26620 = vst [vmem:[#allocation159_spill] sm:$0xff] %v23428_v21  ;;  %v15378_v51 = vpop.f32.mrb[24].mxu1 }
 0x6ac   : > { %v10248_v30 = vpop.f32.mrb[25].mxu1 }
 0x6ad   : > { %v10335_v40 = vadd.f32 %v10248_v30, %v23219_v62  ;;  %v15379_v29 = vpop.f32.mrb[26].mxu1 }
 0x6ae   : > { %v15614_v31 = vpop.f32.mrb[92].mxu0  ;;  %v10251_v55 = vpop.f32.mrb[27].mxu1 }
 0x6af   : > { %v23430_v4 = vpop.f32.mrb[93].mxu0  ;;  %v23436_v35 = vadd.f32 %v10335_v40, %v26621_v45  ;;  %v10336_v56 = vadd.f32 %v10251_v55, %v23224_v13  ;;  %v26625_v45 = vld [vmem:[#allocation89_spill] sm:$0xff]  ;;  %v26626_v55 = vld [vmem:[#allocation52_spill] sm:$0xff] }
 0x6b0   : > { %v15615_v34 = vpop.f32.mrb[94].mxu0 }
 0x6b1   : > { %v23433_v48 = vpop.f32.mrb[95].mxu0  ;;  %26622 = vst [vmem:[#allocation55_spill] sm:$0xff] %v23436_v35  ;;  %v23440_v27 = vadd.f32 %v10336_v56, %v26623_v14 }
 0x6b3   : > { %26624 = vst [vmem:[#allocation81_spill] sm:$0xff] %v23440_v27 }
 0x6b6   : > { %v15382_v3 = vpop.f32.mrb[28].mxu1  ;;  %v15618_v16 = vpop.f32.mrb[96].mxu0 }
 0x6b7   : > { %v10264_v51 = vpop.f32.mrb[29].mxu1  ;;  %v23442_v31 = vpop.f32.mrb[97].mxu0  ;;  %v26627_v16 = vld [vmem:[#allocation135_spill] sm:$0xff] }
 0x6b8   : > { %v10339_v62 = vadd.f32 %v10264_v51, %v23231_v19  ;;  %v15383_v30 = vpop.f32.mrb[30].mxu1  ;;  %v15619_v29 = vpop.f32.mrb[98].mxu0 }
 0x6b9   : > { %v10267_v34 = vpop.f32.mrb[31].mxu1  ;;  %v23445_v21 = vpop.f32.mrb[99].mxu0  ;;  %v23466_v30 = vld [vmem:[%s23673_s4 + $0x2] ss:$0 sm:$0xff] }
 0x6ba   : > { %v23448_v40 = vadd.f32 %v10339_v62, %v26625_v45  ;;  %v10340_v13 = vadd.f32 %v10267_v34, %v23236_v61  ;;  %v26628_v61 = vld [vmem:[#allocation162_spill] sm:$0xff]  ;;  %v11987_v34 = vld [vmem:[%s23459_s28] sm:$0xff] }
 0x6bc   : > { %v23452_v56 = vadd.f32 %v10340_v13, %v26626_v55 }
 0x6be   : > { %v15482_v14 = vpop.f32.mrb[32].mxu1 }
 0x6bf   : > { %v11022_v3 = vpop.f32.mrb[33].mxu1 }
 0x6c0   : > { %v11023_v27 = vadd.f32 %v11022_v3, %v26627_v16  ;;  %v15483_v35 = vpop.f32.mrb[34].mxu1 }
 0x6c1   : > { %v11025_v19 = vpop.f32.mrb[35].mxu1 }
 0x6c2   : > { %v11663_v51 = vadd.f32 %v23254_v60, %v11023_v27  ;;  %v11026_v62 = vadd.f32 %v11025_v19, %v26628_v61  ;;  %v11988_v60 = vld [vmem:[%s23459_s28 + $0x8] sm:$0xff]  ;;  %v26630_v61 = vld [vmem:[#allocation35_spill] sm:$0xff] }
 0x6c4   : > { %v11791_v29 = vadd.f32 %v11663_v51, %v23246_v8  ;;  %v11664_v35 = vadd.f32 %v23257_v43, %v11026_v62  ;;  %v26629_v43 = vld [vmem:[#allocation149_spill] sm:$0xff] }
 0x6c6   : > { %v11955_v45 = vadd.f32 %v23466_v30, %v11791_v29  ;;  %v11792_v13 = vadd.f32 %v11664_v35, %v23251_v38  ;;  %v15486_v55 = vpop.f32.mrb[36].mxu1 }
 0x6c7   : > { %v11038_v27 = vpop.f32.mrb[37].mxu1 }
 0x6c8   : > { %v12019_v14 = vadd.f32 %v11987_v34, %v11955_v45  ;;  %v11956_v8 = vadd.f32 %v23466_v30, %v11792_v13  ;;  %v11039_v3 = vadd.f32 %v11038_v27, %v26629_v43  ;;  %v15487_v16 = vpop.f32.mrb[38].mxu1  ;;  %v11989_v34 = vld [vmem:[%s23459_s28 + $0x10] sm:$0xff]  ;;  %v11990_v27 = vld [vmem:[%s23459_s28 + $0x18] sm:$0xff] }
 0x6c9   : > { %v11041_v19 = vpop.f32.mrb[39].mxu1 }
 0x6ca   : > { %12051 = vst [vmem:[%s23476_s7] sm:$0xff] %v12019_v14  ;;  %v12020_v38 = vadd.f32 %v11988_v60, %v11956_v8  ;;  %v11667_v51 = vadd.f32 %v23268_v20, %v11039_v3  ;;  %v11042_v62 = vadd.f32 %v11041_v19, %v26630_v61  ;;  %v26631_v8 = vld [vmem:[#allocation100_spill] sm:$0xff]  ;;  %v26632_v19 = vld [vmem:[#allocation21_spill] sm:$0xff] }
 0x6cb   : > { %v11991_v61 = vld [vmem:[%s23459_s28 + $0x20] sm:$0xff] }
 0x6cc   : > { %12052 = vst [vmem:[%s23476_s7 + $0x8] sm:$0xff] %v12020_v38  ;;  %v11795_v29 = vadd.f32 %v11667_v51, %v23260_v10  ;;  %v11668_v35 = vadd.f32 %v23271_v18, %v11042_v62 }
 0x6ce   : > { %v11957_v45 = vadd.f32 %v23466_v30, %v11795_v29  ;;  %v11796_v13 = vadd.f32 %v11668_v35, %v23265_v24  ;;  %v15490_v55 = vpop.f32.mrb[40].mxu1 }
 0x6cf   : > { %v11054_v60 = vpop.f32.mrb[41].mxu1  ;;  %v26633_v55 = vld [vmem:[#allocation106_spill] sm:$0xff] }
 0x6d0   : > { %v12021_v14 = vadd.f32 %v11989_v34, %v11957_v45  ;;  %v11958_v20 = vadd.f32 %v23466_v30, %v11796_v13  ;;  %v11055_v43 = vadd.f32 %v11054_v60, %v26631_v8  ;;  %v15491_v3 = vpop.f32.mrb[42].mxu1  ;;  %v11992_v34 = vld [vmem:[%s23459_s28 + $0x28] sm:$0xff] }
 0x6d1   : > { %v11057_v10 = vpop.f32.mrb[43].mxu1  ;;  %v11993_v3 = vld [vmem:[%s23459_s28 + $0x30] sm:$0xff] }
 0x6d2   : > { %12053 = vst [vmem:[%s23476_s7 + $0x10] sm:$0xff] %v12021_v14  ;;  %v12022_v18 = vadd.f32 %v11990_v27, %v11958_v20  ;;  %v11671_v16 = vadd.f32 %v23282_v58, %v11055_v43  ;;  %v11058_v38 = vadd.f32 %v11057_v10, %v26632_v19  ;;  %v26634_v20 = vld [vmem:[#allocation61_spill] sm:$0xff]  ;;  %v11994_v19 = vld [vmem:[%s23459_s28 + $0x38] sm:$0xff] }
 0x6d4   : > { %12054 = vst [vmem:[%s23476_s7 + $0x18] sm:$0xff] %v12022_v18  ;;  %v11799_v24 = vadd.f32 %v11671_v16, %v23274_v25  ;;  %v11672_v51 = vadd.f32 %v23285_v17, %v11058_v38 }
 0x6d6   : > { %v11959_v62 = vadd.f32 %v23466_v30, %v11799_v24  ;;  %v11800_v29 = vadd.f32 %v11672_v51, %v23279_v50  ;;  %v15494_v35 = vpop.f32.mrb[44].mxu1 }
 0x6d7   : > { %v11070_v45 = vpop.f32.mrb[45].mxu1 }
 0x6d8   : > { %v12023_v13 = vadd.f32 %v11991_v61, %v11959_v62  ;;  %v11960_v58 = vadd.f32 %v23466_v30, %v11800_v29  ;;  %v11071_v27 = vadd.f32 %v11070_v45, %v26633_v55  ;;  %v15495_v60 = vpop.f32.mrb[46].mxu1 }
 0x6d9   : > { %v11073_v25 = vpop.f32.mrb[47].mxu1 }
 0x6da   : > { %12055 = vst [vmem:[%s23476_s7 + $0x20] sm:$0xff] %v12023_v13  ;;  %v12024_v17 = vadd.f32 %v11992_v34, %v11960_v58  ;;  %v11675_v14 = vadd.f32 %v23296_v36, %v11071_v27  ;;  %v11074_v8 = vadd.f32 %v11073_v25, %v26634_v20  ;;  %v11995_v34 = vld [vmem:[%s23459_s28 + $0x40] sm:$0xff]  ;;  %v11996_v58 = vld [vmem:[%s23459_s28 + $0x48] sm:$0xff]  ;;  %v11997_v20 = vld [vmem:[%s23459_s28 + $0x50] sm:$0xff] }
 0x6dc   : > { %12056 = vst [vmem:[%s23476_s7 + $0x28] sm:$0xff] %v12024_v17  ;;  %v11803_v50 = vadd.f32 %v11675_v14, %v23288_v47  ;;  %v11676_v43 = vadd.f32 %v23299_v15, %v11074_v8 }
 0x6de   : > { %v11961_v10 = vadd.f32 %v23466_v30, %v11803_v50  ;;  %v11804_v18 = vadd.f32 %v11676_v43, %v23293_v49  ;;  %v15498_v16 = vpop.f32.mrb[48].mxu1  ;;  %v11998_v43 = vld [vmem:[%s23459_s28 + $0x58] sm:$0xff] }
 0x6df   : > { %v11086_v38 = vpop.f32.mrb[49].mxu1 }
 0x6e0   : > { %v12025_v24 = vadd.f32 %v11993_v3, %v11961_v10  ;;  %v11962_v36 = vadd.f32 %v23466_v30, %v11804_v18  ;;  %v11087_v51 = vadd.f32 %v11086_v38, %v23083_v53  ;;  %v15499_v61 = vpop.f32.mrb[50].mxu1  ;;  %v26636_v38 = vld [vmem:[#allocation57_spill] sm:$0xff] }
 0x6e1   : > { %v11089_v47 = vpop.f32.mrb[51].mxu1  ;;  %v11999_v61 = vld [vmem:[%s23459_s28 + $0x60] sm:$0xff] }
 0x6e2   : > { %12057 = vst [vmem:[%s23476_s7 + $0x30] sm:$0xff] %v12025_v24  ;;  %v12026_v15 = vadd.f32 %v11994_v19, %v11962_v36  ;;  %v11679_v62 = vadd.f32 %v23317_v11, %v11087_v51  ;;  %v11090_v29 = vadd.f32 %v11089_v47, %v23091_v46  ;;  %v26637_v36 = vld [vmem:[#allocation130_spill] sm:$0xff] }
 0x6e4   : > { %12058 = vst [vmem:[%s23476_s7 + $0x38] sm:$0xff] %v12026_v15  ;;  %v11807_v49 = vadd.f32 %v11679_v62, %v23302_v7  ;;  %v11680_v35 = vadd.f32 %v23325_v54, %v11090_v29  ;;  %v26638_v15 = vld [vmem:[#allocation126_spill] sm:$0xff] }
 0x6e6   : > { %v11963_v45 = vadd.f32 %v23466_v30, %v11807_v49  ;;  %v11808_v53 = vadd.f32 %v11680_v35, %v23307_v5  ;;  %v15502_v13 = vpop.f32.mrb[52].mxu1  ;;  %v12000_v49 = vld [vmem:[%s23459_s28 + $0x68] sm:$0xff] }
 0x6e7   : > { %v11102_v55 = vpop.f32.mrb[53].mxu1 }
 0x6e8   : > { %v12027_v27 = vadd.f32 %v11995_v34, %v11963_v45  ;;  %v11964_v11 = vadd.f32 %v23466_v30, %v11808_v53  ;;  %v11103_v46 = vadd.f32 %v11102_v55, %v23103_v26  ;;  %v15503_v60 = vpop.f32.mrb[54].mxu1  ;;  %v26639_v45 = vld [vmem:[#allocation117_spill] sm:$0xff] }
 0x6e9   : > { %v11105_v7 = vpop.f32.mrb[55].mxu1  ;;  %v26641_v60 = vld [vmem:[#allocation76_spill] sm:$0xff] }
 0x6ea   : > { %12059 = vst [vmem:[%s23476_s7 + $0x40] sm:$0xff] %v12027_v27  ;;  %v12028_v54 = vadd.f32 %v11996_v58, %v11964_v11  ;;  %v11683_v25 = vadd.f32 %v23334_v6, %v11103_v46  ;;  %v11106_v17 = vadd.f32 %v11105_v7, %v23108_v42  ;;  %v26635_v42 = vld [vmem:[#allocation157_spill] sm:$0xff]  ;;  %v26640_v27 = vld [vmem:[#allocation116_spill] sm:$0xff] }
 0x6ec   : > { %12060 = vst [vmem:[%s23476_s7 + $0x48] sm:$0xff] %v12028_v54  ;;  %v11811_v5 = vadd.f32 %v11683_v25, %v23328_v39  ;;  %v11684_v14 = vadd.f32 %v23337_v44, %v11106_v17  ;;  %v12001_v54 = vld [vmem:[%s23459_s28 + $0x70] sm:$0xff]  ;;  %v26642_v17 = vld [vmem:[#allocation54_spill] sm:$0xff] }
 0x6ee   : > { %v11965_v8 = vadd.f32 %v23466_v30, %v11811_v5  ;;  %v11812_v26 = vadd.f32 %v11684_v14, %v23332_v23  ;;  %v15506_v50 = vpop.f32.mrb[56].mxu1 }
 0x6ef   : > { %v11118_v3 = vpop.f32.mrb[57].mxu1  ;;  %v26643_v50 = vld [vmem:[#allocation160_spill] sm:$0xff] }
 0x6f0   : > { %v12029_v10 = vadd.f32 %v11997_v20, %v11965_v8  ;;  %v11966_v6 = vadd.f32 %v23466_v30, %v11812_v26  ;;  %v11119_v18 = vadd.f32 %v11118_v3, %v26635_v42  ;;  %v15507_v16 = vpop.f32.mrb[58].mxu1  ;;  %v12002_v20 = vld [vmem:[%s23459_s28 + $0x78] sm:$0xff]  ;;  %v26644_v42 = vld [vmem:[#allocation34_spill] sm:$0xff] }
 0x6f1   : > { %v11121_v39 = vpop.f32.mrb[59].mxu1 }
 0x6f2   : > { %12061 = vst [vmem:[%s23476_s7 + $0x50] sm:$0xff] %v12029_v10  ;;  %v12030_v44 = vadd.f32 %v11998_v43, %v11966_v6  ;;  %v11687_v19 = vadd.f32 %v23346_v52, %v11119_v18  ;;  %v11122_v24 = vadd.f32 %v11121_v39, %v26636_v38  ;;  %v26645_v39 = vld [vmem:[#allocation146_spill] sm:$0xff] }
 0x6f4   : > { %12062 = vst [vmem:[%s23476_s7 + $0x58] sm:$0xff] %v12030_v44  ;;  %v11815_v23 = vadd.f32 %v11687_v19, %v23340_v9  ;;  %v11688_v51 = vadd.f32 %v26637_v36, %v11122_v24  ;;  %v12003_v19 = vld [vmem:[%s23459_s28 + $0x80] sm:$0xff]  ;;  %v26646_v24 = vld [vmem:[#allocation51_spill] sm:$0xff] }
 0x6f6   : > { %v11967_v47 = vadd.f32 %v23466_v30, %v11815_v23  ;;  %v11816_v62 = vadd.f32 %v11688_v51, %v26638_v15  ;;  %v15510_v29 = vpop.f32.mrb[60].mxu1  ;;  %v12004_v51 = vld [vmem:[%s23459_s28 + $0x88] sm:$0xff]  ;;  %v26647_v15 = vld [vmem:[#allocation148_spill] sm:$0xff] }
 0x6f7   : > { %v11134_v35 = vpop.f32.mrb[61].mxu1 }
 0x6f8   : > { %v12031_v34 = vadd.f32 %v11999_v61, %v11967_v47  ;;  %v11968_v52 = vadd.f32 %v23466_v30, %v11816_v62  ;;  %v11135_v53 = vadd.f32 %v11134_v35, %v26639_v45  ;;  %v15511_v13 = vpop.f32.mrb[62].mxu1 }
 0x6f9   : > { %v11137_v9 = vpop.f32.mrb[63].mxu1 }
 0x6fa   : > { %12063 = vst [vmem:[%s23476_s7 + $0x60] sm:$0xff] %v12031_v34  ;;  %v12032_v58 = vadd.f32 %v12000_v49, %v11968_v52  ;;  %v11691_v55 = vadd.f32 %v23358_v2, %v11135_v53  ;;  %v11138_v11 = vadd.f32 %v11137_v9, %v26640_v27  ;;  %v26648_v34 = vld [vmem:[#allocation150_spill] sm:$0xff]  ;;  %v26649_v53 = vld [vmem:[#allocation75_spill] sm:$0xff] }
 0x6fb   : > { %v12005_v9 = vld [vmem:[%s23459_s28 + $0x90] sm:$0xff] }
 0x6fc   : > { %12064 = vst [vmem:[%s23476_s7 + $0x68] sm:$0xff] %v12032_v58  ;;  %v11819_v46 = vadd.f32 %v11691_v55, %v23352_v33  ;;  %v11692_v7 = vadd.f32 %v26641_v60, %v11138_v11  ;;  %v26650_v55 = vld [vmem:[#allocation147_spill] sm:$0xff] }
 0x6fe   : > { %v11969_v25 = vadd.f32 %v23466_v30, %v11819_v46  ;;  %v11820_v5 = vadd.f32 %v11692_v7, %v26642_v17  ;;  %v15514_v14 = vpop.f32.mrb[64].mxu1  ;;  %v12006_v46 = vld [vmem:[%s23459_s28 + $0x98] sm:$0xff] }
 0x6ff   : > { %v11150_v8 = vpop.f32.mrb[65].mxu1 }
 0x700   : > { %v12033_v26 = vadd.f32 %v12001_v54, %v11969_v25  ;;  %v11970_v2 = vadd.f32 %v23466_v30, %v11820_v5  ;;  %v11151_v43 = vadd.f32 %v11150_v8, %v26643_v50  ;;  %v15515_v3 = vpop.f32.mrb[66].mxu1  ;;  %v26651_v54 = vld [vmem:[#allocation91_spill] sm:$0xff] }
 0x701   : > { %v11153_v33 = vpop.f32.mrb[67].mxu1 }
 0x702   : > { %12065 = vst [vmem:[%s23476_s7 + $0x70] sm:$0xff] %v12033_v26  ;;  %v12034_v10 = vadd.f32 %v12002_v20, %v11970_v2  ;;  %v11695_v6 = vadd.f32 %v23370_v0, %v11151_v43  ;;  %v11154_v18 = vadd.f32 %v11153_v33, %v26644_v42  ;;  %v26652_v20 = vld [vmem:[#allocation49_spill] sm:$0xff]  ;;  %v26653_v2 = vld [vmem:[#allocation156_spill] sm:$0xff]  ;;  %v26654_v33 = vld [vmem:[#allocation82_spill] sm:$0xff] }
 0x703   : > { %v12007_v43 = vld [vmem:[%s23459_s28 + $0xa0] sm:$0xff]  ;;  %v12008_v42 = vld [vmem:[%s23459_s28 + $0xa8] sm:$0xff] }
 0x704   : > { %12066 = vst [vmem:[%s23476_s7 + $0x78] sm:$0xff] %v12034_v10  ;;  %v11823_v16 = vadd.f32 %v11695_v6, %v23364_v22  ;;  %v11696_v44 = vadd.f32 %v26645_v39, %v11154_v18  ;;  %v26655_v39 = vld [vmem:[#allocation62_spill] sm:$0xff] }
 0x706   : > { %v11971_v38 = vadd.f32 %v23466_v30, %v11823_v16  ;;  %v11824_v23 = vadd.f32 %v11696_v44, %v26646_v24  ;;  %v15518_v36 = vpop.f32.mrb[68].mxu1 }
 0x707   : > { %v11166_v61 = vpop.f32.mrb[69].mxu1 }
 0x708   : > { %v12035_v47 = vadd.f32 %v12003_v19, %v11971_v38  ;;  %v11972_v0 = vadd.f32 %v23466_v30, %v11824_v23  ;;  %v11167_v62 = vadd.f32 %v11166_v61, %v26647_v15  ;;  %v15519_v29 = vpop.f32.mrb[70].mxu1  ;;  %v26656_v23 = vld [vmem:[#allocation142_spill] sm:$0xff]  ;;  %v26657_v61 = vld [vmem:[#allocation144_spill] sm:$0xff] }
 0x709   : > { %v11169_v22 = vpop.f32.mrb[71].mxu1 }
 0x70a   : > { %12067 = vst [vmem:[%s23476_s7 + $0x80] sm:$0xff] %v12035_v47  ;;  %v12036_v49 = vadd.f32 %v12004_v51, %v11972_v0  ;;  %v11699_v35 = vadd.f32 %v23382_v57, %v11167_v62  ;;  %v11170_v52 = vadd.f32 %v11169_v22, %v26648_v34  ;;  %v12009_v0 = vld [vmem:[%s23459_s28 + $0xb0] sm:$0xff]  ;;  %v26658_v62 = vld [vmem:[#allocation20_spill] sm:$0xff] }
 0x70c   : > { %12068 = vst [vmem:[%s23476_s7 + $0x88] sm:$0xff] %v12036_v49  ;;  %v11827_v45 = vadd.f32 %v11699_v35, %v23376_v12  ;;  %v11700_v13 = vadd.f32 %v26649_v53, %v11170_v52  ;;  %v12010_v49 = vld [vmem:[%s23459_s28 + $0xb8] sm:$0xff]  ;;  %v26659_v52 = vld [vmem:[#allocation83_spill] sm:$0xff] }
 0x70e   : > { %v11973_v58 = vadd.f32 %v23466_v30, %v11827_v45  ;;  %v11828_v27 = vadd.f32 %v11700_v13, %v26650_v55  ;;  %v15522_v11 = vpop.f32.mrb[72].mxu1 }
 0x70f   : > { %v11182_v60 = vpop.f32.mrb[73].mxu1  ;;  %v26661_v11 = vld [vmem:[#allocation94_spill] sm:$0xff] }
 0x710   : > { %v12037_v7 = vadd.f32 %v12005_v9, %v11973_v58  ;;  %v11974_v57 = vadd.f32 %v23466_v30, %v11828_v27  ;;  %v11183_v25 = vadd.f32 %v11182_v60, %v26651_v54  ;;  %v15523_v17 = vpop.f32.mrb[74].mxu1  ;;  %v26660_v58 = vld [vmem:[#allocation63_spill] sm:$0xff]  ;;  %v12011_v60 = vld [vmem:[%s23459_s28 + $0xc0] sm:$0xff] }
 0x711   : > { %v11185_v12 = vpop.f32.mrb[75].mxu1  ;;  %v12012_v17 = vld [vmem:[%s23459_s28 + $0xc8] sm:$0xff] }
 0x712   : > { %12069 = vst [vmem:[%s23476_s7 + $0x90] sm:$0xff] %v12037_v7  ;;  %v12038_v5 = vadd.f32 %v12006_v46, %v11974_v57  ;;  %v11703_v14 = vadd.f32 %v23394_v63, %v11183_v25  ;;  %v11186_v8 = vadd.f32 %v11185_v12, %v26652_v20  ;;  %v26662_v57 = vld [vmem:[#allocation99_spill] sm:$0xff] }
 0x714   : > { %12070 = vst [vmem:[%s23476_s7 + $0x98] sm:$0xff] %v12038_v5  ;;  %v11831_v26 = vadd.f32 %v11703_v14, %v23388_v1  ;;  %v11704_v50 = vadd.f32 %v26653_v2, %v11186_v8  ;;  %v26663_v14 = vld [vmem:[#allocation113_spill] sm:$0xff] }
 0x716   : > { %v11975_v3 = vadd.f32 %v23466_v30, %v11831_v26  ;;  %v11832_v10 = vadd.f32 %v11704_v50, %v26654_v33  ;;  %v15526_v6 = vpop.f32.mrb[76].mxu1  ;;  %v26664_v50 = vld [vmem:[#allocation108_spill] sm:$0xff] }
 0x717   : > { %v11198_v18 = vpop.f32.mrb[77].mxu1 }
 0x718   : > { %v12039_v16 = vadd.f32 %v12007_v43, %v11975_v3  ;;  %v11976_v63 = vadd.f32 %v23466_v30, %v11832_v10  ;;  %v11199_v44 = vadd.f32 %v11198_v18, %v26655_v39  ;;  %v15527_v19 = vpop.f32.mrb[78].mxu1  ;;  %v12013_v10 = vld [vmem:[%s23459_s28 + $0xd0] sm:$0xff] }
 0x719   : > { %v11201_v1 = vpop.f32.mrb[79].mxu1  ;;  %v26666_v19 = vld [vmem:[#allocation64_spill] sm:$0xff] }
 0x71a   : > { %12071 = vst [vmem:[%s23476_s7 + $0xa0] sm:$0xff] %v12039_v16  ;;  %v12040_v38 = vadd.f32 %v12008_v42, %v11976_v63  ;;  %v11707_v24 = vadd.f32 %v23406_v59, %v11199_v44  ;;  %v11202_v36 = vadd.f32 %v11201_v1, %v26656_v23  ;;  %v26665_v42 = vld [vmem:[#allocation159_spill] sm:$0xff]  ;;  %v12014_v63 = vld [vmem:[%s23459_s28 + $0xd8] sm:$0xff] }
 0x71b   : > { %v26667_v23 = vld [vmem:[#allocation119_spill] sm:$0xff] }
 0x71c   : > { %12072 = vst [vmem:[%s23476_s7 + $0xa8] sm:$0xff] %v12040_v38  ;;  %v11835_v51 = vadd.f32 %v11707_v24, %v23400_v37  ;;  %v11708_v47 = vadd.f32 %v26657_v61, %v11202_v36 }
 0x71e   : > { %v11977_v15 = vadd.f32 %v23466_v30, %v11835_v51  ;;  %v11836_v29 = vadd.f32 %v11708_v47, %v26658_v62  ;;  %v15530_v22 = vpop.f32.mrb[80].mxu1  ;;  %v26668_v51 = vld [vmem:[#allocation55_spill] sm:$0xff]  ;;  %v26669_v62 = vld [vmem:[#allocation81_spill] sm:$0xff] }
 0x71f   : > { %v11214_v35 = vpop.f32.mrb[81].mxu1 }
 0x720   : > { %v12041_v34 = vadd.f32 %v12009_v0, %v11977_v15  ;;  %v11978_v59 = vadd.f32 %v23466_v30, %v11836_v29  ;;  %v11215_v45 = vadd.f32 %v11214_v35, %v26659_v52  ;;  %v15531_v53 = vpop.f32.mrb[82].mxu1  ;;  %v12015_v0 = vld [vmem:[%s23459_s28 + $0xe0] sm:$0xff] }
 0x721   : > { %v11217_v37 = vpop.f32.mrb[83].mxu1 }
 0x722   : > { %12073 = vst [vmem:[%s23476_s7 + $0xb0] sm:$0xff] %v12041_v34  ;;  %v12042_v13 = vadd.f32 %v12010_v49, %v11978_v59  ;;  %v11711_v9 = vadd.f32 %v23418_v41, %v11215_v45  ;;  %v11218_v55 = vadd.f32 %v11217_v37, %v26660_v58  ;;  %v12016_v49 = vld [vmem:[%s23459_s28 + $0xe8] sm:$0xff] }
 0x723   : > { %v26670_v59 = vld [vmem:[#allocation122_spill] sm:$0xff] }
 0x724   : > { %12074 = vst [vmem:[%s23476_s7 + $0xb8] sm:$0xff] %v12042_v13  ;;  %v11839_v27 = vadd.f32 %v11711_v9, %v23412_v32  ;;  %v11712_v46 = vadd.f32 %v26661_v11, %v11218_v55 }
 0x726   : > { %v11979_v7 = vadd.f32 %v23466_v30, %v11839_v27  ;;  %v11840_v54 = vadd.f32 %v11712_v46, %v26662_v57  ;;  %v15534_v25 = vpop.f32.mrb[84].mxu1 }
 0x727   : > { %v11230_v12 = vpop.f32.mrb[85].mxu1  ;;  %v12018_v25 = vld [vmem:[%s23459_s28 + $0xf8] sm:$0xff] }
 0x728   : > { %v12043_v5 = vadd.f32 %v12011_v60, %v11979_v7  ;;  %v11980_v41 = vadd.f32 %v23466_v30, %v11840_v54  ;;  %v11231_v20 = vadd.f32 %v11230_v12, %v26663_v14  ;;  %v15535_v8 = vpop.f32.mrb[86].mxu1  ;;  %v12017_v7 = vld [vmem:[%s23459_s28 + $0xf0] sm:$0xff] }
 0x729   : > { %v11233_v32 = vpop.f32.mrb[87].mxu1 }
 0x72a   : > { %12075 = vst [vmem:[%s23476_s7 + $0xc0] sm:$0xff] %v12043_v5  ;;  %v12044_v26 = vadd.f32 %v12012_v17, %v11980_v41  ;;  %v11715_v2 = vadd.f32 %v23430_v4, %v11231_v20  ;;  %v11234_v43 = vadd.f32 %v11233_v32, %v26664_v50 }
 0x72c   : > { %12076 = vst [vmem:[%s23476_s7 + $0xc8] sm:$0xff] %v12044_v26  ;;  %v11843_v3 = vadd.f32 %v11715_v2, %v23424_v28  ;;  %v11716_v33 = vadd.f32 %v23433_v48, %v11234_v43 }
 0x72e   : > { %v11981_v6 = vadd.f32 %v23466_v30, %v11843_v3  ;;  %v11844_v18 = vadd.f32 %v11716_v33, %v26665_v42  ;;  %v15538_v16 = vpop.f32.mrb[88].mxu1 }
 0x72f   : > { %v11246_v39 = vpop.f32.mrb[89].mxu1 }
 0x730   : > { %v12045_v44 = vadd.f32 %v12013_v10, %v11981_v6  ;;  %v11982_v4 = vadd.f32 %v23466_v30, %v11844_v18  ;;  %v11247_v1 = vadd.f32 %v11246_v39, %v26666_v19  ;;  %v15539_v38 = vpop.f32.mrb[90].mxu1 }
 0x731   : > { %v11249_v28 = vpop.f32.mrb[91].mxu1 }
 0x732   : > { %12077 = vst [vmem:[%s23476_s7 + $0xd0] sm:$0xff] %v12045_v44  ;;  %v12046_v48 = vadd.f32 %v12014_v63, %v11982_v4  ;;  %v11719_v24 = vadd.f32 %v23442_v31, %v11247_v1  ;;  %v11250_v36 = vadd.f32 %v11249_v28, %v26667_v23 }
 0x734   : > { %12078 = vst [vmem:[%s23476_s7 + $0xd8] sm:$0xff] %v12046_v48  ;;  %v11847_v61 = vadd.f32 %v11719_v24, %v26668_v51  ;;  %v11720_v47 = vadd.f32 %v23445_v21, %v11250_v36  ;;  %v26671_v21 = vld [vmem:[#allocation10_spill] sm:$0xff] }
 0x736   : > { %v11983_v15 = vadd.f32 %v23466_v30, %v11847_v61  ;;  %v11848_v29 = vadd.f32 %v11720_v47, %v26669_v62  ;;  %v15542_v22 = vpop.f32.mrb[92].mxu1 }
 0x737   : > { %v11262_v35 = vpop.f32.mrb[93].mxu1 }
 0x738   : > { %v12047_v34 = vadd.f32 %v12015_v0, %v11983_v15  ;;  %v11984_v31 = vadd.f32 %v23466_v30, %v11848_v29  ;;  %v11263_v52 = vadd.f32 %v11262_v35, %v26670_v59  ;;  %v15543_v45 = vpop.f32.mrb[94].mxu1 }
 0x739   : > { %v11265_v53 = vpop.f32.mrb[95].mxu1 }
 0x73a   : > { %12079 = vst [vmem:[%s23476_s7 + $0xe0] sm:$0xff] %v12047_v34  ;;  %v12048_v37 = vadd.f32 %v12016_v49, %v11984_v31  ;;  %v11266_v13 = vadd.f32 %v11265_v53, %v26671_v21 }
 0x73c   : > { %12080 = vst [vmem:[%s23476_s7 + $0xe8] sm:$0xff] %v12048_v37 }
 0x73e   : > { %v15622_v9 = vpop.f32.mrb[96].mxu1 }
 0x73f   : > { %v11648_v58 = vpop.f32.mrb[97].mxu1 }
 0x740   : > { %v11723_v55 = vadd.f32 %v11648_v58, %v11263_v52  ;;  %v15623_v27 = vpop.f32.mrb[98].mxu1 }
 0x741   : > { %v11651_v11 = vpop.f32.mrb[99].mxu1 }
 0x742   : > { %v11851_v46 = vadd.f32 %v11723_v55, %v23448_v40  ;;  %v11724_v60 = vadd.f32 %v11651_v11, %v11266_v13 }
 0x744   : > { %v11985_v57 = vadd.f32 %v23466_v30, %v11851_v46  ;;  %v11852_v54 = vadd.f32 %v11724_v60, %v23452_v56 }
 0x746   : > { %v12049_v17 = vadd.f32 %v12017_v7, %v11985_v57  ;;  %v11986_v12 = vadd.f32 %v23466_v30, %v11852_v54 }
 0x748   : > { %12081 = vst [vmem:[%s23476_s7 + $0xf0] sm:$0xff] %v12049_v17  ;;  %v12050_v5 = vadd.f32 %v12018_v25, %v11986_v12 }
 0x74a   : > { %12082 = vst [vmem:[%s23476_s7 + $0xf8] sm:$0xff] %v12050_v5 }
 0x74b PF: > { %s15_s20 = sadd.s32 1, %s15950_s20   ;;  %s26672_s18 = smov %s15946_s19 }
 0x74c   : > { %p12_p5 = scmp.ge.s32.totalorder %s15_s20, 4   ;;  %s26673_s19 = smov %s26675_s21 }
 0x74e   :  { %14 = sbr.rel (!%p12_p5) target bundleno = 2 (0x2), region = 91 }

</bundles_post_ra>
